<compile_context>
chip_gen: v6e
topology: v6e:2x2x1
jax: 0.10.0
libtpu: 0.0.40
codegen_flags: <defaults>
</compile_context>

<pallas_src>
import functools

import jax
import jax.numpy as jnp
from jax.experimental import pallas as pl
from jax.experimental.pallas import tpu as pltpu


COMPUTE_DTYPE = jnp.bfloat16      # MXU operand / inter-layer activation dtype


def _round_up(x, m):
    return ((x + m - 1) // m) * m


def _cdiv(a, b):
    return -(-a // b)


def _select_tiling():
    """Per-generation row tile and scoped-VMEM limit (v5e/v6e 128 MiB, v7x 64 MiB)."""
    vmem = 64 * 1024 * 1024
    try:
        vmem = int(getattr(pltpu.get_tpu_info(), "vmem_capacity_bytes", vmem))
    except Exception:
        pass
    if vmem >= 100 * 1024 * 1024:
        return 2048, 96 * 1024 * 1024      # v5e / v6e: big tiles, big scoped limit
    return 1024, 48 * 1024 * 1024          # v7x (and conservative fallback)


TILE_M, VMEM_LIMIT_BYTES = _select_tiling()


# ----------------------------------------------------------------------------
# Kernel 1: out = act(X @ W + b)   (used by conv1-via-im2col and the FC layer)
# ----------------------------------------------------------------------------
def _matmul_bias_act_kernel(x_ref, w_ref, b_ref, o_ref, *, activation):
    acc = jnp.dot(x_ref[...], w_ref[...], preferred_element_type=jnp.float32)
    acc = acc + b_ref[...]                        # (1, N) f32, broadcasts over rows
    if activation == "relu":
        acc = jnp.maximum(acc, 0.0)
    elif activation == "sigmoid":
        acc = jax.nn.sigmoid(acc)
    o_ref[...] = acc.astype(o_ref.dtype)


def _choose_bm(M, tile_m):
    if M < 16:
        return M                                   # tiny M: single full-dim block
    # 128-multiples (bf16 packing / MXU height); >=2 grid steps when M allows (v7x).
    return int(min(tile_m, max(128, _round_up(_cdiv(M, 2), 128))))


def matmul_bias_act(x, w, b2d, activation, out_dtype, *, tile_m=None):
    """x:[M,K] bf16, w:[K,N] bf16 (pre-packed, N multiple of 128), b2d:[1,N] f32."""
    if tile_m is None:
        tile_m = TILE_M
    M, K = x.shape
    K2, N = w.shape
    assert K == K2 and b2d.shape == (1, N)
    bm = _choose_bm(M, tile_m)
    grid_m = _cdiv(M, bm)
    return pl.pallas_call(
        functools.partial(_matmul_bias_act_kernel, activation=activation),
        out_shape=jax.ShapeDtypeStruct((M, N), out_dtype),
        grid=(grid_m,),
        in_specs=[
            pl.BlockSpec((bm, K), lambda i: (i, 0)),   # X row tile (pipelined)
            pl.BlockSpec((K, N), lambda i: (0, 0)),    # W: VMEM resident
            pl.BlockSpec((1, N), lambda i: (0, 0)),    # bias: VMEM resident
        ],
        out_specs=pl.BlockSpec((bm, N), lambda i: (i, 0)),
        compiler_params=pltpu.CompilerParams(
            dimension_semantics=("parallel",),
            vmem_limit_bytes=VMEM_LIMIT_BYTES,
        ),
    )(x, w, b2d)


# ----------------------------------------------------------------------------
# Kernel 2: fused-im2col conv + bias + ReLU (no patch matrix in HBM)
# ----------------------------------------------------------------------------
def _fused_conv_kernel(*refs, num_phases, taps, rout, activation):
    ph_refs = refs[:num_phases]                         # each (R, Cin) bf16
    w_ref = refs[num_phases]                            # (ntaps, Cin, Cout) bf16
    b_ref = refs[num_phases + 1]                        # (1, Cout) f32
    o_ref = refs[num_phases + 2]                        # (R, Cout)
    cout = o_ref.shape[-1]

    # Deterministic garbage rows (wrapper discards them anyway).
    o_ref[...] = jnp.zeros(o_ref.shape, o_ref.dtype)

    acc = jnp.zeros((rout, cout), jnp.float32)
    for t, (p, off) in enumerate(taps):                 # static unrolled tap loop
        xt = ph_refs[p][pl.ds(off, rout), :]            # contiguous shifted row window
        acc = acc + jnp.dot(xt, w_ref[t], preferred_element_type=jnp.float32)
    acc = acc + b_ref[...]
    if activation == "relu":
        acc = jnp.maximum(acc, 0.0)
    o_ref[pl.ds(0, rout), :] = acc.astype(o_ref.dtype)


def conv2d_relu_fused(x_nhwc, w_taps, b2d, *, kh, kw, stride, pad):
    """NHWC conv (PyTorch cross-correlation) + ReLU, one pallas_call, grid over batch.

    Stride handled by a stride x stride phase split in the wrapper, so every tap
    is a contiguous row window of a flattened phase held in VMEM; the kernel
    accumulates kh*kw tap matmuls in f32.  Output rows beyond the valid (OH, OW)
    grid are garbage and sliced off by the wrapper.
    """
    B, H, W, Cin = x_nhwc.shape
    s = stride
    xp = jnp.pad(x_nhwc, ((0, 0), (pad, pad), (pad, pad), (0, 0)))
    Hp, Wp = H + 2 * pad, W + 2 * pad
    oh = (Hp - kh) // s + 1
    ow = (Wp - kw) // s + 1

    phases = [xp[:, dy::s, dx::s, :] for dy in range(s) for dx in range(s)]
    Hq, Wq = phases[0].shape[1], phases[0].shape[2]
    for ph in phases:
        assert ph.shape[1] == Hq and ph.shape[2] == Wq, "phase shapes must match"

    # Per-tap (phase index, flat row offset); order matches packed weights (i, j).
    taps = []
    for i in range(kh):
        for j in range(kw):
            taps.append(((i % s) * s + (j % s), (i // s) * Wq + (j // s)))
    max_di, max_dj = (kh - 1) // s, (kw - 1) // s
    assert Hq >= oh + max_di and Wq >= ow + max_dj       # taps of valid rows stay in-image
    R = Hq * Wq
    rout = R - max(off for _, off in taps)
    assert (oh - 1) * Wq + (ow - 1) < rout               # every valid row is computed

    ntaps, cin_p, cout = w_taps.shape
    assert ntaps == kh * kw and cin_p == Cin

    phases_flat = [ph.reshape(B, R, Cin) for ph in phases]
    kernel = functools.partial(
        _fused_conv_kernel, num_phases=len(phases), taps=tuple(taps),
        rout=rout, activation="relu")

    y_flat = pl.pallas_call(
        kernel,
        out_shape=jax.ShapeDtypeStruct((B, R, cout), COMPUTE_DTYPE),
        grid=(B,),
        in_specs=(
            [pl.BlockSpec((None, R, Cin), lambda b: (b, 0, 0)) for _ in phases]
            + [pl.BlockSpec((ntaps, cin_p, cout), lambda b: (0, 0, 0)),  # weights resident
               pl.BlockSpec((1, cout), lambda b: (0, 0))]                # bias resident
        ),
        out_specs=pl.BlockSpec((None, R, cout), lambda b: (b, 0, 0)),
        compiler_params=pltpu.CompilerParams(
            dimension_semantics=("parallel",),
            vmem_limit_bytes=VMEM_LIMIT_BYTES,
        ),
    )(*phases_flat, w_taps, b2d)

    return y_flat.reshape(B, Hq, Wq, cout)[:, :oh, :ow, :]


# ----------------------------------------------------------------------------
# conv1: tiny im2col (Cin=1, so per-tap K=1 would be degenerate for the fused
# path; the patch matrix here is only ~25 KB/image -- no meaningful inflation).
# K padded to 128 (Cin 1->2) and Cout padded to 128 so loads/stores are lane-dense.
# ----------------------------------------------------------------------------
def _im2col_nhwc(x, kh, kw, stride, pad):
    B, H, W, C = x.shape
    xp = jnp.pad(x, ((0, 0), (pad, pad), (pad, pad), (0, 0)))
    oh = (H + 2 * pad - kh) // stride + 1
    ow = (W + 2 * pad - kw) // stride + 1
    cols = []
    for i in range(kh):
        for j in range(kw):
            cols.append(xp[:, i:i + stride * oh:stride, j:j + stride * ow:stride, :])
    p = jnp.stack(cols, axis=3).reshape(B * oh * ow, kh * kw * C)   # K-order (i, j, c)
    return p, oh, ow


def conv1_im2col_relu(x_nhwc, w_packed, b2d, *, kh, kw, stride, pad):
    B = x_nhwc.shape[0]
    patches, oh, ow = _im2col_nhwc(x_nhwc, kh, kw, stride, pad)
    cout = w_packed.shape[1]
    y = matmul_bias_act(patches, w_packed, b2d, "relu", COMPUTE_DTYPE)
    return y.reshape(B, oh, ow, cout)


# ----------------------------------------------------------------------------
# One-time weight packing (outside the hot path)
# ----------------------------------------------------------------------------
def prepare_params(params, compute_dtype=COMPUTE_DTYPE):
    f32 = jnp.float32

    def pad_axis(a, axis, new):
        pads = [(0, 0)] * a.ndim
        pads[axis] = (0, new - a.shape[axis])
        return jnp.pad(a, pads)

    # conv1 (im2col matmul): (Cout,Cin,KH,KW) -> (KH,KW,Cin,Cout), pad Cin 1->2
    # and Cout 64->128 with zeros, flatten to (K=128, N=128).
    w1 = jnp.transpose(params["w1"], (2, 3, 1, 0))          # (8, 8, 1, 64)
    w1 = pad_axis(pad_axis(w1, 2, 2), 3, 128)               # (8, 8, 2, 128)
    w1 = w1.reshape(8 * 8 * 2, 128).astype(compute_dtype)
    b1 = pad_axis(params["b1"], 0, 128).reshape(1, -1).astype(f32)

    def pack_conv_taps(w, cin_pad=None):                    # -> (KH*KW, Cin, Cout)
        cout, cin, kh, kw = w.shape
        wt = jnp.transpose(w, (2, 3, 1, 0)).reshape(kh * kw, cin, cout)
        if cin_pad is not None and cin_pad > cin:
            wt = pad_axis(wt, 1, cin_pad)                   # zero rows for padded channels
        return wt.astype(compute_dtype)

    w2 = pack_conv_taps(params["w2"], cin_pad=128)          # (36, 128, 128)
    b2 = params["b2"].reshape(1, -1).astype(f32)
    w3 = pack_conv_taps(params["w3"])                       # (25, 128, 128)
    b3 = params["b3"].reshape(1, -1).astype(f32)

    # FC: permute columns from PyTorch NCHW flatten order (c,h,w) to our NHWC
    # flatten order (h,w,c); pad output dim 100 -> 128 with zero columns/bias.
    wf = params["wf"]                                       # (100, 2048)
    odim, feat = wf.shape
    c3 = params["w3"].shape[0]                              # 128
    side = int(round((feat // c3) ** 0.5))                  # 4
    wf = wf.reshape(odim, c3, side, side).transpose(0, 2, 3, 1).reshape(odim, feat)
    wf = pad_axis(wf.T, 1, 128).astype(compute_dtype)       # (2048, 128)
    bf = pad_axis(params["bf"], 0, 128).reshape(1, -1).astype(f32)

    return {"w1": w1, "b1": b1, "w2": w2, "b2": b2, "w3": w3, "b3": b3,
            "wf": wf, "bf": bf}


# ----------------------------------------------------------------------------
# NCAModelV3 forward (normalize=False, output_dim=100)
# ----------------------------------------------------------------------------
@functools.partial(jax.jit, static_argnames=("output_dim",))
def nca_forward(x_nchw, packed, output_dim=100):
    # NCHW -> NHWC once; pad Cin 1 -> 2 so conv1's im2col K is 128 (lane dense).
    x = jnp.transpose(x_nchw, (0, 2, 3, 1)).astype(COMPUTE_DTYPE)
    x = jnp.pad(x, ((0, 0), (0, 0), (0, 0), (0, 1)))
    x = conv1_im2col_relu(x, packed["w1"], packed["b1"], kh=8, kw=8, stride=2, pad=3)   # (B,14,14,128)
    x = conv2d_relu_fused(x, packed["w2"], packed["b2"], kh=6, kw=6, stride=2, pad=3)   # (B, 8, 8,128)
    x = conv2d_relu_fused(x, packed["w3"], packed["b3"], kh=5, kw=5, stride=1, pad=0)   # (B, 4, 4,128)
    B = x.shape[0]
    feat = x.reshape(B, -1)                       # NHWC flatten; wf columns were permuted to match
    # TODO(synk): self.normalize (L2 row-normalize) is False by default and not applied.
    out = matmul_bias_act(feat, packed["wf"], packed["bf"], "sigmoid", jnp.float32)     # (B, 128)
    return out[:, :output_dim]                    # drop padded sigmoid columns


# ----------------------------------------------------------------------------
# Deterministic parameter init (mirrors module shapes; kaiming fan_out for convs)
# ----------------------------------------------------------------------------
def init_params(key, output_dim=100):
    ks = jax.random.split(key, 8)

    def kaiming_out(k, shape):
        fan_out = shape[0] * shape[2] * shape[3]
        std = (2.0 / fan_out) ** 0.5
        return std * jax.random.normal(k, shape, jnp.float32)

    def uniform(k, shape, bound):
        return jax.random.uniform(k, shape, jnp.float32, -bound, bound)

    return {
        "w1": kaiming_out(ks[0], (64, 1, 8, 8)),
        "b1": uniform(ks[1], (64,), 1.0 / (1 * 8 * 8) ** 0.5),
        "w2": kaiming_out(ks[2], (128, 64, 6, 6)),
        "b2": uniform(ks[3], (128,), 1.0 / (64 * 6 * 6) ** 0.5),
        "w3": kaiming_out(ks[4], (128, 128, 5, 5)),
        "b3": uniform(ks[5], (128,), 1.0 / (128 * 5 * 5) ** 0.5),
        "wf": uniform(ks[6], (output_dim, 2048), 1.0 / 2048 ** 0.5),
        "bf": uniform(ks[7], (output_dim,), 1.0 / 2048 ** 0.5),
    }


# ----------------------------------------------------------------------------
# Pure-JAX fp32 reference (lax conv, NCHW, HIGHEST precision) for cross-check
# ----------------------------------------------------------------------------
def ref_forward(x, params):
    def conv_relu(x, w, b, stride, pad):
        y = jax.lax.conv_general_dilated(
            x, w, (stride, stride), [(pad, pad), (pad, pad)],
            dimension_numbers=("NCHW", "OIHW", "NCHW"),
            precision=jax.lax.Precision.HIGHEST,
        )
        return jax.nn.relu(y + b[None, :, None, None])

    x = conv_relu(x, params["w1"], params["b1"], 2, 3)
    x = conv_relu(x, params["w2"], params["b2"], 2, 3)
    x = conv_relu(x, params["w3"], params["b3"], 1, 0)
    x = x.reshape(x.shape[0], -1)
    x = jnp.dot(x, params["wf"].T, precision=jax.lax.Precision.HIGHEST) + params["bf"]
    return jax.nn.sigmoid(x)


if __name__ == "__main__":
    key = jax.random.PRNGKey(0)
    k_x, k_p = jax.random.split(key)

    # MNIST-like input: batch=2, channels=1, 28x28 (required so conv3's output
    # flattens to 2048, matching fc_ = Linear(2048, 100)).
    x = jax.random.uniform(k_x, (2, 1, 28, 28), jnp.float32)
    params = init_params(k_p, output_dim=100)
    packed = prepare_params(params)          # one-time pack; no per-call transposes/pads

    out = jax.block_until_ready(nca_forward(x, packed))
    assert out.shape == (2, 100), out.shape

    ref = jax.block_until_ready(ref_forward(x, params))
    max_err = float(jnp.max(jnp.abs(out - ref)))
    # bf16 inter-layer activations / MXU operands with f32 accumulation vs the
    # fp32 HIGHEST reference on sigmoid outputs: observed O(1e-4); 5e-3 margin.
    assert max_err < 5e-3, max_err

    print("KERNEL_OK")
</pallas_src>

<mosaic_0001>
module attributes {stable_mosaic.version = 11 : i64} {
  func.func @_matmul_bias_act_kernel(%arg0: i32, %arg1: memref<256x128xbf16, #tpu.memory_space<vmem>>, %arg2: memref<128x128xbf16, #tpu.memory_space<vmem>>, %arg3: memref<1x128xf32, #tpu.memory_space<vmem>>, %arg4: memref<256x128xbf16, #tpu.memory_space<vmem>>) attributes {dimension_semantics = [#tpu.dimension_semantics<parallel>], iteration_bounds = array<i64: 2>, scalar_prefetch = 0 : i64, scratch_operands = 0 : i64, tpu.core_type = #tpu.core_type<tc>, window_params = [{transform_indices = @transform_0, window_bounds = array<i64: 256, 128>}, {pipeline_mode = #tpu.pipeline_mode<synchronous>, transform_indices = @transform_1, window_bounds = array<i64: 128, 128>}, {pipeline_mode = #tpu.pipeline_mode<synchronous>, transform_indices = @transform_2, window_bounds = array<i64: 1, 128>}, {transform_indices = @transform_3, window_bounds = array<i64: 256, 128>}]} {
    %c0 = arith.constant 0 : index
    %c0_0 = arith.constant 0 : index
    %0 = vector.load %arg1[%c0, %c0_0] : memref<256x128xbf16, #tpu.memory_space<vmem>>, vector<256x128xbf16>
    %c0_1 = arith.constant 0 : index
    %c0_2 = arith.constant 0 : index
    %1 = vector.load %arg2[%c0_1, %c0_2] : memref<128x128xbf16, #tpu.memory_space<vmem>>, vector<128x128xbf16>
    %cst = arith.constant dense<0.000000e+00> : vector<256x128xf32>
    %2 = tpu.matmul %0, %1, %cst {dimension_numbers = #tpu.dot_dimension_numbers<[1], [0], [0], [1], [0, 0, 1, 1], [], []>} : vector<256x128xbf16>, vector<128x128xbf16>, vector<256x128xf32> -> vector<256x128xf32>
    %c0_3 = arith.constant 0 : index
    %c0_4 = arith.constant 0 : index
    %3 = vector.load %arg3[%c0_3, %c0_4] : memref<1x128xf32, #tpu.memory_space<vmem>>, vector<1x128xf32>
    %4 = vector.broadcast %3 : vector<1x128xf32> to vector<256x128xf32>
    %5 = arith.addf %2, %4 : vector<256x128xf32>
    %cst_5 = arith.constant 0.000000e+00 : f32
    %6 = vector.broadcast %cst_5 : f32 to vector<256x128xf32>
    %7 = arith.maximumf %5, %6 : vector<256x128xf32>
    %8 = arith.truncf %7 : vector<256x128xf32> to vector<256x128xbf16>
    %c0_6 = arith.constant 0 : index
    %c0_7 = arith.constant 0 : index
    %9 = vector.load %arg4[%c0_6, %c0_7] : memref<256x128xbf16, #tpu.memory_space<vmem>>, vector<256x128xbf16>
    tpu.vector_store %arg4[%c0_6, %c0_7], %8 {strides = array<i32>} : memref<256x128xbf16, #tpu.memory_space<vmem>>, vector<256x128xbf16>,
    return
  }
  func.func @transform_0(%arg0: i32) -> (i32, i32) {
    %c0_i32 = arith.constant 0 : i32
    %c0_i32_0 = arith.constant 0 : i32
    return %arg0, %c0_i32 : i32, i32
  }
  func.func @transform_1(%arg0: i32) -> (i32, i32) {
    %c0_i32 = arith.constant 0 : i32
    %c0_i32_0 = arith.constant 0 : i32
    %c0_i32_1 = arith.constant 0 : i32
    return %c0_i32, %c0_i32_0 : i32, i32
  }
  func.func @transform_2(%arg0: i32) -> (i32, i32) {
    %c0_i32 = arith.constant 0 : i32
    %c0_i32_0 = arith.constant 0 : i32
    %c0_i32_1 = arith.constant 0 : i32
    return %c0_i32, %c0_i32_0 : i32, i32
  }
  func.func @transform_3(%arg0: i32) -> (i32, i32) {
    %c0_i32 = arith.constant 0 : i32
    %c0_i32_0 = arith.constant 0 : i32
    return %arg0, %c0_i32 : i32, i32
  }
}

module attributes {stable_mosaic.version = 11 : i64} {
  func.func @_fused_conv_kernel(%arg0: i32, %arg1: memref<1x100x128xbf16, #tpu.memory_space<vmem>>, %arg2: memref<1x100x128xbf16, #tpu.memory_space<vmem>>, %arg3: memref<1x100x128xbf16, #tpu.memory_space<vmem>>, %arg4: memref<1x100x128xbf16, #tpu.memory_space<vmem>>, %arg5: memref<36x128x128xbf16, #tpu.memory_space<vmem>>, %arg6: memref<1x128xf32, #tpu.memory_space<vmem>>, %arg7: memref<1x100x128xbf16, #tpu.memory_space<vmem>>) attributes {dimension_semantics = [#tpu.dimension_semantics<parallel>], iteration_bounds = array<i64: 2>, scalar_prefetch = 0 : i64, scratch_operands = 0 : i64, tpu.core_type = #tpu.core_type<tc>, window_params = [{transform_indices = @transform_0, window_bounds = array<i64: 1, 100, 128>}, {transform_indices = @transform_1, window_bounds = array<i64: 1, 100, 128>}, {transform_indices = @transform_2, window_bounds = array<i64: 1, 100, 128>}, {transform_indices = @transform_3, window_bounds = array<i64: 1, 100, 128>}, {pipeline_mode = #tpu.pipeline_mode<synchronous>, transform_indices = @transform_4, window_bounds = array<i64: 36, 128, 128>}, {pipeline_mode = #tpu.pipeline_mode<synchronous>, transform_indices = @transform_5, window_bounds = array<i64: 1, 128>}, {transform_indices = @transform_6, window_bounds = array<i64: 1, 100, 128>}]} {
    %cst = arith.constant 0.000000e+00 : bf16
    %0 = vector.broadcast %cst : bf16 to vector<100x128xbf16>
    %c0 = arith.constant 0 : index
    %c0_0 = arith.constant 0 : index
    %c0_1 = arith.constant 0 : index
    %1 = vector.load %arg7[%c0, %c0_0, %c0_1] : memref<1x100x128xbf16, #tpu.memory_space<vmem>>, vector<1x100x128xbf16>
    %2 = vector.shape_cast %1 : vector<1x100x128xbf16> to vector<100x128xbf16>
    %3 = vector.shape_cast %0 : vector<100x128xbf16> to vector<1x100x128xbf16>
    tpu.vector_store %arg7[%c0, %c0_0, %c0_1], %3 {strides = array<i32>} : memref<1x100x128xbf16, #tpu.memory_space<vmem>>, vector<1x100x128xbf16>,
    %cst_2 = arith.constant 0.000000e+00 : f32
    %4 = vector.broadcast %cst_2 : f32 to vector<78x128xf32>
    %c0_3 = arith.constant 0 : index
    %c0_4 = arith.constant 0 : index
    %c0_5 = arith.constant 0 : index
    %5 = vector.load %arg1[%c0_3, %c0_4, %c0_5] : memref<1x100x128xbf16, #tpu.memory_space<vmem>>, vector<1x78x128xbf16>
    %6 = vector.shape_cast %5 : vector<1x78x128xbf16> to vector<78x128xbf16>
    %c0_6 = arith.constant 0 : index
    %c0_7 = arith.constant 0 : index
    %c0_8 = arith.constant 0 : index
    %7 = vector.load %arg5[%c0_6, %c0_7, %c0_8] : memref<36x128x128xbf16, #tpu.memory_space<vmem>>, vector<1x128x128xbf16>
    %8 = vector.shape_cast %7 : vector<1x128x128xbf16> to vector<128x128xbf16>
    %cst_9 = arith.constant dense<0.000000e+00> : vector<78x128xf32>
    %9 = tpu.matmul %6, %8, %cst_9 {dimension_numbers = #tpu.dot_dimension_numbers<[1], [0], [0], [1], [0, 0, 1, 1], [], []>} : vector<78x128xbf16>, vector<128x128xbf16>, vector<78x128xf32> -> vector<78x128xf32>
    %10 = arith.addf %4, %9 : vector<78x128xf32>
    %c0_10 = arith.constant 0 : index
    %c0_11 = arith.constant 0 : index
    %c0_12 = arith.constant 0 : index
    %11 = vector.load %arg2[%c0_10, %c0_11, %c0_12] : memref<1x100x128xbf16, #tpu.memory_space<vmem>>, vector<1x78x128xbf16>
    %12 = vector.shape_cast %11 : vector<1x78x128xbf16> to vector<78x128xbf16>
    %c1 = arith.constant 1 : index
    %c0_13 = arith.constant 0 : index
    %c0_14 = arith.constant 0 : index
    %13 = vector.load %arg5[%c1, %c0_13, %c0_14] : memref<36x128x128xbf16, #tpu.memory_space<vmem>>, vector<1x128x128xbf16>
    %14 = vector.shape_cast %13 : vector<1x128x128xbf16> to vector<128x128xbf16>
    %cst_15 = arith.constant dense<0.000000e+00> : vector<78x128xf32>
    %15 = tpu.matmul %12, %14, %cst_15 {dimension_numbers = #tpu.dot_dimension_numbers<[1], [0], [0], [1], [0, 0, 1, 1], [], []>} : vector<78x128xbf16>, vector<128x128xbf16>, vector<78x128xf32> -> vector<78x128xf32>
    %16 = arith.addf %10, %15 : vector<78x128xf32>
    %c0_16 = arith.constant 0 : index
    %c1_17 = arith.constant 1 : index
    %c0_18 = arith.constant 0 : index
    %17 = vector.load %arg1[%c0_16, %c1_17, %c0_18] : memref<1x100x128xbf16, #tpu.memory_space<vmem>>, vector<1x78x128xbf16>
    %18 = vector.shape_cast %17 : vector<1x78x128xbf16> to vector<78x128xbf16>
    %c2 = arith.constant 2 : index
    %c0_19 = arith.constant 0 : index
    %c0_20 = arith.constant 0 : index
    %19 = vector.load %arg5[%c2, %c0_19, %c0_20] : memref<36x128x128xbf16, #tpu.memory_space<vmem>>, vector<1x128x128xbf16>
    %20 = vector.shape_cast %19 : vector<1x128x128xbf16> to vector<128x128xbf16>
    %cst_21 = arith.constant dense<0.000000e+00> : vector<78x128xf32>
    %21 = tpu.matmul %18, %20, %cst_21 {dimension_numbers = #tpu.dot_dimension_numbers<[1], [0], [0], [1], [0, 0, 1, 1], [], []>} : vector<78x128xbf16>, vector<128x128xbf16>, vector<78x128xf32> -> vector<78x128xf32>
    %22 = arith.addf %16, %21 : vector<78x128xf32>
    %c0_22 = arith.constant 0 : index
    %c1_23 = arith.constant 1 : index
    %c0_24 = arith.constant 0 : index
    %23 = vector.load %arg2[%c0_22, %c1_23, %c0_24] : memref<1x100x128xbf16, #tpu.memory_space<vmem>>, vector<1x78x128xbf16>
    %24 = vector.shape_cast %23 : vector<1x78x128xbf16> to vector<78x128xbf16>
    %c3 = arith.constant 3 : index
    %c0_25 = arith.constant 0 : index
    %c0_26 = arith.constant 0 : index
    %25 = vector.load %arg5[%c3, %c0_25, %c0_26] : memref<36x128x128xbf16, #tpu.memory_space<vmem>>, vector<1x128x128xbf16>
    %26 = vector.shape_cast %25 : vector<1x128x128xbf16> to vector<128x128xbf16>
    %cst_27 = arith.constant dense<0.000000e+00> : vector<78x128xf32>
    %27 = tpu.matmul %24, %26, %cst_27 {dimension_numbers = #tpu.dot_dimension_numbers<[1], [0], [0], [1], [0, 0, 1, 1], [], []>} : vector<78x128xbf16>, vector<128x128xbf16>, vector<78x128xf32> -> vector<78x128xf32>
    %28 = arith.addf %22, %27 : vector<78x128xf32>
    %c0_28 = arith.constant 0 : index
    %c2_29 = arith.constant 2 : index
    %c0_30 = arith.constant 0 : index
    %29 = vector.load %arg1[%c0_28, %c2_29, %c0_30] : memref<1x100x128xbf16, #tpu.memory_space<vmem>>, vector<1x78x128xbf16>
    %30 = vector.shape_cast %29 : vector<1x78x128xbf16> to vector<78x128xbf16>
    %c4 = arith.constant 4 : index
    %c0_31 = arith.constant 0 : index
    %c0_32 = arith.constant 0 : index
    %31 = vector.load %arg5[%c4, %c0_31, %c0_32] : memref<36x128x128xbf16, #tpu.memory_space<vmem>>, vector<1x128x128xbf16>
    %32 = vector.shape_cast %31 : vector<1x128x128xbf16> to vector<128x128xbf16>
    %cst_33 = arith.constant dense<0.000000e+00> : vector<78x128xf32>
    %33 = tpu.matmul %30, %32, %cst_33 {dimension_numbers = #tpu.dot_dimension_numbers<[1], [0], [0], [1], [0, 0, 1, 1], [], []>} : vector<78x128xbf16>, vector<128x128xbf16>, vector<78x128xf32> -> vector<78x128xf32>
    %34 = arith.addf %28, %33 : vector<78x128xf32>
    %c0_34 = arith.constant 0 : index
    %c2_35 = arith.constant 2 : index
    %c0_36 = arith.constant 0 : index
    %35 = vector.load %arg2[%c0_34, %c2_35, %c0_36] : memref<1x100x128xbf16, #tpu.memory_space<vmem>>, vector<1x78x128xbf16>
    %36 = vector.shape_cast %35 : vector<1x78x128xbf16> to vector<78x128xbf16>
    %c5 = arith.constant 5 : index
    %c0_37 = arith.constant 0 : index
    %c0_38 = arith.constant 0 : index
    %37 = vector.load %arg5[%c5, %c0_37, %c0_38] : memref<36x128x128xbf16, #tpu.memory_space<vmem>>, vector<1x128x128xbf16>
    %38 = vector.shape_cast %37 : vector<1x128x128xbf16> to vector<128x128xbf16>
    %cst_39 = arith.constant dense<0.000000e+00> : vector<78x128xf32>
    %39 = tpu.matmul %36, %38, %cst_39 {dimension_numbers = #tpu.dot_dimension_numbers<[1], [0], [0], [1], [0, 0, 1, 1], [], []>} : vector<78x128xbf16>, vector<128x128xbf16>, vector<78x128xf32> -> vector<78x128xf32>
    %40 = arith.addf %34, %39 : vector<78x128xf32>
    %c0_40 = arith.constant 0 : index
    %c0_41 = arith.constant 0 : index
    %c0_42 = arith.constant 0 : index
    %41 = vector.load %arg3[%c0_40, %c0_41, %c0_42] : memref<1x100x128xbf16, #tpu.memory_space<vmem>>, vector<1x78x128xbf16>
    %42 = vector.shape_cast %41 : vector<1x78x128xbf16> to vector<78x128xbf16>
    %c6 = arith.constant 6 : index
    %c0_43 = arith.constant 0 : index
    %c0_44 = arith.constant 0 : index
    %43 = vector.load %arg5[%c6, %c0_43, %c0_44] : memref<36x128x128xbf16, #tpu.memory_space<vmem>>, vector<1x128x128xbf16>
    %44 = vector.shape_cast %43 : vector<1x128x128xbf16> to vector<128x128xbf16>
    %cst_45 = arith.constant dense<0.000000e+00> : vector<78x128xf32>
    %45 = tpu.matmul %42, %44, %cst_45 {dimension_numbers = #tpu.dot_dimension_numbers<[1], [0], [0], [1], [0, 0, 1, 1], [], []>} : vector<78x128xbf16>, vector<128x128xbf16>, vector<78x128xf32> -> vector<78x128xf32>
    %46 = arith.addf %40, %45 : vector<78x128xf32>
    %c0_46 = arith.constant 0 : index
    %c0_47 = arith.constant 0 : index
    %c0_48 = arith.constant 0 : index
    %47 = vector.load %arg4[%c0_46, %c0_47, %c0_48] : memref<1x100x128xbf16, #tpu.memory_space<vmem>>, vector<1x78x128xbf16>
    %48 = vector.shape_cast %47 : vector<1x78x128xbf16> to vector<78x128xbf16>
    %c7 = arith.constant 7 : index
    %c0_49 = arith.constant 0 : index
    %c0_50 = arith.constant 0 : index
    %49 = vector.load %arg5[%c7, %c0_49, %c0_50] : memref<36x128x128xbf16, #tpu.memory_space<vmem>>, vector<1x128x128xbf16>
    %50 = vector.shape_cast %49 : vector<1x128x128xbf16> to vector<128x128xbf16>
    %cst_51 = arith.constant dense<0.000000e+00> : vector<78x128xf32>
    %51 = tpu.matmul %48, %50, %cst_51 {dimension_numbers = #tpu.dot_dimension_numbers<[1], [0], [0], [1], [0, 0, 1, 1], [], []>} : vector<78x128xbf16>, vector<128x128xbf16>, vector<78x128xf32> -> vector<78x128xf32>
    %52 = arith.addf %46, %51 : vector<78x128xf32>
    %c0_52 = arith.constant 0 : index
    %c1_53 = arith.constant 1 : index
    %c0_54 = arith.constant 0 : index
    %53 = vector.load %arg3[%c0_52, %c1_53, %c0_54] : memref<1x100x128xbf16, #tpu.memory_space<vmem>>, vector<1x78x128xbf16>
    %54 = vector.shape_cast %53 : vector<1x78x128xbf16> to vector<78x128xbf16>
    %c8 = arith.constant 8 : index
    %c0_55 = arith.constant 0 : index
    %c0_56 = arith.constant 0 : index
    %55 = vector.load %arg5[%c8, %c0_55, %c0_56] : memref<36x128x128xbf16, #tpu.memory_space<vmem>>, vector<1x128x128xbf16>
    %56 = vector.shape_cast %55 : vector<1x128x128xbf16> to vector<128x128xbf16>
    %cst_57 = arith.constant dense<0.000000e+00> : vector<78x128xf32>
    %57 = tpu.matmul %54, %56, %cst_57 {dimension_numbers = #tpu.dot_dimension_numbers<[1], [0], [0], [1], [0, 0, 1, 1], [], []>} : vector<78x128xbf16>, vector<128x128xbf16>, vector<78x128xf32> -> vector<78x128xf32>
    %58 = arith.addf %52, %57 : vector<78x128xf32>
    %c0_58 = arith.constant 0 : index
    %c1_59 = arith.constant 1 : index
    %c0_60 = arith.constant 0 : index
    %59 = vector.load %arg4[%c0_58, %c1_59, %c0_60] : memref<1x100x128xbf16, #tpu.memory_space<vmem>>, vector<1x78x128xbf16>
    %60 = vector.shape_cast %59 : vector<1x78x128xbf16> to vector<78x128xbf16>
    %c9 = arith.constant 9 : index
    %c0_61 = arith.constant 0 : index
    %c0_62 = arith.constant 0 : index
    %61 = vector.load %arg5[%c9, %c0_61, %c0_62] : memref<36x128x128xbf16, #tpu.memory_space<vmem>>, vector<1x128x128xbf16>
    %62 = vector.shape_cast %61 : vector<1x128x128xbf16> to vector<128x128xbf16>
    %cst_63 = arith.constant dense<0.000000e+00> : vector<78x128xf32>
    %63 = tpu.matmul %60, %62, %cst_63 {dimension_numbers = #tpu.dot_dimension_numbers<[1], [0], [0], [1], [0, 0, 1, 1], [], []>} : vector<78x128xbf16>, vector<128x128xbf16>, vector<78x128xf32> -> vector<78x128xf32>
    %64 = arith.addf %58, %63 : vector<78x128xf32>
    %c0_64 = arith.constant 0 : index
    %c2_65 = arith.constant 2 : index
    %c0_66 = arith.constant 0 : index
    %65 = vector.load %arg3[%c0_64, %c2_65, %c0_66] : memref<1x100x128xbf16, #tpu.memory_space<vmem>>, vector<1x78x128xbf16>
    %66 = vector.shape_cast %65 : vector<1x78x128xbf16> to vector<78x128xbf16>
    %c10 = arith.constant 10 : index
    %c0_67 = arith.constant 0 : index
    %c0_68 = arith.constant 0 : index
    %67 = vector.load %arg5[%c10, %c0_67, %c0_68] : memref<36x128x128xbf16, #tpu.memory_space<vmem>>, vector<1x128x128xbf16>
    %68 = vector.shape_cast %67 : vector<1x128x128xbf16> to vector<128x128xbf16>
    %cst_69 = arith.constant dense<0.000000e+00> : vector<78x128xf32>
    %69 = tpu.matmul %66, %68, %cst_69 {dimension_numbers = #tpu.dot_dimension_numbers<[1], [0], [0], [1], [0, 0, 1, 1], [], []>} : vector<78x128xbf16>, vector<128x128xbf16>, vector<78x128xf32> -> vector<78x128xf32>
    %70 = arith.addf %64, %69 : vector<78x128xf32>
    %c0_70 = arith.constant 0 : index
    %c2_71 = arith.constant 2 : index
    %c0_72 = arith.constant 0 : index
    %71 = vector.load %arg4[%c0_70, %c2_71, %c0_72] : memref<1x100x128xbf16, #tpu.memory_space<vmem>>, vector<1x78x128xbf16>
    %72 = vector.shape_cast %71 : vector<1x78x128xbf16> to vector<78x128xbf16>
    %c11 = arith.constant 11 : index
    %c0_73 = arith.constant 0 : index
    %c0_74 = arith.constant 0 : index
    %73 = vector.load %arg5[%c11, %c0_73, %c0_74] : memref<36x128x128xbf16, #tpu.memory_space<vmem>>, vector<1x128x128xbf16>
    %74 = vector.shape_cast %73 : vector<1x128x128xbf16> to vector<128x128xbf16>
    %cst_75 = arith.constant dense<0.000000e+00> : vector<78x128xf32>
    %75 = tpu.matmul %72, %74, %cst_75 {dimension_numbers = #tpu.dot_dimension_numbers<[1], [0], [0], [1], [0, 0, 1, 1], [], []>} : vector<78x128xbf16>, vector<128x128xbf16>, vector<78x128xf32> -> vector<78x128xf32>
    %76 = arith.addf %70, %75 : vector<78x128xf32>
    %c0_76 = arith.constant 0 : index
    %c10_77 = arith.constant 10 : index
    %c0_78 = arith.constant 0 : index
    %77 = vector.load %arg1[%c0_76, %c10_77, %c0_78] : memref<1x100x128xbf16, #tpu.memory_space<vmem>>, vector<1x78x128xbf16>
    %78 = vector.shape_cast %77 : vector<1x78x128xbf16> to vector<78x128xbf16>
    %c12 = arith.constant 12 : index
    %c0_79 = arith.constant 0 : index
    %c0_80 = arith.constant 0 : index
    %79 = vector.load %arg5[%c12, %c0_79, %c0_80] : memref<36x128x128xbf16, #tpu.memory_space<vmem>>, vector<1x128x128xbf16>
    %80 = vector.shape_cast %79 : vector<1x128x128xbf16> to vector<128x128xbf16>
    %cst_81 = arith.constant dense<0.000000e+00> : vector<78x128xf32>
    %81 = tpu.matmul %78, %80, %cst_81 {dimension_numbers = #tpu.dot_dimension_numbers<[1], [0], [0], [1], [0, 0, 1, 1], [], []>} : vector<78x128xbf16>, vector<128x128xbf16>, vector<78x128xf32> -> vector<78x128xf32>
    %82 = arith.addf %76, %81 : vector<78x128xf32>
    %c0_82 = arith.constant 0 : index
    %c10_83 = arith.constant 10 : index
    %c0_84 = arith.constant 0 : index
    %83 = vector.load %arg2[%c0_82, %c10_83, %c0_84] : memref<1x100x128xbf16, #tpu.memory_space<vmem>>, vector<1x78x128xbf16>
    %84 = vector.shape_cast %83 : vector<1x78x128xbf16> to vector<78x128xbf16>
    %c13 = arith.constant 13 : index
    %c0_85 = arith.constant 0 : index
    %c0_86 = arith.constant 0 : index
    %85 = vector.load %arg5[%c13, %c0_85, %c0_86] : memref<36x128x128xbf16, #tpu.memory_space<vmem>>, vector<1x128x128xbf16>
    %86 = vector.shape_cast %85 : vector<1x128x128xbf16> to vector<128x128xbf16>
    %cst_87 = arith.constant dense<0.000000e+00> : vector<78x128xf32>
    %87 = tpu.matmul %84, %86, %cst_87 {dimension_numbers = #tpu.dot_dimension_numbers<[1], [0], [0], [1], [0, 0, 1, 1], [], []>} : vector<78x128xbf16>, vector<128x128xbf16>, vector<78x128xf32> -> vector<78x128xf32>
    %88 = arith.addf %82, %87 : vector<78x128xf32>
    %c0_88 = arith.constant 0 : index
    %c11_89 = arith.constant 11 : index
    %c0_90 = arith.constant 0 : index
    %89 = vector.load %arg1[%c0_88, %c11_89, %c0_90] : memref<1x100x128xbf16, #tpu.memory_space<vmem>>, vector<1x78x128xbf16>
    %90 = vector.shape_cast %89 : vector<1x78x128xbf16> to vector<78x128xbf16>
    %c14 = arith.constant 14 : index
    %c0_91 = arith.constant 0 : index
    %c0_92 = arith.constant 0 : index
    %91 = vector.load %arg5[%c14, %c0_91, %c0_92] : memref<36x128x128xbf16, #tpu.memory_space<vmem>>, vector<1x128x128xbf16>
    %92 = vector.shape_cast %91 : vector<1x128x128xbf16> to vector<128x128xbf16>
    %cst_93 = arith.constant dense<0.000000e+00> : vector<78x128xf32>
    %93 = tpu.matmul %90, %92, %cst_93 {dimension_numbers = #tpu.dot_dimension_numbers<[1], [0], [0], [1], [0, 0, 1, 1], [], []>} : vector<78x128xbf16>, vector<128x128xbf16>, vector<78x128xf32> -> vector<78x128xf32>
    %94 = arith.addf %88, %93 : vector<78x128xf32>
    %c0_94 = arith.constant 0 : index
    %c11_95 = arith.constant 11 : index
    %c0_96 = arith.constant 0 : index
    %95 = vector.load %arg2[%c0_94, %c11_95, %c0_96] : memref<1x100x128xbf16, #tpu.memory_space<vmem>>, vector<1x78x128xbf16>
    %96 = vector.shape_cast %95 : vector<1x78x128xbf16> to vector<78x128xbf16>
    %c15 = arith.constant 15 : index
    %c0_97 = arith.constant 0 : index
    %c0_98 = arith.constant 0 : index
    %97 = vector.load %arg5[%c15, %c0_97, %c0_98] : memref<36x128x128xbf16, #tpu.memory_space<vmem>>, vector<1x128x128xbf16>
    %98 = vector.shape_cast %97 : vector<1x128x128xbf16> to vector<128x128xbf16>
    %cst_99 = arith.constant dense<0.000000e+00> : vector<78x128xf32>
    %99 = tpu.matmul %96, %98, %cst_99 {dimension_numbers = #tpu.dot_dimension_numbers<[1], [0], [0], [1], [0, 0, 1, 1], [], []>} : vector<78x128xbf16>, vector<128x128xbf16>, vector<78x128xf32> -> vector<78x128xf32>
    %100 = arith.addf %94, %99 : vector<78x128xf32>
    %c0_100 = arith.constant 0 : index
    %c12_101 = arith.constant 12 : index
    %c0_102 = arith.constant 0 : index
    %101 = vector.load %arg1[%c0_100, %c12_101, %c0_102] : memref<1x100x128xbf16, #tpu.memory_space<vmem>>, vector<1x78x128xbf16>
    %102 = vector.shape_cast %101 : vector<1x78x128xbf16> to vector<78x128xbf16>
    %c16 = arith.constant 16 : index
    %c0_103 = arith.constant 0 : index
    %c0_104 = arith.constant 0 : index
    %103 = vector.load %arg5[%c16, %c0_103, %c0_104] : memref<36x128x128xbf16, #tpu.memory_space<vmem>>, vector<1x128x128xbf16>
    %104 = vector.shape_cast %103 : vector<1x128x128xbf16> to vector<128x128xbf16>
    %cst_105 = arith.constant dense<0.000000e+00> : vector<78x128xf32>
    %105 = tpu.matmul %102, %104, %cst_105 {dimension_numbers = #tpu.dot_dimension_numbers<[1], [0], [0], [1], [0, 0, 1, 1], [], []>} : vector<78x128xbf16>, vector<128x128xbf16>, vector<78x128xf32> -> vector<78x128xf32>
    %106 = arith.addf %100, %105 : vector<78x128xf32>
    %c0_106 = arith.constant 0 : index
    %c12_107 = arith.constant 12 : index
    %c0_108 = arith.constant 0 : index
    %107 = vector.load %arg2[%c0_106, %c12_107, %c0_108] : memref<1x100x128xbf16, #tpu.memory_space<vmem>>, vector<1x78x128xbf16>
    %108 = vector.shape_cast %107 : vector<1x78x128xbf16> to vector<78x128xbf16>
    %c17 = arith.constant 17 : index
    %c0_109 = arith.constant 0 : index
    %c0_110 = arith.constant 0 : index
    %109 = vector.load %arg5[%c17, %c0_109, %c0_110] : memref<36x128x128xbf16, #tpu.memory_space<vmem>>, vector<1x128x128xbf16>
    %110 = vector.shape_cast %109 : vector<1x128x128xbf16> to vector<128x128xbf16>
    %cst_111 = arith.constant dense<0.000000e+00> : vector<78x128xf32>
    %111 = tpu.matmul %108, %110, %cst_111 {dimension_numbers = #tpu.dot_dimension_numbers<[1], [0], [0], [1], [0, 0, 1, 1], [], []>} : vector<78x128xbf16>, vector<128x128xbf16>, vector<78x128xf32> -> vector<78x128xf32>
    %112 = arith.addf %106, %111 : vector<78x128xf32>
    %c0_112 = arith.constant 0 : index
    %c10_113 = arith.constant 10 : index
    %c0_114 = arith.constant 0 : index
    %113 = vector.load %arg3[%c0_112, %c10_113, %c0_114] : memref<1x100x128xbf16, #tpu.memory_space<vmem>>, vector<1x78x128xbf16>
    %114 = vector.shape_cast %113 : vector<1x78x128xbf16> to vector<78x128xbf16>
    %c18 = arith.constant 18 : index
    %c0_115 = arith.constant 0 : index
    %c0_116 = arith.constant 0 : index
    %115 = vector.load %arg5[%c18, %c0_115, %c0_116] : memref<36x128x128xbf16, #tpu.memory_space<vmem>>, vector<1x128x128xbf16>
    %116 = vector.shape_cast %115 : vector<1x128x128xbf16> to vector<128x128xbf16>
    %cst_117 = arith.constant dense<0.000000e+00> : vector<78x128xf32>
    %117 = tpu.matmul %114, %116, %cst_117 {dimension_numbers = #tpu.dot_dimension_numbers<[1], [0], [0], [1], [0, 0, 1, 1], [], []>} : vector<78x128xbf16>, vector<128x128xbf16>, vector<78x128xf32> -> vector<78x128xf32>
    %118 = arith.addf %112, %117 : vector<78x128xf32>
    %c0_118 = arith.constant 0 : index
    %c10_119 = arith.constant 10 : index
    %c0_120 = arith.constant 0 : index
    %119 = vector.load %arg4[%c0_118, %c10_119, %c0_120] : memref<1x100x128xbf16, #tpu.memory_space<vmem>>, vector<1x78x128xbf16>
    %120 = vector.shape_cast %119 : vector<1x78x128xbf16> to vector<78x128xbf16>
    %c19 = arith.constant 19 : index
    %c0_121 = arith.constant 0 : index
    %c0_122 = arith.constant 0 : index
    %121 = vector.load %arg5[%c19, %c0_121, %c0_122] : memref<36x128x128xbf16, #tpu.memory_space<vmem>>, vector<1x128x128xbf16>
    %122 = vector.shape_cast %121 : vector<1x128x128xbf16> to vector<128x128xbf16>
    %cst_123 = arith.constant dense<0.000000e+00> : vector<78x128xf32>
    %123 = tpu.matmul %120, %122, %cst_123 {dimension_numbers = #tpu.dot_dimension_numbers<[1], [0], [0], [1], [0, 0, 1, 1], [], []>} : vector<78x128xbf16>, vector<128x128xbf16>, vector<78x128xf32> -> vector<78x128xf32>
    %124 = arith.addf %118, %123 : vector<78x128xf32>
    %c0_124 = arith.constant 0 : index
    %c11_125 = arith.constant 11 : index
    %c0_126 = arith.constant 0 : index
    %125 = vector.load %arg3[%c0_124, %c11_125, %c0_126] : memref<1x100x128xbf16, #tpu.memory_space<vmem>>, vector<1x78x128xbf16>
    %126 = vector.shape_cast %125 : vector<1x78x128xbf16> to vector<78x128xbf16>
    %c20 = arith.constant 20 : index
    %c0_127 = arith.constant 0 : index
    %c0_128 = arith.constant 0 : index
    %127 = vector.load %arg5[%c20, %c0_127, %c0_128] : memref<36x128x128xbf16, #tpu.memory_space<vmem>>, vector<1x128x128xbf16>
    %128 = vector.shape_cast %127 : vector<1x128x128xbf16> to vector<128x128xbf16>
    %cst_129 = arith.constant dense<0.000000e+00> : vector<78x128xf32>
    %129 = tpu.matmul %126, %128, %cst_129 {dimension_numbers = #tpu.dot_dimension_numbers<[1], [0], [0], [1], [0, 0, 1, 1], [], []>} : vector<78x128xbf16>, vector<128x128xbf16>, vector<78x128xf32> -> vector<78x128xf32>
    %130 = arith.addf %124, %129 : vector<78x128xf32>
    %c0_130 = arith.constant 0 : index
    %c11_131 = arith.constant 11 : index
    %c0_132 = arith.constant 0 : index
    %131 = vector.load %arg4[%c0_130, %c11_131, %c0_132] : memref<1x100x128xbf16, #tpu.memory_space<vmem>>, vector<1x78x128xbf16>
    %132 = vector.shape_cast %131 : vector<1x78x128xbf16> to vector<78x128xbf16>
    %c21 = arith.constant 21 : index
    %c0_133 = arith.constant 0 : index
    %c0_134 = arith.constant 0 : index
    %133 = vector.load %arg5[%c21, %c0_133, %c0_134] : memref<36x128x128xbf16, #tpu.memory_space<vmem>>, vector<1x128x128xbf16>
    %134 = vector.shape_cast %133 : vector<1x128x128xbf16> to vector<128x128xbf16>
    %cst_135 = arith.constant dense<0.000000e+00> : vector<78x128xf32>
    %135 = tpu.matmul %132, %134, %cst_135 {dimension_numbers = #tpu.dot_dimension_numbers<[1], [0], [0], [1], [0, 0, 1, 1], [], []>} : vector<78x128xbf16>, vector<128x128xbf16>, vector<78x128xf32> -> vector<78x128xf32>
    %136 = arith.addf %130, %135 : vector<78x128xf32>
    %c0_136 = arith.constant 0 : index
    %c12_137 = arith.constant 12 : index
    %c0_138 = arith.constant 0 : index
    %137 = vector.load %arg3[%c0_136, %c12_137, %c0_138] : memref<1x100x128xbf16, #tpu.memory_space<vmem>>, vector<1x78x128xbf16>
    %138 = vector.shape_cast %137 : vector<1x78x128xbf16> to vector<78x128xbf16>
    %c22 = arith.constant 22 : index
    %c0_139 = arith.constant 0 : index
    %c0_140 = arith.constant 0 : index
    %139 = vector.load %arg5[%c22, %c0_139, %c0_140] : memref<36x128x128xbf16, #tpu.memory_space<vmem>>, vector<1x128x128xbf16>
    %140 = vector.shape_cast %139 : vector<1x128x128xbf16> to vector<128x128xbf16>
    %cst_141 = arith.constant dense<0.000000e+00> : vector<78x128xf32>
    %141 = tpu.matmul %138, %140, %cst_141 {dimension_numbers = #tpu.dot_dimension_numbers<[1], [0], [0], [1], [0, 0, 1, 1], [], []>} : vector<78x128xbf16>, vector<128x128xbf16>, vector<78x128xf32> -> vector<78x128xf32>
    %142 = arith.addf %136, %141 : vector<78x128xf32>
    %c0_142 = arith.constant 0 : index
    %c12_143 = arith.constant 12 : index
    %c0_144 = arith.constant 0 : index
    %143 = vector.load %arg4[%c0_142, %c12_143, %c0_144] : memref<1x100x128xbf16, #tpu.memory_space<vmem>>, vector<1x78x128xbf16>
    %144 = vector.shape_cast %143 : vector<1x78x128xbf16> to vector<78x128xbf16>
    %c23 = arith.constant 23 : index
    %c0_145 = arith.constant 0 : index
    %c0_146 = arith.constant 0 : index
    %145 = vector.load %arg5[%c23, %c0_145, %c0_146] : memref<36x128x128xbf16, #tpu.memory_space<vmem>>, vector<1x128x128xbf16>
    %146 = vector.shape_cast %145 : vector<1x128x128xbf16> to vector<128x128xbf16>
    %cst_147 = arith.constant dense<0.000000e+00> : vector<78x128xf32>
    %147 = tpu.matmul %144, %146, %cst_147 {dimension_numbers = #tpu.dot_dimension_numbers<[1], [0], [0], [1], [0, 0, 1, 1], [], []>} : vector<78x128xbf16>, vector<128x128xbf16>, vector<78x128xf32> -> vector<78x128xf32>
    %148 = arith.addf %142, %147 : vector<78x128xf32>
    %c0_148 = arith.constant 0 : index
    %c20_149 = arith.constant 20 : index
    %c0_150 = arith.constant 0 : index
    %149 = vector.load %arg1[%c0_148, %c20_149, %c0_150] : memref<1x100x128xbf16, #tpu.memory_space<vmem>>, vector<1x78x128xbf16>
    %150 = vector.shape_cast %149 : vector<1x78x128xbf16> to vector<78x128xbf16>
    %c24 = arith.constant 24 : index
    %c0_151 = arith.constant 0 : index
    %c0_152 = arith.constant 0 : index
    %151 = vector.load %arg5[%c24, %c0_151, %c0_152] : memref<36x128x128xbf16, #tpu.memory_space<vmem>>, vector<1x128x128xbf16>
    %152 = vector.shape_cast %151 : vector<1x128x128xbf16> to vector<128x128xbf16>
    %cst_153 = arith.constant dense<0.000000e+00> : vector<78x128xf32>
    %153 = tpu.matmul %150, %152, %cst_153 {dimension_numbers = #tpu.dot_dimension_numbers<[1], [0], [0], [1], [0, 0, 1, 1], [], []>} : vector<78x128xbf16>, vector<128x128xbf16>, vector<78x128xf32> -> vector<78x128xf32>
    %154 = arith.addf %148, %153 : vector<78x128xf32>
    %c0_154 = arith.constant 0 : index
    %c20_155 = arith.constant 20 : index
    %c0_156 = arith.constant 0 : index
    %155 = vector.load %arg2[%c0_154, %c20_155, %c0_156] : memref<1x100x128xbf16, #tpu.memory_space<vmem>>, vector<1x78x128xbf16>
    %156 = vector.shape_cast %155 : vector<1x78x128xbf16> to vector<78x128xbf16>
    %c25 = arith.constant 25 : index
    %c0_157 = arith.constant 0 : index
    %c0_158 = arith.constant 0 : index
    %157 = vector.load %arg5[%c25, %c0_157, %c0_158] : memref<36x128x128xbf16, #tpu.memory_space<vmem>>, vector<1x128x128xbf16>
    %158 = vector.shape_cast %157 : vector<1x128x128xbf16> to vector<128x128xbf16>
    %cst_159 = arith.constant dense<0.000000e+00> : vector<78x128xf32>
    %159 = tpu.matmul %156, %158, %cst_159 {dimension_numbers = #tpu.dot_dimension_numbers<[1], [0], [0], [1], [0, 0, 1, 1], [], []>} : vector<78x128xbf16>, vector<128x128xbf16>, vector<78x128xf32> -> vector<78x128xf32>
    %160 = arith.addf %154, %159 : vector<78x128xf32>
    %c0_160 = arith.constant 0 : index
    %c21_161 = arith.constant 21 : index
    %c0_162 = arith.constant 0 : index
    %161 = vector.load %arg1[%c0_160, %c21_161, %c0_162] : memref<1x100x128xbf16, #tpu.memory_space<vmem>>, vector<1x78x128xbf16>
    %162 = vector.shape_cast %161 : vector<1x78x128xbf16> to vector<78x128xbf16>
    %c26 = arith.constant 26 : index
    %c0_163 = arith.constant 0 : index
    %c0_164 = arith.constant 0 : index
    %163 = vector.load %arg5[%c26, %c0_163, %c0_164] : memref<36x128x128xbf16, #tpu.memory_space<vmem>>, vector<1x128x128xbf16>
    %164 = vector.shape_cast %163 : vector<1x128x128xbf16> to vector<128x128xbf16>
    %cst_165 = arith.constant dense<0.000000e+00> : vector<78x128xf32>
    %165 = tpu.matmul %162, %164, %cst_165 {dimension_numbers = #tpu.dot_dimension_numbers<[1], [0], [0], [1], [0, 0, 1, 1], [], []>} : vector<78x128xbf16>, vector<128x128xbf16>, vector<78x128xf32> -> vector<78x128xf32>
    %166 = arith.addf %160, %165 : vector<78x128xf32>
    %c0_166 = arith.constant 0 : index
    %c21_167 = arith.constant 21 : index
    %c0_168 = arith.constant 0 : index
    %167 = vector.load %arg2[%c0_166, %c21_167, %c0_168] : memref<1x100x128xbf16, #tpu.memory_space<vmem>>, vector<1x78x128xbf16>
    %168 = vector.shape_cast %167 : vector<1x78x128xbf16> to vector<78x128xbf16>
    %c27 = arith.constant 27 : index
    %c0_169 = arith.constant 0 : index
    %c0_170 = arith.constant 0 : index
    %169 = vector.load %arg5[%c27, %c0_169, %c0_170] : memref<36x128x128xbf16, #tpu.memory_space<vmem>>, vector<1x128x128xbf16>
    %170 = vector.shape_cast %169 : vector<1x128x128xbf16> to vector<128x128xbf16>
    %cst_171 = arith.constant dense<0.000000e+00> : vector<78x128xf32>
    %171 = tpu.matmul %168, %170, %cst_171 {dimension_numbers = #tpu.dot_dimension_numbers<[1], [0], [0], [1], [0, 0, 1, 1], [], []>} : vector<78x128xbf16>, vector<128x128xbf16>, vector<78x128xf32> -> vector<78x128xf32>
    %172 = arith.addf %166, %171 : vector<78x128xf32>
    %c0_172 = arith.constant 0 : index
    %c22_173 = arith.constant 22 : index
    %c0_174 = arith.constant 0 : index
    %173 = vector.load %arg1[%c0_172, %c22_173, %c0_174] : memref<1x100x128xbf16, #tpu.memory_space<vmem>>, vector<1x78x128xbf16>
    %174 = vector.shape_cast %173 : vector<1x78x128xbf16> to vector<78x128xbf16>
    %c28 = arith.constant 28 : index
    %c0_175 = arith.constant 0 : index
    %c0_176 = arith.constant 0 : index
    %175 = vector.load %arg5[%c28, %c0_175, %c0_176] : memref<36x128x128xbf16, #tpu.memory_space<vmem>>, vector<1x128x128xbf16>
    %176 = vector.shape_cast %175 : vector<1x128x128xbf16> to vector<128x128xbf16>
    %cst_177 = arith.constant dense<0.000000e+00> : vector<78x128xf32>
    %177 = tpu.matmul %174, %176, %cst_177 {dimension_numbers = #tpu.dot_dimension_numbers<[1], [0], [0], [1], [0, 0, 1, 1], [], []>} : vector<78x128xbf16>, vector<128x128xbf16>, vector<78x128xf32> -> vector<78x128xf32>
    %178 = arith.addf %172, %177 : vector<78x128xf32>
    %c0_178 = arith.constant 0 : index
    %c22_179 = arith.constant 22 : index
    %c0_180 = arith.constant 0 : index
    %179 = vector.load %arg2[%c0_178, %c22_179, %c0_180] : memref<1x100x128xbf16, #tpu.memory_space<vmem>>, vector<1x78x128xbf16>
    %180 = vector.shape_cast %179 : vector<1x78x128xbf16> to vector<78x128xbf16>
    %c29 = arith.constant 29 : index
    %c0_181 = arith.constant 0 : index
    %c0_182 = arith.constant 0 : index
    %181 = vector.load %arg5[%c29, %c0_181, %c0_182] : memref<36x128x128xbf16, #tpu.memory_space<vmem>>, vector<1x128x128xbf16>
    %182 = vector.shape_cast %181 : vector<1x128x128xbf16> to vector<128x128xbf16>
    %cst_183 = arith.constant dense<0.000000e+00> : vector<78x128xf32>
    %183 = tpu.matmul %180, %182, %cst_183 {dimension_numbers = #tpu.dot_dimension_numbers<[1], [0], [0], [1], [0, 0, 1, 1], [], []>} : vector<78x128xbf16>, vector<128x128xbf16>, vector<78x128xf32> -> vector<78x128xf32>
    %184 = arith.addf %178, %183 : vector<78x128xf32>
    %c0_184 = arith.constant 0 : index
    %c20_185 = arith.constant 20 : index
    %c0_186 = arith.constant 0 : index
    %185 = vector.load %arg3[%c0_184, %c20_185, %c0_186] : memref<1x100x128xbf16, #tpu.memory_space<vmem>>, vector<1x78x128xbf16>
    %186 = vector.shape_cast %185 : vector<1x78x128xbf16> to vector<78x128xbf16>
    %c30 = arith.constant 30 : index
    %c0_187 = arith.constant 0 : index
    %c0_188 = arith.constant 0 : index
    %187 = vector.load %arg5[%c30, %c0_187, %c0_188] : memref<36x128x128xbf16, #tpu.memory_space<vmem>>, vector<1x128x128xbf16>
    %188 = vector.shape_cast %187 : vector<1x128x128xbf16> to vector<128x128xbf16>
    %cst_189 = arith.constant dense<0.000000e+00> : vector<78x128xf32>
    %189 = tpu.matmul %186, %188, %cst_189 {dimension_numbers = #tpu.dot_dimension_numbers<[1], [0], [0], [1], [0, 0, 1, 1], [], []>} : vector<78x128xbf16>, vector<128x128xbf16>, vector<78x128xf32> -> vector<78x128xf32>
    %190 = arith.addf %184, %189 : vector<78x128xf32>
    %c0_190 = arith.constant 0 : index
    %c20_191 = arith.constant 20 : index
    %c0_192 = arith.constant 0 : index
    %191 = vector.load %arg4[%c0_190, %c20_191, %c0_192] : memref<1x100x128xbf16, #tpu.memory_space<vmem>>, vector<1x78x128xbf16>
    %192 = vector.shape_cast %191 : vector<1x78x128xbf16> to vector<78x128xbf16>
    %c31 = arith.constant 31 : index
    %c0_193 = arith.constant 0 : index
    %c0_194 = arith.constant 0 : index
    %193 = vector.load %arg5[%c31, %c0_193, %c0_194] : memref<36x128x128xbf16, #tpu.memory_space<vmem>>, vector<1x128x128xbf16>
    %194 = vector.shape_cast %193 : vector<1x128x128xbf16> to vector<128x128xbf16>
    %cst_195 = arith.constant dense<0.000000e+00> : vector<78x128xf32>
    %195 = tpu.matmul %192, %194, %cst_195 {dimension_numbers = #tpu.dot_dimension_numbers<[1], [0], [0], [1], [0, 0, 1, 1], [], []>} : vector<78x128xbf16>, vector<128x128xbf16>, vector<78x128xf32> -> vector<78x128xf32>
    %196 = arith.addf %190, %195 : vector<78x128xf32>
    %c0_196 = arith.constant 0 : index
    %c21_197 = arith.constant 21 : index
    %c0_198 = arith.constant 0 : index
    %197 = vector.load %arg3[%c0_196, %c21_197, %c0_198] : memref<1x100x128xbf16, #tpu.memory_space<vmem>>, vector<1x78x128xbf16>
    %198 = vector.shape_cast %197 : vector<1x78x128xbf16> to vector<78x128xbf16>
    %c32 = arith.constant 32 : index
    %c0_199 = arith.constant 0 : index
    %c0_200 = arith.constant 0 : index
    %199 = vector.load %arg5[%c32, %c0_199, %c0_200] : memref<36x128x128xbf16, #tpu.memory_space<vmem>>, vector<1x128x128xbf16>
    %200 = vector.shape_cast %199 : vector<1x128x128xbf16> to vector<128x128xbf16>
    %cst_201 = arith.constant dense<0.000000e+00> : vector<78x128xf32>
    %201 = tpu.matmul %198, %200, %cst_201 {dimension_numbers = #tpu.dot_dimension_numbers<[1], [0], [0], [1], [0, 0, 1, 1], [], []>} : vector<78x128xbf16>, vector<128x128xbf16>, vector<78x128xf32> -> vector<78x128xf32>
    %202 = arith.addf %196, %201 : vector<78x128xf32>
    %c0_202 = arith.constant 0 : index
    %c21_203 = arith.constant 21 : index
    %c0_204 = arith.constant 0 : index
    %203 = vector.load %arg4[%c0_202, %c21_203, %c0_204] : memref<1x100x128xbf16, #tpu.memory_space<vmem>>, vector<1x78x128xbf16>
    %204 = vector.shape_cast %203 : vector<1x78x128xbf16> to vector<78x128xbf16>
    %c33 = arith.constant 33 : index
    %c0_205 = arith.constant 0 : index
    %c0_206 = arith.constant 0 : index
    %205 = vector.load %arg5[%c33, %c0_205, %c0_206] : memref<36x128x128xbf16, #tpu.memory_space<vmem>>, vector<1x128x128xbf16>
    %206 = vector.shape_cast %205 : vector<1x128x128xbf16> to vector<128x128xbf16>
    %cst_207 = arith.constant dense<0.000000e+00> : vector<78x128xf32>
    %207 = tpu.matmul %204, %206, %cst_207 {dimension_numbers = #tpu.dot_dimension_numbers<[1], [0], [0], [1], [0, 0, 1, 1], [], []>} : vector<78x128xbf16>, vector<128x128xbf16>, vector<78x128xf32> -> vector<78x128xf32>
    %208 = arith.addf %202, %207 : vector<78x128xf32>
    %c0_208 = arith.constant 0 : index
    %c22_209 = arith.constant 22 : index
    %c0_210 = arith.constant 0 : index
    %209 = vector.load %arg3[%c0_208, %c22_209, %c0_210] : memref<1x100x128xbf16, #tpu.memory_space<vmem>>, vector<1x78x128xbf16>
    %210 = vector.shape_cast %209 : vector<1x78x128xbf16> to vector<78x128xbf16>
    %c34 = arith.constant 34 : index
    %c0_211 = arith.constant 0 : index
    %c0_212 = arith.constant 0 : index
    %211 = vector.load %arg5[%c34, %c0_211, %c0_212] : memref<36x128x128xbf16, #tpu.memory_space<vmem>>, vector<1x128x128xbf16>
    %212 = vector.shape_cast %211 : vector<1x128x128xbf16> to vector<128x128xbf16>
    %cst_213 = arith.constant dense<0.000000e+00> : vector<78x128xf32>
    %213 = tpu.matmul %210, %212, %cst_213 {dimension_numbers = #tpu.dot_dimension_numbers<[1], [0], [0], [1], [0, 0, 1, 1], [], []>} : vector<78x128xbf16>, vector<128x128xbf16>, vector<78x128xf32> -> vector<78x128xf32>
    %214 = arith.addf %208, %213 : vector<78x128xf32>
    %c0_214 = arith.constant 0 : index
    %c22_215 = arith.constant 22 : index
    %c0_216 = arith.constant 0 : index
    %215 = vector.load %arg4[%c0_214, %c22_215, %c0_216] : memref<1x100x128xbf16, #tpu.memory_space<vmem>>, vector<1x78x128xbf16>
    %216 = vector.shape_cast %215 : vector<1x78x128xbf16> to vector<78x128xbf16>
    %c35 = arith.constant 35 : index
    %c0_217 = arith.constant 0 : index
    %c0_218 = arith.constant 0 : index
    %217 = vector.load %arg5[%c35, %c0_217, %c0_218] : memref<36x128x128xbf16, #tpu.memory_space<vmem>>, vector<1x128x128xbf16>
    %218 = vector.shape_cast %217 : vector<1x128x128xbf16> to vector<128x128xbf16>
    %cst_219 = arith.constant dense<0.000000e+00> : vector<78x128xf32>
    %219 = tpu.matmul %216, %218, %cst_219 {dimension_numbers = #tpu.dot_dimension_numbers<[1], [0], [0], [1], [0, 0, 1, 1], [], []>} : vector<78x128xbf16>, vector<128x128xbf16>, vector<78x128xf32> -> vector<78x128xf32>
    %220 = arith.addf %214, %219 : vector<78x128xf32>
    %c0_220 = arith.constant 0 : index
    %c0_221 = arith.constant 0 : index
    %221 = vector.load %arg6[%c0_220, %c0_221] : memref<1x128xf32, #tpu.memory_space<vmem>>, vector<1x128xf32>
    %222 = vector.broadcast %221 : vector<1x128xf32> to vector<78x128xf32>
    %223 = arith.addf %220, %222 : vector<78x128xf32>
    %cst_222 = arith.constant 0.000000e+00 : f32
    %224 = vector.broadcast %cst_222 : f32 to vector<78x128xf32>
    %225 = arith.maximumf %223, %224 : vector<78x128xf32>
    %226 = arith.truncf %225 : vector<78x128xf32> to vector<78x128xbf16>
    %c0_223 = arith.constant 0 : index
    %c0_224 = arith.constant 0 : index
    %c0_225 = arith.constant 0 : index
    %227 = vector.load %arg7[%c0_223, %c0_224, %c0_225] : memref<1x100x128xbf16, #tpu.memory_space<vmem>>, vector<1x78x128xbf16>
    %228 = vector.shape_cast %227 : vector<1x78x128xbf16> to vector<78x128xbf16>
    %229 = vector.shape_cast %226 : vector<78x128xbf16> to vector<1x78x128xbf16>
    tpu.vector_store %arg7[%c0_223, %c0_224, %c0_225], %229 {strides = array<i32>} : memref<1x100x128xbf16, #tpu.memory_space<vmem>>, vector<1x78x128xbf16>,
    return
  }
  func.func @transform_0(%arg0: i32) -> (i32, i32, i32) {
    %c0_i32 = arith.constant 0 : i32
    %c0_i32_0 = arith.constant 0 : i32
    %c0_i32_1 = arith.constant 0 : i32
    return %arg0, %c0_i32, %c0_i32_0 : i32, i32, i32
  }
  func.func @transform_1(%arg0: i32) -> (i32, i32, i32) {
    %c0_i32 = arith.constant 0 : i32
    %c0_i32_0 = arith.constant 0 : i32
    %c0_i32_1 = arith.constant 0 : i32
    return %arg0, %c0_i32, %c0_i32_0 : i32, i32, i32
  }
  func.func @transform_2(%arg0: i32) -> (i32, i32, i32) {
    %c0_i32 = arith.constant 0 : i32
    %c0_i32_0 = arith.constant 0 : i32
    %c0_i32_1 = arith.constant 0 : i32
    return %arg0, %c0_i32, %c0_i32_0 : i32, i32, i32
  }
  func.func @transform_3(%arg0: i32) -> (i32, i32, i32) {
    %c0_i32 = arith.constant 0 : i32
    %c0_i32_0 = arith.constant 0 : i32
    %c0_i32_1 = arith.constant 0 : i32
    return %arg0, %c0_i32, %c0_i32_0 : i32, i32, i32
  }
  func.func @transform_4(%arg0: i32) -> (i32, i32, i32) {
    %c0_i32 = arith.constant 0 : i32
    %c0_i32_0 = arith.constant 0 : i32
    %c0_i32_1 = arith.constant 0 : i32
    %c0_i32_2 = arith.constant 0 : i32
    return %c0_i32, %c0_i32_0, %c0_i32_1 : i32, i32, i32
  }
  func.func @transform_5(%arg0: i32) -> (i32, i32) {
    %c0_i32 = arith.constant 0 : i32
    %c0_i32_0 = arith.constant 0 : i32
    %c0_i32_1 = arith.constant 0 : i32
    return %c0_i32, %c0_i32_0 : i32, i32
  }
  func.func @transform_6(%arg0: i32) -> (i32, i32, i32) {
    %c0_i32 = arith.constant 0 : i32
    %c0_i32_0 = arith.constant 0 : i32
    %c0_i32_1 = arith.constant 0 : i32
    return %arg0, %c0_i32, %c0_i32_0 : i32, i32, i32
  }
}

module attributes {stable_mosaic.version = 11 : i64} {
  func.func @_fused_conv_kernel(%arg0: i32, %arg1: memref<1x64x128xbf16, #tpu.memory_space<vmem>>, %arg2: memref<25x128x128xbf16, #tpu.memory_space<vmem>>, %arg3: memref<1x128xf32, #tpu.memory_space<vmem>>, %arg4: memref<1x64x128xbf16, #tpu.memory_space<vmem>>) attributes {dimension_semantics = [#tpu.dimension_semantics<parallel>], iteration_bounds = array<i64: 2>, scalar_prefetch = 0 : i64, scratch_operands = 0 : i64, tpu.core_type = #tpu.core_type<tc>, window_params = [{transform_indices = @transform_0, window_bounds = array<i64: 1, 64, 128>}, {pipeline_mode = #tpu.pipeline_mode<synchronous>, transform_indices = @transform_1, window_bounds = array<i64: 25, 128, 128>}, {pipeline_mode = #tpu.pipeline_mode<synchronous>, transform_indices = @transform_2, window_bounds = array<i64: 1, 128>}, {transform_indices = @transform_3, window_bounds = array<i64: 1, 64, 128>}]} {
    %cst = arith.constant 0.000000e+00 : bf16
    %0 = vector.broadcast %cst : bf16 to vector<64x128xbf16>
    %c0 = arith.constant 0 : index
    %c0_0 = arith.constant 0 : index
    %c0_1 = arith.constant 0 : index
    %1 = vector.load %arg4[%c0, %c0_0, %c0_1] : memref<1x64x128xbf16, #tpu.memory_space<vmem>>, vector<1x64x128xbf16>
    %2 = vector.shape_cast %1 : vector<1x64x128xbf16> to vector<64x128xbf16>
    %3 = vector.shape_cast %0 : vector<64x128xbf16> to vector<1x64x128xbf16>
    tpu.vector_store %arg4[%c0, %c0_0, %c0_1], %3 {strides = array<i32>} : memref<1x64x128xbf16, #tpu.memory_space<vmem>>, vector<1x64x128xbf16>,
    %cst_2 = arith.constant 0.000000e+00 : f32
    %4 = vector.broadcast %cst_2 : f32 to vector<28x128xf32>
    %c0_3 = arith.constant 0 : index
    %c0_4 = arith.constant 0 : index
    %c0_5 = arith.constant 0 : index
    %5 = vector.load %arg1[%c0_3, %c0_4, %c0_5] : memref<1x64x128xbf16, #tpu.memory_space<vmem>>, vector<1x28x128xbf16>
    %6 = vector.shape_cast %5 : vector<1x28x128xbf16> to vector<28x128xbf16>
    %c0_6 = arith.constant 0 : index
    %c0_7 = arith.constant 0 : index
    %c0_8 = arith.constant 0 : index
    %7 = vector.load %arg2[%c0_6, %c0_7, %c0_8] : memref<25x128x128xbf16, #tpu.memory_space<vmem>>, vector<1x128x128xbf16>
    %8 = vector.shape_cast %7 : vector<1x128x128xbf16> to vector<128x128xbf16>
    %cst_9 = arith.constant dense<0.000000e+00> : vector<28x128xf32>
    %9 = tpu.matmul %6, %8, %cst_9 {dimension_numbers = #tpu.dot_dimension_numbers<[1], [0], [0], [1], [0, 0, 1, 1], [], []>} : vector<28x128xbf16>, vector<128x128xbf16>, vector<28x128xf32> -> vector<28x128xf32>
    %10 = arith.addf %4, %9 : vector<28x128xf32>
    %c0_10 = arith.constant 0 : index
    %c1 = arith.constant 1 : index
    %c0_11 = arith.constant 0 : index
    %11 = vector.load %arg1[%c0_10, %c1, %c0_11] : memref<1x64x128xbf16, #tpu.memory_space<vmem>>, vector<1x28x128xbf16>
    %12 = vector.shape_cast %11 : vector<1x28x128xbf16> to vector<28x128xbf16>
    %c1_12 = arith.constant 1 : index
    %c0_13 = arith.constant 0 : index
    %c0_14 = arith.constant 0 : index
    %13 = vector.load %arg2[%c1_12, %c0_13, %c0_14] : memref<25x128x128xbf16, #tpu.memory_space<vmem>>, vector<1x128x128xbf16>
    %14 = vector.shape_cast %13 : vector<1x128x128xbf16> to vector<128x128xbf16>
    %cst_15 = arith.constant dense<0.000000e+00> : vector<28x128xf32>
    %15 = tpu.matmul %12, %14, %cst_15 {dimension_numbers = #tpu.dot_dimension_numbers<[1], [0], [0], [1], [0, 0, 1, 1], [], []>} : vector<28x128xbf16>, vector<128x128xbf16>, vector<28x128xf32> -> vector<28x128xf32>
    %16 = arith.addf %10, %15 : vector<28x128xf32>
    %c0_16 = arith.constant 0 : index
    %c2 = arith.constant 2 : index
    %c0_17 = arith.constant 0 : index
    %17 = vector.load %arg1[%c0_16, %c2, %c0_17] : memref<1x64x128xbf16, #tpu.memory_space<vmem>>, vector<1x28x128xbf16>
    %18 = vector.shape_cast %17 : vector<1x28x128xbf16> to vector<28x128xbf16>
    %c2_18 = arith.constant 2 : index
    %c0_19 = arith.constant 0 : index
    %c0_20 = arith.constant 0 : index
    %19 = vector.load %arg2[%c2_18, %c0_19, %c0_20] : memref<25x128x128xbf16, #tpu.memory_space<vmem>>, vector<1x128x128xbf16>
    %20 = vector.shape_cast %19 : vector<1x128x128xbf16> to vector<128x128xbf16>
    %cst_21 = arith.constant dense<0.000000e+00> : vector<28x128xf32>
    %21 = tpu.matmul %18, %20, %cst_21 {dimension_numbers = #tpu.dot_dimension_numbers<[1], [0], [0], [1], [0, 0, 1, 1], [], []>} : vector<28x128xbf16>, vector<128x128xbf16>, vector<28x128xf32> -> vector<28x128xf32>
    %22 = arith.addf %16, %21 : vector<28x128xf32>
    %c0_22 = arith.constant 0 : index
    %c3 = arith.constant 3 : index
    %c0_23 = arith.constant 0 : index
    %23 = vector.load %arg1[%c0_22, %c3, %c0_23] : memref<1x64x128xbf16, #tpu.memory_space<vmem>>, vector<1x28x128xbf16>
    %24 = vector.shape_cast %23 : vector<1x28x128xbf16> to vector<28x128xbf16>
    %c3_24 = arith.constant 3 : index
    %c0_25 = arith.constant 0 : index
    %c0_26 = arith.constant 0 : index
    %25 = vector.load %arg2[%c3_24, %c0_25, %c0_26] : memref<25x128x128xbf16, #tpu.memory_space<vmem>>, vector<1x128x128xbf16>
    %26 = vector.shape_cast %25 : vector<1x128x128xbf16> to vector<128x128xbf16>
    %cst_27 = arith.constant dense<0.000000e+00> : vector<28x128xf32>
    %27 = tpu.matmul %24, %26, %cst_27 {dimension_numbers = #tpu.dot_dimension_numbers<[1], [0], [0], [1], [0, 0, 1, 1], [], []>} : vector<28x128xbf16>, vector<128x128xbf16>, vector<28x128xf32> -> vector<28x128xf32>
    %28 = arith.addf %22, %27 : vector<28x128xf32>
    %c0_28 = arith.constant 0 : index
    %c4 = arith.constant 4 : index
    %c0_29 = arith.constant 0 : index
    %29 = vector.load %arg1[%c0_28, %c4, %c0_29] : memref<1x64x128xbf16, #tpu.memory_space<vmem>>, vector<1x28x128xbf16>
    %30 = vector.shape_cast %29 : vector<1x28x128xbf16> to vector<28x128xbf16>
    %c4_30 = arith.constant 4 : index
    %c0_31 = arith.constant 0 : index
    %c0_32 = arith.constant 0 : index
    %31 = vector.load %arg2[%c4_30, %c0_31, %c0_32] : memref<25x128x128xbf16, #tpu.memory_space<vmem>>, vector<1x128x128xbf16>
    %32 = vector.shape_cast %31 : vector<1x128x128xbf16> to vector<128x128xbf16>
    %cst_33 = arith.constant dense<0.000000e+00> : vector<28x128xf32>
    %33 = tpu.matmul %30, %32, %cst_33 {dimension_numbers = #tpu.dot_dimension_numbers<[1], [0], [0], [1], [0, 0, 1, 1], [], []>} : vector<28x128xbf16>, vector<128x128xbf16>, vector<28x128xf32> -> vector<28x128xf32>
    %34 = arith.addf %28, %33 : vector<28x128xf32>
    %c0_34 = arith.constant 0 : index
    %c8 = arith.constant 8 : index
    %c0_35 = arith.constant 0 : index
    %35 = vector.load %arg1[%c0_34, %c8, %c0_35] : memref<1x64x128xbf16, #tpu.memory_space<vmem>>, vector<1x28x128xbf16>
    %36 = vector.shape_cast %35 : vector<1x28x128xbf16> to vector<28x128xbf16>
    %c5 = arith.constant 5 : index
    %c0_36 = arith.constant 0 : index
    %c0_37 = arith.constant 0 : index
    %37 = vector.load %arg2[%c5, %c0_36, %c0_37] : memref<25x128x128xbf16, #tpu.memory_space<vmem>>, vector<1x128x128xbf16>
    %38 = vector.shape_cast %37 : vector<1x128x128xbf16> to vector<128x128xbf16>
    %cst_38 = arith.constant dense<0.000000e+00> : vector<28x128xf32>
    %39 = tpu.matmul %36, %38, %cst_38 {dimension_numbers = #tpu.dot_dimension_numbers<[1], [0], [0], [1], [0, 0, 1, 1], [], []>} : vector<28x128xbf16>, vector<128x128xbf16>, vector<28x128xf32> -> vector<28x128xf32>
    %40 = arith.addf %34, %39 : vector<28x128xf32>
    %c0_39 = arith.constant 0 : index
    %c9 = arith.constant 9 : index
    %c0_40 = arith.constant 0 : index
    %41 = vector.load %arg1[%c0_39, %c9, %c0_40] : memref<1x64x128xbf16, #tpu.memory_space<vmem>>, vector<1x28x128xbf16>
    %42 = vector.shape_cast %41 : vector<1x28x128xbf16> to vector<28x128xbf16>
    %c6 = arith.constant 6 : index
    %c0_41 = arith.constant 0 : index
    %c0_42 = arith.constant 0 : index
    %43 = vector.load %arg2[%c6, %c0_41, %c0_42] : memref<25x128x128xbf16, #tpu.memory_space<vmem>>, vector<1x128x128xbf16>
    %44 = vector.shape_cast %43 : vector<1x128x128xbf16> to vector<128x128xbf16>
    %cst_43 = arith.constant dense<0.000000e+00> : vector<28x128xf32>
    %45 = tpu.matmul %42, %44, %cst_43 {dimension_numbers = #tpu.dot_dimension_numbers<[1], [0], [0], [1], [0, 0, 1, 1], [], []>} : vector<28x128xbf16>, vector<128x128xbf16>, vector<28x128xf32> -> vector<28x128xf32>
    %46 = arith.addf %40, %45 : vector<28x128xf32>
    %c0_44 = arith.constant 0 : index
    %c10 = arith.constant 10 : index
    %c0_45 = arith.constant 0 : index
    %47 = vector.load %arg1[%c0_44, %c10, %c0_45] : memref<1x64x128xbf16, #tpu.memory_space<vmem>>, vector<1x28x128xbf16>
    %48 = vector.shape_cast %47 : vector<1x28x128xbf16> to vector<28x128xbf16>
    %c7 = arith.constant 7 : index
    %c0_46 = arith.constant 0 : index
    %c0_47 = arith.constant 0 : index
    %49 = vector.load %arg2[%c7, %c0_46, %c0_47] : memref<25x128x128xbf16, #tpu.memory_space<vmem>>, vector<1x128x128xbf16>
    %50 = vector.shape_cast %49 : vector<1x128x128xbf16> to vector<128x128xbf16>
    %cst_48 = arith.constant dense<0.000000e+00> : vector<28x128xf32>
    %51 = tpu.matmul %48, %50, %cst_48 {dimension_numbers = #tpu.dot_dimension_numbers<[1], [0], [0], [1], [0, 0, 1, 1], [], []>} : vector<28x128xbf16>, vector<128x128xbf16>, vector<28x128xf32> -> vector<28x128xf32>
    %52 = arith.addf %46, %51 : vector<28x128xf32>
    %c0_49 = arith.constant 0 : index
    %c11 = arith.constant 11 : index
    %c0_50 = arith.constant 0 : index
    %53 = vector.load %arg1[%c0_49, %c11, %c0_50] : memref<1x64x128xbf16, #tpu.memory_space<vmem>>, vector<1x28x128xbf16>
    %54 = vector.shape_cast %53 : vector<1x28x128xbf16> to vector<28x128xbf16>
    %c8_51 = arith.constant 8 : index
    %c0_52 = arith.constant 0 : index
    %c0_53 = arith.constant 0 : index
    %55 = vector.load %arg2[%c8_51, %c0_52, %c0_53] : memref<25x128x128xbf16, #tpu.memory_space<vmem>>, vector<1x128x128xbf16>
    %56 = vector.shape_cast %55 : vector<1x128x128xbf16> to vector<128x128xbf16>
    %cst_54 = arith.constant dense<0.000000e+00> : vector<28x128xf32>
    %57 = tpu.matmul %54, %56, %cst_54 {dimension_numbers = #tpu.dot_dimension_numbers<[1], [0], [0], [1], [0, 0, 1, 1], [], []>} : vector<28x128xbf16>, vector<128x128xbf16>, vector<28x128xf32> -> vector<28x128xf32>
    %58 = arith.addf %52, %57 : vector<28x128xf32>
    %c0_55 = arith.constant 0 : index
    %c12 = arith.constant 12 : index
    %c0_56 = arith.constant 0 : index
    %59 = vector.load %arg1[%c0_55, %c12, %c0_56] : memref<1x64x128xbf16, #tpu.memory_space<vmem>>, vector<1x28x128xbf16>
    %60 = vector.shape_cast %59 : vector<1x28x128xbf16> to vector<28x128xbf16>
    %c9_57 = arith.constant 9 : index
    %c0_58 = arith.constant 0 : index
    %c0_59 = arith.constant 0 : index
    %61 = vector.load %arg2[%c9_57, %c0_58, %c0_59] : memref<25x128x128xbf16, #tpu.memory_space<vmem>>, vector<1x128x128xbf16>
    %62 = vector.shape_cast %61 : vector<1x128x128xbf16> to vector<128x128xbf16>
    %cst_60 = arith.constant dense<0.000000e+00> : vector<28x128xf32>
    %63 = tpu.matmul %60, %62, %cst_60 {dimension_numbers = #tpu.dot_dimension_numbers<[1], [0], [0], [1], [0, 0, 1, 1], [], []>} : vector<28x128xbf16>, vector<128x128xbf16>, vector<28x128xf32> -> vector<28x128xf32>
    %64 = arith.addf %58, %63 : vector<28x128xf32>
    %c0_61 = arith.constant 0 : index
    %c16 = arith.constant 16 : index
    %c0_62 = arith.constant 0 : index
    %65 = vector.load %arg1[%c0_61, %c16, %c0_62] : memref<1x64x128xbf16, #tpu.memory_space<vmem>>, vector<1x28x128xbf16>
    %66 = vector.shape_cast %65 : vector<1x28x128xbf16> to vector<28x128xbf16>
    %c10_63 = arith.constant 10 : index
    %c0_64 = arith.constant 0 : index
    %c0_65 = arith.constant 0 : index
    %67 = vector.load %arg2[%c10_63, %c0_64, %c0_65] : memref<25x128x128xbf16, #tpu.memory_space<vmem>>, vector<1x128x128xbf16>
    %68 = vector.shape_cast %67 : vector<1x128x128xbf16> to vector<128x128xbf16>
    %cst_66 = arith.constant dense<0.000000e+00> : vector<28x128xf32>
    %69 = tpu.matmul %66, %68, %cst_66 {dimension_numbers = #tpu.dot_dimension_numbers<[1], [0], [0], [1], [0, 0, 1, 1], [], []>} : vector<28x128xbf16>, vector<128x128xbf16>, vector<28x128xf32> -> vector<28x128xf32>
    %70 = arith.addf %64, %69 : vector<28x128xf32>
    %c0_67 = arith.constant 0 : index
    %c17 = arith.constant 17 : index
    %c0_68 = arith.constant 0 : index
    %71 = vector.load %arg1[%c0_67, %c17, %c0_68] : memref<1x64x128xbf16, #tpu.memory_space<vmem>>, vector<1x28x128xbf16>
    %72 = vector.shape_cast %71 : vector<1x28x128xbf16> to vector<28x128xbf16>
    %c11_69 = arith.constant 11 : index
    %c0_70 = arith.constant 0 : index
    %c0_71 = arith.constant 0 : index
    %73 = vector.load %arg2[%c11_69, %c0_70, %c0_71] : memref<25x128x128xbf16, #tpu.memory_space<vmem>>, vector<1x128x128xbf16>
    %74 = vector.shape_cast %73 : vector<1x128x128xbf16> to vector<128x128xbf16>
    %cst_72 = arith.constant dense<0.000000e+00> : vector<28x128xf32>
    %75 = tpu.matmul %72, %74, %cst_72 {dimension_numbers = #tpu.dot_dimension_numbers<[1], [0], [0], [1], [0, 0, 1, 1], [], []>} : vector<28x128xbf16>, vector<128x128xbf16>, vector<28x128xf32> -> vector<28x128xf32>
    %76 = arith.addf %70, %75 : vector<28x128xf32>
    %c0_73 = arith.constant 0 : index
    %c18 = arith.constant 18 : index
    %c0_74 = arith.constant 0 : index
    %77 = vector.load %arg1[%c0_73, %c18, %c0_74] : memref<1x64x128xbf16, #tpu.memory_space<vmem>>, vector<1x28x128xbf16>
    %78 = vector.shape_cast %77 : vector<1x28x128xbf16> to vector<28x128xbf16>
    %c12_75 = arith.constant 12 : index
    %c0_76 = arith.constant 0 : index
    %c0_77 = arith.constant 0 : index
    %79 = vector.load %arg2[%c12_75, %c0_76, %c0_77] : memref<25x128x128xbf16, #tpu.memory_space<vmem>>, vector<1x128x128xbf16>
    %80 = vector.shape_cast %79 : vector<1x128x128xbf16> to vector<128x128xbf16>
    %cst_78 = arith.constant dense<0.000000e+00> : vector<28x128xf32>
    %81 = tpu.matmul %78, %80, %cst_78 {dimension_numbers = #tpu.dot_dimension_numbers<[1], [0], [0], [1], [0, 0, 1, 1], [], []>} : vector<28x128xbf16>, vector<128x128xbf16>, vector<28x128xf32> -> vector<28x128xf32>
    %82 = arith.addf %76, %81 : vector<28x128xf32>
    %c0_79 = arith.constant 0 : index
    %c19 = arith.constant 19 : index
    %c0_80 = arith.constant 0 : index
    %83 = vector.load %arg1[%c0_79, %c19, %c0_80] : memref<1x64x128xbf16, #tpu.memory_space<vmem>>, vector<1x28x128xbf16>
    %84 = vector.shape_cast %83 : vector<1x28x128xbf16> to vector<28x128xbf16>
    %c13 = arith.constant 13 : index
    %c0_81 = arith.constant 0 : index
    %c0_82 = arith.constant 0 : index
    %85 = vector.load %arg2[%c13, %c0_81, %c0_82] : memref<25x128x128xbf16, #tpu.memory_space<vmem>>, vector<1x128x128xbf16>
    %86 = vector.shape_cast %85 : vector<1x128x128xbf16> to vector<128x128xbf16>
    %cst_83 = arith.constant dense<0.000000e+00> : vector<28x128xf32>
    %87 = tpu.matmul %84, %86, %cst_83 {dimension_numbers = #tpu.dot_dimension_numbers<[1], [0], [0], [1], [0, 0, 1, 1], [], []>} : vector<28x128xbf16>, vector<128x128xbf16>, vector<28x128xf32> -> vector<28x128xf32>
    %88 = arith.addf %82, %87 : vector<28x128xf32>
    %c0_84 = arith.constant 0 : index
    %c20 = arith.constant 20 : index
    %c0_85 = arith.constant 0 : index
    %89 = vector.load %arg1[%c0_84, %c20, %c0_85] : memref<1x64x128xbf16, #tpu.memory_space<vmem>>, vector<1x28x128xbf16>
    %90 = vector.shape_cast %89 : vector<1x28x128xbf16> to vector<28x128xbf16>
    %c14 = arith.constant 14 : index
    %c0_86 = arith.constant 0 : index
    %c0_87 = arith.constant 0 : index
    %91 = vector.load %arg2[%c14, %c0_86, %c0_87] : memref<25x128x128xbf16, #tpu.memory_space<vmem>>, vector<1x128x128xbf16>
    %92 = vector.shape_cast %91 : vector<1x128x128xbf16> to vector<128x128xbf16>
    %cst_88 = arith.constant dense<0.000000e+00> : vector<28x128xf32>
    %93 = tpu.matmul %90, %92, %cst_88 {dimension_numbers = #tpu.dot_dimension_numbers<[1], [0], [0], [1], [0, 0, 1, 1], [], []>} : vector<28x128xbf16>, vector<128x128xbf16>, vector<28x128xf32> -> vector<28x128xf32>
    %94 = arith.addf %88, %93 : vector<28x128xf32>
    %c0_89 = arith.constant 0 : index
    %c24 = arith.constant 24 : index
    %c0_90 = arith.constant 0 : index
    %95 = vector.load %arg1[%c0_89, %c24, %c0_90] : memref<1x64x128xbf16, #tpu.memory_space<vmem>>, vector<1x28x128xbf16>
    %96 = vector.shape_cast %95 : vector<1x28x128xbf16> to vector<28x128xbf16>
    %c15 = arith.constant 15 : index
    %c0_91 = arith.constant 0 : index
    %c0_92 = arith.constant 0 : index
    %97 = vector.load %arg2[%c15, %c0_91, %c0_92] : memref<25x128x128xbf16, #tpu.memory_space<vmem>>, vector<1x128x128xbf16>
    %98 = vector.shape_cast %97 : vector<1x128x128xbf16> to vector<128x128xbf16>
    %cst_93 = arith.constant dense<0.000000e+00> : vector<28x128xf32>
    %99 = tpu.matmul %96, %98, %cst_93 {dimension_numbers = #tpu.dot_dimension_numbers<[1], [0], [0], [1], [0, 0, 1, 1], [], []>} : vector<28x128xbf16>, vector<128x128xbf16>, vector<28x128xf32> -> vector<28x128xf32>
    %100 = arith.addf %94, %99 : vector<28x128xf32>
    %c0_94 = arith.constant 0 : index
    %c25 = arith.constant 25 : index
    %c0_95 = arith.constant 0 : index
    %101 = vector.load %arg1[%c0_94, %c25, %c0_95] : memref<1x64x128xbf16, #tpu.memory_space<vmem>>, vector<1x28x128xbf16>
    %102 = vector.shape_cast %101 : vector<1x28x128xbf16> to vector<28x128xbf16>
    %c16_96 = arith.constant 16 : index
    %c0_97 = arith.constant 0 : index
    %c0_98 = arith.constant 0 : index
    %103 = vector.load %arg2[%c16_96, %c0_97, %c0_98] : memref<25x128x128xbf16, #tpu.memory_space<vmem>>, vector<1x128x128xbf16>
    %104 = vector.shape_cast %103 : vector<1x128x128xbf16> to vector<128x128xbf16>
    %cst_99 = arith.constant dense<0.000000e+00> : vector<28x128xf32>
    %105 = tpu.matmul %102, %104, %cst_99 {dimension_numbers = #tpu.dot_dimension_numbers<[1], [0], [0], [1], [0, 0, 1, 1], [], []>} : vector<28x128xbf16>, vector<128x128xbf16>, vector<28x128xf32> -> vector<28x128xf32>
    %106 = arith.addf %100, %105 : vector<28x128xf32>
    %c0_100 = arith.constant 0 : index
    %c26 = arith.constant 26 : index
    %c0_101 = arith.constant 0 : index
    %107 = vector.load %arg1[%c0_100, %c26, %c0_101] : memref<1x64x128xbf16, #tpu.memory_space<vmem>>, vector<1x28x128xbf16>
    %108 = vector.shape_cast %107 : vector<1x28x128xbf16> to vector<28x128xbf16>
    %c17_102 = arith.constant 17 : index
    %c0_103 = arith.constant 0 : index
    %c0_104 = arith.constant 0 : index
    %109 = vector.load %arg2[%c17_102, %c0_103, %c0_104] : memref<25x128x128xbf16, #tpu.memory_space<vmem>>, vector<1x128x128xbf16>
    %110 = vector.shape_cast %109 : vector<1x128x128xbf16> to vector<128x128xbf16>
    %cst_105 = arith.constant dense<0.000000e+00> : vector<28x128xf32>
    %111 = tpu.matmul %108, %110, %cst_105 {dimension_numbers = #tpu.dot_dimension_numbers<[1], [0], [0], [1], [0, 0, 1, 1], [], []>} : vector<28x128xbf16>, vector<128x128xbf16>, vector<28x128xf32> -> vector<28x128xf32>
    %112 = arith.addf %106, %111 : vector<28x128xf32>
    %c0_106 = arith.constant 0 : index
    %c27 = arith.constant 27 : index
    %c0_107 = arith.constant 0 : index
    %113 = vector.load %arg1[%c0_106, %c27, %c0_107] : memref<1x64x128xbf16, #tpu.memory_space<vmem>>, vector<1x28x128xbf16>
    %114 = vector.shape_cast %113 : vector<1x28x128xbf16> to vector<28x128xbf16>
    %c18_108 = arith.constant 18 : index
    %c0_109 = arith.constant 0 : index
    %c0_110 = arith.constant 0 : index
    %115 = vector.load %arg2[%c18_108, %c0_109, %c0_110] : memref<25x128x128xbf16, #tpu.memory_space<vmem>>, vector<1x128x128xbf16>
    %116 = vector.shape_cast %115 : vector<1x128x128xbf16> to vector<128x128xbf16>
    %cst_111 = arith.constant dense<0.000000e+00> : vector<28x128xf32>
    %117 = tpu.matmul %114, %116, %cst_111 {dimension_numbers = #tpu.dot_dimension_numbers<[1], [0], [0], [1], [0, 0, 1, 1], [], []>} : vector<28x128xbf16>, vector<128x128xbf16>, vector<28x128xf32> -> vector<28x128xf32>
    %118 = arith.addf %112, %117 : vector<28x128xf32>
    %c0_112 = arith.constant 0 : index
    %c28 = arith.constant 28 : index
    %c0_113 = arith.constant 0 : index
    %119 = vector.load %arg1[%c0_112, %c28, %c0_113] : memref<1x64x128xbf16, #tpu.memory_space<vmem>>, vector<1x28x128xbf16>
    %120 = vector.shape_cast %119 : vector<1x28x128xbf16> to vector<28x128xbf16>
    %c19_114 = arith.constant 19 : index
    %c0_115 = arith.constant 0 : index
    %c0_116 = arith.constant 0 : index
    %121 = vector.load %arg2[%c19_114, %c0_115, %c0_116] : memref<25x128x128xbf16, #tpu.memory_space<vmem>>, vector<1x128x128xbf16>
    %122 = vector.shape_cast %121 : vector<1x128x128xbf16> to vector<128x128xbf16>
    %cst_117 = arith.constant dense<0.000000e+00> : vector<28x128xf32>
    %123 = tpu.matmul %120, %122, %cst_117 {dimension_numbers = #tpu.dot_dimension_numbers<[1], [0], [0], [1], [0, 0, 1, 1], [], []>} : vector<28x128xbf16>, vector<128x128xbf16>, vector<28x128xf32> -> vector<28x128xf32>
    %124 = arith.addf %118, %123 : vector<28x128xf32>
    %c0_118 = arith.constant 0 : index
    %c32 = arith.constant 32 : index
    %c0_119 = arith.constant 0 : index
    %125 = vector.load %arg1[%c0_118, %c32, %c0_119] : memref<1x64x128xbf16, #tpu.memory_space<vmem>>, vector<1x28x128xbf16>
    %126 = vector.shape_cast %125 : vector<1x28x128xbf16> to vector<28x128xbf16>
    %c20_120 = arith.constant 20 : index
    %c0_121 = arith.constant 0 : index
    %c0_122 = arith.constant 0 : index
    %127 = vector.load %arg2[%c20_120, %c0_121, %c0_122] : memref<25x128x128xbf16, #tpu.memory_space<vmem>>, vector<1x128x128xbf16>
    %128 = vector.shape_cast %127 : vector<1x128x128xbf16> to vector<128x128xbf16>
    %cst_123 = arith.constant dense<0.000000e+00> : vector<28x128xf32>
    %129 = tpu.matmul %126, %128, %cst_123 {dimension_numbers = #tpu.dot_dimension_numbers<[1], [0], [0], [1], [0, 0, 1, 1], [], []>} : vector<28x128xbf16>, vector<128x128xbf16>, vector<28x128xf32> -> vector<28x128xf32>
    %130 = arith.addf %124, %129 : vector<28x128xf32>
    %c0_124 = arith.constant 0 : index
    %c33 = arith.constant 33 : index
    %c0_125 = arith.constant 0 : index
    %131 = vector.load %arg1[%c0_124, %c33, %c0_125] : memref<1x64x128xbf16, #tpu.memory_space<vmem>>, vector<1x28x128xbf16>
    %132 = vector.shape_cast %131 : vector<1x28x128xbf16> to vector<28x128xbf16>
    %c21 = arith.constant 21 : index
    %c0_126 = arith.constant 0 : index
    %c0_127 = arith.constant 0 : index
    %133 = vector.load %arg2[%c21, %c0_126, %c0_127] : memref<25x128x128xbf16, #tpu.memory_space<vmem>>, vector<1x128x128xbf16>
    %134 = vector.shape_cast %133 : vector<1x128x128xbf16> to vector<128x128xbf16>
    %cst_128 = arith.constant dense<0.000000e+00> : vector<28x128xf32>
    %135 = tpu.matmul %132, %134, %cst_128 {dimension_numbers = #tpu.dot_dimension_numbers<[1], [0], [0], [1], [0, 0, 1, 1], [], []>} : vector<28x128xbf16>, vector<128x128xbf16>, vector<28x128xf32> -> vector<28x128xf32>
    %136 = arith.addf %130, %135 : vector<28x128xf32>
    %c0_129 = arith.constant 0 : index
    %c34 = arith.constant 34 : index
    %c0_130 = arith.constant 0 : index
    %137 = vector.load %arg1[%c0_129, %c34, %c0_130] : memref<1x64x128xbf16, #tpu.memory_space<vmem>>, vector<1x28x128xbf16>
    %138 = vector.shape_cast %137 : vector<1x28x128xbf16> to vector<28x128xbf16>
    %c22 = arith.constant 22 : index
    %c0_131 = arith.constant 0 : index
    %c0_132 = arith.constant 0 : index
    %139 = vector.load %arg2[%c22, %c0_131, %c0_132] : memref<25x128x128xbf16, #tpu.memory_space<vmem>>, vector<1x128x128xbf16>
    %140 = vector.shape_cast %139 : vector<1x128x128xbf16> to vector<128x128xbf16>
    %cst_133 = arith.constant dense<0.000000e+00> : vector<28x128xf32>
    %141 = tpu.matmul %138, %140, %cst_133 {dimension_numbers = #tpu.dot_dimension_numbers<[1], [0], [0], [1], [0, 0, 1, 1], [], []>} : vector<28x128xbf16>, vector<128x128xbf16>, vector<28x128xf32> -> vector<28x128xf32>
    %142 = arith.addf %136, %141 : vector<28x128xf32>
    %c0_134 = arith.constant 0 : index
    %c35 = arith.constant 35 : index
    %c0_135 = arith.constant 0 : index
    %143 = vector.load %arg1[%c0_134, %c35, %c0_135] : memref<1x64x128xbf16, #tpu.memory_space<vmem>>, vector<1x28x128xbf16>
    %144 = vector.shape_cast %143 : vector<1x28x128xbf16> to vector<28x128xbf16>
    %c23 = arith.constant 23 : index
    %c0_136 = arith.constant 0 : index
    %c0_137 = arith.constant 0 : index
    %145 = vector.load %arg2[%c23, %c0_136, %c0_137] : memref<25x128x128xbf16, #tpu.memory_space<vmem>>, vector<1x128x128xbf16>
    %146 = vector.shape_cast %145 : vector<1x128x128xbf16> to vector<128x128xbf16>
    %cst_138 = arith.constant dense<0.000000e+00> : vector<28x128xf32>
    %147 = tpu.matmul %144, %146, %cst_138 {dimension_numbers = #tpu.dot_dimension_numbers<[1], [0], [0], [1], [0, 0, 1, 1], [], []>} : vector<28x128xbf16>, vector<128x128xbf16>, vector<28x128xf32> -> vector<28x128xf32>
    %148 = arith.addf %142, %147 : vector<28x128xf32>
    %c0_139 = arith.constant 0 : index
    %c36 = arith.constant 36 : index
    %c0_140 = arith.constant 0 : index
    %149 = vector.load %arg1[%c0_139, %c36, %c0_140] : memref<1x64x128xbf16, #tpu.memory_space<vmem>>, vector<1x28x128xbf16>
    %150 = vector.shape_cast %149 : vector<1x28x128xbf16> to vector<28x128xbf16>
    %c24_141 = arith.constant 24 : index
    %c0_142 = arith.constant 0 : index
    %c0_143 = arith.constant 0 : index
    %151 = vector.load %arg2[%c24_141, %c0_142, %c0_143] : memref<25x128x128xbf16, #tpu.memory_space<vmem>>, vector<1x128x128xbf16>
    %152 = vector.shape_cast %151 : vector<1x128x128xbf16> to vector<128x128xbf16>
    %cst_144 = arith.constant dense<0.000000e+00> : vector<28x128xf32>
    %153 = tpu.matmul %150, %152, %cst_144 {dimension_numbers = #tpu.dot_dimension_numbers<[1], [0], [0], [1], [0, 0, 1, 1], [], []>} : vector<28x128xbf16>, vector<128x128xbf16>, vector<28x128xf32> -> vector<28x128xf32>
    %154 = arith.addf %148, %153 : vector<28x128xf32>
    %c0_145 = arith.constant 0 : index
    %c0_146 = arith.constant 0 : index
    %155 = vector.load %arg3[%c0_145, %c0_146] : memref<1x128xf32, #tpu.memory_space<vmem>>, vector<1x128xf32>
    %156 = vector.broadcast %155 : vector<1x128xf32> to vector<28x128xf32>
    %157 = arith.addf %154, %156 : vector<28x128xf32>
    %cst_147 = arith.constant 0.000000e+00 : f32
    %158 = vector.broadcast %cst_147 : f32 to vector<28x128xf32>
    %159 = arith.maximumf %157, %158 : vector<28x128xf32>
    %160 = arith.truncf %159 : vector<28x128xf32> to vector<28x128xbf16>
    %c0_148 = arith.constant 0 : index
    %c0_149 = arith.constant 0 : index
    %c0_150 = arith.constant 0 : index
    %161 = vector.load %arg4[%c0_148, %c0_149, %c0_150] : memref<1x64x128xbf16, #tpu.memory_space<vmem>>, vector<1x28x128xbf16>
    %162 = vector.shape_cast %161 : vector<1x28x128xbf16> to vector<28x128xbf16>
    %163 = vector.shape_cast %160 : vector<28x128xbf16> to vector<1x28x128xbf16>
    tpu.vector_store %arg4[%c0_148, %c0_149, %c0_150], %163 {strides = array<i32>} : memref<1x64x128xbf16, #tpu.memory_space<vmem>>, vector<1x28x128xbf16>,
    return
  }
  func.func @transform_0(%arg0: i32) -> (i32, i32, i32) {
    %c0_i32 = arith.constant 0 : i32
    %c0_i32_0 = arith.constant 0 : i32
    %c0_i32_1 = arith.constant 0 : i32
    return %arg0, %c0_i32, %c0_i32_0 : i32, i32, i32
  }
  func.func @transform_1(%arg0: i32) -> (i32, i32, i32) {
    %c0_i32 = arith.constant 0 : i32
    %c0_i32_0 = arith.constant 0 : i32
    %c0_i32_1 = arith.constant 0 : i32
    %c0_i32_2 = arith.constant 0 : i32
    return %c0_i32, %c0_i32_0, %c0_i32_1 : i32, i32, i32
  }
  func.func @transform_2(%arg0: i32) -> (i32, i32) {
    %c0_i32 = arith.constant 0 : i32
    %c0_i32_0 = arith.constant 0 : i32
    %c0_i32_1 = arith.constant 0 : i32
    return %c0_i32, %c0_i32_0 : i32, i32
  }
  func.func @transform_3(%arg0: i32) -> (i32, i32, i32) {
    %c0_i32 = arith.constant 0 : i32
    %c0_i32_0 = arith.constant 0 : i32
    %c0_i32_1 = arith.constant 0 : i32
    return %arg0, %c0_i32, %c0_i32_0 : i32, i32, i32
  }
}

module attributes {stable_mosaic.version = 11 : i64} {
  func.func @_matmul_bias_act_kernel(%arg0: i32, %arg1: memref<2x2048xbf16, #tpu.memory_space<vmem>>, %arg2: memref<2048x128xbf16, #tpu.memory_space<vmem>>, %arg3: memref<1x128xf32, #tpu.memory_space<vmem>>, %arg4: memref<2x128xf32, #tpu.memory_space<vmem>>) attributes {dimension_semantics = [#tpu.dimension_semantics<parallel>], iteration_bounds = array<i64: 1>, scalar_prefetch = 0 : i64, scratch_operands = 0 : i64, tpu.core_type = #tpu.core_type<tc>, window_params = [{transform_indices = @transform_0, window_bounds = array<i64: 2, 2048>}, {pipeline_mode = #tpu.pipeline_mode<synchronous>, transform_indices = @transform_1, window_bounds = array<i64: 2048, 128>}, {pipeline_mode = #tpu.pipeline_mode<synchronous>, transform_indices = @transform_2, window_bounds = array<i64: 1, 128>}, {transform_indices = @transform_3, window_bounds = array<i64: 2, 128>}]} {
    %c0 = arith.constant 0 : index
    %c0_0 = arith.constant 0 : index
    %0 = vector.load %arg1[%c0, %c0_0] : memref<2x2048xbf16, #tpu.memory_space<vmem>>, vector<2x2048xbf16>
    %c0_1 = arith.constant 0 : index
    %c0_2 = arith.constant 0 : index
    %1 = vector.load %arg2[%c0_1, %c0_2] : memref<2048x128xbf16, #tpu.memory_space<vmem>>, vector<2048x128xbf16>
    %cst = arith.constant dense<0.000000e+00> : vector<2x128xf32>
    %2 = tpu.matmul %0, %1, %cst {dimension_numbers = #tpu.dot_dimension_numbers<[1], [0], [0], [1], [0, 0, 1, 1], [], []>} : vector<2x2048xbf16>, vector<2048x128xbf16>, vector<2x128xf32> -> vector<2x128xf32>
    %c0_3 = arith.constant 0 : index
    %c0_4 = arith.constant 0 : index
    %3 = vector.load %arg3[%c0_3, %c0_4] : memref<1x128xf32, #tpu.memory_space<vmem>>, vector<1x128xf32>
    %4 = vector.broadcast %3 : vector<1x128xf32> to vector<2x128xf32>
    %5 = arith.addf %2, %4 : vector<2x128xf32>
    %6 = arith.negf %5 : vector<2x128xf32>
    %7 = math.exp %6 : vector<2x128xf32>
    %cst_5 = arith.constant 1.000000e+00 : f32
    %8 = vector.broadcast %cst_5 : f32 to vector<2x128xf32>
    %9 = arith.addf %8, %7 : vector<2x128xf32>
    %10 = arith.divf %8, %9 : vector<2x128xf32>
    %c0_6 = arith.constant 0 : index
    %c0_7 = arith.constant 0 : index
    %11 = vector.load %arg4[%c0_6, %c0_7] : memref<2x128xf32, #tpu.memory_space<vmem>>, vector<2x128xf32>
    tpu.vector_store %arg4[%c0_6, %c0_7], %10 {strides = array<i32>} : memref<2x128xf32, #tpu.memory_space<vmem>>, vector<2x128xf32>,
    return
  }
  func.func @transform_0(%arg0: i32) -> (i32, i32) {
    %c0_i32 = arith.constant 0 : i32
    %c0_i32_0 = arith.constant 0 : i32
    return %arg0, %c0_i32 : i32, i32
  }
  func.func @transform_1(%arg0: i32) -> (i32, i32) {
    %c0_i32 = arith.constant 0 : i32
    %c0_i32_0 = arith.constant 0 : i32
    %c0_i32_1 = arith.constant 0 : i32
    return %c0_i32, %c0_i32_0 : i32, i32
  }
  func.func @transform_2(%arg0: i32) -> (i32, i32) {
    %c0_i32 = arith.constant 0 : i32
    %c0_i32_0 = arith.constant 0 : i32
    %c0_i32_1 = arith.constant 0 : i32
    return %c0_i32, %c0_i32_0 : i32, i32
  }
  func.func @transform_3(%arg0: i32) -> (i32, i32) {
    %c0_i32 = arith.constant 0 : i32
    %c0_i32_0 = arith.constant 0 : i32
    return %arg0, %c0_i32 : i32, i32
  }
}

</mosaic_0001>

<bundles_post_ra>
// kernel: nca_forward.4
= control target key start
LH: loop header
LB: loop body
LE: loop exit
PB: predicated region body
PF: predicated region fallthrough
CT: control target
= control target key end

     0   :  { %s1604_s12 = smov 0   ;;  %s1606_s13 = smov 0   ;;  %s1874_s0 = inlined_call_operand.vmem [shape: bf16[392,128], index: 0, kind: input, shape index: {}]   ;;  %s1875_s1 = inlined_call_operand.vmem [shape: bf16[128,128], index: 1, kind: input, shape index: {}]   ;;  %s1876_s2 = inlined_call_operand.vmem [shape: f32[1,128], index: 2, kind: input, shape index: {}]   ;;  %s1877_s3 = inlined_call_operand.vmem [shape: bf16[392,128], index: 3, kind: output, shape index: {}]  }
   0x1   :  { %s1608_s14 = smov 0  }
   0x2 LB: > { %s1617_s15 = sadd.s32 4294967295, %s1550_s14   ;;  %s1619_s16 = sadd.s32 1, %s1550_s14   ;;  %s1550_s14 = sphi %s1608_s14, %s1884_s14   ;;  %s1546_s13 = sphi %s1606_s13, %s1883_s13   ;;  %s1542_s12 = sphi %s1604_s12, %s1882_s12  }
   0x3   : > { %s85_s17 = ssub.s32 %s1550_s14, %s1619_s16  ;;  %s88_s18 = sadd.s32 1, %s1546_s13 }
   0x4   : > { %p86_p0 = scmp.eq.s32.totalorder %s85_s17, 0  ;;  %p98_p1 = scmp.ne.s32.totalorder %s1546_s13, %s1542_s12 }
   0x5   : > { %p99_p2 = scmp.eq.s32.totalorder %s1617_s15, 1  ;;  %p1088_p3 = scmp.ge.s32.totalorder %s1550_s14, 1 }
   0x6   : > { %s1627_s19 = scalar_select %p86_p0, %s1546_s13, %s88_s18  }
   0x7   : > { %p1629_p4 = por %p99_p2, %p98_p1  ;;  %p146_p5 = scmp.lt.s32.totalorder %s1550_s14, 3 }
   0x9   : > { %p147_p6 = pnand %p1088_p3, %p146_p5 }
   0xa   : > { %s1637_s23 = sshll.u32 (!%p147_p6), %s1617_s15, 5  ;;  %s170_s25 = sand.u32 (!%p147_p6), 1, %s1542_s12  }
   0xb   : > { %150 = sbr.rel (%p147_p6) target bundleno = 339 (0x153), region = 32  ;;  %p178_p7 = scmp.lt.s32.totalorder (!%p147_p6), %s1637_s23, 48 }
  0x10   : > { %v1472_v0 = vld [vmem:[%s1875_s1 + $0x38] sm:$0xff]   ;;  %v1473_v1 = vld [vmem:[%s1875_s1 + $0x30] sm:$0xff]   ;;  %s179_s26 = scalar_select %p178_p7, %s1637_s23, 48  ;;  %v1474_v2 = vld [vmem:[%s1875_s1 + $0x28] sm:$0xff]  }
  0x11   : > { %1320 = vmatprep.subr.bf16.mxu0 %v1472_v0  ;;  %1368 = vmatprep.subr.bf16.mxu1 %v1472_v0  ;;  %v1475_v3 = vld [vmem:[%s1875_s1 + $0x20] sm:$0xff]   ;;  %v1476_v6 = vld [vmem:[%s1875_s1 + $0x18] sm:$0xff]   ;;  %v1477_v7 = vld [vmem:[%s1875_s1 + $0x10] sm:$0xff]   ;;  %s753_s27 = ssub.s32 (%p1629_p4), 49, %s1637_s23  ;;  %s1198_s28 = sshll.u32 (%p1629_p4), %s1617_s15, 7 }
  0x12   : > { %1321 = vmatpush3.bf16.msra.mxu0 %v1472_v0  ;;  %1376 = vmatpush3.bf16.msra.mxu1 %v1472_v0  ;;  %s1091_s29 = sshll.u32 %s179_s26, 2  ;;  %v1478_v8 = vld [vmem:[%s1875_s1 + $0x8] sm:$0xff]   ;;  %v1479_v9 = vld [vmem:[%s1875_s1] sm:$0xff]   ;;  %s1089_s26 = sshll.u32 %s170_s25, 7 }
  0x13   : > { %1322 = vmatprep.subr.bf16.mxu0 %v1473_v1  ;;  %1369 = vmatprep.subr.bf16.mxu1 %v1473_v1  ;;  %s1650_s5 = scalar_lea.vmem %s1874_s0, %s1091_s29  ;;  %v1686_v24 = vld [vmem:[%s1876_s2] ss:$0 sm:$0xff]  ;;  %s1699_s12 = scalar_lea.vmem [#allocation2], %s1089_s26  }
  0x14   : > { %v1480_v4 = vld [vmem:[%s1650_s5] sm:$0xff]   ;;  %v1482_v10 = vld [vmem:[%s1650_s5 + $0x8] sm:$0xff]   ;;  %v1484_v12 = vld [vmem:[%s1650_s5 + $0x10] sm:$0xff]   ;;  %p754_p8 = scmp.lt.s32.totalorder (%p1629_p4), %s753_s27, 32  ;;  %s1746_s4 = scalar_lea.vmem (%p1629_p4), %s1877_s3, %s1198_s28  }
  0x15   : > { %v1481_v5 = vld [vmem:[%s1650_s5 + $0x40] sm:$0xff]   ;;  %1336 = vmatprep.mubr.bf16.mxu0 %v1480_v4  ;;  %v1483_v11 = vld [vmem:[%s1650_s5 + $0x48] sm:$0xff]   ;;  %v1485_v13 = vld [vmem:[%s1650_s5 + $0x50] sm:$0xff]  }
  0x16   : > { %1323 = vmatpush3.bf16.msra.mxu0 %v1473_v1  ;;  %1377 = vmatpush3.bf16.msra.mxu1 %v1473_v1  ;;  %v1486_v14 = vld [vmem:[%s1650_s5 + $0x18] sm:$0xff]   ;;  %v1488_v16 = vld [vmem:[%s1650_s5 + $0x20] sm:$0xff]   ;;  %v1490_v18 = vld [vmem:[%s1650_s5 + $0x28] sm:$0xff]  }
  0x17   : > { %1324 = vmatprep.subr.bf16.mxu0 %v1474_v2  ;;  %1370 = vmatprep.subr.bf16.mxu1 %v1474_v2  ;;  %v1487_v15 = vld [vmem:[%s1650_s5 + $0x58] sm:$0xff]   ;;  %v1489_v17 = vld [vmem:[%s1650_s5 + $0x60] sm:$0xff]   ;;  %v1491_v19 = vld [vmem:[%s1650_s5 + $0x68] sm:$0xff]  }
  0x18   : > { %1352 = vmatprep.mubr.bf16.mxu1 %v1481_v5  ;;  %v1492_v20 = vld [vmem:[%s1650_s5 + $0x30] sm:$0xff]   ;;  %v1494_v22 = vld [vmem:[%s1650_s5 + $0x38] sm:$0xff]  }
  0x19   : > { %v1493_v21 = vld [vmem:[%s1650_s5 + $0x70] sm:$0xff]   ;;  %v1495_v23 = vld [vmem:[%s1650_s5 + $0x78] sm:$0xff]  }
  0x1a   : > { %1325 = vmatpush3.bf16.msra.mxu0 %v1474_v2  ;;  %1378 = vmatpush3.bf16.msra.mxu1 %v1474_v2 }
  0x1b   : > { %1326 = vmatprep.subr.bf16.mxu0 %v1475_v3  ;;  %1371 = vmatprep.subr.bf16.mxu1 %v1475_v3 }
  0x1e   : > { %1327 = vmatpush3.bf16.msra.mxu0 %v1475_v3  ;;  %1379 = vmatpush3.bf16.msra.mxu1 %v1475_v3 }
  0x1f   : > { %1328 = vmatprep.subr.bf16.mxu0 %v1476_v6  ;;  %1372 = vmatprep.subr.bf16.mxu1 %v1476_v6 }
  0x22   : > { %1329 = vmatpush3.bf16.msra.mxu0 %v1476_v6  ;;  %1380 = vmatpush3.bf16.msra.mxu1 %v1476_v6 }
  0x23   : > { %1330 = vmatprep.subr.bf16.mxu0 %v1477_v7  ;;  %1373 = vmatprep.subr.bf16.mxu1 %v1477_v7 }
  0x26   : > { %1331 = vmatpush3.bf16.msra.mxu0 %v1477_v7  ;;  %1381 = vmatpush3.bf16.msra.mxu1 %v1477_v7 }
  0x27   : > { %1332 = vmatprep.subr.bf16.mxu0 %v1478_v8  ;;  %1374 = vmatprep.subr.bf16.mxu1 %v1478_v8 }
  0x2a   : > { %1333 = vmatpush3.bf16.msra.mxu0 %v1478_v8  ;;  %1382 = vmatpush3.bf16.msra.mxu1 %v1478_v8 }
  0x2b   : > { %1334 = vmatprep.subr.bf16.mxu0 %v1479_v9  ;;  %1375 = vmatprep.subr.bf16.mxu1 %v1479_v9 }
  0x2e   : > { %1335 = vmatpush3.bf16.msra.mxu0 %v1479_v9  ;;  %1383 = vmatpush3.bf16.msra.mxu1 %v1479_v9 }
  0x31   : > { %1337 = vmatmul.mubr.bf16.vlgmr.msra.gmra.mxu0 %v1482_v10  ;;  %1353 = vmatmul.mubr.bf16.vlgmr.msra.gmra.mxu1 %v1483_v11 }
  0x32   : > { %1340 = vmatprep.mubr.bf16.mxu0 %v1484_v12  ;;  %1356 = vmatprep.mubr.bf16.mxu1 %v1485_v13 }
  0x39   : > { %1341 = vmatmul.mubr.bf16.gmra.mxu0 %v1486_v14  ;;  %1357 = vmatmul.mubr.bf16.gmra.mxu1 %v1487_v15 }
  0x3a   : > { %1344 = vmatprep.mubr.bf16.mxu0 %v1488_v16  ;;  %1360 = vmatprep.mubr.bf16.mxu1 %v1489_v17 }
  0x41   : > { %1345 = vmatmul.mubr.bf16.gmra.mxu0 %v1490_v18  ;;  %1361 = vmatmul.mubr.bf16.gmra.mxu1 %v1491_v19 }
  0x42   : > { %1348 = vmatprep.mubr.bf16.mxu0 %v1492_v20  ;;  %1364 = vmatprep.mubr.bf16.mxu1 %v1493_v21 }
  0x49   : > { %1349 = vmatmul.mubr.bf16.gmra.mxu0 %v1494_v22  ;;  %1365 = vmatmul.mubr.bf16.gmra.mxu1 %v1495_v23 }
  0xf1   : > { %v1338_v25 = vpop.f32.mrf.mxu0  ;;  %v1354_v26 = vpop.f32.mrf.mxu1 }
  0xf2   : > { %v435_v27 = vadd.f32 %v1338_v25, %v1686_v24  ;;  %v499_v28 = vadd.f32 %v1354_v26, %v1686_v24 }
  0xf3   : > { %v426_v29 = vpop.f32.mrf.mxu0  ;;  %v490_v30 = vpop.f32.mrf.mxu1 }
  0xf4   : > { %v427_v31 = vadd.f32 %v1686_v24, %v426_v29  ;;  %v491_v32 = vadd.f32 %v1686_v24, %v490_v30  ;;  %v555_v37 = vmax.f32 %v435_v27, 0.0  ;;  %v571_v38 = vmax.f32 %v499_v28, 0.0 }
  0xf5   : > { %v1339_v33 = vpop.f32.mrf.mxu0  ;;  %v1355_v34 = vpop.f32.mrf.mxu1 }
  0xf6   : > { %v438_v35 = vadd.f32 %v1339_v33, %v1686_v24  ;;  %v502_v36 = vadd.f32 %v1355_v34, %v1686_v24  ;;  %v553_v45 = vmax.f32 %v427_v31, 0.0  ;;  %v569_v46 = vmax.f32 %v491_v32, 0.0 }
  0xf7   : > { %v429_v39 = vpop.f32.mrf.mxu0  ;;  %v493_v40 = vpop.f32.mrf.mxu1 }
  0xf8   : > { %v556_v41 = vmax.f32 %v438_v35, 0.0  ;;  %v572_v42 = vmax.f32 %v502_v36, 0.0  ;;  %v430_v43 = vadd.f32 %v1686_v24, %v429_v39  ;;  %v494_v44 = vadd.f32 %v1686_v24, %v493_v40 }
  0xf9   : > { %v1342_v47 = vpop.f32.mrf.mxu0  ;;  %v1358_v48 = vpop.f32.mrf.mxu1 }
  0xfa   : > { %v1209_v49 = vpack.c.bf16 %v556_v41, %v555_v37  ;;  %v1249_v50 = vpack.c.bf16 %v572_v42, %v571_v38  ;;  %v554_v51 = vmax.f32 %v430_v43, 0.0  ;;  %v570_v52 = vmax.f32 %v494_v44, 0.0 }
  0xfb   : > { %v451_v53 = vadd.f32 %v1342_v47, %v1686_v24  ;;  %v515_v54 = vadd.f32 %v1358_v48, %v1686_v24  ;;  %v442_v55 = vpop.f32.mrf.mxu0  ;;  %v506_v56 = vpop.f32.mrf.mxu1 }
  0xfc   : > { %1281 = vst [vmem:[%s1699_s12 + $0x8] sm:$0xff] %v1209_v49   ;;  %1289 = vst [vmem:[%s1699_s12 + $0x48] sm:$0xff] %v1249_v50   ;;  %v1204_v57 = vpack.c.bf16 %v554_v51, %v553_v45  ;;  %v1244_v58 = vpack.c.bf16 %v570_v52, %v569_v46  ;;  %v443_v59 = vadd.f32 %v1686_v24, %v442_v55 }
  0xfd   : > { %v507_v60 = vadd.f32 %v1686_v24, %v506_v56  ;;  %v1343_v61 = vpop.f32.mrf.mxu0  ;;  %v1359_v62 = vpop.f32.mrf.mxu1  ;;  %v559_v1 = vmax.f32 %v451_v53, 0.0  ;;  %v575_v2 = vmax.f32 %v515_v54, 0.0 }
  0xfe   : > { %1205 = vst [vmem:[%s1699_s12] sm:$0xff] %v1204_v57   ;;  %1288 = vst [vmem:[%s1699_s12 + $0x40] sm:$0xff] %v1244_v58   ;;  %v454_v63 = vadd.f32 %v1343_v61, %v1686_v24  ;;  %v518_v0 = vadd.f32 %v1359_v62, %v1686_v24  ;;  %v557_v9 = vmax.f32 %v443_v59, 0.0 }
  0xff   : > { %v445_v3 = vpop.f32.mrf.mxu0  ;;  %v509_v4 = vpop.f32.mrf.mxu1  ;;  %v573_v10 = vmax.f32 %v507_v60, 0.0 }
 0x100   : > { %v560_v5 = vmax.f32 %v454_v63, 0.0  ;;  %v576_v6 = vmax.f32 %v518_v0, 0.0  ;;  %v446_v7 = vadd.f32 %v1686_v24, %v445_v3  ;;  %v510_v8 = vadd.f32 %v1686_v24, %v509_v4 }
 0x101   : > { %v1346_v11 = vpop.f32.mrf.mxu0  ;;  %v1362_v12 = vpop.f32.mrf.mxu1 }
 0x102   : > { %v1219_v13 = vpack.c.bf16 %v560_v5, %v559_v1  ;;  %v1259_v14 = vpack.c.bf16 %v576_v6, %v575_v2  ;;  %v558_v15 = vmax.f32 %v446_v7, 0.0  ;;  %v574_v16 = vmax.f32 %v510_v8, 0.0 }
 0x103   : > { %v467_v17 = vadd.f32 %v1346_v11, %v1686_v24  ;;  %v531_v18 = vadd.f32 %v1362_v12, %v1686_v24  ;;  %v458_v19 = vpop.f32.mrf.mxu0  ;;  %v522_v20 = vpop.f32.mrf.mxu1 }
 0x104   : > { %1283 = vst [vmem:[%s1699_s12 + $0x18] sm:$0xff] %v1219_v13   ;;  %1291 = vst [vmem:[%s1699_s12 + $0x58] sm:$0xff] %v1259_v14   ;;  %v1214_v21 = vpack.c.bf16 %v558_v15, %v557_v9  ;;  %v1254_v22 = vpack.c.bf16 %v574_v16, %v573_v10  ;;  %v459_v23 = vadd.f32 %v1686_v24, %v458_v19 }
 0x105   : > { %v523_v25 = vadd.f32 %v1686_v24, %v522_v20  ;;  %v1347_v26 = vpop.f32.mrf.mxu0  ;;  %v1363_v27 = vpop.f32.mrf.mxu1  ;;  %v563_v30 = vmax.f32 %v467_v17, 0.0  ;;  %v579_v31 = vmax.f32 %v531_v18, 0.0 }
 0x106   : > { %1282 = vst [vmem:[%s1699_s12 + $0x10] sm:$0xff] %v1214_v21   ;;  %1290 = vst [vmem:[%s1699_s12 + $0x50] sm:$0xff] %v1254_v22   ;;  %v470_v28 = vadd.f32 %v1347_v26, %v1686_v24  ;;  %v534_v29 = vadd.f32 %v1363_v27, %v1686_v24  ;;  %v561_v38 = vmax.f32 %v459_v23, 0.0 }
 0x107   : > { %v461_v32 = vpop.f32.mrf.mxu0  ;;  %v525_v33 = vpop.f32.mrf.mxu1  ;;  %v577_v39 = vmax.f32 %v523_v25, 0.0 }
 0x108   : > { %v564_v34 = vmax.f32 %v470_v28, 0.0  ;;  %v580_v35 = vmax.f32 %v534_v29, 0.0  ;;  %v462_v36 = vadd.f32 %v1686_v24, %v461_v32  ;;  %v526_v37 = vadd.f32 %v1686_v24, %v525_v33 }
 0x109   : > { %v1350_v40 = vpop.f32.mrf.mxu0  ;;  %v1366_v41 = vpop.f32.mrf.mxu1 }
 0x10a   : > { %v1229_v42 = vpack.c.bf16 %v564_v34, %v563_v30  ;;  %v1269_v43 = vpack.c.bf16 %v580_v35, %v579_v31  ;;  %v562_v44 = vmax.f32 %v462_v36, 0.0  ;;  %v578_v45 = vmax.f32 %v526_v37, 0.0 }
 0x10b   : > { %v483_v46 = vadd.f32 %v1350_v40, %v1686_v24  ;;  %v547_v47 = vadd.f32 %v1366_v41, %v1686_v24  ;;  %v474_v48 = vpop.f32.mrf.mxu0  ;;  %v538_v49 = vpop.f32.mrf.mxu1 }
 0x10c   : > { %1285 = vst [vmem:[%s1699_s12 + $0x28] sm:$0xff] %v1229_v42   ;;  %1293 = vst [vmem:[%s1699_s12 + $0x68] sm:$0xff] %v1269_v43   ;;  %v1224_v50 = vpack.c.bf16 %v562_v44, %v561_v38  ;;  %v1264_v51 = vpack.c.bf16 %v578_v45, %v577_v39  ;;  %v475_v52 = vadd.f32 %v1686_v24, %v474_v48 }
 0x10d   : > { %v539_v53 = vadd.f32 %v1686_v24, %v538_v49  ;;  %v1351_v54 = vpop.f32.mrf.mxu0  ;;  %v1367_v55 = vpop.f32.mrf.mxu1  ;;  %v567_v58 = vmax.f32 %v483_v46, 0.0  ;;  %v583_v59 = vmax.f32 %v547_v47, 0.0 }
 0x10e   : > { %1284 = vst [vmem:[%s1699_s12 + $0x20] sm:$0xff] %v1224_v50   ;;  %1292 = vst [vmem:[%s1699_s12 + $0x60] sm:$0xff] %v1264_v51   ;;  %v486_v56 = vadd.f32 %v1351_v54, %v1686_v24  ;;  %v550_v57 = vadd.f32 %v1367_v55, %v1686_v24  ;;  %v565_v2 = vmax.f32 %v475_v52, 0.0 }
 0x10f   : > { %v477_v60 = vpop.f32.mrf.mxu0  ;;  %v541_v61 = vpop.f32.mrf.mxu1  ;;  %v581_v3 = vmax.f32 %v539_v53, 0.0 }
 0x110   : > { %v568_v62 = vmax.f32 %v486_v56, 0.0  ;;  %v584_v63 = vmax.f32 %v550_v57, 0.0  ;;  %v478_v0 = vadd.f32 %v1686_v24, %v477_v60  ;;  %v542_v1 = vadd.f32 %v1686_v24, %v541_v61 }
 0x112   : > { %v1239_v4 = vpack.c.bf16 %v568_v62, %v567_v58  ;;  %v1279_v5 = vpack.c.bf16 %v584_v63, %v583_v59  ;;  %v566_v6 = vmax.f32 %v478_v0, 0.0  ;;  %v582_v7 = vmax.f32 %v542_v1, 0.0  ;;  %751 = sbr.rel (!%p1629_p4) target bundleno = 339 (0x153), region = 36 }
 0x114   : > { %1287 = vst [vmem:[%s1699_s12 + $0x38] sm:$0xff] %v1239_v4   ;;  %1295 = vst [vmem:[%s1699_s12 + $0x78] sm:$0xff] %v1279_v5   ;;  %v1234_v8 = vpack.c.bf16 %v566_v6, %v565_v2  ;;  %v1274_v9 = vpack.c.bf16 %v582_v7, %v581_v3 }
 0x116   : > { %1286 = vst [vmem:[%s1699_s12 + $0x30] sm:$0xff] %v1234_v8   ;;  %1294 = vst [vmem:[%s1699_s12 + $0x70] sm:$0xff] %v1274_v9  }
 0x117   : > { %s1886_s27 = smov (!%p754_p8, %s753_s27), 32 }
 0x118   : > { %s1151_s5 = sshll.u32 %s1886_s27, 6 }
 0x119   : > { %p1154_p9 = scmp.eq.s32.totalorder %s1151_s5, 0 }
 0x11a   : > { %s1752_s6 = sshrl.u32 (!%p1154_p9), %s1886_s27, 5 }
 0x11b   : > { %762 = sbr.rel (%p1154_p9) target bundleno = 339 (0x153), region = 40  ;;  %p1155_p10 = scmp.le.s32.totalorder (!%p1154_p9), %s1752_s6, 0 }
 0x120   : > { %1041 = sbr.rel (%p1155_p10) target bundleno = 322 (0x142), region = 112  ;;  %s1879_s15 = smov (!%p1155_p10), %s1746_s4 }
 0x121   : > { %s1880_s20 = smov (!%p1155_p10), %s1699_s12  ;;  %s1761_s23 = smov (!%p1155_p10), 0  }
 0x122   : > { %s1763_s7 = smov (!%p1155_p10), 0  }
 0x125 LB: >> { %v779_v24 = vld [vmem:[%s1558_s20] sm:$0xf]  ;;  %v781_v10 = vld [vmem:[%s1558_s20 + $0x4] sm:$0xf]  ;;  %v783_v11 = vld [vmem:[%s1558_s20 + $0x8] sm:$0xf]  ;;  %s1566_s7 = sphi %s1763_s7, %s773_s7   ;;  %s1562_s23 = sphi %s1761_s23, %s1881_s23   ;;  %s1558_s20 = sphi %s1880_s20, %s848_s20   ;;  %s1554_s15 = sphi %s1879_s15, %s849_s15  }
 0x126   : >> { %780 = vst [vmem:[%s1554_s15] sm:$0xf] %v779_v24  ;;  %782 = vst [vmem:[%s1554_s15 + $0x4] sm:$0xf] %v781_v10  ;;  %v785_v12 = vld [vmem:[%s1558_s20 + $0xc] sm:$0xf]  ;;  %s843_s8 = sadd.s32 1, %s1562_s23 }
 0x127   : >> { %784 = vst [vmem:[%s1554_s15 + $0x8] sm:$0xf] %v783_v11  ;;  %v787_v13 = vld [vmem:[%s1558_s20 + $0x10] sm:$0xf]  ;;  %v789_v14 = vld [vmem:[%s1558_s20 + $0x14] sm:$0xf]  ;;  %p844_p11 = scmp.ge.s32.totalorder %s843_s8, %s1752_s6 }
 0x128   : >> { %786 = vst [vmem:[%s1554_s15 + $0xc] sm:$0xf] %v785_v12  ;;  %788 = vst [vmem:[%s1554_s15 + $0x10] sm:$0xf] %v787_v13  ;;  %v791_v15 = vld [vmem:[%s1558_s20 + $0x18] sm:$0xf] }
 0x129   : >> { %790 = vst [vmem:[%s1554_s15 + $0x14] sm:$0xf] %v789_v14  ;;  %v793_v16 = vld [vmem:[%s1558_s20 + $0x1c] sm:$0xf]  ;;  %v795_v17 = vld [vmem:[%s1558_s20 + $0x20] sm:$0xf] }
 0x12a   : >> { %792 = vst [vmem:[%s1554_s15 + $0x18] sm:$0xf] %v791_v15  ;;  %794 = vst [vmem:[%s1554_s15 + $0x1c] sm:$0xf] %v793_v16  ;;  %v797_v18 = vld [vmem:[%s1558_s20 + $0x24] sm:$0xf] }
 0x12b   : >> { %796 = vst [vmem:[%s1554_s15 + $0x20] sm:$0xf] %v795_v17  ;;  %v799_v19 = vld [vmem:[%s1558_s20 + $0x28] sm:$0xf]  ;;  %v801_v20 = vld [vmem:[%s1558_s20 + $0x2c] sm:$0xf] }
 0x12c   : >> { %798 = vst [vmem:[%s1554_s15 + $0x24] sm:$0xf] %v797_v18  ;;  %800 = vst [vmem:[%s1554_s15 + $0x28] sm:$0xf] %v799_v19  ;;  %v803_v21 = vld [vmem:[%s1558_s20 + $0x30] sm:$0xf] }
 0x12d   : >> { %802 = vst [vmem:[%s1554_s15 + $0x2c] sm:$0xf] %v801_v20  ;;  %v805_v22 = vld [vmem:[%s1558_s20 + $0x34] sm:$0xf]  ;;  %v807_v23 = vld [vmem:[%s1558_s20 + $0x38] sm:$0xf] }
 0x12e   : >> { %804 = vst [vmem:[%s1554_s15 + $0x30] sm:$0xf] %v803_v21  ;;  %806 = vst [vmem:[%s1554_s15 + $0x34] sm:$0xf] %v805_v22  ;;  %v809_v25 = vld [vmem:[%s1558_s20 + $0x3c] sm:$0xf] }
 0x12f   : >> { %808 = vst [vmem:[%s1554_s15 + $0x38] sm:$0xf] %v807_v23  ;;  %v811_v26 = vld [vmem:[%s1558_s20 + $0x40] sm:$0xf]  ;;  %v813_v27 = vld [vmem:[%s1558_s20 + $0x44] sm:$0xf] }
 0x130   : >> { %810 = vst [vmem:[%s1554_s15 + $0x3c] sm:$0xf] %v809_v25  ;;  %812 = vst [vmem:[%s1554_s15 + $0x40] sm:$0xf] %v811_v26  ;;  %v815_v28 = vld [vmem:[%s1558_s20 + $0x48] sm:$0xf] }
 0x131   : >> { %814 = vst [vmem:[%s1554_s15 + $0x44] sm:$0xf] %v813_v27  ;;  %v817_v29 = vld [vmem:[%s1558_s20 + $0x4c] sm:$0xf]  ;;  %v819_v30 = vld [vmem:[%s1558_s20 + $0x50] sm:$0xf] }
 0x132   : >> { %816 = vst [vmem:[%s1554_s15 + $0x48] sm:$0xf] %v815_v28  ;;  %818 = vst [vmem:[%s1554_s15 + $0x4c] sm:$0xf] %v817_v29  ;;  %v821_v31 = vld [vmem:[%s1558_s20 + $0x54] sm:$0xf] }
 0x133   : >> { %820 = vst [vmem:[%s1554_s15 + $0x50] sm:$0xf] %v819_v30  ;;  %v823_v32 = vld [vmem:[%s1558_s20 + $0x58] sm:$0xf]  ;;  %v825_v33 = vld [vmem:[%s1558_s20 + $0x5c] sm:$0xf] }
 0x134   : >> { %822 = vst [vmem:[%s1554_s15 + $0x54] sm:$0xf] %v821_v31  ;;  %824 = vst [vmem:[%s1554_s15 + $0x58] sm:$0xf] %v823_v32  ;;  %v827_v34 = vld [vmem:[%s1558_s20 + $0x60] sm:$0xf] }
 0x135   : >> { %826 = vst [vmem:[%s1554_s15 + $0x5c] sm:$0xf] %v825_v33  ;;  %v829_v35 = vld [vmem:[%s1558_s20 + $0x64] sm:$0xf]  ;;  %v831_v36 = vld [vmem:[%s1558_s20 + $0x68] sm:$0xf] }
 0x136   : >> { %828 = vst [vmem:[%s1554_s15 + $0x60] sm:$0xf] %v827_v34  ;;  %830 = vst [vmem:[%s1554_s15 + $0x64] sm:$0xf] %v829_v35  ;;  %v833_v37 = vld [vmem:[%s1558_s20 + $0x6c] sm:$0xf] }
 0x137   : >> { %832 = vst [vmem:[%s1554_s15 + $0x68] sm:$0xf] %v831_v36  ;;  %v835_v38 = vld [vmem:[%s1558_s20 + $0x70] sm:$0xf]  ;;  %v837_v39 = vld [vmem:[%s1558_s20 + $0x74] sm:$0xf] }
 0x138   : >> { %834 = vst [vmem:[%s1554_s15 + $0x6c] sm:$0xf] %v833_v37  ;;  %836 = vst [vmem:[%s1554_s15 + $0x70] sm:$0xf] %v835_v38  ;;  %v839_v40 = vld [vmem:[%s1558_s20 + $0x78] sm:$0xf] }
 0x139   : >> { %838 = vst [vmem:[%s1554_s15 + $0x74] sm:$0xf] %v837_v39  ;;  %v841_v41 = vld [vmem:[%s1558_s20 + $0x7c] sm:$0xf]  ;;  %840 = vst [vmem:[%s1554_s15 + $0x78] sm:$0xf] %v839_v40 }
 0x13a   : >> { %842 = vst [vmem:[%s1554_s15 + $0x7c] sm:$0xf] %v841_v41  ;;  %s1888_s8 = smov (%p844_p11, %s843_s8), 0  ;;  %s773_s7 = sadd.s32 1, %s1566_s7  }
 0x13b   : >> { %s1156_s9 = sshll.u32 %s1888_s8, 7  ;;  %p772_p12 = scmp.ge.s32.totalorder %s773_s7, %s1752_s6 }
 0x13c   : >> { %s848_s20 = scalar_lea.vmem %s1699_s12, %s1156_s9 [#allocation2]   ;;  %s849_s15 = scalar_lea.vmem %s1746_s4, %s1156_s9  }
 0x13d   : >> { %s1881_s23 = smov %s1888_s8  ;;  %775 = sbr.rel (!%p772_p12) target bundleno = 293 (0x125), region = 118 }
 0x142 PF: > { %s1856_s10 = sand.u32 31, %s1886_s27   ;;  %s1199_s11 = sshll.u32 %s1752_s6, 7 }
 0x143   : > { %s854_s14 = scalar_lea.vmem %s1699_s12, %s1199_s11 [#allocation2]   ;;  %s856_s17 = scalar_lea.vmem %s1746_s4, %s1199_s11  }
 0x144   : > { %p1161_p13 = scmp.le.s32.totalorder %s1856_s10, 0 }
 0x145   : > { %s1568_s18 = smov (!%p1161_p13), %s856_s17   ;;  %s1572_s21 = smov (!%p1161_p13), %s854_s14  }
 0x146   : > { %1055 = sbr.rel (%p1161_p13) target bundleno = 339 (0x153), region = 123  ;;  %s1576_s22 = smov (!%p1161_p13), 0  }
 0x147   : > { %s1580_s24 = smov (!%p1161_p13), 0  }
 0x14b LB: >> { %v866_v42 = vld [vmem:[%s1574_s21] sm:$0xf]  ;;  %s868_s25 = sadd.s32 1, %s1578_s22  ;;  %s860_s24 = sadd.s32 1, %s1582_s24   ;;  %s1582_s24 = sphi %s1580_s24, %s860_s24   ;;  %s1578_s22 = sphi %s1576_s22, %s1577_s22   ;;  %s1574_s21 = sphi %s1572_s21, %s873_s21   ;;  %s1570_s18 = sphi %s1568_s18, %s874_s18  }
 0x14c   : >> { %867 = vst [vmem:[%s1570_s18] sm:$0xf] %v866_v42  ;;  %p869_p0 = scmp.ge.s32.totalorder %s868_s25, %s1856_s10  ;;  %p859_p1 = scmp.ge.s32.totalorder %s860_s24, %s1856_s10 }
 0x14e   : >> { %s1890_s25 = smov (%p869_p0, %s868_s25), 0  ;;  %862 = sbr.rel (!%p859_p1) target bundleno = 331 (0x14b), region = 129 }
 0x14f   : >> { %s1162_s26 = sshll.u32 %s1890_s25, 2  ;;  %s1577_s22 = smov %s1890_s25  }
 0x150   : >> { %s873_s21 = scalar_lea.vmem %s854_s14, %s1162_s26 [#allocation2]   ;;  %s874_s18 = scalar_lea.vmem %s856_s17, %s1162_s26  }
 0x153 PF: > { %p10_p2 = scmp.ge.s32.totalorder %s1619_s16, 4   ;;  %s1882_s12 = smov %s1546_s13 }
 0x154   : > { %s1883_s13 = smov %s1627_s19  ;;  %s1884_s14 = smov %s1619_s16 }
 0x155   :  { %12 = sbr.rel (!%p10_p2) target bundleno = 2 (0x2), region = 140 }

// kernel: nca_forward.7
= control target key start
LH: loop header
LB: loop body
LE: loop exit
PB: predicated region body
PF: predicated region fallthrough
CT: control target
= control target key end

     0   :  { %v287_v28 = vlaneseq  ;;  %v1970_v36 = vmov 1966171168   ;;  %s2412_s0 = inlined_call_operand.vmem [shape: bf16[2,2048], index: 0, kind: input, shape index: {}]   ;;  %s2413_s1 = inlined_call_operand.vmem [shape: bf16[2048,128], index: 1, kind: input, shape index: {}]   ;;  %s2414_s2 = inlined_call_operand.vmem [shape: f32[1,128], index: 2, kind: input, shape index: {}]   ;;  %s2415_s3 = inlined_call_operand.hbm [shape: f32[2,128], index: 3, kind: output, shape index: {}]  }
   0x1   :  { %v1814_v0 = vld [vmem:[%s2413_s1 + $0x78] sm:$0xff]   ;;  %v1818_v4 = vld [vmem:[%s2413_s1 + $0x70] sm:$0xff]   ;;  %v1822_v8 = vld [vmem:[%s2413_s1 + $0x68] sm:$0xff]   ;;  %v285_v37 = vunpack.c.l.s4 %v1970_v36 }
   0x2   :  { %v1815_v1 = vld [vmem:[%s2413_s1 + $0xf8] sm:$0xff]   ;;  %1636 = vmatprep.subr.bf16.mxu0 %v1814_v0  ;;  %v1819_v5 = vld [vmem:[%s2413_s1 + $0xf0] sm:$0xff]   ;;  %v1823_v9 = vld [vmem:[%s2413_s1 + $0xe8] sm:$0xff]   ;;  %v288_v33 = vshrl.u32 %v287_v28, 7 }
   0x3   :  { %v1816_v2 = vld [vmem:[%s2413_s1 + $0x38] sm:$0xff]   ;;  %1658 = vmatprep.subr.bf16.mxu1 %v1815_v1  ;;  %v1820_v6 = vld [vmem:[%s2413_s1 + $0x30] sm:$0xff]   ;;  %v1824_v10 = vld [vmem:[%s2413_s1 + $0x28] sm:$0xff]   ;;  %v286_v40 = vunpack.c.0.s8 %v285_v37 }
   0x4   :  { %v1817_v3 = vld [vmem:[%s2413_s1 + $0xb8] sm:$0xff]   ;;  %1637 = vmatpush3.bf16.msra.mxu0 %v1816_v2  ;;  %v1821_v7 = vld [vmem:[%s2413_s1 + $0xb0] sm:$0xff]   ;;  %v1825_v11 = vld [vmem:[%s2413_s1 + $0xa8] sm:$0xff]  }
   0x5   :  { %1659 = vmatpush3.bf16.msra.mxu1 %v1817_v3  ;;  %1638 = vmatprep.subr.bf16.mxu0 %v1818_v4  ;;  %v1826_v12 = vld [vmem:[%s2413_s1 + $0x60] sm:$0xff]   ;;  %v1830_v16 = vld [vmem:[%s2413_s1 + $0x58] sm:$0xff]   ;;  %v1834_v20 = vld [vmem:[%s2413_s1 + $0x50] sm:$0xff]   ;;  %v2097_v41 = vsub.s32 %v286_v40, %v288_v33 }
   0x6   :  { %1660 = vmatprep.subr.bf16.mxu1 %v1819_v5  ;;  %v1827_v13 = vld [vmem:[%s2413_s1 + $0xe0] sm:$0xff]   ;;  %v1831_v17 = vld [vmem:[%s2413_s1 + $0xd8] sm:$0xff]   ;;  %v1835_v21 = vld [vmem:[%s2413_s1 + $0xd0] sm:$0xff]  }
   0x7   :  { %v1828_v14 = vld [vmem:[%s2413_s1 + $0x20] sm:$0xff]   ;;  %v1832_v18 = vld [vmem:[%s2413_s1 + $0x18] sm:$0xff]   ;;  %v1836_v22 = vld [vmem:[%s2413_s1 + $0x10] sm:$0xff]  }
   0x8   :  { %1639 = vmatpush3.bf16.msra.mxu0 %v1820_v6  ;;  %v1829_v15 = vld [vmem:[%s2413_s1 + $0xa0] sm:$0xff]   ;;  %v1833_v19 = vld [vmem:[%s2413_s1 + $0x98] sm:$0xff]   ;;  %v1837_v23 = vld [vmem:[%s2413_s1 + $0x90] sm:$0xff]  }
   0x9   :  { %1661 = vmatpush3.bf16.msra.mxu1 %v1821_v7  ;;  %1640 = vmatprep.subr.bf16.mxu0 %v1822_v8  ;;  %v1838_v24 = vld [vmem:[%s2413_s1 + $0x48] sm:$0xff]   ;;  %v1842_v29 = vld [vmem:[%s2413_s1 + $0x40] sm:$0xff]   ;;  %v1847_v35 = vld [vmem:[%s2413_s1 + $0x178] sm:$0xff]  }
   0xa   :  { %1662 = vmatprep.subr.bf16.mxu1 %v1823_v9  ;;  %v1839_v25 = vld [vmem:[%s2413_s1 + $0xc8] sm:$0xff]   ;;  %v1843_v30 = vld [vmem:[%s2413_s1 + $0xc0] sm:$0xff]   ;;  %v1848_v38 = vld [vmem:[%s2413_s1 + $0x1f8] sm:$0xff]  }
   0xb   :  { %v1840_v26 = vld [vmem:[%s2413_s1 + $0x8] sm:$0xff]   ;;  %v1844_v31 = vld [vmem:[%s2413_s1] sm:$0xff]   ;;  %v1849_v48 = vld [vmem:[%s2413_s1 + $0x138] sm:$0xff]  }
   0xc   :  { %1641 = vmatpush3.bf16.msra.mxu0 %v1824_v10  ;;  %v1841_v27 = vld [vmem:[%s2413_s1 + $0x88] sm:$0xff]   ;;  %v1845_v32 = vld [vmem:[%s2413_s1 + $0x80] sm:$0xff]   ;;  %v1851_v51 = vld [vmem:[%s2413_s1 + $0x170] sm:$0xff]  }
   0xd   :  { %1663 = vmatpush3.bf16.msra.mxu1 %v1825_v11  ;;  %1642 = vmatprep.subr.bf16.mxu0 %v1826_v12  ;;  %v16_v34 = vld [vmem:[%s2412_s0] sm:$0xff]  ;;  %v1850_v53 = vld [vmem:[%s2413_s1 + $0x1b8] sm:$0xff]   ;;  %v1852_v54 = vld [vmem:[%s2413_s1 + $0x1f0] sm:$0xff]  }
   0xe   :  { %1664 = vmatprep.subr.bf16.mxu1 %v1827_v13  ;;  %v283_v39 = vcombine.high %v16_v34, %v16_v34  ;;  %v290_v42 = vrot.slane %v16_v34, %v2097_v41  ;;  %v1853_v56 = vld [vmem:[%s2413_s1 + $0x130] sm:$0xff]   ;;  %v1855_v57 = vld [vmem:[%s2413_s1 + $0x168] sm:$0xff]   ;;  %v1859_v61 = vld [vmem:[%s2413_s1 + $0x160] sm:$0xff]  }
   0xf   :  { %v1854_v58 = vld [vmem:[%s2413_s1 + $0x1b0] sm:$0xff]   ;;  %v1856_v59 = vld [vmem:[%s2413_s1 + $0x1e8] sm:$0xff]   ;;  %v1860_v63 = vld [vmem:[%s2413_s1 + $0x1e0] sm:$0xff]  }
  0x10   :  { %1643 = vmatpush3.bf16.msra.mxu0 %v1828_v14  ;;  %v2101_v43 = vrot.slane %v283_v39, %v2097_v41  ;;  %v298_v44 = vcombine.high %v290_v42, %v290_v42  ;;  %v306_v45 = vrot.slane %v290_v42, %v2097_v41  ;;  %v1857_v60 = vld [vmem:[%s2413_s1 + $0x128] sm:$0xff]   ;;  %v1861_v0 = vld [vmem:[%s2413_s1 + $0x120] sm:$0xff]   ;;  %v1863_v1 = vld [vmem:[%s2413_s1 + $0x158] sm:$0xff]  }
  0x11   :  { %1665 = vmatpush3.bf16.msra.mxu1 %v1829_v15  ;;  %1644 = vmatprep.subr.bf16.mxu0 %v1830_v16  ;;  %v1858_v62 = vld [vmem:[%s2413_s1 + $0x1a8] sm:$0xff]   ;;  %v1862_v2 = vld [vmem:[%s2413_s1 + $0x1a0] sm:$0xff]   ;;  %v1864_v3 = vld [vmem:[%s2413_s1 + $0x1d8] sm:$0xff]  }
  0x12   :  { %1666 = vmatprep.subr.bf16.mxu1 %v1831_v17  ;;  %v299_v46 = vcombine.high %v2101_v43, %v2101_v43  ;;  %v320_v47 = vrot.slane %v298_v44, %v2097_v41  ;;  %v328_v50 = vcombine.high %v306_v45, %v306_v45  ;;  %v1865_v4 = vld [vmem:[%s2413_s1 + $0x118] sm:$0xff]   ;;  %v1867_v5 = vld [vmem:[%s2413_s1 + $0x150] sm:$0xff]   ;;  %v1871_v9 = vld [vmem:[%s2413_s1 + $0x148] sm:$0xff]   ;;  %v313_v17 = vrot.slane %v2101_v43, %v2097_v41 }
  0x13   :  { %v1866_v6 = vld [vmem:[%s2413_s1 + $0x198] sm:$0xff]   ;;  %v1868_v7 = vld [vmem:[%s2413_s1 + $0x1d0] sm:$0xff]   ;;  %v1872_v11 = vld [vmem:[%s2413_s1 + $0x1c8] sm:$0xff]  }
  0x14   :  { %1645 = vmatpush3.bf16.msra.mxu0 %v1832_v18  ;;  %v327_v49 = vrot.slane %v299_v46, %v2097_v41  ;;  %1197 = vmatprep.mubr.bf16.mxu0 %v320_v47  ;;  %v330_v52 = vcombine.high %v320_v47, %v320_v47  ;;  %v1869_v8 = vld [vmem:[%s2413_s1 + $0x110] sm:$0xff]   ;;  %v1873_v12 = vld [vmem:[%s2413_s1 + $0x108] sm:$0xff]   ;;  %v1875_v13 = vld [vmem:[%s2413_s1 + $0x140] sm:$0xff]  }
  0x15   :  { %1667 = vmatpush3.bf16.msra.mxu1 %v1833_v19  ;;  %1646 = vmatprep.subr.bf16.mxu0 %v1834_v20  ;;  %v1870_v10 = vld [vmem:[%s2413_s1 + $0x190] sm:$0xff]   ;;  %v1874_v14 = vld [vmem:[%s2413_s1 + $0x188] sm:$0xff]   ;;  %v1876_v15 = vld [vmem:[%s2413_s1 + $0x1c0] sm:$0xff]  }
  0x16   :  { %1668 = vmatprep.subr.bf16.mxu1 %v1835_v21  ;;  %v331_v55 = vcombine.high %v327_v49, %v327_v49  ;;  %1237 = vmatprep.mubr.bf16.mxu1 %v330_v52  ;;  %v1877_v16 = vld [vmem:[%s2413_s1 + $0x100] sm:$0xff]   ;;  %v1879_v18 = vld [vmem:[%s2413_s1 + $0x278] sm:$0xff]   ;;  %v1886_v28 = vld [vmem:[%s2413_s1 + $0x2b0] sm:$0xff]  }
  0x17   :  { %v1878_v19 = vld [vmem:[%s2413_s1 + $0x180] sm:$0xff]   ;;  %v1880_v20 = vld [vmem:[%s2413_s1 + $0x2f8] sm:$0xff]   ;;  %v1899_v39 = vld [vmem:[%s2413_s1 + $0x250] sm:$0xff]  }
  0x18   :  { %1647 = vmatpush3.bf16.msra.mxu0 %v1836_v22  ;;  %v1881_v21 = vld [vmem:[%s2413_s1 + $0x238] sm:$0xff]   ;;  %v329_v22 = vcombine.high %v313_v17, %v313_v17  ;;  %v1892_v33 = vld [vmem:[%s2413_s1 + $0x2e0] sm:$0xff]   ;;  %v1900_v42 = vld [vmem:[%s2413_s1 + $0x2d0] sm:$0xff]  }
  0x19   :  { %1669 = vmatpush3.bf16.msra.mxu1 %v1837_v23  ;;  %1648 = vmatprep.subr.bf16.mxu0 %v1838_v24  ;;  %v1883_v23 = vld [vmem:[%s2413_s1 + $0x270] sm:$0xff]   ;;  %v1882_v24 = vld [vmem:[%s2413_s1 + $0x2b8] sm:$0xff]   ;;  %v1893_v34 = vld [vmem:[%s2413_s1 + $0x220] sm:$0xff]  }
  0x1a   :  { %1670 = vmatprep.subr.bf16.mxu1 %v1839_v25  ;;  %v1884_v25 = vld [vmem:[%s2413_s1 + $0x2f0] sm:$0xff]   ;;  %v1894_v36 = vld [vmem:[%s2413_s1 + $0x2a0] sm:$0xff]   ;;  %v1896_v37 = vld [vmem:[%s2413_s1 + $0x2d8] sm:$0xff]  }
  0x1b   :  { %v1898_v40 = vld [vmem:[%s2413_s1 + $0x298] sm:$0xff]   ;;  %v1901_v43 = vld [vmem:[%s2413_s1 + $0x210] sm:$0xff]   ;;  %v1903_v44 = vld [vmem:[%s2413_s1 + $0x248] sm:$0xff]  }
  0x1c   :  { %1649 = vmatpush3.bf16.msra.mxu0 %v1840_v26  ;;  %v1885_v26 = vld [vmem:[%s2413_s1 + $0x230] sm:$0xff]  }
  0x1d   :  { %1671 = vmatpush3.bf16.msra.mxu1 %v1841_v27  ;;  %1650 = vmatprep.subr.bf16.mxu0 %v1842_v29  ;;  %v1887_v27 = vld [vmem:[%s2413_s1 + $0x268] sm:$0xff]   ;;  %v1902_v46 = vld [vmem:[%s2413_s1 + $0x290] sm:$0xff]  }
  0x1e   :  { %1672 = vmatprep.subr.bf16.mxu1 %v1843_v30  ;;  %v1888_v29 = vld [vmem:[%s2413_s1 + $0x2e8] sm:$0xff]  }
  0x1f   :  { %v1889_v30 = vld [vmem:[%s2413_s1 + $0x228] sm:$0xff]  }
  0x20   :  { %1651 = vmatpush3.bf16.msra.mxu0 %v1844_v31  ;;  %v1891_v31 = vld [vmem:[%s2413_s1 + $0x260] sm:$0xff]  }
  0x21   :  { %1673 = vmatpush3.bf16.msra.mxu1 %v1845_v32  ;;  %1680 = vmatprep.subr.bf16.mxu0 %v1847_v35  ;;  %v1890_v32 = vld [vmem:[%s2413_s1 + $0x2a8] sm:$0xff]   ;;  %v1895_v35 = vld [vmem:[%s2413_s1 + $0x258] sm:$0xff]  }
  0x22   :  { %1702 = vmatprep.subr.bf16.mxu1 %v1848_v38  ;;  %v1897_v38 = vld [vmem:[%s2413_s1 + $0x218] sm:$0xff]  }
  0x23   :  { %1198 = vmatmul.mubr.bf16.vlgmr.msra.gmra.mxu0 %v306_v45  ;;  %v17_v45 = vld [vmem:[%s2412_s0 + $0x8] sm:$0xff] }
  0x24   :  { %1681 = vmatpush3.bf16.msra.mxu0 %v1849_v48  ;;  %1238 = vmatmul.mubr.bf16.vlgmr.msra.gmra.mxu1 %v328_v50  ;;  %v339_v47 = vrot.slane %v17_v45, %v2097_v41  ;;  %v332_v48 = vcombine.high %v17_v45, %v17_v45  ;;  %v1905_v50 = vld [vmem:[%s2413_s1 + $0x208] sm:$0xff]  }
  0x25   :  { %1682 = vmatprep.subr.bf16.mxu0 %v1851_v51  ;;  %1703 = vmatpush3.bf16.msra.mxu1 %v1850_v53  ;;  %v1907_v53 = vld [vmem:[%s2413_s1 + $0x240] sm:$0xff]  }
  0x26   :  { %1277 = vmatprep.mubr.bf16.mxu0 %v327_v49  ;;  %1704 = vmatprep.subr.bf16.mxu1 %v1852_v54  ;;  %v1904_v49 = vld [vmem:[%s2413_s1 + $0x2c8] sm:$0xff]   ;;  %v347_v51 = vcombine.high %v339_v47, %v339_v47  ;;  %v2286_v52 = vrot.slane %v332_v48, %v2097_v41 }
  0x27   :  { %1317 = vmatprep.mubr.bf16.mxu1 %v331_v55  ;;  %v1906_v54 = vld [vmem:[%s2413_s1 + $0x288] sm:$0xff]  }
  0x28   :  { %1683 = vmatpush3.bf16.msra.mxu0 %v1853_v56  ;;  %v369_v55 = vrot.slane %v347_v51, %v2097_v41  ;;  %v348_v56 = vcombine.high %v2286_v52, %v2286_v52 }
  0x29   :  { %1684 = vmatprep.subr.bf16.mxu0 %v1855_v57  ;;  %1705 = vmatpush3.bf16.msra.mxu1 %v1854_v58  ;;  %v1908_v57 = vld [vmem:[%s2413_s1 + $0x2c0] sm:$0xff]  }
  0x2a   :  { %1706 = vmatprep.subr.bf16.mxu1 %v1856_v59  ;;  %v1909_v58 = vld [vmem:[%s2413_s1 + $0x200] sm:$0xff]   ;;  %v379_v59 = vcombine.high %v369_v55, %v369_v55 }
  0x2c   :  { %1685 = vmatpush3.bf16.msra.mxu0 %v1857_v60  ;;  %v355_v60 = vrot.slane %v339_v47, %v2097_v41 }
  0x2d   :  { %1686 = vmatprep.subr.bf16.mxu0 %v1859_v61  ;;  %1707 = vmatpush3.bf16.msra.mxu1 %v1858_v62  ;;  %v1911_v61 = vld [vmem:[%s2413_s1 + $0x378] sm:$0xff]   ;;  %v1910_v62 = vld [vmem:[%s2413_s1 + $0x280] sm:$0xff]  }
  0x2e   :  { %1708 = vmatprep.subr.bf16.mxu1 %v1860_v63  ;;  %v376_v63 = vrot.slane %v348_v56, %v2097_v41 }
  0x30   :  { %1687 = vmatpush3.bf16.msra.mxu0 %v1861_v0  ;;  %v1912_v0 = vld [vmem:[%s2413_s1 + $0x3f8] sm:$0xff]  }
  0x31   :  { %1688 = vmatprep.subr.bf16.mxu0 %v1863_v1  ;;  %1709 = vmatpush3.bf16.msra.mxu1 %v1862_v2  ;;  %v1913_v1 = vld [vmem:[%s2413_s1 + $0x338] sm:$0xff]   ;;  %v377_v2 = vcombine.high %v355_v60, %v355_v60 }
  0x32   :  { %1710 = vmatprep.subr.bf16.mxu1 %v1864_v3  ;;  %v1915_v3 = vld [vmem:[%s2413_s1 + $0x370] sm:$0xff]  }
  0x34   :  { %1689 = vmatpush3.bf16.msra.mxu0 %v1865_v4  ;;  %v1914_v4 = vld [vmem:[%s2413_s1 + $0x3b8] sm:$0xff]  }
  0x35   :  { %1690 = vmatprep.subr.bf16.mxu0 %v1867_v5  ;;  %1711 = vmatpush3.bf16.msra.mxu1 %v1866_v6  ;;  %v380_v5 = vcombine.high %v376_v63, %v376_v63  ;;  %v1916_v6 = vld [vmem:[%s2413_s1 + $0x3f0] sm:$0xff]  }
  0x36   :  { %1712 = vmatprep.subr.bf16.mxu1 %v1868_v7  ;;  %v1917_v7 = vld [vmem:[%s2413_s1 + $0x330] sm:$0xff]  }
  0x38   :  { %1691 = vmatpush3.bf16.msra.mxu0 %v1869_v8  ;;  %v1919_v8 = vld [vmem:[%s2413_s1 + $0x368] sm:$0xff]  }
  0x39   :  { %1692 = vmatprep.subr.bf16.mxu0 %v1871_v9  ;;  %1713 = vmatpush3.bf16.msra.mxu1 %v1870_v10  ;;  %v1918_v9 = vld [vmem:[%s2413_s1 + $0x3b0] sm:$0xff]   ;;  %v1920_v10 = vld [vmem:[%s2413_s1 + $0x3e8] sm:$0xff]  }
  0x3a   :  { %1714 = vmatprep.subr.bf16.mxu1 %v1872_v11  ;;  %v1921_v11 = vld [vmem:[%s2413_s1 + $0x328] sm:$0xff]  }
  0x3c   :  { %1693 = vmatpush3.bf16.msra.mxu0 %v1873_v12  ;;  %v1923_v12 = vld [vmem:[%s2413_s1 + $0x360] sm:$0xff]  }
  0x3d   :  { %1694 = vmatprep.subr.bf16.mxu0 %v1875_v13  ;;  %1715 = vmatpush3.bf16.msra.mxu1 %v1874_v14  ;;  %v1922_v13 = vld [vmem:[%s2413_s1 + $0x3a8] sm:$0xff]   ;;  %v1924_v14 = vld [vmem:[%s2413_s1 + $0x3e0] sm:$0xff]  }
  0x3e   :  { %1716 = vmatprep.subr.bf16.mxu1 %v1876_v15  ;;  %v1925_v15 = vld [vmem:[%s2413_s1 + $0x320] sm:$0xff]  }
  0x40   :  { %1695 = vmatpush3.bf16.msra.mxu0 %v1877_v16  ;;  %v1927_v16 = vld [vmem:[%s2413_s1 + $0x358] sm:$0xff]  }
  0x41   :  { %1724 = vmatprep.subr.bf16.mxu0 %v1879_v18  ;;  %1717 = vmatpush3.bf16.msra.mxu1 %v1878_v19  ;;  %v1928_v18 = vld [vmem:[%s2413_s1 + $0x3d8] sm:$0xff]  }
  0x42   :  { %1746 = vmatprep.subr.bf16.mxu1 %v1880_v20  ;;  %v1929_v19 = vld [vmem:[%s2413_s1 + $0x318] sm:$0xff]   ;;  %v1931_v20 = vld [vmem:[%s2413_s1 + $0x350] sm:$0xff]  }
  0x43   :  { %1278 = vmatmul.mubr.bf16.vlgmr.msra.gmra.mxu0 %v313_v17  ;;  %v1926_v17 = vld [vmem:[%s2413_s1 + $0x3a0] sm:$0xff]  }
  0x44   :  { %1725 = vmatpush3.bf16.msra.mxu0 %v1881_v21  ;;  %1318 = vmatmul.mubr.bf16.vlgmr.msra.gmra.mxu1 %v329_v22  ;;  %v1930_v21 = vld [vmem:[%s2413_s1 + $0x398] sm:$0xff]   ;;  %v1932_v22 = vld [vmem:[%s2413_s1 + $0x3d0] sm:$0xff]  }
  0x45   :  { %1726 = vmatprep.subr.bf16.mxu0 %v1883_v23  ;;  %1747 = vmatpush3.bf16.msra.mxu1 %v1882_v24  ;;  %v1933_v23 = vld [vmem:[%s2413_s1 + $0x310] sm:$0xff]   ;;  %v1935_v24 = vld [vmem:[%s2413_s1 + $0x348] sm:$0xff]  }
  0x46   :  { %1748 = vmatprep.subr.bf16.mxu1 %v1884_v25  ;;  %1357 = vmatprep.mubr.bf16.mxu0 %v369_v55  ;;  %v1934_v25 = vld [vmem:[%s2413_s1 + $0x390] sm:$0xff]  }
  0x47   :  { %1397 = vmatprep.mubr.bf16.mxu1 %v379_v59 }
  0x48   :  { %1727 = vmatpush3.bf16.msra.mxu0 %v1885_v26 }
  0x49   :  { %1728 = vmatprep.subr.bf16.mxu0 %v1887_v27  ;;  %1749 = vmatpush3.bf16.msra.mxu1 %v1886_v28 }
  0x4a   :  { %1750 = vmatprep.subr.bf16.mxu1 %v1888_v29 }
  0x4c   :  { %1729 = vmatpush3.bf16.msra.mxu0 %v1889_v30 }
  0x4d   :  { %1730 = vmatprep.subr.bf16.mxu0 %v1891_v31  ;;  %1751 = vmatpush3.bf16.msra.mxu1 %v1890_v32 }
  0x4e   :  { %1752 = vmatprep.subr.bf16.mxu1 %v1892_v33 }
  0x50   :  { %1731 = vmatpush3.bf16.msra.mxu0 %v1893_v34 }
  0x51   :  { %1732 = vmatprep.subr.bf16.mxu0 %v1895_v35  ;;  %1753 = vmatpush3.bf16.msra.mxu1 %v1894_v36 }
  0x52   :  { %1754 = vmatprep.subr.bf16.mxu1 %v1896_v37 }
  0x54   :  { %1733 = vmatpush3.bf16.msra.mxu0 %v1897_v38 }
  0x55   :  { %1734 = vmatprep.subr.bf16.mxu0 %v1899_v39  ;;  %1755 = vmatpush3.bf16.msra.mxu1 %v1898_v40 }
  0x56   :  { %1756 = vmatprep.subr.bf16.mxu1 %v1900_v42 }
  0x58   :  { %1735 = vmatpush3.bf16.msra.mxu0 %v1901_v43 }
  0x59   :  { %1736 = vmatprep.subr.bf16.mxu0 %v1903_v44  ;;  %1757 = vmatpush3.bf16.msra.mxu1 %v1902_v46 }
  0x5a   :  { %1758 = vmatprep.subr.bf16.mxu1 %v1904_v49 }
  0x5c   :  { %1737 = vmatpush3.bf16.msra.mxu0 %v1905_v50 }
  0x5d   :  { %1738 = vmatprep.subr.bf16.mxu0 %v1907_v53  ;;  %1759 = vmatpush3.bf16.msra.mxu1 %v1906_v54 }
  0x5e   :  { %1760 = vmatprep.subr.bf16.mxu1 %v1908_v57 }
  0x60   :  { %1739 = vmatpush3.bf16.msra.mxu0 %v1909_v58 }
  0x61   :  { %1768 = vmatprep.subr.bf16.mxu0 %v1911_v61  ;;  %1761 = vmatpush3.bf16.msra.mxu1 %v1910_v62 }
  0x62   :  { %1790 = vmatprep.subr.bf16.mxu1 %v1912_v0 }
  0x63   :  { %1358 = vmatmul.mubr.bf16.vlgmr.msra.gmra.mxu0 %v355_v60 }
  0x64   :  { %1769 = vmatpush3.bf16.msra.mxu0 %v1913_v1  ;;  %1437 = vmatprep.mubr.bf16.mxu0 %v376_v63 }
  0x65   :  { %1398 = vmatmul.mubr.bf16.vlgmr.msra.gmra.mxu1 %v377_v2  ;;  %1770 = vmatprep.subr.bf16.mxu0 %v1915_v3 }
  0x66   :  { %1791 = vmatpush3.bf16.msra.mxu1 %v1914_v4  ;;  %1477 = vmatprep.mubr.bf16.mxu1 %v380_v5 }
  0x67   :  { %1792 = vmatprep.subr.bf16.mxu1 %v1916_v6 }
  0x68   :  { %1771 = vmatpush3.bf16.msra.mxu0 %v1917_v7 }
  0x69   :  { %1772 = vmatprep.subr.bf16.mxu0 %v1919_v8 }
  0x6a   :  { %1793 = vmatpush3.bf16.msra.mxu1 %v1918_v9 }
  0x6b   :  { %1794 = vmatprep.subr.bf16.mxu1 %v1920_v10 }
  0x6c   :  { %1773 = vmatpush3.bf16.msra.mxu0 %v1921_v11 }
  0x6d   :  { %1774 = vmatprep.subr.bf16.mxu0 %v1923_v12 }
  0x6e   :  { %1795 = vmatpush3.bf16.msra.mxu1 %v1922_v13 }
  0x6f   :  { %1796 = vmatprep.subr.bf16.mxu1 %v1924_v14 }
  0x70   :  { %1775 = vmatpush3.bf16.msra.mxu0 %v1925_v15 }
  0x71   :  { %1776 = vmatprep.subr.bf16.mxu0 %v1927_v16 }
  0x72   :  { %1797 = vmatpush3.bf16.msra.mxu1 %v1926_v17 }
  0x73   :  { %1798 = vmatprep.subr.bf16.mxu1 %v1928_v18 }
  0x74   :  { %1777 = vmatpush3.bf16.msra.mxu0 %v1929_v19 }
  0x75   :  { %1778 = vmatprep.subr.bf16.mxu0 %v1931_v20 }
  0x76   :  { %1799 = vmatpush3.bf16.msra.mxu1 %v1930_v21 }
  0x77   :  { %8 = vsyncpa [#allocation3], 0  ;;  %1800 = vmatprep.subr.bf16.mxu1 %v1932_v22  ;;  %v1936_v26 = vld [vmem:[%s2413_s1 + $0x3c8] sm:$0xff]   ;;  %v1939_v28 = vld [vmem:[%s2413_s1 + $0x340] sm:$0xff]   ;;  %v362_v32 = vrot.slane %v2286_v52, %v2097_v41 }
  0x78   :  { %1779 = vmatpush3.bf16.msra.mxu0 %v1933_v23  ;;  %v1937_v27 = vld [vmem:[%s2413_s1 + $0x308] sm:$0xff]   ;;  %v1940_v30 = vld [vmem:[%s2413_s1 + $0x3c0] sm:$0xff]  }
  0x79   :  { %1780 = vmatprep.subr.bf16.mxu0 %v1935_v24  ;;  %v1938_v29 = vld [vmem:[%s2413_s1 + $0x388] sm:$0xff]   ;;  %v1941_v31 = vld [vmem:[%s2413_s1 + $0x300] sm:$0xff]   ;;  %v378_v34 = vcombine.high %v362_v32, %v362_v32 }
  0x7a   :  { %1801 = vmatpush3.bf16.msra.mxu1 %v1934_v25  ;;  %v1942_v33 = vld [vmem:[%s2413_s1 + $0x380] sm:$0xff]   ;;  %s1971_s1 = smov [#allocation2]  }
  0x7b   :  { %1802 = vmatprep.subr.bf16.mxu1 %v1936_v26  ;;  %v1506_v37 = vld [vmem:[%s2414_s2] ss:$0 sm:$0xff]  ;;  %s1498_s2 = sshll.u32 %s1971_s1, 4  ;;  %s1499_s2 = int_to_ptr.vmem [resolvable:$true] %s1498_s2 }
  0x7c   :  { %1781 = vmatpush3.bf16.msra.mxu0 %v1937_v27  ;;  %s1948_s28 = scalar_lea.vmem %s1499_s2, 32  ;;  %p1953_p1 = scmp.lt.s32.totalorder %s1499_s2, %s1499_s2 }
  0x7d   :  { %1782 = vmatprep.subr.bf16.mxu0 %v1939_v28  ;;  %p1949_p0 = scmp.ne.s32.totalorder %s1499_s2, %s1948_s28  ;;  %p1954_p2 = scmp.lt.s32.totalorder %s1948_s28, %s1948_s28 }
  0x7e   :  { %1803 = vmatpush3.bf16.msra.mxu1 %v1938_v29 }
  0x7f   :  { %1804 = vmatprep.subr.bf16.mxu1 %v1940_v30  ;;  %p1955_p3 = por %p1954_p2, %p1953_p1 }
  0x80   :  { %1783 = vmatpush3.bf16.msra.mxu0 %v1941_v31 }
  0x81   :  { %p1956_p4 = pnand %p1955_p3, %p1949_p0 }
  0x82   :  { %1805 = vmatpush3.bf16.msra.mxu1 %v1942_v33 }
  0x83   :  { %1438 = vmatmul.mubr.bf16.vlgmr.msra.gmra.mxu0 %v362_v32 }
  0x85   :  { %1478 = vmatmul.mubr.bf16.vlgmr.msra.gmra.mxu1 %v378_v34 }
  0xe3   :  { %v1652_v35 = vpop.f32.mrf.mxu0 }
  0xe4   :  { %v1674_v36 = vpop.f32.mrf.mxu1 }
  0xe5   :  { %v1653_v38 = vpop.f32.mrf.mxu0 }
  0xe6   :  { %v1654_v39 = vadd.f32 %v1653_v38, %v1652_v35  ;;  %v1675_v41 = vpop.f32.mrf.mxu1 }
  0xe7   :  { %v1655_v40 = vpop.f32.mrf.mxu0  ;;  %v1676_v43 = vadd.f32 %v1675_v41, %v1674_v36 }
  0xe8   :  { %v1200_v42 = vadd.f32 %v1654_v39, %v1506_v37  ;;  %v1677_v44 = vpop.f32.mrf.mxu1 }
  0xe9   :  { %v1656_v45 = vpop.f32.mrf.mxu0 }
  0xea   :  { %v1240_v46 = vadd.f32 %v1676_v43, %v1200_v42  ;;  %v1678_v47 = vpop.f32.mrf.mxu1 }
 0x103   :  { %v1696_v48 = vpop.f32.mrf.mxu0 }
 0x104   :  { %v1718_v49 = vpop.f32.mrf.mxu1 }
 0x105   :  { %v1697_v50 = vpop.f32.mrf.mxu0 }
 0x106   :  { %v1719_v51 = vpop.f32.mrf.mxu1  ;;  %v1698_v0 = vadd.f32 %v1697_v50, %v1696_v48 }
 0x107   :  { %v1699_v52 = vpop.f32.mrf.mxu0  ;;  %v1720_v2 = vadd.f32 %v1719_v51, %v1718_v49 }
 0x108   :  { %v1721_v53 = vpop.f32.mrf.mxu1  ;;  %v1280_v1 = vadd.f32 %v1698_v0, %v1240_v46 }
 0x109   :  { %v1700_v54 = vpop.f32.mrf.mxu0 }
 0x10a   :  { %v1722_v55 = vpop.f32.mrf.mxu1  ;;  %v1320_v4 = vadd.f32 %v1720_v2, %v1280_v1 }
 0x123   :  { %v1740_v56 = vpop.f32.mrf.mxu0 }
 0x125   :  { %v1762_v57 = vpop.f32.mrf.mxu1  ;;  %v1741_v58 = vpop.f32.mrf.mxu0 }
 0x126   :  { %v1742_v3 = vadd.f32 %v1741_v58, %v1740_v56 }
 0x127   :  { %v1763_v59 = vpop.f32.mrf.mxu1  ;;  %v1743_v60 = vpop.f32.mrf.mxu0 }
 0x128   :  { %v1360_v5 = vadd.f32 %v1742_v3, %v1320_v4  ;;  %v1764_v6 = vadd.f32 %v1763_v59, %v1762_v57 }
 0x129   :  { %v1765_v61 = vpop.f32.mrf.mxu1  ;;  %v1744_v62 = vpop.f32.mrf.mxu0 }
 0x12a   :  { %v1400_v10 = vadd.f32 %v1764_v6, %v1360_v5 }
 0x12b   :  { %v1766_v63 = vpop.f32.mrf.mxu1 }
 0x143   :  { %v1784_v7 = vpop.f32.mrf.mxu0 }
 0x145   :  { %v1806_v8 = vpop.f32.mrf.mxu1  ;;  %v1785_v9 = vpop.f32.mrf.mxu0 }
 0x146   :  { %v1786_v11 = vadd.f32 %v1785_v9, %v1784_v7 }
 0x147   :  { %v1807_v12 = vpop.f32.mrf.mxu1  ;;  %v1787_v13 = vpop.f32.mrf.mxu0 }
 0x148   :  { %v1440_v14 = vadd.f32 %v1786_v11, %v1400_v10  ;;  %v1808_v15 = vadd.f32 %v1807_v12, %v1806_v8 }
 0x149   :  { %v1809_v16 = vpop.f32.mrf.mxu1  ;;  %v1788_v17 = vpop.f32.mrf.mxu0 }
 0x14a   :  { %v1480_v18 = vadd.f32 %v1808_v15, %v1440_v14 }
 0x14b   :  { %v1810_v19 = vpop.f32.mrf.mxu1 }
 0x14c   :  { %v1635_v20 = vmul.f32 -1.442695, %v1480_v18 }
 0x14e   :  { %1944 = vpow2.f32 %v1635_v20 }
 0x15b   :  { %v1945_v21 = vpop.eup %1944 }
 0x15c   :  { %v1488_v22 = vadd.f32 1.0, %v1945_v21 }
 0x15e   :  { %1946 = vrcp.f32 %v1488_v22 }
 0x16b   :  { %v1947_v23 = vpop.eup %1946 }
 0x16c   :  { %1491 = vst [vmem:[#allocation2] sm:$0x3] %v1947_v23 }
 0x16d   :  { %1959 = shalt.err (!%p1956_p4)
}
 0x16e   :  { %1501 = dma.vmem_to_hbm [thread:$0]  %s1499_s2, 32, %s2415_s3, [#allocation3]  }
 0x16f   :  { %1968 = dma.done.wait [#allocation3], 32  }
 0x170   :  { %1969 = vsyncadd [#allocation3], 4294967264 }
 0x171   :  { %1505 = vsyncpa [#allocation3], 1 }

// kernel: nca_forward.6
= control target key start
LH: loop header
LB: loop body
LE: loop exit
PB: predicated region body
PF: predicated region fallthrough
CT: control target
= control target key end

     0   :  { %s5264_s12 = smov 0   ;;  %s6285_s0 = inlined_call_operand.vmem [shape: bf16[2,64,128], index: 0, kind: input, shape index: {}]   ;;  %s6286_s1 = inlined_call_operand.vmem [shape: bf16[25,128,128], index: 1, kind: input, shape index: {}]   ;;  %s6287_s2 = inlined_call_operand.vmem [shape: f32[1,128], index: 2, kind: input, shape index: {}]   ;;  %s6288_s3 = inlined_call_operand.vmem [shape: bf16[2,64,128], index: 3, kind: output, shape index: {}]  }
   0x1 LB: > { %s3605_s13 = sadd.s32 4294967295, %s5241_s12   ;;  %p3609_p0 = scmp.ge.s32.totalorder %s5241_s12, 1  ;;  %s5241_s12 = sphi %s5264_s12, %s13_s12  }
   0x2   : > { %p137_p1 = scmp.lt.s32.totalorder %s5241_s12, 3 }
   0x4   : > { %p138_p2 = pnand %p3609_p0, %p137_p1 }
   0x6   : > { %141 = sbr.rel (%p138_p2) target bundleno = 636 (0x27c), region = 32 }
   0xb   : > { %v5005_v0 = vld [vmem:[%s6286_s1 + $0x78] sm:$0xff]   ;;  %v5007_v2 = vld [vmem:[%s6286_s1 + $0x70] sm:$0xff]   ;;  %p161_p3 = scmp.lt.s32.totalorder %s3605_s13, 1  ;;  %v5009_v4 = vld [vmem:[%s6286_s1 + $0x68] sm:$0xff]   ;;  %vm228_vm0 = vsmask.f32 7424 }
   0xc   : > { %v5006_v1 = vld [vmem:[%s6286_s1 + $0x38] sm:$0xff]   ;;  %4496 = vmatprep.subr.bf16.mxu0 %v5005_v0  ;;  %v5008_v3 = vld [vmem:[%s6286_s1 + $0x30] sm:$0xff]   ;;  %v5010_v5 = vld [vmem:[%s6286_s1 + $0x28] sm:$0xff]   ;;  %vm466_vm1 = vcmask 1046528   ;;  %vm594_vm2 = vsmask.f32 6400 }
   0xd   : > { %4516 = vmatprep.subr.bf16.mxu1 %v5006_v1  ;;  %4497 = vmatpush3.bf16.msra.mxu0 %v5005_v0  ;;  %s6304_s13 = smov (!%p161_p3, %s3605_s13), 1  ;;  %v5011_v6 = vld [vmem:[%s6286_s1 + $0x60] sm:$0xff]   ;;  %v5013_v8 = vld [vmem:[%s6286_s1 + $0x58] sm:$0xff]   ;;  %v5015_v10 = vld [vmem:[%s6286_s1 + $0x50] sm:$0xff]   ;;  %vm736_vm3 = vcmask 1045504  }
   0xe   : > { %4517 = vmatpush3.bf16.msra.mxu1 %v5006_v1  ;;  %4498 = vmatprep.subr.bf16.mxu0 %v5007_v2  ;;  %v5012_v7 = vld [vmem:[%s6286_s1 + $0x20] sm:$0xff]   ;;  %s4235_s30 = sshll.u32 %s6304_s13, 5  ;;  %v5014_v9 = vld [vmem:[%s6286_s1 + $0x18] sm:$0xff]   ;;  %v5016_v14 = vld [vmem:[%s6286_s1 + $0x10] sm:$0xff]  }
   0xf   : > { %4518 = vmatprep.subr.bf16.mxu1 %v5008_v3  ;;  %s5310_s10 = scalar_lea.vmem %s6285_s0, %s4235_s30  ;;  %v5017_v20 = vld [vmem:[%s6286_s1 + $0x48] sm:$0xff]   ;;  %v5019_v26 = vld [vmem:[%s6286_s1 + $0x40] sm:$0xff]   ;;  %v5024_v31 = vld [vmem:[%s6286_s1 + $0xb8] sm:$0xff]   ;;  %s6128_s26 = scalar_lea.vmem %s6288_s3, %s4235_s30 }
  0x10   : > { %v180_v11 = vld [vmem:[%s5310_s10] sm:$0xf]  ;;  %v5317_v12 = vld [vmem:[%s5310_s10 + $0x4] sm:$0xf]  ;;  %v182_v13 = vld [vmem:[%s5310_s10 + $0x8] sm:$0xf] }
  0x11   : > { %4499 = vmatpush3.bf16.msra.mxu0 %v5007_v2  ;;  %v200_v15 = vld [vmem:[%s5310_s10 + $0xc] sm:$0x7]  ;;  %v3630_v16 = vcombine.low %v180_v11, %v5317_v12  ;;  %v5020_v27 = vld [vmem:[%s6286_s1] sm:$0xff]   ;;  %v5025_v32 = vld [vmem:[%s6286_s1 + $0xf8] sm:$0xff]  }
  0x12   : > { %4519 = vmatpush3.bf16.msra.mxu1 %v5008_v3  ;;  %4500 = vmatprep.subr.bf16.mxu0 %v5009_v4  ;;  %v5325_v17 = vcombine.low %v182_v13, %v200_v15  ;;  %v5018_v22 = vld [vmem:[%s6286_s1 + $0x8] sm:$0xff]   ;;  %v5026_v35 = vld [vmem:[%s6286_s1 + $0xb0] sm:$0xff]   ;;  %v445_v37 = vld [vmem:[%s5310_s10] sm:$0xe] }
  0x13   : > { %4520 = vmatprep.subr.bf16.mxu1 %v5010_v5  ;;  %v230_v18 = vshrl.u32 %v3630_v16, 16  ;;  %v232_v19 = vshll.u32 %v3630_v16, 16  ;;  %4532 = vmatprep.mubr.bf16.mxu1 %v3630_v16  ;;  %v183_v30 = vld [vmem:[%s5310_s10 + $0xc] sm:$0x3]  ;;  %v5027_v36 = vld [vmem:[%s6286_s1 + $0xf0] sm:$0xff]   ;;  %v3665_v38 = vcombine.low %v445_v37, %v5317_v12  ;;  %v5030_v47 = vld [vmem:[%s6286_s1 + $0xa0] sm:$0xff]  }
  0x14   : > { %v237_v21 = vshll.u32 %v5325_v17, 16  ;;  %v241_v29 = vshrl.u32 %v5325_v17, 16  ;;  %v3640_v34 = vcombine.low %v182_v13, %v183_v30  ;;  %v468_v39 = vrot.slane %v5325_v17, 1  ;;  %v573_v40 = vld [vmem:[%s5310_s10 + $0xc] sm:$0xf]  ;;  %v5031_v50 = vld [vmem:[%s6286_s1 + $0xe0] sm:$0xff]  }
  0x15   : > { %4501 = vmatpush3.bf16.msra.mxu0 %v5009_v4  ;;  %v234_v23 = vrot.slane %v232_v19, 1  ;;  %v5028_v41 = vld [vmem:[%s6286_s1 + $0xa8] sm:$0xff]   ;;  %v5362_v42 = vcombine.low %v182_v13, %v573_v40  ;;  %v467_v44 = vrot.slane %v3665_v38, 1  ;;  %v596_v45 = vshrl.u32 %v3665_v38, 16  ;;  %v5032_v58 = vld [vmem:[%s6286_s1 + $0x98] sm:$0xff]   ;;  %v5034_v61 = vld [vmem:[%s6286_s1 + $0x90] sm:$0xff]  }
  0x16   : > { %4521 = vmatpush3.bf16.msra.mxu1 %v5010_v5  ;;  %4502 = vmatprep.subr.bf16.mxu0 %v5011_v6  ;;  %v239_v24 = vrot.slane %v237_v21, 1  ;;  %v5029_v43 = vld [vmem:[%s6286_s1 + $0xe8] sm:$0xff]   ;;  %v599_v46 = vshll.u32 %v3665_v38, 16  ;;  %v5033_v60 = vld [vmem:[%s6286_s1 + $0xd8] sm:$0xff]   ;;  %v5035_v62 = vld [vmem:[%s6286_s1 + $0xd0] sm:$0xff]  }
  0x17   : > { %4522 = vmatprep.subr.bf16.mxu1 %v5012_v7  ;;  %v235_v25 = vor.u32 %v234_v23, %v230_v18  ;;  %v604_v48 = vshrl.u32 %v5362_v42, 16  ;;  %v607_v49 = vshll.u32 %v5362_v42, 16  ;;  %v469_v51 = vsel %vm466_vm1, %v467_v44, %v468_v39  ;;  %v5036_v63 = vld [vmem:[%s6286_s1 + $0x88] sm:$0xff]   ;;  %v5038_v1 = vld [vmem:[%s6286_s1 + $0x80] sm:$0xff]   ;;  %v5041_v5 = vld [vmem:[%s6286_s1 + $0x138] sm:$0xff]  }
  0x18   : > { %v243_v33 = vor.u32 %v241_v29, %v239_v24  ;;  %v598_v52 = vrot.slane %v596_v45, 1  ;;  %v601_v53 = vrot.slane %v599_v46, 2  ;;  %v5037_v0 = vld [vmem:[%s6286_s1 + $0xc8] sm:$0xff]   ;;  %v715_v2 = vld [vmem:[%s5310_s10] sm:$0xc]  ;;  %v5044_v11 = vld [vmem:[%s6286_s1 + $0x130] sm:$0xff]  }
  0x19   : > { %4503 = vmatpush3.bf16.msra.mxu0 %v5011_v6  ;;  %v240_v28 = vsel %vm228_vm0, %v235_v25, %v239_v24  ;;  %v606_v54 = vrot.slane %v604_v48, 1  ;;  %v609_v55 = vrot.slane %v607_v49, 2  ;;  %v5039_v3 = vld [vmem:[%s6286_s1 + $0xc0] sm:$0xff]   ;;  %v3715_v4 = vcombine.low %v715_v2, %v5317_v12  ;;  %v5043_v6 = vld [vmem:[%s6286_s1 + $0x178] sm:$0xff]   ;;  %v5045_v12 = vld [vmem:[%s6286_s1 + $0x170] sm:$0xff]  }
  0x1a   : > { %4523 = vmatpush3.bf16.msra.mxu1 %v5012_v7  ;;  %4504 = vmatprep.subr.bf16.mxu0 %v5013_v8  ;;  %v602_v56 = vor.u32 %v601_v53, %v598_v52  ;;  %v843_v7 = vld [vmem:[%s5310_s10 + $0x4] sm:$0xf]  ;;  %v5046_v15 = vld [vmem:[%s6286_s1 + $0x128] sm:$0xff]   ;;  %v5050_v19 = vld [vmem:[%s6286_s1 + $0x118] sm:$0xff]  }
  0x1b   : > { %4524 = vmatprep.subr.bf16.mxu1 %v5014_v9  ;;  %4512 = vmatprep.mubr.bf16.mxu0 %v240_v28  ;;  %v610_v57 = vor.u32 %v609_v55, %v606_v54  ;;  %v5047_v16 = vld [vmem:[%s6286_s1 + $0x168] sm:$0xff]   ;;  %v5048_v17 = vld [vmem:[%s6286_s1 + $0x120] sm:$0xff]   ;;  %v5052_v21 = vld [vmem:[%s6286_s1 + $0x110] sm:$0xff]  }
  0x1c   : > { %v5049_v18 = vld [vmem:[%s6286_s1 + $0x160] sm:$0xff]   ;;  %v5054_v23 = vld [vmem:[%s6286_s1 + $0x108] sm:$0xff]   ;;  %v977_v24 = vld [vmem:[%s5310_s10 + $0x10] sm:$0x7] }
  0x1d   : > { %4505 = vmatpush3.bf16.msra.mxu0 %v5013_v8  ;;  %v611_v59 = vsel %vm594_vm2, %v602_v56, %v610_v57  ;;  %v737_v8 = vrot.slane %v3715_v4, 2  ;;  %v5055_v25 = vld [vmem:[%s6286_s1 + $0x148] sm:$0xff]   ;;  %v5056_v29 = vld [vmem:[%s6286_s1 + $0x100] sm:$0xff]   ;;  %v846_v37 = vld [vmem:[%s5310_s10 + $0x10] sm:$0x3] }
  0x1e   : > { %4525 = vmatpush3.bf16.msra.mxu1 %v5014_v9  ;;  %4506 = vmatprep.subr.bf16.mxu0 %v5015_v10  ;;  %v738_v9 = vrot.slane %v5362_v42, 2  ;;  %v1116_v30 = vld [vmem:[%s5310_s10 + $0x4] sm:$0xe]  ;;  %v5064_v38 = vld [vmem:[%s6286_s1 + $0x1f8] sm:$0xff]   ;;  %v5065_v45 = vld [vmem:[%s6286_s1 + $0x1b0] sm:$0xff]  }
  0x1f   : > { %4526 = vmatprep.subr.bf16.mxu1 %v5016_v14  ;;  %v5066_v46 = vld [vmem:[%s6286_s1 + $0x1f0] sm:$0xff]   ;;  %v5067_v49 = vld [vmem:[%s6286_s1 + $0x1a8] sm:$0xff]   ;;  %v5071_v52 = vld [vmem:[%s6286_s1 + $0x198] sm:$0xff]  }
  0x20   : > { %v739_v13 = vsel %vm736_vm3, %v737_v8, %v738_v9  ;;  %v5068_v42 = vld [vmem:[%s6286_s1 + $0x1e8] sm:$0xff]   ;;  %v5072_v53 = vld [vmem:[%s6286_s1 + $0x1d8] sm:$0xff]   ;;  %v1243_v54 = vld [vmem:[%s5310_s10 + $0x10] sm:$0xf] }
  0x21   : > { %4507 = vmatpush3.bf16.msra.mxu0 %v5015_v10  ;;  %v5414_v10 = vld [vmem:[%s5310_s10 + $0x8] sm:$0xf]  ;;  %v5073_v55 = vld [vmem:[%s6286_s1 + $0x190] sm:$0xff]   ;;  %v5078_v4 = vld [vmem:[%s6286_s1 + $0x1c0] sm:$0xff]  }
  0x22   : > { %4527 = vmatpush3.bf16.msra.mxu1 %v5016_v14  ;;  %4508 = vmatprep.subr.bf16.mxu0 %v5017_v20  ;;  %v3740_v14 = vcombine.low %v843_v7, %v5414_v10 }
  0x23   : > { %4528 = vmatprep.subr.bf16.mxu1 %v5018_v22 }
  0x25   : > { %4509 = vmatpush3.bf16.msra.mxu0 %v5017_v20  ;;  %v5051_v20 = vld [vmem:[%s6286_s1 + $0x158] sm:$0xff]  }
  0x26   : > { %4529 = vmatpush3.bf16.msra.mxu1 %v5018_v22  ;;  %4510 = vmatprep.subr.bf16.mxu0 %v5019_v26  ;;  %v5053_v22 = vld [vmem:[%s6286_s1 + $0x150] sm:$0xff]  }
  0x27   : > { %4530 = vmatprep.subr.bf16.mxu1 %v5020_v27 }
  0x29   : > { %4511 = vmatpush3.bf16.msra.mxu0 %v5019_v26  ;;  %v845_v26 = vld [vmem:[%s5310_s10 + $0xc] sm:$0xf] }
  0x2a   : > { %4531 = vmatpush3.bf16.msra.mxu1 %v5020_v27  ;;  %4536 = vmatprep.subr.bf16.mxu0 %v5024_v31  ;;  %v1001_v27 = vshll.u32 %v3740_v14, 16  ;;  %v5460_v28 = vcombine.low %v845_v26, %v977_v24  ;;  %v5516_v56 = vcombine.low %v845_v26, %v1243_v54  ;;  %v5088_v24 = vld [vmem:[%s6286_s1 + $0x218] sm:$0xff]  }
  0x2b   : > { %4556 = vmatprep.subr.bf16.mxu1 %v5025_v32  ;;  %v5106_v54 = vld [vmem:[%s6286_s1 + $0x2d8] sm:$0xff]  }
  0x2c   : > { %4513 = vmatmul.mubr.bf16.vlgmr.msra.gmra.mxu0 %v243_v33  ;;  %v1003_v33 = vrot.slane %v1001_v27, 1  ;;  %v1138_v44 = vrot.slane %v5460_v28, 1  ;;  %v1511_v27 = vld [vmem:[%s5310_s10 + $0x8] sm:$0xf] }
  0x2d   : > { %4533 = vmatmul.mubr.bf16.vlgmr.msra.gmra.mxu1 %v3640_v34  ;;  %4537 = vmatpush3.bf16.msra.mxu0 %v5024_v31  ;;  %v5057_v31 = vld [vmem:[%s6286_s1 + $0x140] sm:$0xff]   ;;  %v1006_v34 = vshll.u32 %v5460_v28, 16 }
  0x2e   : > { %4557 = vmatpush3.bf16.msra.mxu1 %v5025_v32  ;;  %4538 = vmatprep.subr.bf16.mxu0 %v5026_v35  ;;  %v999_v32 = vshrl.u32 %v3740_v14, 16 }
  0x2f   : > { %4558 = vmatprep.subr.bf16.mxu1 %v5027_v36  ;;  %4552 = vmatprep.mubr.bf16.mxu0 %v469_v51  ;;  %v5478_v40 = vrot.slane %v1006_v34, 1  ;;  %v5070_v51 = vld [vmem:[%s6286_s1 + $0x1e0] sm:$0xff]   ;;  %v5093_v34 = vld [vmem:[%s6286_s1 + $0x248] sm:$0xff]  }
  0x30   : > { %4572 = vmatprep.mubr.bf16.mxu1 %v611_v59 }
  0x31   : > { %4539 = vmatpush3.bf16.msra.mxu0 %v5026_v35  ;;  %v5059_v35 = vld [vmem:[%s6286_s1 + $0x1b8] sm:$0xff]  }
  0x32   : > { %4559 = vmatpush3.bf16.msra.mxu1 %v5027_v36  ;;  %4540 = vmatprep.subr.bf16.mxu0 %v5028_v41  ;;  %v3791_v36 = vcombine.low %v1116_v30, %v5414_v10  ;;  %v5092_v30 = vld [vmem:[%s6286_s1 + $0x208] sm:$0xff]  }
  0x33   : > { %4560 = vmatprep.subr.bf16.mxu1 %v5029_v43 }
  0x34   : > { %v1268_v59 = vshll.u32 %v3791_v36, 16 }
  0x35   : > { %4541 = vmatpush3.bf16.msra.mxu0 %v5028_v41  ;;  %v3741_v41 = vcombine.low %v845_v26, %v846_v37  ;;  %v5090_v26 = vld [vmem:[%s6286_s1 + $0x210] sm:$0xff]   ;;  %v5094_v37 = vld [vmem:[%s6286_s1 + $0x200] sm:$0xff]  }
  0x36   : > { %4561 = vmatpush3.bf16.msra.mxu1 %v5029_v43  ;;  %4542 = vmatprep.subr.bf16.mxu0 %v5030_v47  ;;  %v1137_v43 = vrot.slane %v3791_v36, 1  ;;  %v1270_v2 = vrot.slane %v1268_v59, 2  ;;  %v1911_v59 = vld [vmem:[%s5310_s10 + $0x14] sm:$0xf] }
  0x37   : > { %4562 = vmatprep.subr.bf16.mxu1 %v5031_v50 }
  0x38   : > { %v1139_v48 = vsel %vm466_vm1, %v1137_v43, %v1138_v44  ;;  %v5096_v43 = vld [vmem:[%s6286_s1 + $0x2b8] sm:$0xff]  }
  0x39   : > { %4543 = vmatpush3.bf16.msra.mxu0 %v5030_v47 }
  0x3a   : > { %4563 = vmatpush3.bf16.msra.mxu1 %v5031_v50  ;;  %4544 = vmatprep.subr.bf16.mxu0 %v5032_v58  ;;  %v5069_v50 = vld [vmem:[%s6286_s1 + $0x1a0] sm:$0xff]  }
  0x3b   : > { %4564 = vmatprep.subr.bf16.mxu1 %v5033_v60 }
  0x3d   : > { %4545 = vmatpush3.bf16.msra.mxu0 %v5032_v58  ;;  %v1265_v58 = vshrl.u32 %v3791_v36, 16 }
  0x3e   : > { %4565 = vmatpush3.bf16.msra.mxu1 %v5033_v60  ;;  %4546 = vmatprep.subr.bf16.mxu0 %v5034_v61  ;;  %v5075_v60 = vld [vmem:[%s6286_s1 + $0x188] sm:$0xff]  }
  0x3f   : > { %4566 = vmatprep.subr.bf16.mxu1 %v5035_v62 }
  0x41   : > { %4547 = vmatpush3.bf16.msra.mxu0 %v5034_v61  ;;  %v5076_v61 = vld [vmem:[%s6286_s1 + $0x1c8] sm:$0xff]  }
  0x42   : > { %4567 = vmatpush3.bf16.msra.mxu1 %v5035_v62  ;;  %4548 = vmatprep.subr.bf16.mxu0 %v5036_v63  ;;  %v1273_v62 = vshrl.u32 %v5516_v56, 16 }
  0x43   : > { %4568 = vmatprep.subr.bf16.mxu1 %v5037_v0 }
  0x45   : > { %4549 = vmatpush3.bf16.msra.mxu0 %v5036_v63  ;;  %v1267_v63 = vrot.slane %v1265_v58, 1 }
  0x46   : > { %4569 = vmatpush3.bf16.msra.mxu1 %v5037_v0  ;;  %4550 = vmatprep.subr.bf16.mxu0 %v5038_v1  ;;  %v1276_v0 = vshll.u32 %v5516_v56, 16 }
  0x47   : > { %4570 = vmatprep.subr.bf16.mxu1 %v5039_v3 }
  0x48   : > { %v1278_v7 = vrot.slane %v1276_v0, 2 }
  0x49   : > { %4551 = vmatpush3.bf16.msra.mxu0 %v5038_v1  ;;  %v5077_v1 = vld [vmem:[%s6286_s1 + $0x180] sm:$0xff]  }
  0x4a   : > { %4571 = vmatpush3.bf16.msra.mxu1 %v5039_v3  ;;  %4576 = vmatprep.subr.bf16.mxu0 %v5041_v5  ;;  %v1384_v3 = vld [vmem:[%s5310_s10 + $0x4] sm:$0xc] }
  0x4b   : > { %4596 = vmatprep.subr.bf16.mxu1 %v5043_v6  ;;  %v3841_v8 = vcombine.low %v1384_v3, %v5414_v10  ;;  %v1406_v10 = vrot.slane %v5516_v56, 2  ;;  %v5107_v56 = vld [vmem:[%s6286_s1 + $0x290] sm:$0xff]  }
  0x4c   : > { %4553 = vmatmul.mubr.bf16.vlgmr.msra.gmra.mxu0 %v468_v39  ;;  %v1004_v39 = vor.u32 %v1003_v33, %v999_v32  ;;  %v5594_v32 = vld [vmem:[%s5310_s10 + $0x10] sm:$0xf]  ;;  %v1645_v33 = vld [vmem:[%s5310_s10 + $0x14] sm:$0x7] }
  0x4d   : > { %4577 = vmatpush3.bf16.msra.mxu0 %v5041_v5  ;;  %4573 = vmatmul.mubr.bf16.vlgmr.msra.gmra.mxu1 %v610_v57  ;;  %v5074_v57 = vld [vmem:[%s6286_s1 + $0x1d0] sm:$0xff]   ;;  %v1275_v5 = vrot.slane %v1273_v62, 1  ;;  %v5601_v36 = vcombine.low %v5594_v32, %v1645_v33  ;;  %v5663_v62 = vcombine.low %v5594_v32, %v1911_v59  ;;  %v5131_v33 = vld [vmem:[%s6286_s1 + $0x348] sm:$0xff]  }
  0x4e   : > { %4597 = vmatpush3.bf16.msra.mxu1 %v5043_v6  ;;  %4578 = vmatprep.subr.bf16.mxu0 %v5044_v11  ;;  %v1009_v47 = vsel %vm228_vm0, %v1004_v39, %v5478_v40  ;;  %v1010_v6 = vshrl.u32 %v5460_v28, 16  ;;  %v5584_v28 = vld [vmem:[%s5310_s10 + $0xc] sm:$0xf] }
  0x4f   : > { %4598 = vmatprep.subr.bf16.mxu1 %v5045_v12  ;;  %4592 = vmatprep.mubr.bf16.mxu0 %v739_v13  ;;  %v1271_v13 = vor.u32 %v1270_v2, %v1267_v63  ;;  %v1941_v2 = vshrl.u32 %v5663_v62, 16  ;;  %v1944_v3 = vshll.u32 %v5663_v62, 16 }
  0x50   : > { %4612 = vmatprep.mubr.bf16.mxu1 %v3740_v14  ;;  %v5545_v14 = vor.u32 %v1278_v7, %v1275_v5  ;;  %v1678_v5 = vshrl.u32 %v5601_v36, 16 }
  0x51   : > { %4579 = vmatpush3.bf16.msra.mxu0 %v5044_v11  ;;  %v5081_v11 = vld [vmem:[%s6286_s1 + $0x278] sm:$0xff]  }
  0x52   : > { %4599 = vmatpush3.bf16.msra.mxu1 %v5045_v12  ;;  %4580 = vmatprep.subr.bf16.mxu0 %v5046_v15  ;;  %v1012_v12 = vor.u32 %v1010_v6, %v5478_v40  ;;  %v1514_v6 = vld [vmem:[%s5310_s10 + $0x14] sm:$0x3] }
  0x53   : > { %4600 = vmatprep.subr.bf16.mxu1 %v5047_v16 }
  0x55   : > { %4581 = vmatpush3.bf16.msra.mxu0 %v5046_v15  ;;  %v1405_v15 = vrot.slane %v3841_v8, 2 }
  0x56   : > { %4601 = vmatpush3.bf16.msra.mxu1 %v5047_v16  ;;  %4582 = vmatprep.subr.bf16.mxu0 %v5048_v17  ;;  %v5082_v16 = vld [vmem:[%s6286_s1 + $0x230] sm:$0xff]  }
  0x57   : > { %4602 = vmatprep.subr.bf16.mxu1 %v5049_v18 }
  0x59   : > { %4583 = vmatpush3.bf16.msra.mxu0 %v5048_v17  ;;  %v5083_v17 = vld [vmem:[%s6286_s1 + $0x270] sm:$0xff]  }
  0x5a   : > { %4603 = vmatpush3.bf16.msra.mxu1 %v5049_v18  ;;  %4584 = vmatprep.subr.bf16.mxu0 %v5050_v19  ;;  %v1280_v18 = vsel %vm594_vm2, %v1271_v13, %v5545_v14  ;;  %v5119_v13 = vld [vmem:[%s6286_s1 + $0x378] sm:$0xff]  }
  0x5b   : > { %4604 = vmatprep.subr.bf16.mxu1 %v5051_v20 }
  0x5d   : > { %4585 = vmatpush3.bf16.msra.mxu0 %v5050_v19  ;;  %v1407_v19 = vsel %vm736_vm3, %v1405_v15, %v1406_v10 }
  0x5e   : > { %4605 = vmatpush3.bf16.msra.mxu1 %v5051_v20  ;;  %4586 = vmatprep.subr.bf16.mxu0 %v5052_v21  ;;  %v5084_v20 = vld [vmem:[%s6286_s1 + $0x228] sm:$0xff]  }
  0x5f   : > { %4606 = vmatprep.subr.bf16.mxu1 %v5053_v22 }
  0x61   : > { %4587 = vmatpush3.bf16.msra.mxu0 %v5052_v21  ;;  %v5085_v21 = vld [vmem:[%s6286_s1 + $0x268] sm:$0xff]  }
  0x62   : > { %4607 = vmatpush3.bf16.msra.mxu1 %v5053_v22  ;;  %4588 = vmatprep.subr.bf16.mxu0 %v5054_v23  ;;  %v5086_v22 = vld [vmem:[%s6286_s1 + $0x220] sm:$0xff]  }
  0x63   : > { %4608 = vmatprep.subr.bf16.mxu1 %v5055_v25 }
  0x65   : > { %4589 = vmatpush3.bf16.msra.mxu0 %v5054_v23  ;;  %v5087_v23 = vld [vmem:[%s6286_s1 + $0x260] sm:$0xff]  }
  0x66   : > { %4609 = vmatpush3.bf16.msra.mxu1 %v5055_v25  ;;  %4590 = vmatprep.subr.bf16.mxu0 %v5056_v29  ;;  %v5089_v25 = vld [vmem:[%s6286_s1 + $0x258] sm:$0xff]  }
  0x67   : > { %4610 = vmatprep.subr.bf16.mxu1 %v5057_v31 }
  0x69   : > { %4591 = vmatpush3.bf16.msra.mxu0 %v5056_v29  ;;  %v5091_v29 = vld [vmem:[%s6286_s1 + $0x250] sm:$0xff]  }
  0x6a   : > { %4611 = vmatpush3.bf16.msra.mxu1 %v5057_v31  ;;  %4616 = vmatprep.subr.bf16.mxu0 %v5059_v35  ;;  %v3866_v31 = vcombine.low %v1511_v27, %v5584_v28  ;;  %v5126_v27 = vld [vmem:[%s6286_s1 + $0x318] sm:$0xff]  }
  0x6b   : > { %4636 = vmatprep.subr.bf16.mxu1 %v5064_v38 }
  0x6c   : > { %4593 = vmatmul.mubr.bf16.vlgmr.msra.gmra.mxu0 %v738_v9  ;;  %v5080_v9 = vld [vmem:[%s6286_s1 + $0x238] sm:$0xff]   ;;  %v1667_v39 = vshrl.u32 %v3866_v31, 16 }
  0x6d   : > { %4617 = vmatpush3.bf16.msra.mxu0 %v5059_v35  ;;  %4613 = vmatmul.mubr.bf16.vlgmr.msra.gmra.mxu1 %v3741_v41  ;;  %v1669_v35 = vshll.u32 %v3866_v31, 16  ;;  %v1674_v41 = vshll.u32 %v5601_v36, 16 }
  0x6e   : > { %4637 = vmatpush3.bf16.msra.mxu1 %v5064_v38  ;;  %4618 = vmatprep.subr.bf16.mxu0 %v5065_v45  ;;  %v5095_v38 = vld [vmem:[%s6286_s1 + $0x240] sm:$0xff]  }
  0x6f   : > { %4638 = vmatprep.subr.bf16.mxu1 %v5066_v46  ;;  %4632 = vmatprep.mubr.bf16.mxu0 %v1009_v47  ;;  %v1671_v40 = vrot.slane %v1669_v35, 1  ;;  %v5619_v47 = vrot.slane %v1674_v41, 1  ;;  %v5132_v35 = vld [vmem:[%s6286_s1 + $0x300] sm:$0xff]  }
  0x70   : > { %4652 = vmatprep.mubr.bf16.mxu1 %v1139_v48  ;;  %v5100_v48 = vld [vmem:[%s6286_s1 + $0x2f0] sm:$0xff]  }
  0x71   : > { %4619 = vmatpush3.bf16.msra.mxu0 %v5065_v45  ;;  %v5099_v45 = vld [vmem:[%s6286_s1 + $0x2b0] sm:$0xff]  }
  0x72   : > { %4639 = vmatpush3.bf16.msra.mxu1 %v5066_v46  ;;  %4620 = vmatprep.subr.bf16.mxu0 %v5067_v49  ;;  %v1672_v46 = vor.u32 %v1671_v40, %v1667_v39  ;;  %v5134_v39 = vld [vmem:[%s6286_s1 + $0x3b8] sm:$0xff]  }
  0x73   : > { %4640 = vmatprep.subr.bf16.mxu1 %v5068_v42  ;;  %v5135_v40 = vld [vmem:[%s6286_s1 + $0x3f8] sm:$0xff]  }
  0x75   : > { %4621 = vmatpush3.bf16.msra.mxu0 %v5067_v49  ;;  %v5101_v49 = vld [vmem:[%s6286_s1 + $0x2a8] sm:$0xff]  }
  0x76   : > { %4641 = vmatpush3.bf16.msra.mxu1 %v5068_v42  ;;  %4622 = vmatprep.subr.bf16.mxu0 %v5069_v50  ;;  %v1677_v42 = vsel %vm228_vm0, %v1672_v46, %v5619_v47  ;;  %v5137_v46 = vld [vmem:[%s6286_s1 + $0x3f0] sm:$0xff]  }
  0x77   : > { %4642 = vmatprep.subr.bf16.mxu1 %v5070_v51 }
  0x79   : > { %4623 = vmatpush3.bf16.msra.mxu0 %v5069_v50  ;;  %v5102_v50 = vld [vmem:[%s6286_s1 + $0x2e8] sm:$0xff]  }
  0x7a   : > { %4643 = vmatpush3.bf16.msra.mxu1 %v5070_v51  ;;  %4624 = vmatprep.subr.bf16.mxu0 %v5071_v52  ;;  %v5103_v51 = vld [vmem:[%s6286_s1 + $0x2a0] sm:$0xff]  }
  0x7b   : > { %4644 = vmatprep.subr.bf16.mxu1 %v5072_v53 }
  0x7d   : > { %4625 = vmatpush3.bf16.msra.mxu0 %v5071_v52  ;;  %v5104_v52 = vld [vmem:[%s6286_s1 + $0x2e0] sm:$0xff]  }
  0x7e   : > { %4645 = vmatpush3.bf16.msra.mxu1 %v5072_v53  ;;  %4626 = vmatprep.subr.bf16.mxu0 %v5073_v55  ;;  %v5105_v53 = vld [vmem:[%s6286_s1 + $0x298] sm:$0xff]  }
  0x7f   : > { %4646 = vmatprep.subr.bf16.mxu1 %v5074_v57 }
  0x81   : > { %4627 = vmatpush3.bf16.msra.mxu0 %v5073_v55  ;;  %v1784_v55 = vld [vmem:[%s5310_s10 + $0x8] sm:$0xe] }
  0x82   : > { %4647 = vmatpush3.bf16.msra.mxu1 %v5074_v57  ;;  %4628 = vmatprep.subr.bf16.mxu0 %v5075_v60  ;;  %v5108_v57 = vld [vmem:[%s6286_s1 + $0x2d0] sm:$0xff]   ;;  %v3917_v58 = vcombine.low %v1784_v55, %v5584_v28  ;;  %v2313_v55 = vld [vmem:[%s5310_s10 + $0x18] sm:$0x7] }
  0x83   : > { %4648 = vmatprep.subr.bf16.mxu1 %v5076_v61 }
  0x84   : > { %v1933_v63 = vshrl.u32 %v3917_v58, 16  ;;  %v1936_v0 = vshll.u32 %v3917_v58, 16  ;;  %v1805_v15 = vrot.slane %v3917_v58, 1  ;;  %v5791_v58 = vld [vmem:[%s5310_s10 + $0x14] sm:$0xf] }
  0x85   : > { %4629 = vmatpush3.bf16.msra.mxu0 %v5075_v60  ;;  %v5109_v60 = vld [vmem:[%s6286_s1 + $0x288] sm:$0xff]  }
  0x86   : > { %4649 = vmatpush3.bf16.msra.mxu1 %v5076_v61  ;;  %4630 = vmatprep.subr.bf16.mxu0 %v5077_v1  ;;  %v5110_v61 = vld [vmem:[%s6286_s1 + $0x2c8] sm:$0xff]   ;;  %v1935_v7 = vrot.slane %v1933_v63, 1  ;;  %v1938_v8 = vrot.slane %v1936_v0, 2  ;;  %v5149_v0 = vld [vmem:[%s6286_s1 + $0x3c0] sm:$0xff]  }
  0x87   : > { %4650 = vmatprep.subr.bf16.mxu1 %v5078_v4  ;;  %v2452_v63 = vld [vmem:[%s5310_s10 + $0xc] sm:$0xe] }
  0x89   : > { %4631 = vmatpush3.bf16.msra.mxu0 %v5077_v1  ;;  %v5111_v1 = vld [vmem:[%s6286_s1 + $0x280] sm:$0xff]  }
  0x8a   : > { %4651 = vmatpush3.bf16.msra.mxu1 %v5078_v4  ;;  %4656 = vmatprep.subr.bf16.mxu0 %v5080_v9  ;;  %v5112_v4 = vld [vmem:[%s6286_s1 + $0x2c0] sm:$0xff]  }
  0x8b   : > { %4676 = vmatprep.subr.bf16.mxu1 %v5081_v11 }
  0x8c   : > { %4633 = vmatmul.mubr.bf16.vlgmr.msra.gmra.mxu0 %v1012_v12  ;;  %v5117_v12 = vld [vmem:[%s6286_s1 + $0x338] sm:$0xff]  }
  0x8d   : > { %4657 = vmatpush3.bf16.msra.mxu0 %v5080_v9  ;;  %4653 = vmatmul.mubr.bf16.vlgmr.msra.gmra.mxu1 %v1138_v44  ;;  %v5098_v44 = vld [vmem:[%s6286_s1 + $0x2f8] sm:$0xff]   ;;  %v1943_v9 = vrot.slane %v1941_v2, 1 }
  0x8e   : > { %4677 = vmatpush3.bf16.msra.mxu1 %v5081_v11  ;;  %4658 = vmatprep.subr.bf16.mxu0 %v5082_v16  ;;  %v1946_v11 = vrot.slane %v1944_v3, 2 }
  0x8f   : > { %4678 = vmatprep.subr.bf16.mxu1 %v5083_v17  ;;  %4672 = vmatprep.mubr.bf16.mxu0 %v1280_v18  ;;  %v1939_v18 = vor.u32 %v1938_v8, %v1935_v7  ;;  %v5156_v7 = vld [vmem:[%s6286_s1 + $0x478] sm:$0xff]  }
  0x90   : > { %4692 = vmatprep.mubr.bf16.mxu1 %v1407_v19  ;;  %v5687_v19 = vor.u32 %v1946_v11, %v1943_v9 }
  0x91   : > { %4659 = vmatpush3.bf16.msra.mxu0 %v5082_v16  ;;  %v1680_v16 = vor.u32 %v1678_v5, %v5619_v47  ;;  %v5151_v5 = vld [vmem:[%s6286_s1 + $0x438] sm:$0xff]  }
  0x92   : > { %4679 = vmatpush3.bf16.msra.mxu1 %v5083_v17  ;;  %4660 = vmatprep.subr.bf16.mxu0 %v5084_v20  ;;  %v5120_v17 = vld [vmem:[%s6286_s1 + $0x330] sm:$0xff]  }
  0x93   : > { %4680 = vmatprep.subr.bf16.mxu1 %v5085_v21 }
  0x95   : > { %4661 = vmatpush3.bf16.msra.mxu0 %v5084_v20  ;;  %v5121_v20 = vld [vmem:[%s6286_s1 + $0x370] sm:$0xff]  }
  0x96   : > { %4681 = vmatpush3.bf16.msra.mxu1 %v5085_v21  ;;  %4662 = vmatprep.subr.bf16.mxu0 %v5086_v22 }
  0x97   : > { %4682 = vmatprep.subr.bf16.mxu1 %v5087_v23 }
  0x99   : > { %4663 = vmatpush3.bf16.msra.mxu0 %v5086_v22  ;;  %v5122_v22 = vld [vmem:[%s6286_s1 + $0x328] sm:$0xff]  }
  0x9a   : > { %4683 = vmatpush3.bf16.msra.mxu1 %v5087_v23  ;;  %4664 = vmatprep.subr.bf16.mxu0 %v5088_v24  ;;  %v1948_v23 = vsel %vm594_vm2, %v1939_v18, %v5687_v19  ;;  %v5161_v18 = vld [vmem:[%s6286_s1 + $0x420] sm:$0xff]  }
  0x9b   : > { %4684 = vmatprep.subr.bf16.mxu1 %v5089_v25 }
  0x9d   : > { %4665 = vmatpush3.bf16.msra.mxu0 %v5088_v24  ;;  %v5123_v24 = vld [vmem:[%s6286_s1 + $0x368] sm:$0xff]  }
  0x9e   : > { %4685 = vmatpush3.bf16.msra.mxu1 %v5089_v25  ;;  %4666 = vmatprep.subr.bf16.mxu0 %v5090_v26  ;;  %v5124_v25 = vld [vmem:[%s6286_s1 + $0x320] sm:$0xff]  }
  0x9f   : > { %4686 = vmatprep.subr.bf16.mxu1 %v5091_v29 }
  0xa1   : > { %4667 = vmatpush3.bf16.msra.mxu0 %v5090_v26  ;;  %v5125_v26 = vld [vmem:[%s6286_s1 + $0x360] sm:$0xff]  }
  0xa2   : > { %4687 = vmatpush3.bf16.msra.mxu1 %v5091_v29  ;;  %4668 = vmatprep.subr.bf16.mxu0 %v5092_v30  ;;  %v5127_v29 = vld [vmem:[%s6286_s1 + $0x358] sm:$0xff]  }
  0xa3   : > { %4688 = vmatprep.subr.bf16.mxu1 %v5093_v34 }
  0xa5   : > { %4669 = vmatpush3.bf16.msra.mxu0 %v5092_v30  ;;  %v5128_v30 = vld [vmem:[%s6286_s1 + $0x310] sm:$0xff]  }
  0xa6   : > { %4689 = vmatpush3.bf16.msra.mxu1 %v5093_v34  ;;  %4670 = vmatprep.subr.bf16.mxu0 %v5094_v37  ;;  %v2052_v34 = vld [vmem:[%s5310_s10 + $0x8] sm:$0xc] }
  0xa7   : > { %4690 = vmatprep.subr.bf16.mxu1 %v5095_v38 }
  0xa9   : > { %4671 = vmatpush3.bf16.msra.mxu0 %v5094_v37  ;;  %v5133_v37 = vld [vmem:[%s6286_s1 + $0x340] sm:$0xff]  }
  0xaa   : > { %4691 = vmatpush3.bf16.msra.mxu1 %v5095_v38  ;;  %4696 = vmatprep.subr.bf16.mxu0 %v5096_v43  ;;  %v3967_v38 = vcombine.low %v2052_v34, %v5584_v28  ;;  %v5136_v28 = vld [vmem:[%s6286_s1 + $0x3b0] sm:$0xff]   ;;  %v2720_v34 = vld [vmem:[%s5310_s10 + $0xc] sm:$0xc] }
  0xab   : > { %4716 = vmatprep.subr.bf16.mxu1 %v5098_v44 }
  0xac   : > { %4673 = vmatmul.mubr.bf16.vlgmr.msra.gmra.mxu0 %v5545_v14  ;;  %v3867_v14 = vcombine.low %v5594_v32, %v1514_v6  ;;  %v5130_v32 = vld [vmem:[%s6286_s1 + $0x308] sm:$0xff]   ;;  %v2073_v41 = vrot.slane %v3967_v38, 2  ;;  %v2182_v6 = vld [vmem:[%s5310_s10 + $0x18] sm:$0x3] }
  0xad   : > { %4697 = vmatpush3.bf16.msra.mxu0 %v5096_v43  ;;  %4693 = vmatmul.mubr.bf16.vlgmr.msra.gmra.mxu1 %v1406_v10  ;;  %v1806_v10 = vrot.slane %v5601_v36, 1  ;;  %v2074_v43 = vrot.slane %v5663_v62, 2  ;;  %v5139_v36 = vld [vmem:[%s6286_s1 + $0x3e8] sm:$0xff]   ;;  %v3993_v11 = vcombine.low %v5791_v58, %v2182_v6  ;;  %v5186_v6 = vld [vmem:[%s6286_s1 + $0x480] sm:$0xff]  }
  0xae   : > { %4717 = vmatpush3.bf16.msra.mxu1 %v5098_v44  ;;  %4698 = vmatprep.subr.bf16.mxu0 %v5099_v45  ;;  %v2179_v44 = vld [vmem:[%s5310_s10 + $0xc] sm:$0xf] }
  0xaf   : > { %4718 = vmatprep.subr.bf16.mxu1 %v5100_v48  ;;  %4712 = vmatprep.mubr.bf16.mxu0 %v3866_v31  ;;  %v1807_v21 = vsel %vm466_vm1, %v1805_v15, %v1806_v10  ;;  %v5129_v31 = vld [vmem:[%s6286_s1 + $0x350] sm:$0xff]   ;;  %v2075_v47 = vsel %vm736_vm3, %v2073_v41, %v2074_v43  ;;  %v5160_v62 = vld [vmem:[%s6286_s1 + $0x468] sm:$0xff]  }
  0xb0   : > { %4732 = vmatprep.mubr.bf16.mxu1 %v1677_v42  ;;  %v5140_v42 = vld [vmem:[%s6286_s1 + $0x3a0] sm:$0xff]   ;;  %v5158_v15 = vld [vmem:[%s6286_s1 + $0x470] sm:$0xff]  }
  0xb1   : > { %4699 = vmatpush3.bf16.msra.mxu0 %v5099_v45  ;;  %v5744_v45 = vld [vmem:[%s5310_s10 + $0x10] sm:$0xf] }
  0xb2   : > { %4719 = vmatpush3.bf16.msra.mxu1 %v5100_v48  ;;  %4700 = vmatprep.subr.bf16.mxu0 %v5101_v49  ;;  %v3992_v48 = vcombine.low %v2179_v44, %v5744_v45  ;;  %v5172_v44 = vld [vmem:[%s6286_s1 + $0x4b8] sm:$0xff]  }
  0xb3   : > { %4720 = vmatprep.subr.bf16.mxu1 %v5102_v50 }
  0xb4   : > { %v2337_v59 = vshll.u32 %v3992_v48, 16 }
  0xb5   : > { %4701 = vmatpush3.bf16.msra.mxu0 %v5101_v49  ;;  %v5138_v49 = vld [vmem:[%s6286_s1 + $0x3a8] sm:$0xff]  }
  0xb6   : > { %4721 = vmatpush3.bf16.msra.mxu1 %v5102_v50  ;;  %4702 = vmatprep.subr.bf16.mxu0 %v5103_v51  ;;  %v5141_v50 = vld [vmem:[%s6286_s1 + $0x3e0] sm:$0xff]   ;;  %v2339_v2 = vrot.slane %v2337_v59, 1  ;;  %v2847_v59 = vld [vmem:[%s5310_s10 + $0x10] sm:$0xf] }
  0xb7   : > { %4722 = vmatprep.subr.bf16.mxu1 %v5104_v52 }
  0xb9   : > { %4703 = vmatpush3.bf16.msra.mxu0 %v5103_v51  ;;  %v5142_v51 = vld [vmem:[%s6286_s1 + $0x398] sm:$0xff]  }
  0xba   : > { %4723 = vmatpush3.bf16.msra.mxu1 %v5104_v52  ;;  %4704 = vmatprep.subr.bf16.mxu0 %v5105_v53  ;;  %v5143_v52 = vld [vmem:[%s6286_s1 + $0x3d8] sm:$0xff]  }
  0xbb   : > { %4724 = vmatprep.subr.bf16.mxu1 %v5106_v54 }
  0xbd   : > { %4705 = vmatpush3.bf16.msra.mxu0 %v5105_v53  ;;  %v5144_v53 = vld [vmem:[%s6286_s1 + $0x390] sm:$0xff]  }
  0xbe   : > { %4725 = vmatpush3.bf16.msra.mxu1 %v5106_v54  ;;  %4706 = vmatprep.subr.bf16.mxu0 %v5107_v56  ;;  %v5145_v54 = vld [vmem:[%s6286_s1 + $0x3d0] sm:$0xff]  }
  0xbf   : > { %4726 = vmatprep.subr.bf16.mxu1 %v5108_v57 }
  0xc1   : > { %4707 = vmatpush3.bf16.msra.mxu0 %v5107_v56  ;;  %v5146_v56 = vld [vmem:[%s6286_s1 + $0x388] sm:$0xff]  }
  0xc2   : > { %4727 = vmatpush3.bf16.msra.mxu1 %v5108_v57  ;;  %4708 = vmatprep.subr.bf16.mxu0 %v5109_v60  ;;  %v5147_v57 = vld [vmem:[%s6286_s1 + $0x3c8] sm:$0xff]  }
  0xc3   : > { %4728 = vmatprep.subr.bf16.mxu1 %v5110_v61 }
  0xc5   : > { %4709 = vmatpush3.bf16.msra.mxu0 %v5109_v60  ;;  %v5794_v60 = vcombine.low %v5791_v58, %v2313_v55  ;;  %v5179_v55 = vld [vmem:[%s6286_s1 + $0x4e0] sm:$0xff]  }
  0xc6   : > { %4729 = vmatpush3.bf16.msra.mxu1 %v5110_v61  ;;  %4710 = vmatprep.subr.bf16.mxu0 %v5111_v1  ;;  %v5148_v61 = vld [vmem:[%s6286_s1 + $0x380] sm:$0xff]  }
  0xc7   : > { %4730 = vmatprep.subr.bf16.mxu1 %v5112_v4  ;;  %v2342_v3 = vshll.u32 %v5794_v60, 16 }
  0xc9   : > { %4711 = vmatpush3.bf16.msra.mxu0 %v5111_v1  ;;  %v2335_v1 = vshrl.u32 %v3992_v48, 16  ;;  %v5814_v9 = vrot.slane %v2342_v3, 1  ;;  %v5185_v3 = vld [vmem:[%s6286_s1 + $0x4c8] sm:$0xff]  }
  0xca   : > { %4731 = vmatpush3.bf16.msra.mxu1 %v5112_v4  ;;  %4736 = vmatprep.subr.bf16.mxu0 %v5117_v12  ;;  %v5805_v4 = vcombine.low %v2452_v63, %v5744_v45 }
  0xcb   : > { %4756 = vmatprep.subr.bf16.mxu1 %v5119_v13  ;;  %v2340_v8 = vor.u32 %v2339_v2, %v2335_v1  ;;  %v5935_v1 = vld [vmem:[%s5310_s10 + $0x18] sm:$0xf]  ;;  %v2981_v2 = vld [vmem:[%s5310_s10 + $0x1c] sm:$0x7] }
  0xcc   : > { %4713 = vmatmul.mubr.bf16.vlgmr.msra.gmra.mxu0 %v3867_v14  ;;  %v5157_v14 = vld [vmem:[%s6286_s1 + $0x430] sm:$0xff]  }
  0xcd   : > { %4737 = vmatpush3.bf16.msra.mxu0 %v5117_v12  ;;  %4733 = vmatmul.mubr.bf16.vlgmr.msra.gmra.mxu1 %v1680_v16  ;;  %v2473_v12 = vrot.slane %v5805_v4, 1 }
  0xce   : > { %4757 = vmatpush3.bf16.msra.mxu1 %v5119_v13  ;;  %4738 = vmatprep.subr.bf16.mxu0 %v5120_v17  ;;  %v2474_v13 = vrot.slane %v5794_v60, 1 }
  0xcf   : > { %4758 = vmatprep.subr.bf16.mxu1 %v5121_v20  ;;  %4752 = vmatprep.mubr.bf16.mxu0 %v1807_v21  ;;  %v5164_v21 = vld [vmem:[%s6286_s1 + $0x458] sm:$0xff]  }
  0xd0   : > { %4772 = vmatprep.mubr.bf16.mxu1 %v1948_v23  ;;  %v2475_v16 = vsel %vm466_vm1, %v2473_v12, %v2474_v13  ;;  %v5165_v23 = vld [vmem:[%s6286_s1 + $0x410] sm:$0xff]   ;;  %v5188_v12 = vld [vmem:[%s6286_s1 + $0x538] sm:$0xff]  }
  0xd1   : > { %4739 = vmatpush3.bf16.msra.mxu0 %v5120_v17  ;;  %v5159_v17 = vld [vmem:[%s6286_s1 + $0x428] sm:$0xff]  }
  0xd2   : > { %4759 = vmatpush3.bf16.msra.mxu1 %v5121_v20  ;;  %4740 = vmatprep.subr.bf16.mxu0 %v5122_v22  ;;  %v5163_v20 = vld [vmem:[%s6286_s1 + $0x418] sm:$0xff]  }
  0xd3   : > { %4760 = vmatprep.subr.bf16.mxu1 %v5123_v24 }
  0xd5   : > { %4741 = vmatpush3.bf16.msra.mxu0 %v5122_v22  ;;  %v2579_v22 = vld [vmem:[%s5310_s10 + $0x18] sm:$0xf] }
  0xd6   : > { %4761 = vmatpush3.bf16.msra.mxu1 %v5123_v24  ;;  %4742 = vmatprep.subr.bf16.mxu0 %v5124_v25  ;;  %v5166_v24 = vld [vmem:[%s6286_s1 + $0x450] sm:$0xff]  }
  0xd7   : > { %4762 = vmatprep.subr.bf16.mxu1 %v5125_v26 }
  0xd9   : > { %4743 = vmatpush3.bf16.msra.mxu0 %v5124_v25  ;;  %v5858_v25 = vcombine.low %v5791_v58, %v2579_v22  ;;  %v5182_v58 = vld [vmem:[%s6286_s1 + $0x490] sm:$0xff]   ;;  %v5198_v22 = vld [vmem:[%s6286_s1 + $0x558] sm:$0xff]  }
  0xda   : > { %4763 = vmatpush3.bf16.msra.mxu1 %v5125_v26  ;;  %4744 = vmatprep.subr.bf16.mxu0 %v5126_v27  ;;  %v5167_v26 = vld [vmem:[%s6286_s1 + $0x408] sm:$0xff]  }
  0xdb   : > { %4764 = vmatprep.subr.bf16.mxu1 %v5127_v29 }
  0xdd   : > { %4745 = vmatpush3.bf16.msra.mxu0 %v5126_v27  ;;  %v5168_v27 = vld [vmem:[%s6286_s1 + $0x448] sm:$0xff]  }
  0xde   : > { %4765 = vmatpush3.bf16.msra.mxu1 %v5127_v29  ;;  %4746 = vmatprep.subr.bf16.mxu0 %v5128_v30  ;;  %v2601_v29 = vshrl.u32 %v5805_v4, 16 }
  0xdf   : > { %4766 = vmatprep.subr.bf16.mxu1 %v5129_v31 }
  0xe0   : > { %v2603_v38 = vrot.slane %v2601_v29, 1 }
  0xe1   : > { %4747 = vmatpush3.bf16.msra.mxu0 %v5128_v30  ;;  %v2604_v30 = vshll.u32 %v5805_v4, 16 }
  0xe2   : > { %4767 = vmatpush3.bf16.msra.mxu1 %v5129_v31  ;;  %4748 = vmatprep.subr.bf16.mxu0 %v5130_v32  ;;  %v2609_v31 = vshrl.u32 %v5858_v25, 16 }
  0xe3   : > { %4768 = vmatprep.subr.bf16.mxu1 %v5131_v33 }
  0xe5   : > { %4749 = vmatpush3.bf16.msra.mxu0 %v5130_v32  ;;  %v2612_v32 = vshll.u32 %v5858_v25, 16 }
  0xe6   : > { %4769 = vmatpush3.bf16.msra.mxu1 %v5131_v33  ;;  %4750 = vmatprep.subr.bf16.mxu0 %v5132_v35  ;;  %v5169_v33 = vld [vmem:[%s6286_s1 + $0x400] sm:$0xff]  }
  0xe7   : > { %4770 = vmatprep.subr.bf16.mxu1 %v5133_v37  ;;  %v2614_v41 = vrot.slane %v2612_v32, 2 }
  0xe9   : > { %4751 = vmatpush3.bf16.msra.mxu0 %v5132_v35  ;;  %v5170_v35 = vld [vmem:[%s6286_s1 + $0x440] sm:$0xff]  }
  0xea   : > { %4771 = vmatpush3.bf16.msra.mxu1 %v5133_v37  ;;  %4776 = vmatprep.subr.bf16.mxu0 %v5134_v39  ;;  %v2346_v37 = vshrl.u32 %v5794_v60, 16  ;;  %v5925_v60 = vld [vmem:[%s5310_s10 + $0x14] sm:$0xf] }
  0xeb   : > { %4796 = vmatprep.subr.bf16.mxu1 %v5135_v40  ;;  %v4118_v63 = vcombine.low %v2847_v59, %v5925_v60  ;;  %v5218_v59 = vld [vmem:[%s6286_s1 + $0x598] sm:$0xff]  }
  0xec   : > { %4753 = vmatmul.mubr.bf16.vlgmr.msra.gmra.mxu0 %v1806_v10  ;;  %v2345_v10 = vsel %vm228_vm0, %v2340_v8, %v5814_v9 }
  0xed   : > { %4777 = vmatpush3.bf16.msra.mxu0 %v5134_v39  ;;  %4773 = vmatmul.mubr.bf16.vlgmr.msra.gmra.mxu1 %v5687_v19  ;;  %v5162_v19 = vld [vmem:[%s6286_s1 + $0x460] sm:$0xff]   ;;  %v2606_v39 = vrot.slane %v2604_v30, 2  ;;  %v3005_v4 = vshll.u32 %v4118_v63, 16  ;;  %v3003_v8 = vshrl.u32 %v4118_v63, 16  ;;  %v5201_v30 = vld [vmem:[%s6286_s1 + $0x508] sm:$0xff]  }
  0xee   : > { %4797 = vmatpush3.bf16.msra.mxu1 %v5135_v40  ;;  %4778 = vmatprep.subr.bf16.mxu0 %v5136_v28  ;;  %v2611_v40 = vrot.slane %v2609_v31, 1  ;;  %v5202_v31 = vld [vmem:[%s6286_s1 + $0x548] sm:$0xff]  }
  0xef   : > { %4798 = vmatprep.subr.bf16.mxu1 %v5137_v46  ;;  %4792 = vmatprep.mubr.bf16.mxu0 %v2075_v47  ;;  %v2607_v47 = vor.u32 %v2606_v39, %v2603_v38  ;;  %v5204_v38 = vld [vmem:[%s6286_s1 + $0x540] sm:$0xff]  }
  0xf0   : > { %4812 = vmatprep.mubr.bf16.mxu1 %v3992_v48  ;;  %v5886_v48 = vor.u32 %v2614_v41, %v2611_v40  ;;  %v2850_v40 = vld [vmem:[%s5310_s10 + $0x1c] sm:$0x3] }
  0xf1   : > { %4779 = vmatpush3.bf16.msra.mxu0 %v5136_v28  ;;  %v5173_v28 = vld [vmem:[%s6286_s1 + $0x4f8] sm:$0xff]  }
  0xf2   : > { %4799 = vmatpush3.bf16.msra.mxu1 %v5137_v46  ;;  %4780 = vmatprep.subr.bf16.mxu0 %v5138_v49  ;;  %v2348_v46 = vor.u32 %v2346_v37, %v5814_v9  ;;  %v3007_v9 = vrot.slane %v3005_v4, 1  ;;  %v5203_v37 = vld [vmem:[%s6286_s1 + $0x500] sm:$0xff]  }
  0xf3   : > { %4800 = vmatprep.subr.bf16.mxu1 %v5139_v36  ;;  %v5224_v4 = vld [vmem:[%s6286_s1 + $0x580] sm:$0xff]  }
  0xf5   : > { %4781 = vmatpush3.bf16.msra.mxu0 %v5138_v49 }
  0xf6   : > { %4801 = vmatpush3.bf16.msra.mxu1 %v5139_v36  ;;  %4782 = vmatprep.subr.bf16.mxu0 %v5140_v42  ;;  %v5174_v36 = vld [vmem:[%s6286_s1 + $0x4b0] sm:$0xff]  }
  0xf7   : > { %4802 = vmatprep.subr.bf16.mxu1 %v5141_v50 }
  0xf9   : > { %4783 = vmatpush3.bf16.msra.mxu0 %v5140_v42  ;;  %v5175_v42 = vld [vmem:[%s6286_s1 + $0x4f0] sm:$0xff]  }
  0xfa   : > { %4803 = vmatpush3.bf16.msra.mxu1 %v5141_v50  ;;  %4784 = vmatprep.subr.bf16.mxu0 %v5142_v51  ;;  %v2616_v50 = vsel %vm594_vm2, %v2607_v47, %v5886_v48  ;;  %v5211_v47 = vld [vmem:[%s6286_s1 + $0x5f8] sm:$0xff]  }
  0xfb   : > { %4804 = vmatprep.subr.bf16.mxu1 %v5143_v52 }
  0xfd   : > { %4785 = vmatpush3.bf16.msra.mxu0 %v5142_v51 }
  0xfe   : > { %4805 = vmatpush3.bf16.msra.mxu1 %v5143_v52  ;;  %4786 = vmatprep.subr.bf16.mxu0 %v5144_v53  ;;  %v5176_v52 = vld [vmem:[%s6286_s1 + $0x4a8] sm:$0xff]  }
  0xff   : > { %4806 = vmatprep.subr.bf16.mxu1 %v5145_v54 }
 0x101   : > { %4787 = vmatpush3.bf16.msra.mxu0 %v5144_v53  ;;  %v5177_v53 = vld [vmem:[%s6286_s1 + $0x4e8] sm:$0xff]  }
 0x102   : > { %4807 = vmatpush3.bf16.msra.mxu1 %v5145_v54  ;;  %4788 = vmatprep.subr.bf16.mxu0 %v5146_v56  ;;  %v5178_v54 = vld [vmem:[%s6286_s1 + $0x4a0] sm:$0xff]  }
 0x103   : > { %4808 = vmatprep.subr.bf16.mxu1 %v5147_v57 }
 0x105   : > { %4789 = vmatpush3.bf16.msra.mxu0 %v5146_v56  ;;  %v5180_v56 = vld [vmem:[%s6286_s1 + $0x498] sm:$0xff]  }
 0x106   : > { %4809 = vmatpush3.bf16.msra.mxu1 %v5147_v57  ;;  %4790 = vmatprep.subr.bf16.mxu0 %v5148_v61  ;;  %v5181_v57 = vld [vmem:[%s6286_s1 + $0x4d8] sm:$0xff]  }
 0x107   : > { %4810 = vmatprep.subr.bf16.mxu1 %v5149_v0 }
 0x109   : > { %4791 = vmatpush3.bf16.msra.mxu0 %v5148_v61  ;;  %v5183_v61 = vld [vmem:[%s6286_s1 + $0x4d0] sm:$0xff]  }
 0x10a   : > { %4811 = vmatpush3.bf16.msra.mxu1 %v5149_v0  ;;  %4816 = vmatprep.subr.bf16.mxu0 %v5151_v5  ;;  %v5184_v0 = vld [vmem:[%s6286_s1 + $0x488] sm:$0xff]  }
 0x10b   : > { %4836 = vmatprep.subr.bf16.mxu1 %v5156_v7 }
 0x10c   : > { %4793 = vmatmul.mubr.bf16.vlgmr.msra.gmra.mxu0 %v2074_v43  ;;  %v4093_v43 = vcombine.low %v2720_v34, %v5744_v45  ;;  %v2742_v45 = vrot.slane %v5858_v25, 2  ;;  %v3247_v25 = vld [vmem:[%s5310_s10 + $0x1c] sm:$0xf] }
 0x10d   : > { %4817 = vmatpush3.bf16.msra.mxu0 %v5151_v5  ;;  %4813 = vmatmul.mubr.bf16.vlgmr.msra.gmra.mxu1 %v3993_v11  ;;  %v5942_v5 = vcombine.low %v5935_v1, %v2981_v2  ;;  %v5998_v29 = vcombine.low %v5935_v1, %v3247_v25  ;;  %v5223_v2 = vld [vmem:[%s6286_s1 + $0x5c8] sm:$0xff]  }
 0x10e   : > { %4837 = vmatpush3.bf16.msra.mxu1 %v5156_v7  ;;  %4818 = vmatprep.subr.bf16.mxu0 %v5157_v14  ;;  %v2741_v49 = vrot.slane %v4093_v43, 2  ;;  %v5187_v7 = vld [vmem:[%s6286_s1 + $0x4c0] sm:$0xff]  }
 0x10f   : > { %4838 = vmatprep.subr.bf16.mxu1 %v5158_v15  ;;  %4832 = vmatprep.mubr.bf16.mxu0 %v2345_v10  ;;  %v3010_v11 = vshll.u32 %v5942_v5, 16  ;;  %v5191_v10 = vld [vmem:[%s6286_s1 + $0x530] sm:$0xff]   ;;  %v3277_v34 = vshrl.u32 %v5998_v29, 16  ;;  %v3014_v39 = vshrl.u32 %v5942_v5, 16 }
 0x110   : > { %4852 = vmatprep.mubr.bf16.mxu1 %v2475_v16  ;;  %v2743_v51 = vsel %vm736_vm3, %v2741_v49, %v2742_v45  ;;  %v5192_v16 = vld [vmem:[%s6286_s1 + $0x570] sm:$0xff]  }
 0x111   : > { %4819 = vmatpush3.bf16.msra.mxu0 %v5157_v14  ;;  %v3008_v14 = vor.u32 %v3007_v9, %v3003_v8  ;;  %v5226_v8 = vld [vmem:[%s6286_s1 + $0x638] sm:$0xff]  }
 0x112   : > { %4839 = vmatpush3.bf16.msra.mxu1 %v5158_v15  ;;  %4820 = vmatprep.subr.bf16.mxu0 %v5159_v17  ;;  %v5957_v15 = vrot.slane %v3010_v11, 1  ;;  %v3410_v11 = vrot.slane %v5998_v29, 2 }
 0x113   : > { %4840 = vmatprep.subr.bf16.mxu1 %v5160_v62 }
 0x115   : > { %4821 = vmatpush3.bf16.msra.mxu0 %v5159_v17  ;;  %v3013_v17 = vsel %vm228_vm0, %v3008_v14, %v5957_v15  ;;  %v5229_v14 = vld [vmem:[%s6286_s1 + $0x620] sm:$0xff]  }
 0x116   : > { %4841 = vmatpush3.bf16.msra.mxu1 %v5160_v62  ;;  %4822 = vmatprep.subr.bf16.mxu0 %v5161_v18  ;;  %v5193_v62 = vld [vmem:[%s6286_s1 + $0x528] sm:$0xff]  }
 0x117   : > { %4842 = vmatprep.subr.bf16.mxu1 %v5162_v19 }
 0x119   : > { %4823 = vmatpush3.bf16.msra.mxu0 %v5161_v18  ;;  %v5194_v18 = vld [vmem:[%s6286_s1 + $0x568] sm:$0xff]  }
 0x11a   : > { %4843 = vmatpush3.bf16.msra.mxu1 %v5162_v19  ;;  %4824 = vmatprep.subr.bf16.mxu0 %v5163_v20  ;;  %v5195_v19 = vld [vmem:[%s6286_s1 + $0x520] sm:$0xff]  }
 0x11b   : > { %4844 = vmatprep.subr.bf16.mxu1 %v5164_v21 }
 0x11d   : > { %4825 = vmatpush3.bf16.msra.mxu0 %v5163_v20  ;;  %v5196_v20 = vld [vmem:[%s6286_s1 + $0x560] sm:$0xff]  }
 0x11e   : > { %4845 = vmatpush3.bf16.msra.mxu1 %v5164_v21  ;;  %4826 = vmatprep.subr.bf16.mxu0 %v5165_v23  ;;  %v5197_v21 = vld [vmem:[%s6286_s1 + $0x518] sm:$0xff]  }
 0x11f   : > { %4846 = vmatprep.subr.bf16.mxu1 %v5166_v24 }
 0x121   : > { %4827 = vmatpush3.bf16.msra.mxu0 %v5165_v23  ;;  %v5199_v23 = vld [vmem:[%s6286_s1 + $0x510] sm:$0xff]  }
 0x122   : > { %4847 = vmatpush3.bf16.msra.mxu1 %v5166_v24  ;;  %4828 = vmatprep.subr.bf16.mxu0 %v5167_v26  ;;  %v3120_v24 = vld [vmem:[%s5310_s10 + $0x10] sm:$0xe] }
 0x123   : > { %4848 = vmatprep.subr.bf16.mxu1 %v5168_v27 }
 0x125   : > { %4829 = vmatpush3.bf16.msra.mxu0 %v5167_v26  ;;  %v5200_v26 = vld [vmem:[%s6286_s1 + $0x550] sm:$0xff]  }
 0x126   : > { %4849 = vmatpush3.bf16.msra.mxu1 %v5168_v27  ;;  %4830 = vmatprep.subr.bf16.mxu0 %v5169_v33  ;;  %v4169_v27 = vcombine.low %v3120_v24, %v5925_v60 }
 0x127   : > { %4850 = vmatprep.subr.bf16.mxu1 %v5170_v35 }
 0x128   : > { %v3269_v32 = vshrl.u32 %v4169_v27, 16  ;;  %v3141_v49 = vrot.slane %v4169_v27, 1 }
 0x129   : > { %4831 = vmatpush3.bf16.msra.mxu0 %v5169_v33  ;;  %v3272_v33 = vshll.u32 %v4169_v27, 16  ;;  %v5243_v27 = vmov 0  }
 0x12a   : > { %4851 = vmatpush3.bf16.msra.mxu1 %v5170_v35  ;;  %4856 = vmatprep.subr.bf16.mxu0 %v5172_v44  ;;  %v3280_v35 = vshll.u32 %v5998_v29, 16  ;;  %v3271_v41 = vrot.slane %v3269_v32, 1  ;;  %174 = vst [vmem:[%s6128_s26 + $0x8] sm:$0xf] %v5243_v27  ;;  %176 = vst [vmem:[%s6128_s26 + $0x10] sm:$0xf] %v5243_v27 }
 0x12b   : > { %4876 = vmatprep.subr.bf16.mxu1 %v5173_v28  ;;  %v3274_v43 = vrot.slane %v3272_v33, 2  ;;  %177 = vst [vmem:[%s6128_s26 + $0x14] sm:$0xf] %v5243_v27  ;;  %178 = vst [vmem:[%s6128_s26 + $0x18] sm:$0xf] %v5243_v27 }
 0x12c   : > { %4833 = vmatmul.mubr.bf16.vlgmr.msra.gmra.mxu0 %v2348_v46  ;;  %v5209_v46 = vld [vmem:[%s6286_s1 + $0x5b8] sm:$0xff]   ;;  %179 = vst [vmem:[%s6128_s26 + $0x1c] sm:$0xf] %v5243_v27  ;;  %172 = vst [vmem:[%s6128_s26] sm:$0xf] %v5243_v27 }
 0x12d   : > { %4857 = vmatpush3.bf16.msra.mxu0 %v5172_v44  ;;  %4853 = vmatmul.mubr.bf16.vlgmr.msra.gmra.mxu1 %v2474_v13  ;;  %v5190_v13 = vld [vmem:[%s6286_s1 + $0x578] sm:$0xff]   ;;  %v3279_v44 = vrot.slane %v3277_v34, 1  ;;  %173 = vst [vmem:[%s6128_s26 + $0x4] sm:$0xf] %v5243_v27  ;;  %175 = vst [vmem:[%s6128_s26 + $0xc] sm:$0xf] %v5243_v27 }
 0x12e   : > { %4877 = vmatpush3.bf16.msra.mxu1 %v5173_v28  ;;  %4858 = vmatprep.subr.bf16.mxu0 %v5174_v36  ;;  %v3282_v28 = vrot.slane %v3280_v35, 2 }
 0x12f   : > { %4878 = vmatprep.subr.bf16.mxu1 %v5175_v42  ;;  %4872 = vmatprep.mubr.bf16.mxu0 %v2616_v50 }
 0x130   : > { %4892 = vmatprep.mubr.bf16.mxu1 %v2743_v51  ;;  %v6025_v50 = vor.u32 %v3282_v28, %v3279_v44  ;;  %v5212_v51 = vld [vmem:[%s6286_s1 + $0x5b0] sm:$0xff]  }
 0x131   : > { %4859 = vmatpush3.bf16.msra.mxu0 %v5174_v36  ;;  %v3016_v36 = vor.u32 %v3014_v39, %v5957_v15  ;;  %v5231_v15 = vld [vmem:[%s6286_s1 + $0x610] sm:$0xff]  }
 0x132   : > { %4879 = vmatpush3.bf16.msra.mxu1 %v5175_v42  ;;  %4860 = vmatprep.subr.bf16.mxu0 %v5176_v52  ;;  %v3275_v42 = vor.u32 %v3274_v43, %v3271_v41 }
 0x133   : > { %4880 = vmatprep.subr.bf16.mxu1 %v5177_v53 }
 0x135   : > { %4861 = vmatpush3.bf16.msra.mxu0 %v5176_v52  ;;  %v5213_v52 = vld [vmem:[%s6286_s1 + $0x5f0] sm:$0xff]  }
 0x136   : > { %4881 = vmatpush3.bf16.msra.mxu1 %v5177_v53  ;;  %4862 = vmatprep.subr.bf16.mxu0 %v5178_v54 }
 0x137   : > { %4882 = vmatprep.subr.bf16.mxu1 %v5179_v55 }
 0x139   : > { %4863 = vmatpush3.bf16.msra.mxu0 %v5178_v54  ;;  %v3284_v54 = vsel %vm594_vm2, %v3275_v42, %v6025_v50 }
 0x13a   : > { %4883 = vmatpush3.bf16.msra.mxu1 %v5179_v55  ;;  %4864 = vmatprep.subr.bf16.mxu0 %v5180_v56  ;;  %v5214_v55 = vld [vmem:[%s6286_s1 + $0x5a8] sm:$0xff]  }
 0x13b   : > { %4884 = vmatprep.subr.bf16.mxu1 %v5181_v57 }
 0x13d   : > { %4865 = vmatpush3.bf16.msra.mxu0 %v5180_v56  ;;  %v5215_v56 = vld [vmem:[%s6286_s1 + $0x5e8] sm:$0xff]  }
 0x13e   : > { %4885 = vmatpush3.bf16.msra.mxu1 %v5181_v57  ;;  %4866 = vmatprep.subr.bf16.mxu0 %v5182_v58  ;;  %v5216_v57 = vld [vmem:[%s6286_s1 + $0x5a0] sm:$0xff]  }
 0x13f   : > { %4886 = vmatprep.subr.bf16.mxu1 %v5183_v61 }
 0x141   : > { %4867 = vmatpush3.bf16.msra.mxu0 %v5182_v58  ;;  %v5217_v58 = vld [vmem:[%s6286_s1 + $0x5e0] sm:$0xff]  }
 0x142   : > { %4887 = vmatpush3.bf16.msra.mxu1 %v5183_v61  ;;  %4868 = vmatprep.subr.bf16.mxu0 %v5184_v0  ;;  %v5219_v61 = vld [vmem:[%s6286_s1 + $0x5d8] sm:$0xff]  }
 0x143   : > { %4888 = vmatprep.subr.bf16.mxu1 %v5185_v3 }
 0x145   : > { %4869 = vmatpush3.bf16.msra.mxu0 %v5184_v0  ;;  %v5221_v0 = vld [vmem:[%s6286_s1 + $0x5d0] sm:$0xff]  }
 0x146   : > { %4889 = vmatpush3.bf16.msra.mxu1 %v5185_v3  ;;  %4870 = vmatprep.subr.bf16.mxu0 %v5186_v6  ;;  %v3388_v3 = vld [vmem:[%s5310_s10 + $0x10] sm:$0xc] }
 0x147   : > { %4890 = vmatprep.subr.bf16.mxu1 %v5187_v7 }
 0x149   : > { %4871 = vmatpush3.bf16.msra.mxu0 %v5186_v6  ;;  %v5225_v6 = vld [vmem:[%s6286_s1 + $0x5c0] sm:$0xff]  }
 0x14a   : > { %4891 = vmatpush3.bf16.msra.mxu1 %v5187_v7  ;;  %4896 = vmatprep.subr.bf16.mxu0 %v5188_v12  ;;  %v4219_v7 = vcombine.low %v3388_v3, %v5925_v60 }
 0x14b   : > { %4916 = vmatprep.subr.bf16.mxu1 %v5190_v13 }
 0x14c   : > { %4873 = vmatmul.mubr.bf16.vlgmr.msra.gmra.mxu0 %v5886_v48  ;;  %v4119_v48 = vcombine.low %v5935_v1, %v2850_v40  ;;  %v5222_v1 = vld [vmem:[%s6286_s1 + $0x588] sm:$0xff]   ;;  %v3409_v9 = vrot.slane %v4219_v7, 2 }
 0x14d   : > { %4897 = vmatpush3.bf16.msra.mxu0 %v5188_v12  ;;  %4893 = vmatmul.mubr.bf16.vlgmr.msra.gmra.mxu1 %v2742_v45  ;;  %v3142_v45 = vrot.slane %v5942_v5, 1  ;;  %v5227_v12 = vld [vmem:[%s6286_s1 + $0x630] sm:$0xff]   ;;  %v5230_v5 = vld [vmem:[%s6286_s1 + $0x618] sm:$0xff]  }
 0x14e   : > { %4917 = vmatpush3.bf16.msra.mxu1 %v5190_v13  ;;  %4898 = vmatprep.subr.bf16.mxu0 %v5191_v10  ;;  %v3411_v60 = vsel %vm736_vm3, %v3409_v9, %v3410_v11  ;;  %v5228_v13 = vld [vmem:[%s6286_s1 + $0x628] sm:$0xff]  }
 0x14f   : > { %4918 = vmatprep.subr.bf16.mxu1 %v5192_v16  ;;  %4912 = vmatprep.mubr.bf16.mxu0 %v4118_v63  ;;  %v3143_v53 = vsel %vm466_vm1, %v3141_v49, %v3142_v45  ;;  %v5220_v63 = vld [vmem:[%s6286_s1 + $0x590] sm:$0xff]  }
 0x150   : > { %4932 = vmatprep.mubr.bf16.mxu1 %v3013_v17  ;;  %v6105_v17 = vpop.f32.mrf.mxu0 }
 0x151   : > { %4899 = vmatpush3.bf16.msra.mxu0 %v5191_v10  ;;  %v5232_v10 = vld [vmem:[%s6286_s1 + $0x608] sm:$0xff]  }
 0x152   : > { %4919 = vmatpush3.bf16.msra.mxu1 %v5192_v16  ;;  %4900 = vmatprep.subr.bf16.mxu0 %v5193_v62  ;;  %v5233_v16 = vld [vmem:[%s6286_s1 + $0x600] sm:$0xff]  }
 0x153   : > { %4920 = vmatprep.subr.bf16.mxu1 %v5194_v18 }
 0x155   : > { %4901 = vmatpush3.bf16.msra.mxu0 %v5193_v62  ;;  %v6107_v62 = vpop.f32.mrf.mxu1 }
 0x156   : > { %4921 = vmatpush3.bf16.msra.mxu1 %v5194_v18  ;;  %4902 = vmatprep.subr.bf16.mxu0 %v5195_v19  ;;  %v6109_v18 = vpop.f32.mrf.mxu0 }
 0x157   : > { %4922 = vmatprep.subr.bf16.mxu1 %v5196_v20 }
 0x159   : > { %4903 = vmatpush3.bf16.msra.mxu0 %v5195_v19  ;;  %v6111_v19 = vpop.f32.mrf.mxu1 }
 0x15a   : > { %4923 = vmatpush3.bf16.msra.mxu1 %v5196_v20  ;;  %4904 = vmatprep.subr.bf16.mxu0 %v5197_v21  ;;  %v6113_v20 = vpop.f32.mrf.mxu0 }
 0x15b   : > { %4924 = vmatprep.subr.bf16.mxu1 %v5198_v22 }
 0x15d   : > { %4905 = vmatpush3.bf16.msra.mxu0 %v5197_v21  ;;  %v6115_v21 = vpop.f32.mrf.mxu1 }
 0x15e   : > { %4925 = vmatpush3.bf16.msra.mxu1 %v5198_v22  ;;  %4906 = vmatprep.subr.bf16.mxu0 %v5199_v23  ;;  %v6117_v22 = vpop.f32.mrf.mxu0 }
 0x15f   : > { %4926 = vmatprep.subr.bf16.mxu1 %v5200_v26  ;;  %v6121_v24 = vpop.f32.mrf.mxu1 }
 0x161   : > { %4907 = vmatpush3.bf16.msra.mxu0 %v5199_v23  ;;  %v6119_v23 = vpop.f32.mrf.mxu0 }
 0x162   : > { %4927 = vmatpush3.bf16.msra.mxu1 %v5200_v26  ;;  %4908 = vmatprep.subr.bf16.mxu0 %v5201_v30  ;;  %v6132_v26 = vpop.f32.mrf.mxu1 }
 0x163   : > { %4928 = vmatprep.subr.bf16.mxu1 %v5202_v31  ;;  %v6130_v25 = vpop.f32.mrf.mxu0 }
 0x165   : > { %4909 = vmatpush3.bf16.msra.mxu0 %v5201_v30  ;;  %v4555_v29 = vpop.f32.mrf.mxu0  ;;  %v696_v30 = vpop.f32.mrf.mxu1 }
 0x166   : > { %4929 = vmatpush3.bf16.msra.mxu1 %v5202_v31  ;;  %4910 = vmatprep.subr.bf16.mxu0 %v5203_v37 }
 0x167   : > { %4930 = vmatprep.subr.bf16.mxu1 %v5204_v38  ;;  %v557_v31 = vpop.f32.mrf.mxu0  ;;  %v4575_v32 = vpop.f32.mrf.mxu1 }
 0x169   : > { %4911 = vmatpush3.bf16.msra.mxu0 %v5203_v37  ;;  %v4594_v33 = vpop.f32.mrf.mxu0  ;;  %v699_v34 = vpop.f32.mrf.mxu1 }
 0x16a   : > { %4931 = vmatpush3.bf16.msra.mxu1 %v5204_v38  ;;  %4936 = vmatprep.subr.bf16.mxu0 %v5209_v46 }
 0x16b   : > { %4956 = vmatprep.subr.bf16.mxu1 %v5211_v47  ;;  %v824_v35 = vpop.f32.mrf.mxu0  ;;  %v4614_v37 = vpop.f32.mrf.mxu1 }
 0x16c   : > { %4913 = vmatmul.mubr.bf16.vlgmr.msra.gmra.mxu0 %v4119_v48 }
 0x16d   : > { %4937 = vmatpush3.bf16.msra.mxu0 %v5209_v46  ;;  %4933 = vmatmul.mubr.bf16.vlgmr.msra.gmra.mxu1 %v3016_v36  ;;  %v4595_v38 = vpop.f32.mrf.mxu0  ;;  %v958_v39 = vpop.f32.mrf.mxu1 }
 0x16e   : > { %4957 = vmatpush3.bf16.msra.mxu1 %v5211_v47  ;;  %4938 = vmatprep.subr.bf16.mxu0 %v5212_v51 }
 0x16f   : > { %4958 = vmatprep.subr.bf16.mxu1 %v5213_v52  ;;  %4952 = vmatprep.mubr.bf16.mxu0 %v3143_v53  ;;  %v827_v40 = vpop.f32.mrf.mxu0  ;;  %v6142_v41 = vpop.f32.mrf.mxu1 }
 0x170   : > { %4972 = vmatprep.mubr.bf16.mxu1 %v3284_v54 }
 0x171   : > { %4939 = vmatpush3.bf16.msra.mxu0 %v5212_v51  ;;  %v4634_v43 = vpop.f32.mrf.mxu0  ;;  %v6144_v44 = vpop.f32.mrf.mxu1 }
 0x172   : > { %4959 = vmatpush3.bf16.msra.mxu1 %v5213_v52  ;;  %4940 = vmatprep.subr.bf16.mxu0 %v5214_v55 }
 0x173   : > { %4960 = vmatprep.subr.bf16.mxu1 %v5215_v56  ;;  %v1097_v28 = vpop.f32.mrf.mxu0  ;;  %v6146_v46 = vpop.f32.mrf.mxu1 }
 0x175   : > { %4941 = vmatpush3.bf16.msra.mxu0 %v5214_v55  ;;  %v6148_v47 = vpop.f32.mrf.mxu0  ;;  %v6150_v48 = vpop.f32.mrf.mxu1 }
 0x176   : > { %4961 = vmatpush3.bf16.msra.mxu1 %v5215_v56  ;;  %4942 = vmatprep.subr.bf16.mxu0 %v5216_v57 }
 0x177   : > { %4962 = vmatprep.subr.bf16.mxu1 %v5217_v58  ;;  %v6152_v49 = vpop.f32.mrf.mxu0 }
 0x179   : > { %4943 = vmatpush3.bf16.msra.mxu0 %v5216_v57  ;;  %v6156_v36 = vpop.f32.mrf.mxu0 }
 0x17a   : > { %4963 = vmatpush3.bf16.msra.mxu1 %v5217_v58  ;;  %4944 = vmatprep.subr.bf16.mxu0 %v5218_v59 }
 0x17b   : > { %4964 = vmatprep.subr.bf16.mxu1 %v5219_v61 }
 0x17d   : > { %4945 = vmatpush3.bf16.msra.mxu0 %v5218_v59 }
 0x17e   : > { %4965 = vmatpush3.bf16.msra.mxu1 %v5219_v61  ;;  %4946 = vmatprep.subr.bf16.mxu0 %v5220_v63 }
 0x17f   : > { %4966 = vmatprep.subr.bf16.mxu1 %v5221_v0 }
 0x181   : > { %4947 = vmatpush3.bf16.msra.mxu0 %v5220_v63 }
 0x182   : > { %4967 = vmatpush3.bf16.msra.mxu1 %v5221_v0  ;;  %4948 = vmatprep.subr.bf16.mxu0 %v5222_v1 }
 0x183   : > { %4968 = vmatprep.subr.bf16.mxu1 %v5223_v2 }
 0x185   : > { %4949 = vmatpush3.bf16.msra.mxu0 %v5222_v1 }
 0x186   : > { %4969 = vmatpush3.bf16.msra.mxu1 %v5223_v2  ;;  %4950 = vmatprep.subr.bf16.mxu0 %v5224_v4 }
 0x187   : > { %4970 = vmatprep.subr.bf16.mxu1 %v5225_v6 }
 0x189   : > { %4951 = vmatpush3.bf16.msra.mxu0 %v5224_v4 }
 0x18a   : > { %4971 = vmatpush3.bf16.msra.mxu1 %v5225_v6  ;;  %4976 = vmatprep.subr.bf16.mxu0 %v5226_v8 }
 0x18c   : > { %4953 = vmatmul.mubr.bf16.vlgmr.msra.gmra.mxu0 %v3142_v45  ;;  %v6154_v45 = vpop.f32.mrf.mxu1 }
 0x18d   : > { %4977 = vmatpush3.bf16.msra.mxu0 %v5226_v8  ;;  %4973 = vmatmul.mubr.bf16.vlgmr.msra.gmra.mxu1 %v6025_v50  ;;  %v6160_v50 = vpop.f32.mrf.mxu0 }
 0x18e   : > { %4978 = vmatprep.subr.bf16.mxu0 %v5227_v12  ;;  %4992 = vmatprep.mubr.bf16.mxu0 %v3411_v60  ;;  %v6158_v42 = vpop.f32.mrf.mxu1 }
 0x18f   : > { %v6164_v52 = vpop.f32.mrf.mxu0 }
 0x190   : > { %v6162_v51 = vpop.f32.mrf.mxu1 }
 0x191   : > { %4979 = vmatpush3.bf16.msra.mxu0 %v5227_v12  ;;  %v6168_v54 = vpop.f32.mrf.mxu0 }
 0x192   : > { %4980 = vmatprep.subr.bf16.mxu0 %v5228_v13  ;;  %v6166_v53 = vpop.f32.mrf.mxu1 }
 0x193   : > { %v6172_v56 = vpop.f32.mrf.mxu0 }
 0x194   : > { %v6170_v55 = vpop.f32.mrf.mxu1 }
 0x195   : > { %4981 = vmatpush3.bf16.msra.mxu0 %v5228_v13  ;;  %v6176_v58 = vpop.f32.mrf.mxu0  ;;  %v439_v13 = vadd.f32 %v6107_v62, %v6105_v17  ;;  %v434_v17 = vadd.f32 %v6121_v24, %v6117_v22 }
 0x196   : > { %4982 = vmatprep.subr.bf16.mxu0 %v5229_v14  ;;  %v6174_v57 = vpop.f32.mrf.mxu1 }
 0x197   : > { %v6180_v61 = vpop.f32.mrf.mxu0 }
 0x198   : > { %v6178_v59 = vpop.f32.mrf.mxu1 }
 0x199   : > { %4983 = vmatpush3.bf16.msra.mxu0 %v5229_v14  ;;  %v6184_v0 = vpop.f32.mrf.mxu0 }
 0x19a   : > { %4984 = vmatprep.subr.bf16.mxu0 %v5230_v5  ;;  %v6182_v63 = vpop.f32.mrf.mxu1 }
 0x19c   : > { %v6186_v1 = vpop.f32.mrf.mxu1 }
 0x19d   : > { %4985 = vmatpush3.bf16.msra.mxu0 %v5230_v5 }
 0x19e   : > { %4986 = vmatprep.subr.bf16.mxu0 %v5231_v15  ;;  %v6190_v3 = vpop.f32.mrf.mxu1 }
 0x1a1   : > { %4987 = vmatpush3.bf16.msra.mxu0 %v5231_v15  ;;  %v431_v15 = vadd.f32 %v6111_v19, %v6109_v18 }
 0x1a2   : > { %4988 = vmatprep.subr.bf16.mxu0 %v5232_v10 }
 0x1a3   : > { %v569_v27 = vadd.f32 %v6130_v25, %v431_v15 }
 0x1a5   : > { %4989 = vmatpush3.bf16.msra.mxu0 %v5232_v10  ;;  %v571_v10 = vadd.f32 %v6119_v23, %v439_v13 }
 0x1a6   : > { %4990 = vmatprep.subr.bf16.mxu0 %v5233_v16 }
 0x1a7   : > { %v713_v62 = vadd.f32 %v6132_v26, %v571_v10 }
 0x1a9   : > { %4991 = vmatpush3.bf16.msra.mxu0 %v5233_v16  ;;  %v442_v16 = vadd.f32 %v6115_v21, %v6113_v20  ;;  %v841_v18 = vadd.f32 %v4594_v33, %v713_v62 }
 0x1ab   : > { %v975_v15 = vadd.f32 %v4614_v37, %v841_v18 }
 0x1ac   : > { %4993 = vmatmul.mubr.bf16.vlgmr.msra.gmra.mxu0 %v3410_v11  ;;  %v6188_v2 = vpop.f32.mrf.mxu0 }
 0x1ad   : > { %v6194_v6 = vpop.f32.mrf.mxu1  ;;  %v1114_v26 = vadd.f32 %v4634_v43, %v975_v15 }
 0x1ae   : > { %v6192_v4 = vpop.f32.mrf.mxu0 }
 0x1af   : > { %v6198_v8 = vpop.f32.mrf.mxu1 }
 0x1b0   : > { %v6196_v7 = vpop.f32.mrf.mxu0 }
 0x1b1   : > { %v6202_v11 = vpop.f32.mrf.mxu1 }
 0x1b2   : > { %v6200_v9 = vpop.f32.mrf.mxu0  ;;  %6289 = vst [vmem:[#allocation2_spill] sm:$0xff] %v6202_v11 }
 0x1b3   : > { %v6206_v60 = vpop.f32.mrf.mxu1 }
 0x1b4   : > { %6291 = vst [vmem:[#allocation4_spill] sm:$0xff] %v6206_v60 }
 0x1cc   : > { %v6204_v12 = vpop.f32.mrf.mxu0 }
 0x1cd   : > { %6290 = vst [vmem:[#allocation3_spill] sm:$0xff] %v6204_v12  ;;  %v6212_v5 = vpop.f32.mrf.mxu1  ;;  %v570_v12 = vadd.f32 %v557_v31, %v434_v17 }
 0x1ce   : > { %v6210_v14 = vpop.f32.mrf.mxu0  ;;  %6293 = vst [vmem:[#allocation6_spill] sm:$0xff] %v6212_v5  ;;  %v572_v5 = vadd.f32 %v4555_v29, %v442_v16 }
 0x1cf   : > { %6292 = vst [vmem:[#allocation5_spill] sm:$0xff] %v6210_v14  ;;  %v6222_v60 = vpop.f32.mrf.mxu1  ;;  %v711_v14 = vadd.f32 %v696_v30, %v569_v27  ;;  %v712_v13 = vadd.f32 %v699_v34, %v570_v12 }
 0x1d0   : > { %v6220_v11 = vpop.f32.mrf.mxu0  ;;  %6295 = vst [vmem:[#allocation8_spill] sm:$0xff] %v6222_v60  ;;  %v714_v20 = vadd.f32 %v4575_v32, %v572_v5  ;;  %v1241_v32 = vadd.f32 %v6146_v46, %v1114_v26 }
 0x1d1   : > { %6294 = vst [vmem:[#allocation7_spill] sm:$0xff] %v6220_v11  ;;  %v6229_v23 = vpop.f32.mrf.mxu1  ;;  %v839_v21 = vadd.f32 %v824_v35, %v711_v14  ;;  %v840_v24 = vadd.f32 %v827_v40, %v712_v13  ;;  %v6297_v13 = vld [vmem:[#allocation2_spill] sm:$0xff] }
 0x1d2   : > { %v6227_v19 = vpop.f32.mrf.mxu0  ;;  %v842_v60 = vadd.f32 %v4595_v38, %v714_v20 }
 0x1d3   : > { %v6233_v11 = vpop.f32.mrf.mxu1  ;;  %v973_v22 = vadd.f32 %v958_v39, %v839_v21  ;;  %v974_v10 = vadd.f32 %v6144_v44, %v840_v24  ;;  %v1382_v39 = vadd.f32 %v6156_v36, %v1241_v32  ;;  %v6299_v24 = vld [vmem:[#allocation4_spill] sm:$0xff] }
 0x1d4   : > { %v976_v31 = vadd.f32 %v6142_v41, %v842_v60  ;;  %v6296_v20 = vld [vmem:[#allocation3_spill] sm:$0xff] }
 0x1d5   : > { %v1112_v33 = vadd.f32 %v1097_v28, %v973_v22  ;;  %v1113_v38 = vadd.f32 %v6152_v49, %v974_v10  ;;  %v1509_v46 = vadd.f32 %v6162_v51, %v1382_v39  ;;  %v6300_v26 = vld [vmem:[#allocation6_spill] sm:$0xff] }
 0x1d6   : > { %v1115_v35 = vadd.f32 %v6148_v47, %v976_v31 }
 0x1d7   : > { %v1239_v37 = vadd.f32 %v6150_v48, %v1112_v33  ;;  %v1240_v44 = vadd.f32 %v6158_v42, %v1113_v38  ;;  %v1643_v49 = vadd.f32 %v6172_v56, %v1509_v46  ;;  %v6302_v32 = vld [vmem:[#allocation8_spill] sm:$0xff] }
 0x1d8   : > { %v1242_v40 = vadd.f32 %v6154_v45, %v1115_v35  ;;  %v6301_v31 = vld [vmem:[#allocation7_spill] sm:$0xff] }
 0x1d9   : > { %v1380_v43 = vadd.f32 %v6160_v50, %v1239_v37  ;;  %v1381_v48 = vadd.f32 %v6168_v54, %v1240_v44  ;;  %v1782_v51 = vadd.f32 %v6178_v59, %v1643_v49 }
 0x1da   : > { %v1383_v47 = vadd.f32 %v6164_v52, %v1242_v40 }
 0x1db   : > { %v1507_v60 = vadd.f32 %v6166_v53, %v1380_v43  ;;  %v1508_v42 = vadd.f32 %v6174_v57, %v1381_v48  ;;  %v1909_v54 = vadd.f32 %v6188_v2, %v1782_v51 }
 0x1dc   : > { %v1510_v45 = vadd.f32 %v6170_v55, %v1383_v47 }
 0x1dd   : > { %v1641_v50 = vadd.f32 %v6176_v58, %v1507_v60  ;;  %v1642_v53 = vadd.f32 %v6184_v0, %v1508_v42  ;;  %v2050_v57 = vadd.f32 %v6194_v6, %v1909_v54 }
 0x1de   : > { %v1644_v52 = vadd.f32 %v6180_v61, %v1510_v45 }
 0x1df   : > { %v1780_v27 = vadd.f32 %v6182_v63, %v1641_v50  ;;  %v1781_v62 = vadd.f32 %v6190_v3, %v1642_v53  ;;  %v2177_v2 = vadd.f32 %v6296_v20, %v2050_v57 }
 0x1e0   : > { %v1783_v55 = vadd.f32 %v6186_v1, %v1644_v52  ;;  %v6298_v1 = vld [vmem:[#allocation5_spill] sm:$0xff] }
 0x1e1   : > { %v1907_v58 = vadd.f32 %v6192_v4, %v1780_v27  ;;  %v1908_v0 = vadd.f32 %v6200_v9, %v1781_v62  ;;  %v2311_v6 = vadd.f32 %v6300_v26, %v2177_v2 }
 0x1e2   : > { %v1910_v59 = vadd.f32 %v6196_v7, %v1783_v55 }
 0x1e3   : > { %v2048_v63 = vadd.f32 %v6198_v8, %v1907_v58  ;;  %v2049_v3 = vadd.f32 %v6299_v24, %v1908_v0 }
 0x1e4   : > { %v2051_v15 = vadd.f32 %v6297_v13, %v1910_v59 }
 0x1e5   : > { %v2175_v22 = vadd.f32 %v6298_v1, %v2048_v63  ;;  %v2176_v9 = vadd.f32 %v6227_v19, %v2049_v3 }
 0x1e6   : > { %v2178_v7 = vadd.f32 %v6301_v31, %v2051_v15 }
 0x1e7   : > { %v2309_v8 = vadd.f32 %v6302_v32, %v2175_v22  ;;  %v2310_v43 = vadd.f32 %v6233_v11, %v2176_v9 }
 0x1e8   : > { %v2312_v37 = vadd.f32 %v6229_v23, %v2178_v7 }
 0x1ec   : > { %v6231_v25 = vpop.f32.mrf.mxu0 }
 0x1ed   : > { %v4854_v30 = vpop.f32.mrf.mxu1  ;;  %v2450_v35 = vadd.f32 %v6231_v25, %v2311_v6 }
 0x1ee   : > { %v2433_v29 = vpop.f32.mrf.mxu0 }
 0x1ef   : > { %v2560_v34 = vpop.f32.mrf.mxu1  ;;  %v2448_v38 = vadd.f32 %v2433_v29, %v2309_v8  ;;  %v2577_v44 = vadd.f32 %v4854_v30, %v2450_v35 }
 0x1f0   : > { %v4835_v14 = vpop.f32.mrf.mxu0 }
 0x1f1   : > { %v4855_v28 = vpop.f32.mrf.mxu1  ;;  %v2451_v46 = vadd.f32 %v4835_v14, %v2312_v37  ;;  %v2575_v47 = vadd.f32 %v2560_v34, %v2448_v38 }
 0x1f2   : > { %v2436_v41 = vpop.f32.mrf.mxu0 }
 0x1f3   : > { %v2563_v36 = vpop.f32.mrf.mxu1  ;;  %v2449_v60 = vadd.f32 %v2436_v41, %v2310_v43  ;;  %v2578_v50 = vadd.f32 %v4855_v28, %v2451_v46 }
 0x1f5   : > { %v2576_v19 = vadd.f32 %v2563_v36, %v2449_v60 }
 0x20c   : > { %v4874_v12 = vpop.f32.mrf.mxu0 }
 0x20d   : > { %v4894_v16 = vpop.f32.mrf.mxu1  ;;  %v2718_v48 = vadd.f32 %v4874_v12, %v2577_v44 }
 0x20e   : > { %v2701_v5 = vpop.f32.mrf.mxu0 }
 0x20f   : > { %v2828_v17 = vpop.f32.mrf.mxu1  ;;  %v2716_v42 = vadd.f32 %v2701_v5, %v2575_v47  ;;  %v2845_v52 = vadd.f32 %v4894_v16, %v2718_v48 }
 0x210   : > { %v4875_v56 = vpop.f32.mrf.mxu0 }
 0x211   : > { %v4895_v61 = vpop.f32.mrf.mxu1  ;;  %v2719_v25 = vadd.f32 %v4875_v56, %v2578_v50  ;;  %v2843_v23 = vadd.f32 %v2828_v17, %v2716_v42 }
 0x212   : > { %v2704_v18 = vpop.f32.mrf.mxu0 }
 0x213   : > { %v2831_v4 = vpop.f32.mrf.mxu1  ;;  %v2717_v29 = vadd.f32 %v2704_v18, %v2576_v19  ;;  %v2846_v11 = vadd.f32 %v4895_v61, %v2719_v25  ;;  %v4228_v61 = vld [vmem:[%s6287_s2] ss:$0 sm:$0xff] }
 0x215   : > { %v2844_v14 = vadd.f32 %v2831_v4, %v2717_v29 }
 0x22c   : > { %v4914_v21 = vpop.f32.mrf.mxu0 }
 0x22d   : > { %v4934_v10 = vpop.f32.mrf.mxu1  ;;  %v2979_v53 = vadd.f32 %v4914_v21, %v2845_v52 }
 0x22e   : > { %v2962_v33 = vpop.f32.mrf.mxu0 }
 0x22f   : > { %v3101_v40 = vpop.f32.mrf.mxu1  ;;  %v2977_v30 = vadd.f32 %v2962_v33, %v2843_v23  ;;  %v3118_v34 = vadd.f32 %v4934_v10, %v2979_v53 }
 0x230   : > { %v4915_v39 = vpop.f32.mrf.mxu0 }
 0x231   : > { %v4935_v45 = vpop.f32.mrf.mxu1  ;;  %v2980_v41 = vadd.f32 %v4915_v39, %v2846_v11  ;;  %v3116_v62 = vadd.f32 %v3101_v40, %v2977_v30 }
 0x232   : > { %v2965_v49 = vpop.f32.mrf.mxu0 }
 0x233   : > { %v3104_v27 = vpop.f32.mrf.mxu1  ;;  %v2978_v28 = vadd.f32 %v2965_v49, %v2844_v14  ;;  %v3119_v57 = vadd.f32 %v4935_v45, %v2980_v41 }
 0x235   : > { %v3117_v59 = vadd.f32 %v3104_v27, %v2978_v28 }
 0x24c   : > { %v4954_v51 = vpop.f32.mrf.mxu0 }
 0x24d   : > { %v4974_v55 = vpop.f32.mrf.mxu1  ;;  %v3245_v5 = vadd.f32 %v4954_v51, %v3118_v34 }
 0x24e   : > { %v3228_v54 = vpop.f32.mrf.mxu0 }
 0x24f   : > { %v3369_v58 = vpop.f32.mrf.mxu1  ;;  %v3243_v36 = vadd.f32 %v3228_v54, %v3116_v62  ;;  %v3386_v17 = vadd.f32 %v4974_v55, %v3245_v5 }
 0x250   : > { %v4955_v12 = vpop.f32.mrf.mxu0 }
 0x251   : > { %v4975_v56 = vpop.f32.mrf.mxu1  ;;  %v3246_v18 = vadd.f32 %v4955_v12, %v3119_v57  ;;  %v3384_v0 = vadd.f32 %v3369_v58, %v3243_v36 }
 0x252   : > { %v3231_v16 = vpop.f32.mrf.mxu0 }
 0x253   : > { %v3244_v20 = vadd.f32 %v3231_v16, %v3117_v59  ;;  %v3372_v21 = vpop.f32.mrf.mxu1  ;;  %v3387_v15 = vadd.f32 %v4975_v56, %v3246_v18 }
 0x255   : > { %v3385_v24 = vadd.f32 %v3372_v21, %v3244_v20 }
 0x26c   : > { %v4994_v63 = vpop.f32.mrf.mxu0 }
 0x26d   : > { %v3513_v2 = vadd.f32 %v4994_v63, %v3386_v17 }
 0x26e   : > { %v3496_v13 = vpop.f32.mrf.mxu0 }
 0x26f   : > { %v3524_v1 = vadd.f32 %v4228_v61, %v3513_v2  ;;  %v3511_v22 = vadd.f32 %v3496_v13, %v3384_v0 }
 0x270   : > { %v4995_v4 = vpop.f32.mrf.mxu0 }
 0x271   : > { %v3528_v3 = vmax.f32 %v3524_v1, 0.0  ;;  %v3514_v26 = vadd.f32 %v4995_v4, %v3387_v15  ;;  %v3522_v7 = vadd.f32 %v4228_v61, %v3511_v22 }
 0x272   : > { %v3499_v6 = vpop.f32.mrf.mxu0 }
 0x273   : > { %v4239_v31 = vpack.c.bf16 %v3528_v3, %v3528_v3  ;;  %v3525_v33 = vadd.f32 %v4228_v61, %v3514_v26  ;;  %v3512_v10 = vadd.f32 %v3499_v6, %v3385_v24  ;;  %v3526_v9 = vmax.f32 %v3522_v7, 0.0 }
 0x275   : > { %3548 = vst [vmem:[%s6128_s26 + $0x8] sm:$0xf] %v4239_v31  ;;  %v3529_v32 = vmax.f32 %v3525_v33, 0.0  ;;  %v3523_v8 = vadd.f32 %v4228_v61, %v3512_v10 }
 0x277   : > { %v4240_v35 = vpack.c.bf16 %v3529_v32, %v3529_v32  ;;  %v3527_v37 = vmax.f32 %v3523_v8, 0.0 }
 0x279   : > { %3549 = vst [vmem:[%s6128_s26 + $0xc] sm:$0x3] %v4240_v35  ;;  %v4244_v38 = vpack.c.bf16 %v3527_v37, %v3526_v9 }
 0x27b   : > { %4245 = vst [vmem:[%s6128_s26] sm:$0xff] %v4244_v38  }
 0x27c PF: > { %s13_s12 = sadd.s32 1, %s5241_s12  }
 0x27d   : > { %p10_p4 = scmp.ge.s32.totalorder %s13_s12, 4  }
 0x27f   :  { %12 = sbr.rel (!%p10_p4) target bundleno = 1 (0x1), region = 86 }

// kernel: nca_forward.5
= control target key start
LH: loop header
LB: loop body
LE: loop exit
PB: predicated region body
PF: predicated region fallthrough
CT: control target
= control target key end

     0   :  { %s10657_s21 = smov 0   ;;  %s13489_s0 = inlined_call_operand.vmem [shape: bf16[2,100,128], index: 0, kind: input, shape index: {}]   ;;  %s13490_s1 = inlined_call_operand.vmem [shape: bf16[2,100,128], index: 1, kind: input, shape index: {}]   ;;  %s13491_s2 = inlined_call_operand.vmem [shape: bf16[2,100,128], index: 2, kind: input, shape index: {}]   ;;  %s13492_s3 = inlined_call_operand.vmem [shape: bf16[2,100,128], index: 3, kind: input, shape index: {}]   ;;  %s13493_s4 = inlined_call_operand.vmem [shape: bf16[36,128,128], index: 4, kind: input, shape index: {}]   ;;  %s13494_s5 = inlined_call_operand.vmem [shape: f32[1,128], index: 5, kind: input, shape index: {}]   ;;  %s13495_s6 = inlined_call_operand.vmem [shape: bf16[2,100,128], index: 6, kind: output, shape index: {}]  }
   0x1 LB: > { %s7427_s22 = sadd.s32 4294967295, %s10617_s21   ;;  %p7431_p0 = scmp.ge.s32.totalorder %s10617_s21, 1  ;;  %s10617_s21 = sphi %s10657_s21, %s16_s21  }
   0x2   : > { %p242_p1 = scmp.lt.s32.totalorder %s10617_s21, 3 }
   0x4   : > { %p243_p2 = pnand %p7431_p0, %p242_p1 }
   0x5   : > { %p287_p3 = scmp.lt.s32.totalorder (!%p243_p2), %s7427_s22, 1 }
   0x6   : > { %246 = sbr.rel (%p243_p2) target bundleno = 964 (0x3c4), region = 44 }
   0xb   : > { %v10215_v0 = vld [vmem:[%s13493_s4 + $0x78] sm:$0xff]   ;;  %v10619_v1 = vmov 0.0   ;;  %v10217_v3 = vld [vmem:[%s13493_s4 + $0x70] sm:$0xff]   ;;  %vm10620_vm0 = vmmov 0   ;;  %v10219_v5 = vld [vmem:[%s13493_s4 + $0x68] sm:$0xff]   ;;  %s13497_s22 = smov (!%p287_p3, %s7427_s22), 1 }
   0xc   : > { %8907 = vmatprep.subr.bf16.mxu0 %v10619_v1  ;;  %8943 = vmatprep.subr.bf16.mxu1 %v10619_v1  ;;  %v10216_v2 = vld [vmem:[%s13493_s4 + $0x38] sm:$0xff]   ;;  %v10218_v4 = vld [vmem:[%s13493_s4 + $0x30] sm:$0xff]   ;;  %v10220_v6 = vld [vmem:[%s13493_s4 + $0x28] sm:$0xff]   ;;  %s10713_s19 = smul.u32 52, %s13497_s22  ;;  %vm1095_vm1 = vcmask 1046528   ;;  %vm3405_vm4 = vcmask 1045504  }
   0xd   : > { %8908 = vmatpush3.bf16.msra.mxu0 %v10215_v0  ;;  %8923 = vmatprep.mubr.msk.bf16.mxu0 %vm10620_vm0, %v10619_v1  ;;  %v10221_v7 = vld [vmem:[%s13493_s4 + $0x60] sm:$0xff]   ;;  %v10223_v9 = vld [vmem:[%s13493_s4 + $0x58] sm:$0xff]   ;;  %v10225_v11 = vld [vmem:[%s13493_s4 + $0x50] sm:$0xff]   ;;  %vm702_vm2 = vsmask.f32 7424  ;;  %vm5781_vm6 = vcmask 1044480  }
   0xe   : > { %8944 = vmatpush3.bf16.msra.mxu1 %v10216_v2  ;;  %8909 = vmatprep.subr.bf16.mxu0 %v10619_v1  ;;  %v10222_v8 = vld [vmem:[%s13493_s4 + $0x20] sm:$0xff]   ;;  %v10224_v10 = vld [vmem:[%s13493_s4 + $0x18] sm:$0xff]   ;;  %v10226_v12 = vld [vmem:[%s13493_s4 + $0x10] sm:$0xff]   ;;  %s10730_s29 = scalar_lea.vmem %s13490_s1, %s10713_s19  ;;  %s10739_s10 = scalar_lea.vmem %s13489_s0, %s10713_s19  ;;  %vm2957_vm3 = vsmask.f32 6400 }
   0xf   : > { %8945 = vmatprep.subr.bf16.mxu1 %v10619_v1  ;;  %8959 = vmatprep.mubr.msk.bf16.mxu1 %vm10620_vm0, %v10619_v1  ;;  %v10227_v13 = vld [vmem:[%s13493_s4 + $0x48] sm:$0xff]   ;;  %v10229_v15 = vld [vmem:[%s13493_s4 + $0x40] sm:$0xff]   ;;  %v10235_v23 = vld [vmem:[%s13493_s4 + $0xb8] sm:$0xff]   ;;  %s10953_s20 = scalar_lea.vmem %s13491_s2, %s10713_s19  ;;  %s10965_s27 = scalar_lea.vmem %s13492_s3, %s10713_s19  ;;  %vm5360_vm5 = vsmask.f32 5376 }
  0x10   : > { %v10228_v14 = vld [vmem:[%s13493_s4 + $0x8] sm:$0xff]   ;;  %v352_v16 = vld [vmem:[%s10730_s29] sm:$0xf]  ;;  %v353_v18 = vld [vmem:[%s10730_s29 + $0x4] sm:$0xf]  ;;  %s13383_s8 = scalar_lea.vmem %s13495_s6, %s10713_s19 }
  0x11   : > { %8910 = vmatpush3.bf16.msra.mxu0 %v10217_v3  ;;  %v10230_v17 = vld [vmem:[%s13493_s4] sm:$0xff]   ;;  %v10755_v21 = vcombine.low %v352_v16, %v353_v18  ;;  %v10236_v24 = vld [vmem:[%s13493_s4 + $0xf8] sm:$0xff]   ;;  %v10237_v25 = vld [vmem:[%s13493_s4 + $0xb0] sm:$0xff]  }
  0x12   : > { %8946 = vmatpush3.bf16.msra.mxu1 %v10218_v4  ;;  %8911 = vmatprep.subr.bf16.mxu0 %v10619_v1  ;;  %v326_v19 = vld [vmem:[%s10739_s10] sm:$0xf]  ;;  %v327_v20 = vld [vmem:[%s10739_s10 + $0x4] sm:$0xf]  ;;  %v10240_v26 = vld [vmem:[%s13493_s4 + $0xf0] sm:$0xff]  }
  0x13   : > { %8947 = vmatprep.subr.bf16.mxu1 %v10619_v1  ;;  %v10757_v22 = vcombine.low %v326_v19, %v327_v20  ;;  %v10782_v27 = vld [vmem:[%s10730_s29 + $0x8] sm:$0xff]   ;;  %v1074_v31 = vld [vmem:[%s10739_s10] sm:$0xe]  ;;  %v10811_v35 = vld [vmem:[%s10730_s29 + $0x10] sm:$0xff]   ;;  %v902_v2 = vshll.u32 %v10755_v21, 16 }
  0x14   : > { %v10785_v28 = vld [vmem:[%s10739_s10 + $0x8] sm:$0xff]   ;;  %v1241_v32 = vld [vmem:[%s10730_s29] sm:$0xe]  ;;  %v10814_v36 = vld [vmem:[%s10739_s10 + $0x10] sm:$0xff]   ;;  %v7545_v37 = vcombine.low %v1074_v31, %v327_v20  ;;  %v1263_v47 = vrot.slane %v10782_v27, 1  ;;  %v1265_v53 = vrot.slane %v10811_v35, 1 }
  0x15   : > { %8912 = vmatpush3.bf16.msra.mxu0 %v10219_v5  ;;  %v10241_v29 = vld [vmem:[%s13493_s4 + $0xa8] sm:$0xff]   ;;  %v10245_v33 = vld [vmem:[%s13493_s4 + $0xa0] sm:$0xff]   ;;  %v10247_v38 = vld [vmem:[%s13493_s4 + $0x98] sm:$0xff]   ;;  %v7570_v39 = vcombine.low %v1241_v32, %v353_v18  ;;  %v1097_v45 = vrot.slane %v10785_v28, 1  ;;  %v1099_v50 = vrot.slane %v10814_v36, 1  ;;  %v706_v59 = vshll.u32 %v10757_v22, 16 }
  0x16   : > { %8948 = vmatpush3.bf16.msra.mxu1 %v10220_v6  ;;  %8913 = vmatprep.subr.bf16.mxu0 %v10619_v1  ;;  %v10242_v30 = vld [vmem:[%s13493_s4 + $0xe8] sm:$0xff]   ;;  %v10246_v34 = vld [vmem:[%s13493_s4 + $0xe0] sm:$0xff]   ;;  %v10248_v40 = vld [vmem:[%s13493_s4 + $0xd8] sm:$0xff]   ;;  %v1096_v41 = vrot.slane %v7545_v37, 1  ;;  %v10877_v61 = vsel %vm1095_vm1, %v1263_v47, %v1265_v53  ;;  %v704_v6 = vshrl.u32 %v10757_v22, 16  ;;  %v715_v18 = vshrl.u32 %v10785_v28, 16 }
  0x17   : > { %8949 = vmatprep.subr.bf16.mxu1 %v10619_v1  ;;  %v10251_v42 = vld [vmem:[%s13493_s4 + $0x90] sm:$0xff]   ;;  %v1262_v43 = vrot.slane %v7570_v39, 1  ;;  %v10840_v46 = vld [vmem:[%s10730_s29 + $0x18] sm:$0xff]   ;;  %v10253_v51 = vld [vmem:[%s13493_s4 + $0x88] sm:$0xff]   ;;  %v10867_v57 = vsel %vm1095_vm1, %v1097_v45, %v1099_v50  ;;  %v911_v19 = vshrl.u32 %v10782_v27, 16  ;;  %v723_v32 = vshrl.u32 %v10814_v36, 16 }
  0x18   : > { %v10252_v44 = vld [vmem:[%s13493_s4 + $0xd0] sm:$0xff]   ;;  %v10845_v48 = vld [vmem:[%s10739_s10 + $0x18] sm:$0xff]   ;;  %v10848_v49 = vsel %vm1095_vm1, %v1096_v41, %v1097_v45  ;;  %v10860_v54 = vld [vmem:[%s10730_s29 + $0x20] sm:$0xf]  ;;  %v1267_v62 = vrot.slane %v10840_v46, 1 }
  0x19   : > { %8914 = vmatpush3.bf16.msra.mxu0 %v10221_v7  ;;  %v10856_v52 = vsel %vm1095_vm1, %v1262_v43, %v1263_v47  ;;  %v361_v55 = vld [vmem:[%s10730_s29 + $0x24] sm:$0x7]  ;;  %v10258_v56 = vld [vmem:[%s13493_s4 + $0xc8] sm:$0xff]   ;;  %v1101_v58 = vrot.slane %v10845_v48, 1  ;;  %v10873_v60 = vld [vmem:[%s10739_s10 + $0x20] sm:$0xf] }
  0x1a   : > { %8950 = vmatpush3.bf16.msra.mxu1 %v10222_v8  ;;  %8915 = vmatprep.subr.bf16.mxu0 %v10619_v1  ;;  %v335_v63 = vld [vmem:[%s10739_s10 + $0x24] sm:$0x7]  ;;  %v10898_v4 = vsel %vm1095_vm1, %v1265_v53, %v1267_v62  ;;  %v708_v7 = vrot.slane %v706_v59, 1  ;;  %v7457_v8 = vcombine.low %v10860_v54, %v361_v55  ;;  %v10264_v31 = vld [vmem:[%s13493_s4 + $0x170] sm:$0xff]   ;;  %v727_v39 = vshll.u32 %v10845_v48, 16 }
  0x1b   : > { %8951 = vmatprep.subr.bf16.mxu1 %v10619_v1  ;;  %v10887_v0 = vsel %vm1095_vm1, %v1099_v50, %v1101_v58  ;;  %v10259_v3 = vld [vmem:[%s13493_s4 + $0x80] sm:$0xff]  }
  0x1c   : > { %v10260_v5 = vld [vmem:[%s13493_s4 + $0xc0] sm:$0xff]  }
  0x1d   : > { %8916 = vmatpush3.bf16.msra.mxu0 %v10223_v9  ;;  %v7470_v9 = vcombine.low %v10873_v60, %v335_v63  ;;  %v878_v41 = vld [vmem:[%s10730_s29 + $0x24] sm:$0xf]  ;;  %v927_v63 = vshrl.u32 %v10840_v46, 16 }
  0x1e   : > { %8952 = vmatpush3.bf16.msra.mxu1 %v10224_v10  ;;  %8917 = vmatprep.subr.bf16.mxu0 %v10619_v1  ;;  %v711_v10 = vshll.u32 %v10785_v28, 16  ;;  %v10267_v45 = vld [vmem:[%s13493_s4 + $0x120] sm:$0xff]   ;;  %v10976_v47 = vcombine.low %v10860_v54, %v878_v41  ;;  %v731_v54 = vshrl.u32 %v10845_v48, 16  ;;  %v11175_v41 = vld [vmem:[%s10953_s20 + $0x8] sm:$0xff]  }
  0x1f   : > { %8953 = vmatprep.subr.bf16.mxu1 %v10619_v1  ;;  %v10268_v53 = vld [vmem:[%s13493_s4 + $0x160] sm:$0xff]  }
  0x21   : > { %8918 = vmatpush3.bf16.msra.mxu0 %v10225_v11  ;;  %v907_v11 = vshll.u32 %v10782_v27, 16 }
  0x22   : > { %8954 = vmatpush3.bf16.msra.mxu1 %v10226_v12  ;;  %8919 = vmatprep.subr.bf16.mxu0 %v10619_v1  ;;  %v900_v12 = vshrl.u32 %v10755_v21, 16 }
  0x23   : > { %8955 = vmatprep.subr.bf16.mxu1 %v10619_v1  ;;  %v909_v16 = vrot.slane %v907_v11, 1 }
  0x25   : > { %8920 = vmatpush3.bf16.msra.mxu0 %v10227_v13  ;;  %v904_v13 = vrot.slane %v902_v2, 1  ;;  %v931_v2 = vshll.u32 %v10976_v47, 16 }
  0x26   : > { %8956 = vmatpush3.bf16.msra.mxu1 %v10228_v14  ;;  %8921 = vmatprep.subr.bf16.mxu0 %v10619_v1  ;;  %v709_v14 = vor.u32 %v708_v7, %v704_v6  ;;  %v10271_v7 = vld [vmem:[%s13493_s4 + $0x110] sm:$0xff]  }
  0x27   : > { %8957 = vmatprep.subr.bf16.mxu1 %v10619_v1 }
  0x29   : > { %8922 = vmatpush3.bf16.msra.mxu0 %v10229_v15  ;;  %v713_v15 = vrot.slane %v711_v10, 1  ;;  %v10272_v10 = vld [vmem:[%s13493_s4 + $0x150] sm:$0xff]  }
  0x2a   : > { %8958 = vmatpush3.bf16.msra.mxu1 %v10230_v17  ;;  %8979 = vmatprep.subr.bf16.mxu0 %v10619_v1  ;;  %v905_v17 = vor.u32 %v904_v13, %v900_v12  ;;  %v10273_v13 = vld [vmem:[%s13493_s4 + $0x108] sm:$0xff]  }
  0x2b   : > { %9015 = vmatprep.subr.bf16.mxu1 %v10619_v1  ;;  %v714_v20 = vsel %vm702_vm2, %v709_v14, %v713_v15  ;;  %v10274_v14 = vld [vmem:[%s13493_s4 + $0x148] sm:$0xff]  }
  0x2c   : > { %8924 = vmatmul.mubr.bf16.vlgmr.msra.gmra.mxu0 %v10755_v21  ;;  %v10261_v21 = vld [vmem:[%s13493_s4 + $0x138] sm:$0xff]  }
  0x2d   : > { %8960 = vmatmul.mubr.bf16.vlgmr.msra.gmra.mxu1 %v10757_v22  ;;  %8980 = vmatpush3.bf16.msra.mxu0 %v10235_v23  ;;  %v719_v22 = vshll.u32 %v10814_v36, 16  ;;  %v910_v23 = vsel %vm702_vm2, %v905_v17, %v909_v16  ;;  %v10275_v17 = vld [vmem:[%s13493_s4 + $0x100] sm:$0xff]  }
  0x2e   : > { %9016 = vmatpush3.bf16.msra.mxu1 %v10236_v24  ;;  %8981 = vmatprep.subr.bf16.mxu0 %v10619_v1  ;;  %v10262_v24 = vld [vmem:[%s13493_s4 + $0x178] sm:$0xff]  }
  0x2f   : > { %8927 = vmatprep.mubr.msk.bf16.mxu0 %vm10620_vm0, %v10619_v1  ;;  %8963 = vmatprep.mubr.msk.bf16.mxu1 %vm10620_vm0, %v10619_v1 }
  0x30   : > { %9017 = vmatprep.subr.bf16.mxu1 %v10619_v1 }
  0x31   : > { %8982 = vmatpush3.bf16.msra.mxu0 %v10237_v25  ;;  %v915_v25 = vshll.u32 %v10811_v35, 16 }
  0x32   : > { %9018 = vmatpush3.bf16.msra.mxu1 %v10240_v26  ;;  %8983 = vmatprep.subr.bf16.mxu0 %v10619_v1  ;;  %v10263_v26 = vld [vmem:[%s13493_s4 + $0x130] sm:$0xff]  }
  0x33   : > { %9019 = vmatprep.subr.bf16.mxu1 %v10619_v1 }
  0x34   : > { %8928 = vmatmul.mubr.bf16.gmra.mxu0 %v10782_v27  ;;  %v717_v27 = vor.u32 %v715_v18, %v713_v15  ;;  %v10276_v18 = vld [vmem:[%s13493_s4 + $0x140] sm:$0xff]  }
  0x35   : > { %8964 = vmatmul.mubr.bf16.gmra.mxu1 %v10785_v28  ;;  %8984 = vmatpush3.bf16.msra.mxu0 %v10241_v29  ;;  %v721_v28 = vrot.slane %v719_v22, 1  ;;  %v913_v29 = vor.u32 %v911_v19, %v909_v16  ;;  %v935_v16 = vshrl.u32 %v10976_v47, 16  ;;  %v10278_v22 = vld [vmem:[%s13493_s4 + $0x1f8] sm:$0xff]  }
  0x36   : > { %9020 = vmatpush3.bf16.msra.mxu1 %v10242_v30  ;;  %8931 = vmatprep.mubr.msk.bf16.mxu0 %vm10620_vm0, %v10619_v1  ;;  %v917_v30 = vrot.slane %v915_v25, 1  ;;  %v10283_v25 = vld [vmem:[%s13493_s4 + $0x1a0] sm:$0xff]  }
  0x37   : > { %8967 = vmatprep.mubr.msk.bf16.mxu1 %vm10620_vm0, %v10619_v1  ;;  %8985 = vmatprep.subr.bf16.mxu0 %v10619_v1  ;;  %v722_v37 = vsel %vm702_vm2, %v717_v27, %v721_v28  ;;  %v725_v43 = vor.u32 %v723_v32, %v721_v28  ;;  %v1269_v28 = vrot.slane %v10976_v47, 1  ;;  %v10290_v32 = vld [vmem:[%s13493_s4 + $0x1c8] sm:$0xff]   ;;  %v10306_v47 = vld [vmem:[%s13493_s4 + $0x260] sm:$0xff]  }
  0x38   : > { %9021 = vmatprep.subr.bf16.mxu1 %v10619_v1 }
  0x39   : > { %8986 = vmatpush3.bf16.msra.mxu0 %v10245_v33  ;;  %v919_v33 = vshrl.u32 %v10811_v35, 16 }
  0x3a   : > { %9022 = vmatpush3.bf16.msra.mxu1 %v10246_v34  ;;  %8987 = vmatprep.subr.bf16.mxu0 %v10619_v1  ;;  %v681_v34 = vld [vmem:[%s10739_s10 + $0x24] sm:$0xf] }
  0x3b   : > { %9023 = vmatprep.subr.bf16.mxu1 %v10619_v1  ;;  %v921_v50 = vor.u32 %v919_v33, %v917_v30  ;;  %v1595_v33 = vld [vmem:[%s10965_s27] sm:$0xf] }
  0x3c   : > { %8932 = vmatmul.mubr.bf16.gmra.mxu0 %v10811_v35  ;;  %v10266_v35 = vld [vmem:[%s13493_s4 + $0x168] sm:$0xff]  }
  0x3d   : > { %8968 = vmatmul.mubr.bf16.gmra.mxu1 %v10814_v36  ;;  %8988 = vmatpush3.bf16.msra.mxu0 %v10247_v38  ;;  %v10265_v38 = vld [vmem:[%s13493_s4 + $0x128] sm:$0xff]   ;;  %v918_v36 = vsel %vm702_vm2, %v913_v29, %v917_v30  ;;  %v10287_v29 = vld [vmem:[%s13493_s4 + $0x190] sm:$0xff]  }
  0x3e   : > { %8935 = vmatprep.mubr.msk.bf16.mxu0 %vm10620_vm0, %v10619_v1  ;;  %8971 = vmatprep.mubr.msk.bf16.mxu1 %vm10620_vm0, %v10619_v1  ;;  %v10288_v30 = vld [vmem:[%s13493_s4 + $0x1d0] sm:$0xff]  }
  0x3f   : > { %9024 = vmatpush3.bf16.msra.mxu1 %v10248_v40  ;;  %8989 = vmatprep.subr.bf16.mxu0 %v10619_v1  ;;  %v923_v40 = vshll.u32 %v10840_v46, 16 }
  0x40   : > { %9025 = vmatprep.subr.bf16.mxu1 %v10619_v1 }
  0x41   : > { %8990 = vmatpush3.bf16.msra.mxu0 %v10251_v42  ;;  %v10970_v42 = vcombine.low %v10873_v60, %v681_v34  ;;  %v11142_v34 = vld [vmem:[%s10965_s27 + $0x4] sm:$0xf] }
  0x42   : > { %8991 = vmatprep.subr.bf16.mxu0 %v10619_v1 }
  0x43   : > { %9026 = vmatpush3.bf16.msra.mxu1 %v10252_v44  ;;  %v729_v44 = vrot.slane %v727_v39, 1  ;;  %v735_v59 = vshll.u32 %v10970_v42, 16  ;;  %v739_v15 = vshrl.u32 %v10970_v42, 16  ;;  %v1103_v27 = vrot.slane %v10970_v42, 1  ;;  %v11179_v42 = vld [vmem:[%s10965_s27 + $0x8] sm:$0xff]  }
  0x44   : > { %8936 = vmatmul.mubr.bf16.gmra.mxu0 %v10840_v46  ;;  %9027 = vmatprep.subr.bf16.mxu1 %v10619_v1  ;;  %v10292_v46 = vld [vmem:[%s13493_s4 + $0x1c0] sm:$0xff]   ;;  %v11156_v39 = vcombine.low %v1595_v33, %v11142_v34  ;;  %v10325_v33 = vld [vmem:[%s13493_s4 + $0x2a8] sm:$0xff]  }
  0x45   : > { %8972 = vmatmul.mubr.bf16.gmra.mxu1 %v10845_v48  ;;  %8939 = vmatprep.mubr.msk.bf16.mxu0 %vm10620_vm0, %v10619_v1  ;;  %v730_v55 = vsel %vm702_vm2, %v725_v43, %v729_v44  ;;  %v737_v6 = vrot.slane %v735_v59, 1  ;;  %v10291_v48 = vld [vmem:[%s13493_s4 + $0x180] sm:$0xff]   ;;  %v10301_v43 = vld [vmem:[%s13493_s4 + $0x228] sm:$0xff]   ;;  %v11230_v59 = vld [vmem:[%s10965_s27 + $0x18] sm:$0xff]  }
  0x46   : > { %8975 = vmatprep.mubr.msk.bf16.mxu1 %vm10620_vm0, %v10619_v1  ;;  %8992 = vmatpush3.bf16.msra.mxu0 %v10253_v51  ;;  %v925_v51 = vrot.slane %v923_v40, 1  ;;  %v10300_v40 = vld [vmem:[%s13493_s4 + $0x270] sm:$0xff]  }
  0x47   : > { %9028 = vmatpush3.bf16.msra.mxu1 %v10258_v56  ;;  %8993 = vmatprep.subr.bf16.mxu0 %v10619_v1  ;;  %v10269_v56 = vld [vmem:[%s13493_s4 + $0x118] sm:$0xff]   ;;  %v741_v19 = vor.u32 %v739_v15, %v737_v6  ;;  %v2001_v15 = vshrl.u32 %v11156_v39, 16 }
  0x48   : > { %9029 = vmatprep.subr.bf16.mxu1 %v10619_v1  ;;  %v926_v60 = vsel %vm702_vm2, %v921_v50, %v925_v51  ;;  %v11203_v50 = vld [vmem:[%s10953_s20 + $0x10] sm:$0xff]  }
  0x4a   : > { %8994 = vmatpush3.bf16.msra.mxu0 %v10259_v3  ;;  %v10270_v3 = vld [vmem:[%s13493_s4 + $0x158] sm:$0xff]  }
  0x4b   : > { %9030 = vmatpush3.bf16.msra.mxu1 %v10260_v5  ;;  %9051 = vmatprep.subr.bf16.mxu0 %v10619_v1  ;;  %v733_v5 = vor.u32 %v731_v54, %v729_v44  ;;  %v10302_v44 = vld [vmem:[%s13493_s4 + $0x268] sm:$0xff]   ;;  %v10308_v54 = vld [vmem:[%s13493_s4 + $0x258] sm:$0xff]  }
  0x4c   : > { %8940 = vmatmul.mubr.bf16.gmra.mxu0 %v7457_v8  ;;  %9087 = vmatprep.subr.bf16.mxu1 %v10619_v1  ;;  %v929_v8 = vor.u32 %v927_v63, %v925_v51  ;;  %v11206_v51 = vld [vmem:[%s10965_s27 + $0x10] sm:$0xff]   ;;  %v10313_v63 = vld [vmem:[%s13493_s4 + $0x208] sm:$0xff]  }
  0x4d   : > { %8976 = vmatmul.mubr.bf16.gmra.mxu1 %v7470_v9  ;;  %8995 = vmatprep.mubr.msk.bf16.mxu0 %vm10620_vm0, %v10619_v1  ;;  %v933_v9 = vrot.slane %v931_v2, 1  ;;  %v738_v11 = vsel %vm702_vm2, %v733_v5, %v737_v6  ;;  %v10318_v2 = vld [vmem:[%s13493_s4 + $0x248] sm:$0xff]   ;;  %v2003_v6 = vshll.u32 %v11156_v39, 16 }
  0x4e   : > { %9031 = vmatprep.mubr.msk.bf16.mxu1 %vm10620_vm0, %v10619_v1 }
  0x4f   : > { %v934_v12 = vsel %vm702_vm2, %v929_v8, %v933_v9  ;;  %v11256_v8 = vld [vmem:[%s10965_s27 + $0x20] sm:$0xf] }
  0x54   : > { %8996 = vmatmul.mubr.bf16.vlgmr.msra.gmra.mxu0 %v714_v20  ;;  %v937_v20 = vor.u32 %v935_v16, %v933_v9  ;;  %v1604_v9 = vld [vmem:[%s10965_s27 + $0x24] sm:$0x7] }
  0x55   : > { %9032 = vmatmul.mubr.bf16.vlgmr.msra.gmra.mxu1 %v910_v23  ;;  %9052 = vmatpush3.bf16.msra.mxu0 %v10261_v21  ;;  %v10277_v21 = vld [vmem:[%s13493_s4 + $0x1b8] sm:$0xff]   ;;  %v10279_v23 = vld [vmem:[%s13493_s4 + $0x1b0] sm:$0xff]   ;;  %v7628_v16 = vcombine.low %v11256_v8, %v1604_v9 }
  0x56   : > { %9088 = vmatpush3.bf16.msra.mxu1 %v10262_v24  ;;  %9053 = vmatprep.subr.bf16.mxu0 %v10619_v1  ;;  %v10280_v24 = vld [vmem:[%s13493_s4 + $0x1f0] sm:$0xff]  }
  0x57   : > { %8999 = vmatprep.mubr.msk.bf16.mxu0 %vm10620_vm0, %v10619_v1  ;;  %9035 = vmatprep.mubr.msk.bf16.mxu1 %vm10620_vm0, %v10619_v1 }
  0x58   : > { %9089 = vmatprep.subr.bf16.mxu1 %v10619_v1 }
  0x59   : > { %9054 = vmatpush3.bf16.msra.mxu0 %v10263_v26  ;;  %v10284_v26 = vld [vmem:[%s13493_s4 + $0x1e0] sm:$0xff]  }
  0x5a   : > { %9090 = vmatpush3.bf16.msra.mxu1 %v10264_v31  ;;  %9055 = vmatprep.subr.bf16.mxu0 %v10619_v1  ;;  %v1270_v31 = vsel %vm1095_vm1, %v1267_v62, %v1269_v28  ;;  %v11137_v62 = vld [vmem:[%s10953_s20 + $0x4] sm:$0xf] }
  0x5b   : > { %9091 = vmatprep.subr.bf16.mxu1 %v10619_v1 }
  0x5c   : > { %9000 = vmatmul.mubr.bf16.gmra.mxu0 %v722_v37 }
  0x5d   : > { %9036 = vmatmul.mubr.bf16.gmra.mxu1 %v918_v36  ;;  %9056 = vmatpush3.bf16.msra.mxu0 %v10265_v38  ;;  %v10295_v38 = vld [vmem:[%s13493_s4 + $0x238] sm:$0xff]  }
  0x5e   : > { %9092 = vmatpush3.bf16.msra.mxu1 %v10266_v35  ;;  %9003 = vmatprep.mubr.msk.bf16.mxu0 %vm10620_vm0, %v10619_v1  ;;  %v10296_v36 = vld [vmem:[%s13493_s4 + $0x278] sm:$0xff]   ;;  %v10297_v35 = vld [vmem:[%s13493_s4 + $0x230] sm:$0xff]  }
  0x5f   : > { %9039 = vmatprep.mubr.msk.bf16.mxu1 %vm10620_vm0, %v10619_v1  ;;  %9057 = vmatprep.subr.bf16.mxu0 %v10619_v1 }
  0x60   : > { %9093 = vmatprep.subr.bf16.mxu1 %v10619_v1 }
  0x61   : > { %9058 = vmatpush3.bf16.msra.mxu0 %v10267_v45  ;;  %v10305_v45 = vld [vmem:[%s13493_s4 + $0x220] sm:$0xff]  }
  0x62   : > { %9094 = vmatpush3.bf16.msra.mxu1 %v10268_v53  ;;  %9059 = vmatprep.subr.bf16.mxu0 %v10619_v1  ;;  %v10307_v53 = vld [vmem:[%s13493_s4 + $0x218] sm:$0xff]  }
  0x63   : > { %9095 = vmatprep.subr.bf16.mxu1 %v10619_v1 }
  0x64   : > { %9004 = vmatmul.mubr.bf16.gmra.mxu0 %v730_v55  ;;  %v10311_v55 = vld [vmem:[%s13493_s4 + $0x210] sm:$0xff]  }
  0x65   : > { %9040 = vmatmul.mubr.bf16.gmra.mxu1 %v926_v60  ;;  %9060 = vmatpush3.bf16.msra.mxu0 %v10269_v56  ;;  %v11227_v56 = vld [vmem:[%s10953_s20 + $0x18] sm:$0xff]   ;;  %v10312_v60 = vld [vmem:[%s13493_s4 + $0x250] sm:$0xff]  }
  0x66   : > { %9007 = vmatprep.mubr.msk.bf16.mxu0 %vm10620_vm0, %v10619_v1  ;;  %9043 = vmatprep.mubr.msk.bf16.mxu1 %vm10620_vm0, %v10619_v1 }
  0x67   : > { %9096 = vmatpush3.bf16.msra.mxu1 %v10270_v3  ;;  %9061 = vmatprep.subr.bf16.mxu0 %v10619_v1  ;;  %v11246_v3 = vld [vmem:[%s10953_s20 + $0x20] sm:$0xf] }
  0x68   : > { %9097 = vmatprep.subr.bf16.mxu1 %v10619_v1 }
  0x69   : > { %9062 = vmatpush3.bf16.msra.mxu0 %v10271_v7  ;;  %v1416_v7 = vld [vmem:[%s10953_s20 + $0x24] sm:$0x7] }
  0x6a   : > { %9063 = vmatprep.subr.bf16.mxu0 %v10619_v1 }
  0x6b   : > { %9098 = vmatpush3.bf16.msra.mxu1 %v10272_v10  ;;  %v10319_v10 = vld [vmem:[%s13493_s4 + $0x200] sm:$0xff]  }
  0x6c   : > { %9008 = vmatmul.mubr.bf16.gmra.mxu0 %v738_v11  ;;  %9099 = vmatprep.subr.bf16.mxu1 %v10619_v1  ;;  %v10320_v11 = vld [vmem:[%s13493_s4 + $0x240] sm:$0xff]  }
  0x6d   : > { %9044 = vmatmul.mubr.bf16.gmra.mxu1 %v934_v12  ;;  %9011 = vmatprep.mubr.msk.bf16.mxu0 %vm10620_vm0, %v10619_v1  ;;  %v7599_v12 = vcombine.low %v11246_v3, %v1416_v7 }
  0x6e   : > { %9047 = vmatprep.mubr.msk.bf16.mxu1 %vm10620_vm0, %v10619_v1  ;;  %9064 = vmatpush3.bf16.msra.mxu0 %v10273_v13 }
  0x6f   : > { %9100 = vmatpush3.bf16.msra.mxu1 %v10274_v14  ;;  %9065 = vmatprep.subr.bf16.mxu0 %v10619_v1  ;;  %v1812_v14 = vshll.u32 %v11175_v41, 16 }
  0x70   : > { %9101 = vmatprep.subr.bf16.mxu1 %v10619_v1 }
  0x72   : > { %9066 = vmatpush3.bf16.msra.mxu0 %v10275_v17 }
  0x73   : > { %9102 = vmatpush3.bf16.msra.mxu1 %v10276_v18  ;;  %9123 = vmatprep.subr.bf16.mxu0 %v10619_v1  ;;  %v2005_v18 = vrot.slane %v2003_v6, 1 }
  0x74   : > { %9012 = vmatmul.mubr.bf16.gmra.mxu0 %v741_v19  ;;  %9159 = vmatprep.subr.bf16.mxu1 %v10619_v1  ;;  %v2008_v19 = vshll.u32 %v11179_v42, 16 }
  0x75   : > { %9048 = vmatmul.mubr.bf16.gmra.mxu1 %v937_v20  ;;  %9067 = vmatprep.mubr.msk.bf16.mxu0 %vm10620_vm0, %v10619_v1  ;;  %v1814_v20 = vrot.slane %v1812_v14, 1  ;;  %v10332_v14 = vld [vmem:[%s13493_s4 + $0x2d0] sm:$0xff]  }
  0x76   : > { %9103 = vmatprep.mubr.msk.bf16.mxu1 %vm10620_vm0, %v10619_v1 }
  0x7c   : > { %9068 = vmatmul.mubr.bf16.vlgmr.msra.gmra.mxu0 %v10848_v49  ;;  %v10281_v49 = vld [vmem:[%s13493_s4 + $0x1a8] sm:$0xff]  }
  0x7d   : > { %9104 = vmatmul.mubr.bf16.vlgmr.msra.gmra.mxu1 %v10856_v52  ;;  %9124 = vmatpush3.bf16.msra.mxu0 %v10277_v21  ;;  %v10282_v52 = vld [vmem:[%s13493_s4 + $0x1e8] sm:$0xff]  }
  0x7e   : > { %9160 = vmatpush3.bf16.msra.mxu1 %v10278_v22  ;;  %9125 = vmatprep.subr.bf16.mxu0 %v10619_v1  ;;  %v2006_v22 = vor.u32 %v2005_v18, %v2001_v15  ;;  %v10333_v15 = vld [vmem:[%s13493_s4 + $0x288] sm:$0xff]  }
  0x7f   : > { %9071 = vmatprep.mubr.msk.bf16.mxu0 %vm10620_vm0, %v10619_v1  ;;  %9107 = vmatprep.mubr.msk.bf16.mxu1 %vm10620_vm0, %v10619_v1 }
  0x80   : > { %9161 = vmatprep.subr.bf16.mxu1 %v10619_v1 }
  0x81   : > { %9126 = vmatpush3.bf16.msra.mxu0 %v10279_v23  ;;  %v2010_v23 = vrot.slane %v2008_v19, 1 }
  0x82   : > { %9162 = vmatpush3.bf16.msra.mxu1 %v10280_v24  ;;  %9127 = vmatprep.subr.bf16.mxu0 %v10619_v1  ;;  %v1816_v24 = vshrl.u32 %v11175_v41, 16 }
  0x83   : > { %9163 = vmatprep.subr.bf16.mxu1 %v10619_v1 }
  0x84   : > { %9072 = vmatmul.mubr.bf16.gmra.mxu0 %v10867_v57  ;;  %v10285_v57 = vld [vmem:[%s13493_s4 + $0x198] sm:$0xff]  }
  0x85   : > { %9108 = vmatmul.mubr.bf16.gmra.mxu1 %v10877_v61  ;;  %9128 = vmatpush3.bf16.msra.mxu0 %v10281_v49  ;;  %v10286_v61 = vld [vmem:[%s13493_s4 + $0x1d8] sm:$0xff]   ;;  %v1820_v49 = vshll.u32 %v11203_v50, 16 }
  0x86   : > { %9164 = vmatpush3.bf16.msra.mxu1 %v10282_v52  ;;  %9075 = vmatprep.mubr.msk.bf16.mxu0 %vm10620_vm0, %v10619_v1  ;;  %v10321_v52 = vld [vmem:[%s13493_s4 + $0x2b8] sm:$0xff]  }
  0x87   : > { %9111 = vmatprep.mubr.msk.bf16.mxu1 %vm10620_vm0, %v10619_v1  ;;  %9129 = vmatprep.subr.bf16.mxu0 %v10619_v1 }
  0x88   : > { %9165 = vmatprep.subr.bf16.mxu1 %v10619_v1 }
  0x89   : > { %9130 = vmatpush3.bf16.msra.mxu0 %v10283_v25  ;;  %v10322_v25 = vld [vmem:[%s13493_s4 + $0x2f8] sm:$0xff]  }
  0x8a   : > { %9166 = vmatpush3.bf16.msra.mxu1 %v10284_v26  ;;  %9131 = vmatprep.subr.bf16.mxu0 %v10619_v1  ;;  %v2012_v26 = vshrl.u32 %v11179_v42, 16 }
  0x8b   : > { %9167 = vmatprep.subr.bf16.mxu1 %v10619_v1 }
  0x8c   : > { %9076 = vmatmul.mubr.bf16.gmra.mxu0 %v10887_v0  ;;  %v10289_v0 = vld [vmem:[%s13493_s4 + $0x188] sm:$0xff]  }
  0x8d   : > { %9112 = vmatmul.mubr.bf16.gmra.mxu1 %v10898_v4  ;;  %9132 = vmatpush3.bf16.msra.mxu0 %v10285_v57  ;;  %v1104_v4 = vsel %vm1095_vm1, %v1101_v58, %v1103_v27  ;;  %v1407_v58 = vld [vmem:[%s10953_s20] sm:$0xf]  ;;  %v2016_v57 = vshll.u32 %v11206_v51, 16 }
  0x8e   : > { %9079 = vmatprep.mubr.msk.bf16.mxu0 %vm10620_vm0, %v10619_v1  ;;  %9115 = vmatprep.mubr.msk.bf16.mxu1 %vm10620_vm0, %v10619_v1  ;;  %v11150_v37 = vcombine.low %v1407_v58, %v11137_v62  ;;  %v1828_v58 = vshll.u32 %v11227_v56, 16 }
  0x8f   : > { %9168 = vmatpush3.bf16.msra.mxu1 %v10286_v61  ;;  %9133 = vmatprep.subr.bf16.mxu0 %v10619_v1 }
  0x90   : > { %9169 = vmatprep.subr.bf16.mxu1 %v10619_v1  ;;  %v1807_v5 = vshll.u32 %v11150_v37, 16  ;;  %v1805_v13 = vshrl.u32 %v11150_v37, 16 }
  0x91   : > { %9134 = vmatpush3.bf16.msra.mxu0 %v10287_v29  ;;  %v1822_v29 = vrot.slane %v1820_v49, 1 }
  0x92   : > { %9135 = vmatprep.subr.bf16.mxu0 %v10619_v1  ;;  %v1809_v17 = vrot.slane %v1807_v5, 1 }
  0x93   : > { %9170 = vmatpush3.bf16.msra.mxu1 %v10288_v30  ;;  %v1818_v30 = vor.u32 %v1816_v24, %v1814_v20  ;;  %v10336_v24 = vld [vmem:[%s13493_s4 + $0x2c0] sm:$0xff]  }
  0x94   : > { %9080 = vmatmul.mubr.bf16.gmra.mxu0 %v1104_v4  ;;  %9171 = vmatprep.subr.bf16.mxu1 %v10619_v1  ;;  %v1810_v21 = vor.u32 %v1809_v17, %v1805_v13  ;;  %v2014_v4 = vor.u32 %v2012_v26, %v2010_v23 }
  0x95   : > { %9116 = vmatmul.mubr.bf16.gmra.mxu1 %v1270_v31  ;;  %9083 = vmatprep.mubr.msk.bf16.mxu0 %vm10620_vm0, %v10619_v1  ;;  %v2018_v31 = vrot.slane %v2016_v57, 1  ;;  %v2197_v57 = vrot.slane %v11175_v41, 1 }
  0x96   : > { %9119 = vmatprep.mubr.msk.bf16.mxu1 %vm10620_vm0, %v10619_v1  ;;  %9136 = vmatpush3.bf16.msra.mxu0 %v10289_v0  ;;  %v1815_v61 = vsel %vm702_vm2, %v1810_v21, %v1814_v20  ;;  %v1783_v0 = vld [vmem:[%s10953_s20 + $0x24] sm:$0xf]  ;;  %v10334_v20 = vld [vmem:[%s13493_s4 + $0x2c8] sm:$0xff]   ;;  %v2175_v21 = vld [vmem:[%s10953_s20] sm:$0xe] }
  0x97   : > { %9172 = vmatpush3.bf16.msra.mxu1 %v10290_v32  ;;  %9137 = vmatprep.subr.bf16.mxu0 %v10619_v1  ;;  %v10324_v32 = vld [vmem:[%s13493_s4 + $0x2f0] sm:$0xff]   ;;  %v7703_v49 = vcombine.low %v2175_v21, %v11137_v62  ;;  %v10348_v21 = vld [vmem:[%s13493_s4 + $0x358] sm:$0xff]  }
  0x98   : > { %9173 = vmatprep.subr.bf16.mxu1 %v10619_v1 }
  0x9a   : > { %9138 = vmatpush3.bf16.msra.mxu0 %v10291_v48  ;;  %v1979_v48 = vld [vmem:[%s10965_s27 + $0x24] sm:$0xf] }
  0x9b   : > { %9174 = vmatpush3.bf16.msra.mxu1 %v10292_v46  ;;  %9195 = vmatprep.subr.bf16.mxu0 %v10619_v1  ;;  %v1824_v46 = vshrl.u32 %v11203_v50, 16 }
  0x9c   : > { %9084 = vmatmul.mubr.bf16.gmra.mxu0 %v1103_v27  ;;  %9231 = vmatprep.subr.bf16.mxu1 %v10619_v1  ;;  %v2011_v27 = vsel %vm702_vm2, %v2006_v22, %v2010_v23  ;;  %v10335_v22 = vld [vmem:[%s13493_s4 + $0x280] sm:$0xff]  }
  0x9d   : > { %9120 = vmatmul.mubr.bf16.gmra.mxu1 %v1269_v28  ;;  %9139 = vmatprep.mubr.msk.bf16.mxu0 %vm10620_vm0, %v10619_v1  ;;  %v10323_v28 = vld [vmem:[%s13493_s4 + $0x2b0] sm:$0xff]   ;;  %v2341_v23 = vld [vmem:[%s10965_s27] sm:$0xe] }
  0x9e   : > { %9175 = vmatprep.mubr.msk.bf16.mxu1 %vm10620_vm0, %v10619_v1 }
  0xa4   : > { %9140 = vmatmul.mubr.bf16.vlgmr.msra.gmra.mxu0 %v11150_v37  ;;  %v10326_v37 = vld [vmem:[%s13493_s4 + $0x2e8] sm:$0xff]  }
  0xa5   : > { %9176 = vmatmul.mubr.bf16.vlgmr.msra.gmra.mxu1 %v11156_v39  ;;  %9196 = vmatpush3.bf16.msra.mxu0 %v10295_v38  ;;  %v2020_v38 = vshrl.u32 %v11206_v51, 16  ;;  %v2024_v39 = vshll.u32 %v11230_v59, 16 }
  0xa6   : > { %9232 = vmatpush3.bf16.msra.mxu1 %v10296_v36  ;;  %9197 = vmatprep.subr.bf16.mxu0 %v10619_v1  ;;  %v1823_v36 = vsel %vm702_vm2, %v1818_v30, %v1822_v29 }
  0xa7   : > { %9143 = vmatprep.mubr.msk.bf16.mxu0 %vm10620_vm0, %v10619_v1  ;;  %9179 = vmatprep.mubr.msk.bf16.mxu1 %vm10620_vm0, %v10619_v1 }
  0xa8   : > { %9233 = vmatprep.subr.bf16.mxu1 %v10619_v1 }
  0xa9   : > { %9198 = vmatpush3.bf16.msra.mxu0 %v10297_v35  ;;  %v2019_v35 = vsel %vm702_vm2, %v2014_v4, %v2018_v31 }
  0xaa   : > { %9234 = vmatpush3.bf16.msra.mxu1 %v10300_v40  ;;  %9199 = vmatprep.subr.bf16.mxu0 %v10619_v1  ;;  %v11321_v40 = vcombine.low %v11246_v3, %v1783_v0  ;;  %v2028_v3 = vshrl.u32 %v11230_v59, 16 }
  0xab   : > { %9235 = vmatprep.subr.bf16.mxu1 %v10619_v1 }
  0xac   : > { %9144 = vmatmul.mubr.bf16.gmra.mxu0 %v11175_v41 }
  0xad   : > { %9180 = vmatmul.mubr.bf16.gmra.mxu1 %v11179_v42  ;;  %9200 = vmatpush3.bf16.msra.mxu0 %v10301_v43  ;;  %v11325_v43 = vcombine.low %v11256_v8, %v1979_v48  ;;  %v10330_v8 = vld [vmem:[%s13493_s4 + $0x2d8] sm:$0xff]  }
  0xae   : > { %9236 = vmatpush3.bf16.msra.mxu1 %v10302_v44  ;;  %9147 = vmatprep.mubr.msk.bf16.mxu0 %vm10620_vm0, %v10619_v1  ;;  %v1830_v44 = vrot.slane %v1828_v58, 1  ;;  %v10340_v58 = vld [vmem:[%s13493_s4 + $0x378] sm:$0xff]  }
  0xaf   : > { %9183 = vmatprep.mubr.msk.bf16.mxu1 %vm10620_vm0, %v10619_v1  ;;  %9201 = vmatprep.subr.bf16.mxu0 %v10619_v1  ;;  %v2032_v5 = vshll.u32 %v11325_v43, 16  ;;  %v2036_v19 = vshrl.u32 %v11325_v43, 16 }
  0xb0   : > { %9237 = vmatprep.subr.bf16.mxu1 %v10619_v1 }
  0xb1   : > { %9202 = vmatpush3.bf16.msra.mxu0 %v10305_v45  ;;  %v10327_v45 = vld [vmem:[%s13493_s4 + $0x2a0] sm:$0xff]   ;;  %v2034_v13 = vrot.slane %v2032_v5, 1  ;;  %v2201_v5 = vrot.slane %v11227_v56, 1 }
  0xb2   : > { %9238 = vmatpush3.bf16.msra.mxu1 %v10306_v47  ;;  %9203 = vmatprep.subr.bf16.mxu0 %v10619_v1  ;;  %v1826_v47 = vor.u32 %v1824_v46, %v1822_v29 }
  0xb3   : > { %9239 = vmatprep.subr.bf16.mxu1 %v10619_v1  ;;  %v2038_v26 = vor.u32 %v2036_v19, %v2034_v13 }
  0xb4   : > { %9148 = vmatmul.mubr.bf16.gmra.mxu0 %v11203_v50  ;;  %v1831_v6 = vsel %vm702_vm2, %v1826_v47, %v1830_v44 }
  0xb5   : > { %9184 = vmatmul.mubr.bf16.gmra.mxu1 %v11206_v51  ;;  %9204 = vmatpush3.bf16.msra.mxu0 %v10307_v53  ;;  %v2022_v53 = vor.u32 %v2020_v38, %v2018_v31  ;;  %v10341_v38 = vld [vmem:[%s13493_s4 + $0x330] sm:$0xff]  }
  0xb6   : > { %9151 = vmatprep.mubr.msk.bf16.mxu0 %vm10620_vm0, %v10619_v1  ;;  %9187 = vmatprep.mubr.msk.bf16.mxu1 %vm10620_vm0, %v10619_v1 }
  0xb7   : > { %9240 = vmatpush3.bf16.msra.mxu1 %v10308_v54  ;;  %9205 = vmatprep.subr.bf16.mxu0 %v10619_v1  ;;  %v2026_v54 = vrot.slane %v2024_v39, 1  ;;  %v2365_v39 = vrot.slane %v11206_v51, 1  ;;  %v10343_v51 = vld [vmem:[%s13493_s4 + $0x328] sm:$0xff]  }
  0xb8   : > { %9241 = vmatprep.subr.bf16.mxu1 %v10619_v1 }
  0xb9   : > { %9206 = vmatpush3.bf16.msra.mxu0 %v10311_v55  ;;  %v10328_v55 = vld [vmem:[%s13493_s4 + $0x2e0] sm:$0xff]   ;;  %v2027_v7 = vsel %vm702_vm2, %v2022_v53, %v2026_v54 }
  0xba   : > { %9207 = vmatprep.subr.bf16.mxu0 %v10619_v1 }
  0xbb   : > { %9242 = vmatpush3.bf16.msra.mxu1 %v10312_v60  ;;  %v1836_v60 = vshll.u32 %v11321_v40, 16 }
  0xbc   : > { %9152 = vmatmul.mubr.bf16.gmra.mxu0 %v11227_v56  ;;  %9243 = vmatprep.subr.bf16.mxu1 %v10619_v1 }
  0xbd   : > { %9188 = vmatmul.mubr.bf16.gmra.mxu1 %v11230_v59  ;;  %9155 = vmatprep.mubr.msk.bf16.mxu0 %vm10620_vm0, %v10619_v1  ;;  %v1838_v9 = vrot.slane %v1836_v60, 1 }
  0xbe   : > { %9191 = vmatprep.mubr.msk.bf16.mxu1 %vm10620_vm0, %v10619_v1  ;;  %9208 = vmatpush3.bf16.msra.mxu0 %v10313_v63  ;;  %v10329_v63 = vld [vmem:[%s13493_s4 + $0x298] sm:$0xff]  }
  0xbf   : > { %9244 = vmatpush3.bf16.msra.mxu1 %v10318_v2  ;;  %9209 = vmatprep.subr.bf16.mxu0 %v10619_v1  ;;  %v1832_v2 = vshrl.u32 %v11227_v56, 16 }
  0xc0   : > { %9245 = vmatprep.subr.bf16.mxu1 %v10619_v1 }
  0xc2   : > { %9210 = vmatpush3.bf16.msra.mxu0 %v10319_v10  ;;  %v10331_v10 = vld [vmem:[%s13493_s4 + $0x290] sm:$0xff]  }
  0xc3   : > { %9246 = vmatpush3.bf16.msra.mxu1 %v10320_v11  ;;  %9267 = vmatprep.subr.bf16.mxu0 %v10619_v1  ;;  %v1834_v11 = vor.u32 %v1832_v2, %v1830_v44 }
  0xc4   : > { %9156 = vmatmul.mubr.bf16.gmra.mxu0 %v7599_v12  ;;  %9303 = vmatprep.subr.bf16.mxu1 %v10619_v1  ;;  %v2030_v12 = vor.u32 %v2028_v3, %v2026_v54  ;;  %v10344_v3 = vld [vmem:[%s13493_s4 + $0x368] sm:$0xff]  }
  0xc5   : > { %9192 = vmatmul.mubr.bf16.gmra.mxu1 %v7628_v16  ;;  %9211 = vmatprep.mubr.msk.bf16.mxu0 %vm10620_vm0, %v10619_v1  ;;  %v1840_v16 = vshrl.u32 %v11321_v40, 16  ;;  %v1839_v17 = vsel %vm702_vm2, %v1834_v11, %v1838_v9 }
  0xc6   : > { %9247 = vmatprep.mubr.msk.bf16.mxu1 %vm10620_vm0, %v10619_v1  ;;  %v2035_v18 = vsel %vm702_vm2, %v2030_v12, %v2034_v13  ;;  %v10347_v13 = vld [vmem:[%s13493_s4 + $0x318] sm:$0xff]  }
  0xcc   : > { %9212 = vmatmul.mubr.bf16.vlgmr.msra.gmra.mxu0 %v1815_v61  ;;  %v2363_v61 = vrot.slane %v11179_v42, 1  ;;  %v10339_v42 = vld [vmem:[%s13493_s4 + $0x338] sm:$0xff]  }
  0xcd   : > { %9248 = vmatmul.mubr.bf16.vlgmr.msra.gmra.mxu1 %v2011_v27  ;;  %9268 = vmatpush3.bf16.msra.mxu0 %v10321_v52  ;;  %v7728_v52 = vcombine.low %v2341_v23, %v11142_v34  ;;  %v2196_v27 = vrot.slane %v7703_v49, 1  ;;  %v2369_v23 = vrot.slane %v11325_v43, 1 }
  0xce   : > { %9304 = vmatpush3.bf16.msra.mxu1 %v10322_v25  ;;  %9269 = vmatprep.subr.bf16.mxu0 %v10619_v1  ;;  %v1842_v25 = vor.u32 %v1840_v16, %v1838_v9  ;;  %v2366_v2 = vsel %vm1095_vm1, %v2363_v61, %v2365_v39 }
  0xcf   : > { %9215 = vmatprep.mubr.msk.bf16.mxu0 %vm10620_vm0, %v10619_v1  ;;  %9251 = vmatprep.mubr.msk.bf16.mxu1 %vm10620_vm0, %v10619_v1  ;;  %v2198_v31 = vsel %vm1095_vm1, %v2196_v27, %v2197_v57 }
  0xd0   : > { %9305 = vmatprep.subr.bf16.mxu1 %v10619_v1 }
  0xd1   : > { %9270 = vmatpush3.bf16.msra.mxu0 %v10323_v28  ;;  %v2362_v28 = vrot.slane %v7728_v52, 1 }
  0xd2   : > { %9306 = vmatpush3.bf16.msra.mxu1 %v10324_v32  ;;  %9271 = vmatprep.subr.bf16.mxu0 %v10619_v1 }
  0xd3   : > { %9307 = vmatprep.subr.bf16.mxu1 %v10619_v1  ;;  %v2364_v46 = vsel %vm1095_vm1, %v2362_v28, %v2363_v61 }
  0xd4   : > { %9216 = vmatmul.mubr.bf16.gmra.mxu0 %v1823_v36 }
  0xd5   : > { %9252 = vmatmul.mubr.bf16.gmra.mxu1 %v2019_v35  ;;  %9272 = vmatpush3.bf16.msra.mxu0 %v10325_v33  ;;  %v2199_v33 = vrot.slane %v11203_v50, 1  ;;  %v10342_v35 = vld [vmem:[%s13493_s4 + $0x370] sm:$0xff]  }
  0xd6   : > { %9308 = vmatpush3.bf16.msra.mxu1 %v10326_v37  ;;  %9219 = vmatprep.mubr.msk.bf16.mxu0 %vm10620_vm0, %v10619_v1 }
  0xd7   : > { %9255 = vmatprep.mubr.msk.bf16.mxu1 %vm10620_vm0, %v10619_v1  ;;  %9273 = vmatprep.subr.bf16.mxu0 %v10619_v1  ;;  %v2202_v16 = vsel %vm1095_vm1, %v2199_v33, %v2201_v5 }
  0xd8   : > { %9309 = vmatprep.subr.bf16.mxu1 %v10619_v1 }
  0xd9   : > { %9274 = vmatpush3.bf16.msra.mxu0 %v10327_v45 }
  0xda   : > { %9310 = vmatpush3.bf16.msra.mxu1 %v10328_v55  ;;  %9275 = vmatprep.subr.bf16.mxu0 %v10619_v1  ;;  %v2200_v55 = vsel %vm1095_vm1, %v2197_v57, %v2199_v33  ;;  %v10350_v57 = vld [vmem:[%s13493_s4 + $0x350] sm:$0xff]  }
  0xdb   : > { %9311 = vmatprep.subr.bf16.mxu1 %v10619_v1  ;;  %v11509_v33 = vld [vmem:[%s10739_s10 + $0xc] sm:$0xff]  }
  0xdc   : > { %9220 = vmatmul.mubr.bf16.gmra.mxu0 %v1831_v6 }
  0xdd   : > { %9256 = vmatmul.mubr.bf16.gmra.mxu1 %v2027_v7  ;;  %9276 = vmatpush3.bf16.msra.mxu0 %v10329_v63  ;;  %v2367_v7 = vrot.slane %v11230_v59, 1 }
  0xde   : > { %9223 = vmatprep.mubr.msk.bf16.mxu0 %vm10620_vm0, %v10619_v1  ;;  %9259 = vmatprep.mubr.msk.bf16.mxu1 %vm10620_vm0, %v10619_v1 }
  0xdf   : > { %9312 = vmatpush3.bf16.msra.mxu1 %v10330_v8  ;;  %9277 = vmatprep.subr.bf16.mxu0 %v10619_v1  ;;  %v10345_v8 = vld [vmem:[%s13493_s4 + $0x320] sm:$0xff]   ;;  %v2368_v19 = vsel %vm1095_vm1, %v2365_v39, %v2367_v7 }
  0xe0   : > { %9313 = vmatprep.subr.bf16.mxu1 %v10619_v1 }
  0xe1   : > { %9278 = vmatpush3.bf16.msra.mxu0 %v10331_v10  ;;  %v10346_v10 = vld [vmem:[%s13493_s4 + $0x360] sm:$0xff]  }
  0xe2   : > { %9279 = vmatprep.subr.bf16.mxu0 %v10619_v1 }
  0xe3   : > { %9314 = vmatpush3.bf16.msra.mxu1 %v10332_v14 }
  0xe4   : > { %9224 = vmatmul.mubr.bf16.gmra.mxu0 %v1839_v17  ;;  %9315 = vmatprep.subr.bf16.mxu1 %v10619_v1 }
  0xe5   : > { %9260 = vmatmul.mubr.bf16.gmra.mxu1 %v2035_v18  ;;  %9227 = vmatprep.mubr.msk.bf16.mxu0 %vm10620_vm0, %v10619_v1 }
  0xe6   : > { %9263 = vmatprep.mubr.msk.bf16.mxu1 %vm10620_vm0, %v10619_v1  ;;  %9280 = vmatpush3.bf16.msra.mxu0 %v10333_v15 }
  0xe7   : > { %9316 = vmatpush3.bf16.msra.mxu1 %v10334_v20  ;;  %9281 = vmatprep.subr.bf16.mxu0 %v10619_v1 }
  0xe8   : > { %9317 = vmatprep.subr.bf16.mxu1 %v10619_v1 }
  0xea   : > { %9282 = vmatpush3.bf16.msra.mxu0 %v10335_v22  ;;  %v2203_v22 = vrot.slane %v11321_v40, 1 }
  0xeb   : > { %9318 = vmatpush3.bf16.msra.mxu1 %v10336_v24  ;;  %9339 = vmatprep.subr.bf16.mxu0 %v10619_v1  ;;  %v10349_v24 = vld [vmem:[%s13493_s4 + $0x310] sm:$0xff]  }
  0xec   : > { %v491_v29 = vpop.f32.mrf.mxu0  ;;  %9228 = vmatmul.mubr.bf16.gmra.mxu0 %v1842_v25  ;;  %9375 = vmatprep.subr.bf16.mxu1 %v10619_v1  ;;  %v2204_v28 = vsel %vm1095_vm1, %v2201_v5, %v2203_v22  ;;  %v11528_v5 = vld [vmem:[%s10739_s10 + $0x14] sm:$0xff]  }
  0xed   : > { %v642_v62 = vpop.f32.mrf.mxu1  ;;  %9264 = vmatmul.mubr.bf16.gmra.mxu1 %v2038_v26  ;;  %9283 = vmatprep.mubr.msk.bf16.mxu0 %vm10620_vm0, %v10619_v1 }
  0xee   : > { %v11399_v34 = vadd.f32 %v642_v62, %v491_v29  ;;  %v8925_v30 = vpop.f32.mrf.mxu0  ;;  %9319 = vmatprep.mubr.msk.bf16.mxu1 %vm10620_vm0, %v10619_v1 }
  0xef   : > { %v8961_v41 = vpop.f32.mrf.mxu1  ;;  %v2370_v30 = vsel %vm1095_vm1, %v2367_v7, %v2369_v23 }
  0xf0   : > { %v494_v0 = vpop.f32.mrf.mxu0  ;;  %v10351_v41 = vld [vmem:[%s13493_s4 + $0x308] sm:$0xff]  }
  0xf1   : > { %v645_v4 = vpop.f32.mrf.mxu1 }
  0xf2   : > { %v11407_v32 = vadd.f32 %v645_v4, %v494_v0  ;;  %v8926_v48 = vpop.f32.mrf.mxu0  ;;  %v10352_v0 = vld [vmem:[%s13493_s4 + $0x348] sm:$0xff]  }
  0xf3   : > { %v8962_v37 = vpop.f32.mrf.mxu1 }
  0xf4   : > { %v499_v36 = vpop.f32.mrf.mxu0  ;;  %9284 = vmatmul.mubr.bf16.vlgmr.msra.gmra.mxu0 %v2198_v31  ;;  %v10353_v31 = vld [vmem:[%s13493_s4 + $0x300] sm:$0xff]  }
  0xf5   : > { %v650_v44 = vpop.f32.mrf.mxu1  ;;  %9320 = vmatmul.mubr.bf16.vlgmr.msra.gmra.mxu1 %v2364_v46  ;;  %9340 = vmatpush3.bf16.msra.mxu0 %v10339_v42  ;;  %v10354_v46 = vld [vmem:[%s13493_s4 + $0x340] sm:$0xff]  }
  0xf6   : > { %v11421_v45 = vadd.f32 %v650_v44, %v499_v36  ;;  %v8929_v47 = vpop.f32.mrf.mxu0  ;;  %9376 = vmatpush3.bf16.msra.mxu1 %v10340_v58  ;;  %9341 = vmatprep.subr.bf16.mxu0 %v10619_v1  ;;  %v10355_v58 = vld [vmem:[%s10739_s10 + $0x4] sm:$0xfe]  }
  0xf7   : > { %v8965_v50 = vpop.f32.mrf.mxu1  ;;  %9287 = vmatprep.mubr.msk.bf16.mxu0 %vm10620_vm0, %v10619_v1  ;;  %9323 = vmatprep.mubr.msk.bf16.mxu1 %vm10620_vm0, %v10619_v1  ;;  %v10357_v37 = vld [vmem:[%s10730_s29 + $0x4] sm:$0xfe]  }
  0xf8   : > { %v502_v53 = vpop.f32.mrf.mxu0  ;;  %9377 = vmatprep.subr.bf16.mxu1 %v10619_v1 }
  0xf9   : > { %v653_v54 = vpop.f32.mrf.mxu1  ;;  %9342 = vmatpush3.bf16.msra.mxu0 %v10341_v38  ;;  %v11513_v38 = vld [vmem:[%s10730_s29 + $0xc] sm:$0xff]  }
  0xfa   : > { %v11433_v60 = vadd.f32 %v653_v54, %v502_v53  ;;  %v8930_v63 = vpop.f32.mrf.mxu0  ;;  %9378 = vmatpush3.bf16.msra.mxu1 %v10342_v35  ;;  %9343 = vmatprep.subr.bf16.mxu0 %v10619_v1  ;;  %v2559_v54 = vrot.slane %v10355_v58, 1  ;;  %v11595_v58 = vld [vmem:[%s10739_s10 + $0x24] sm:$0xff]  }
  0xfb   : > { %v8966_v6 = vpop.f32.mrf.mxu1  ;;  %9379 = vmatprep.subr.bf16.mxu1 %v10619_v1  ;;  %v2756_v63 = vrot.slane %v10357_v37, 1  ;;  %v10370_v37 = vld [vmem:[%s13493_s4 + $0x3e0] sm:$0xff]  }
  0xfc   : > { %v507_v9 = vpop.f32.mrf.mxu0  ;;  %9288 = vmatmul.mubr.bf16.gmra.mxu0 %v2200_v55  ;;  %v2560_v55 = vrot.slane %v11509_v33, 1 }
  0xfd   : > { %v658_v11 = vpop.f32.mrf.mxu1  ;;  %9324 = vmatmul.mubr.bf16.gmra.mxu1 %v2366_v2  ;;  %9344 = vmatpush3.bf16.msra.mxu0 %v10343_v51  ;;  %v2757_v2 = vrot.slane %v11513_v38, 1  ;;  %v11601_v38 = vld [vmem:[%s10730_s29 + $0x24] sm:$0xff]  }
  0xfe   : > { %v11449_v12 = vadd.f32 %v658_v11, %v507_v9  ;;  %v8933_v56 = vpop.f32.mrf.mxu0  ;;  %9380 = vmatpush3.bf16.msra.mxu1 %v10344_v3  ;;  %9291 = vmatprep.mubr.msk.bf16.mxu0 %vm10620_vm0, %v10619_v1  ;;  %v11540_v11 = vld [vmem:[%s10730_s29 + $0x14] sm:$0xff]  }
  0xff   : > { %v8969_v59 = vpop.f32.mrf.mxu1  ;;  %9327 = vmatprep.mubr.msk.bf16.mxu1 %vm10620_vm0, %v10619_v1  ;;  %9345 = vmatprep.subr.bf16.mxu0 %v10619_v1 }
 0x100   : > { %v510_v14 = vpop.f32.mrf.mxu0  ;;  %9381 = vmatprep.subr.bf16.mxu1 %v10619_v1 }
 0x101   : > { %v661_v15 = vpop.f32.mrf.mxu1  ;;  %9346 = vmatpush3.bf16.msra.mxu0 %v10345_v8 }
 0x102   : > { %v11461_v17 = vadd.f32 %v661_v15, %v510_v14  ;;  %v8934_v18 = vpop.f32.mrf.mxu0  ;;  %9382 = vmatpush3.bf16.msra.mxu1 %v10346_v10  ;;  %9347 = vmatprep.subr.bf16.mxu0 %v10619_v1  ;;  %v2758_v15 = vsel %vm1095_vm1, %v2756_v63, %v2757_v2 }
 0x103   : > { %v8970_v20 = vpop.f32.mrf.mxu1  ;;  %9383 = vmatprep.subr.bf16.mxu1 %v10619_v1  ;;  %v2562_v18 = vrot.slane %v11528_v5, 1 }
 0x104   : > { %v515_v49 = vpop.f32.mrf.mxu0  ;;  %9292 = vmatmul.mubr.bf16.gmra.mxu0 %v2202_v16  ;;  %v10360_v16 = vld [vmem:[%s13493_s4 + $0x3f8] sm:$0xff]  }
 0x105   : > { %v666_v52 = vpop.f32.mrf.mxu1  ;;  %9328 = vmatmul.mubr.bf16.gmra.mxu1 %v2368_v19  ;;  %9348 = vmatpush3.bf16.msra.mxu0 %v10347_v13  ;;  %v2561_v13 = vsel %vm1095_vm1, %v2559_v54, %v2560_v55  ;;  %v2566_v54 = vrot.slane %v11595_v58, 1 }
 0x106   : > { %v11474_v25 = vadd.f32 %v666_v52, %v515_v49  ;;  %v8937_v26 = vpop.f32.mrf.mxu0  ;;  %9295 = vmatprep.mubr.msk.bf16.mxu0 %vm10620_vm0, %v10619_v1  ;;  %9331 = vmatprep.mubr.msk.bf16.mxu1 %vm10620_vm0, %v10619_v1 }
 0x107   : > { %v8973_v40 = vpop.f32.mrf.mxu1  ;;  %9384 = vmatpush3.bf16.msra.mxu1 %v10348_v21  ;;  %9349 = vmatprep.subr.bf16.mxu0 %v10619_v1  ;;  %v10361_v21 = vld [vmem:[%s13493_s4 + $0x3b0] sm:$0xff]  }
 0x108   : > { %v518_v61 = vpop.f32.mrf.mxu0  ;;  %9385 = vmatprep.subr.bf16.mxu1 %v10619_v1 }
 0x109   : > { %v669_v27 = vpop.f32.mrf.mxu1  ;;  %9350 = vmatpush3.bf16.msra.mxu0 %v10349_v24  ;;  %v11562_v24 = vld [vmem:[%s10739_s10 + $0x1c] sm:$0xff]  }
 0x10a   : > { %v11486_v29 = vadd.f32 %v669_v27, %v518_v61  ;;  %v8938_v62 = vpop.f32.mrf.mxu0  ;;  %9351 = vmatprep.subr.bf16.mxu0 %v10619_v1  ;;  %v11573_v61 = vld [vmem:[%s10730_s29 + $0x1c] sm:$0xff]  }
 0x10b   : > { %v8974_v42 = vpop.f32.mrf.mxu1  ;;  %9386 = vmatpush3.bf16.msra.mxu1 %v10350_v57 }
 0x10c   : > { %v523_v4 = vpop.f32.mrf.mxu0  ;;  %9296 = vmatmul.mubr.bf16.gmra.mxu0 %v2204_v28  ;;  %9387 = vmatprep.subr.bf16.mxu1 %v10619_v1 }
 0x10d   : > { %v674_v48 = vpop.f32.mrf.mxu1  ;;  %9332 = vmatmul.mubr.bf16.gmra.mxu1 %v2370_v30  ;;  %9299 = vmatprep.mubr.msk.bf16.mxu0 %vm10620_vm0, %v10619_v1  ;;  %v2563_v30 = vsel %vm1095_vm1, %v2560_v55, %v2562_v18 }
 0x10e   : > { %v11515_v39 = vadd.f32 %v674_v48, %v523_v4  ;;  %v8941_v36 = vpop.f32.mrf.mxu0  ;;  %9335 = vmatprep.mubr.msk.bf16.mxu1 %vm10620_vm0, %v10619_v1  ;;  %9352 = vmatpush3.bf16.msra.mxu0 %v10351_v41  ;;  %v2564_v4 = vrot.slane %v11562_v24, 1  ;;  %v2761_v48 = vrot.slane %v11573_v61, 1  ;;  %v10378_v24 = vld [vmem:[%s13493_s4 + $0x3c8] sm:$0xff]  }
 0x10f   : > { %v8977_v35 = vpop.f32.mrf.mxu1  ;;  %9388 = vmatpush3.bf16.msra.mxu1 %v10352_v0  ;;  %9353 = vmatprep.subr.bf16.mxu0 %v10619_v1  ;;  %v10366_v0 = vld [vmem:[%s13493_s4 + $0x3e8] sm:$0xff]  }
 0x110   : > { %v526_v44 = vpop.f32.mrf.mxu0  ;;  %9389 = vmatprep.subr.bf16.mxu1 %v10619_v1 }
 0x111   : > { %v677_v47 = vpop.f32.mrf.mxu1 }
 0x112   : > { %v11521_v50 = vadd.f32 %v677_v47, %v526_v44  ;;  %v8942_v51 = vpop.f32.mrf.mxu0  ;;  %9354 = vmatpush3.bf16.msra.mxu0 %v10353_v31 }
 0x113   : > { %v8978_v53 = vpop.f32.mrf.mxu1  ;;  %9390 = vmatpush3.bf16.msra.mxu1 %v10354_v46  ;;  %9411 = vmatprep.subr.bf16.mxu0 %v10619_v1  ;;  %v10369_v46 = vld [vmem:[%s13493_s4 + $0x3a0] sm:$0xff]  }
 0x114   : > { %v829_v3 = vpop.f32.mrf.mxu0  ;;  %9300 = vmatmul.mubr.bf16.gmra.mxu0 %v2203_v22  ;;  %9447 = vmatprep.subr.bf16.mxu1 %v10619_v1 }
 0x115   : > { %v868_v6 = vadd.f32 %v829_v3, %v11399_v34  ;;  %v1025_v7 = vpop.f32.mrf.mxu1  ;;  %9336 = vmatmul.mubr.bf16.gmra.mxu1 %v2369_v23  ;;  %9355 = vmatprep.mubr.msk.bf16.mxu0 %vm10620_vm0, %v10619_v1  ;;  %v10359_v34 = vld [vmem:[%s13493_s4 + $0x3b8] sm:$0xff]   ;;  %v10364_v23 = vld [vmem:[%s13493_s4 + $0x3f0] sm:$0xff]  }
 0x116   : > { %v8997_v8 = vpop.f32.mrf.mxu0  ;;  %9391 = vmatprep.mubr.msk.bf16.mxu1 %vm10620_vm0, %v10619_v1 }
 0x117   : > { %v11537_v9 = vadd.f32 %v1025_v7, %v868_v6  ;;  %v9033_v10 = vpop.f32.mrf.mxu1  ;;  %v10372_v6 = vld [vmem:[%s13493_s4 + $0x3d8] sm:$0xff]  }
 0x118   : > { %v832_v56 = vpop.f32.mrf.mxu0  ;;  %v10375_v10 = vld [vmem:[%s13493_s4 + $0x390] sm:$0xff]  }
 0x119   : > { %v869_v43 = vadd.f32 %v832_v56, %v11407_v32  ;;  %v1028_v59 = vpop.f32.mrf.mxu1  ;;  %v2759_v32 = vrot.slane %v11540_v11, 1  ;;  %v2901_v11 = vld [vmem:[%s10739_s10 + $0x4] sm:$0xe]  ;;  %v11636_v56 = vld [vmem:[%s10739_s10 + $0x8] sm:$0xf] }
 0x11a   : > { %v8998_v14 = vpop.f32.mrf.mxu0 }
 0x11b   : > { %v11552_v19 = vadd.f32 %v1028_v59, %v869_v43  ;;  %v9034_v20 = vpop.f32.mrf.mxu1  ;;  %v2760_v42 = vsel %vm1095_vm1, %v2757_v2, %v2759_v32  ;;  %v2565_v2 = vsel %vm1095_vm1, %v2562_v18, %v2564_v4  ;;  %v2762_v5 = vsel %vm1095_vm1, %v2759_v32, %v2761_v48  ;;  %v3143_v14 = vld [vmem:[%s10730_s29 + $0x4] sm:$0xe]  ;;  %v10377_v32 = vld [vmem:[%s13493_s4 + $0x388] sm:$0xff]  }
 0x11c   : > { %v837_v22 = vpop.f32.mrf.mxu0  ;;  %9356 = vmatmul.mubr.bf16.vlgmr.msra.gmra.mxu0 %v2561_v13  ;;  %v10376_v13 = vld [vmem:[%s13493_s4 + $0x3d0] sm:$0xff]   ;;  %v11654_v20 = vld [vmem:[%s10730_s29 + $0x8] sm:$0xf] }
 0x11d   : > { %v870_v49 = vadd.f32 %v837_v22, %v11421_v45  ;;  %v1033_v52 = vpop.f32.mrf.mxu1  ;;  %9392 = vmatmul.mubr.bf16.vlgmr.msra.gmra.mxu1 %v2758_v15  ;;  %9412 = vmatpush3.bf16.msra.mxu0 %v10359_v34  ;;  %v10365_v45 = vld [vmem:[%s13493_s4 + $0x3a8] sm:$0xff]   ;;  %v7811_v22 = vcombine.low %v2901_v11, %v11636_v56 }
 0x11e   : > { %v9001_v26 = vpop.f32.mrf.mxu0  ;;  %9448 = vmatpush3.bf16.msra.mxu1 %v10360_v16  ;;  %9413 = vmatprep.subr.bf16.mxu0 %v10619_v1  ;;  %v11648_v16 = vld [vmem:[%s10739_s10 + $0xc] sm:$0xff]  }
 0x11f   : > { %v11566_v40 = vadd.f32 %v1033_v52, %v870_v49  ;;  %v9037_v57 = vpop.f32.mrf.mxu1  ;;  %9359 = vmatprep.mubr.msk.bf16.mxu0 %vm10620_vm0, %v10619_v1  ;;  %9395 = vmatprep.mubr.msk.bf16.mxu1 %vm10620_vm0, %v10619_v1  ;;  %v2567_v26 = vsel %vm1095_vm1, %v2564_v4, %v2566_v54  ;;  %v2962_v61 = vshll.u32 %v7811_v22, 16  ;;  %v2970_v4 = vshll.u32 %v11648_v16, 16 }
 0x120   : > { %v840_v27 = vpop.f32.mrf.mxu0  ;;  %9449 = vmatprep.subr.bf16.mxu1 %v10619_v1 }
 0x121   : > { %v871_v28 = vadd.f32 %v840_v27, %v11433_v60  ;;  %v1036_v62 = vpop.f32.mrf.mxu1  ;;  %9414 = vmatpush3.bf16.msra.mxu0 %v10361_v21 }
 0x122   : > { %v9002_v41 = vpop.f32.mrf.mxu0  ;;  %9450 = vmatpush3.bf16.msra.mxu1 %v10364_v23  ;;  %9415 = vmatprep.subr.bf16.mxu0 %v10619_v1  ;;  %v11662_v23 = vld [vmem:[%s10730_s29 + $0xc] sm:$0xff]  }
 0x123   : > { %v11587_v31 = vadd.f32 %v1036_v62, %v871_v28  ;;  %v9038_v60 = vpop.f32.mrf.mxu1  ;;  %9451 = vmatprep.subr.bf16.mxu1 %v10619_v1  ;;  %v2967_v41 = vshrl.u32 %v11648_v16, 16 }
 0x124   : > { %v845_v33 = vpop.f32.mrf.mxu0  ;;  %9360 = vmatmul.mubr.bf16.gmra.mxu0 %v2563_v30  ;;  %v2959_v30 = vshrl.u32 %v7811_v22, 16  ;;  %v3208_v60 = vshrl.u32 %v11662_v23, 16 }
 0x125   : > { %v872_v36 = vadd.f32 %v845_v33, %v11449_v12  ;;  %v1041_v35 = vpop.f32.mrf.mxu1  ;;  %9396 = vmatmul.mubr.bf16.gmra.mxu1 %v2760_v42  ;;  %9416 = vmatpush3.bf16.msra.mxu0 %v10365_v45  ;;  %v10371_v12 = vld [vmem:[%s13493_s4 + $0x398] sm:$0xff]   ;;  %v7841_v45 = vcombine.low %v3143_v14, %v11654_v20  ;;  %v10380_v33 = vld [vmem:[%s13493_s4 + $0x3c0] sm:$0xff]  }
 0x126   : > { %v9005_v44 = vpop.f32.mrf.mxu0  ;;  %9452 = vmatpush3.bf16.msra.mxu1 %v10366_v0  ;;  %9363 = vmatprep.mubr.msk.bf16.mxu0 %vm10620_vm0, %v10619_v1 }
 0x127   : > { %v11606_v47 = vadd.f32 %v1041_v35, %v872_v36  ;;  %v9041_v51 = vpop.f32.mrf.mxu1  ;;  %9399 = vmatprep.mubr.msk.bf16.mxu1 %vm10620_vm0, %v10619_v1  ;;  %9417 = vmatprep.subr.bf16.mxu0 %v10619_v1  ;;  %v3203_v36 = vshll.u32 %v7841_v45, 16 }
 0x128   : > { %v848_v53 = vpop.f32.mrf.mxu0  ;;  %9453 = vmatprep.subr.bf16.mxu1 %v10619_v1  ;;  %v11702_v51 = vld [vmem:[%s10739_s10 + $0x14] sm:$0xff]  }
 0x129   : > { %v873_v55 = vadd.f32 %v848_v53, %v11461_v17  ;;  %v1044_v63 = vpop.f32.mrf.mxu1  ;;  %9418 = vmatpush3.bf16.msra.mxu0 %v10369_v46  ;;  %v2763_v17 = vrot.slane %v11601_v38, 1  ;;  %v2976_v14 = vshrl.u32 %v11702_v51, 16 }
 0x12a   : > { %v9006_v3 = vpop.f32.mrf.mxu0  ;;  %9454 = vmatpush3.bf16.msra.mxu1 %v10370_v37  ;;  %9419 = vmatprep.subr.bf16.mxu0 %v10619_v1  ;;  %v3200_v37 = vshrl.u32 %v7841_v45, 16 }
 0x12b   : > { %v11628_v7 = vadd.f32 %v1044_v63, %v873_v55  ;;  %v9042_v8 = vpop.f32.mrf.mxu1  ;;  %9455 = vmatprep.subr.bf16.mxu1 %v10619_v1  ;;  %v2764_v27 = vsel %vm1095_vm1, %v2761_v48, %v2763_v17  ;;  %v3211_v48 = vshll.u32 %v11662_v23, 16  ;;  %v2964_v55 = vrot.slane %v2962_v61, 2 }
 0x12c   : > { %v853_v34 = vpop.f32.mrf.mxu0  ;;  %9364 = vmatmul.mubr.bf16.gmra.mxu0 %v2565_v2  ;;  %v2969_v63 = vrot.slane %v2967_v41, 1  ;;  %v11706_v2 = vld [vmem:[%s10730_s29 + $0x14] sm:$0xff]   ;;  %v3210_v8 = vrot.slane %v3208_v60, 1  ;;  %v2978_v38 = vrot.slane %v2976_v14, 1 }
 0x12d   : > { %v874_v43 = vadd.f32 %v853_v34, %v11474_v25  ;;  %v1049_v59 = vpop.f32.mrf.mxu1  ;;  %9400 = vmatmul.mubr.bf16.gmra.mxu1 %v2762_v5  ;;  %9420 = vmatpush3.bf16.msra.mxu0 %v10371_v12  ;;  %v2961_v12 = vrot.slane %v2959_v30, 1  ;;  %v3202_v34 = vrot.slane %v3200_v37, 1 }
 0x12e   : > { %v9009_v15 = vpop.f32.mrf.mxu0  ;;  %9367 = vmatprep.mubr.msk.bf16.mxu0 %vm10620_vm0, %v10619_v1  ;;  %9403 = vmatprep.mubr.msk.bf16.mxu1 %vm10620_vm0, %v10619_v1 }
 0x12f   : > { %v11650_v18 = vadd.f32 %v1049_v59, %v874_v43  ;;  %v9045_v25 = vpop.f32.mrf.mxu1  ;;  %9456 = vmatpush3.bf16.msra.mxu1 %v10372_v6  ;;  %9421 = vmatprep.subr.bf16.mxu0 %v10619_v1  ;;  %v2972_v6 = vrot.slane %v2970_v4, 2  ;;  %v3205_v43 = vrot.slane %v3203_v36, 2  ;;  %v2965_v58 = vor.u32 %v2964_v55, %v2961_v12 }
 0x130   : > { %v856_v21 = vpop.f32.mrf.mxu0  ;;  %9457 = vmatprep.subr.bf16.mxu1 %v10619_v1  ;;  %v3217_v25 = vshrl.u32 %v11706_v2, 16 }
 0x131   : > { %v875_v49 = vadd.f32 %v856_v21, %v11486_v29  ;;  %v1052_v52 = vpop.f32.mrf.mxu1  ;;  %9422 = vmatpush3.bf16.msra.mxu0 %v10375_v10  ;;  %v3213_v10 = vrot.slane %v3211_v48, 2  ;;  %v3220_v21 = vshll.u32 %v11706_v2, 16 }
 0x132   : > { %v9010_v57 = vpop.f32.mrf.mxu0  ;;  %9423 = vmatprep.subr.bf16.mxu0 %v10619_v1  ;;  %v3219_v30 = vrot.slane %v3217_v25, 1 }
 0x133   : > { %v11677_v29 = vadd.f32 %v1052_v52, %v875_v49  ;;  %v9046_v28 = vpop.f32.mrf.mxu1  ;;  %9458 = vmatpush3.bf16.msra.mxu1 %v10376_v13  ;;  %v3214_v57 = vor.u32 %v3213_v10, %v3210_v8  ;;  %v3222_v61 = vrot.slane %v3220_v21, 2 }
 0x134   : > { %v861_v62 = vpop.f32.mrf.mxu0  ;;  %9368 = vmatmul.mubr.bf16.gmra.mxu0 %v2567_v26  ;;  %9459 = vmatprep.subr.bf16.mxu1 %v10619_v1  ;;  %v3206_v26 = vor.u32 %v3205_v43, %v3202_v34 }
 0x135   : > { %v876_v42 = vadd.f32 %v861_v62, %v11515_v39  ;;  %v1057_v0 = vpop.f32.mrf.mxu1  ;;  %9404 = vmatmul.mubr.bf16.gmra.mxu1 %v2764_v27  ;;  %9371 = vmatprep.mubr.msk.bf16.mxu0 %vm10620_vm0, %v10619_v1  ;;  %v10379_v39 = vld [vmem:[%s13493_s4 + $0x380] sm:$0xff]  }
 0x136   : > { %v9013_v46 = vpop.f32.mrf.mxu0  ;;  %9407 = vmatprep.mubr.msk.bf16.mxu1 %vm10620_vm0, %v10619_v1  ;;  %9424 = vmatpush3.bf16.msra.mxu0 %v10377_v32  ;;  %v11720_v32 = vld [vmem:[%s10739_s10 + $0x1c] sm:$0xff]   ;;  %v3215_v48 = vsel %vm2957_vm3, %v3206_v26, %v3214_v57 }
 0x137   : > { %v11698_v35 = vadd.f32 %v1057_v0, %v876_v42  ;;  %v9049_v44 = vpop.f32.mrf.mxu1  ;;  %9460 = vmatpush3.bf16.msra.mxu1 %v10378_v24  ;;  %9425 = vmatprep.subr.bf16.mxu0 %v10619_v1  ;;  %v10386_v24 = vld [vmem:[%s13493_s4 + $0x478] sm:$0xff]   ;;  %v2985_v41 = vshrl.u32 %v11720_v32, 16 }
 0x138   : > { %v864_v53 = vpop.f32.mrf.mxu0  ;;  %9461 = vmatprep.subr.bf16.mxu1 %v10619_v1  ;;  %v10387_v44 = vld [vmem:[%s13493_s4 + $0x430] sm:$0xff]  }
 0x139   : > { %v877_v3 = vadd.f32 %v864_v53, %v11521_v50  ;;  %v1060_v5 = vpop.f32.mrf.mxu1  ;;  %v2979_v50 = vshll.u32 %v11702_v51, 16  ;;  %v11753_v53 = vld [vmem:[%s10739_s10 + $0x24] sm:$0xff]  }
 0x13a   : > { %v9014_v11 = vpop.f32.mrf.mxu0  ;;  %9426 = vmatpush3.bf16.msra.mxu0 %v10379_v39  ;;  %v2994_v25 = vshrl.u32 %v11753_v53, 16  ;;  %v2997_v21 = vshll.u32 %v11753_v53, 16 }
 0x13b   : > { %v11709_v59 = vadd.f32 %v1060_v5, %v877_v3  ;;  %v9050_v13 = vpop.f32.mrf.mxu1  ;;  %9462 = vmatpush3.bf16.msra.mxu1 %v10380_v33  ;;  %9483 = vmatprep.subr.bf16.mxu0 %v10619_v1  ;;  %v2981_v62 = vrot.slane %v2979_v50, 2  ;;  %v2988_v33 = vshll.u32 %v11720_v32, 16  ;;  %v3223_v5 = vor.u32 %v3222_v61, %v3219_v30 }
 0x13c   : > { %v1192_v15 = vpop.f32.mrf.mxu0  ;;  %9372 = vmatmul.mubr.bf16.gmra.mxu0 %v2566_v54  ;;  %9519 = vmatprep.subr.bf16.mxu1 %v10619_v1  ;;  %v2973_v54 = vor.u32 %v2972_v6, %v2969_v63  ;;  %v10390_v6 = vld [vmem:[%s13493_s4 + $0x470] sm:$0xff]   ;;  %v2987_v11 = vrot.slane %v2985_v41, 1  ;;  %v11770_v13 = vld [vmem:[%s10730_s29 + $0x24] sm:$0xff]  }
 0x13d   : > { %v1231_v22 = vadd.f32 %v1192_v15, %v11537_v9  ;;  %v1358_v49 = vpop.f32.mrf.mxu1  ;;  %9408 = vmatmul.mubr.bf16.gmra.mxu1 %v2763_v17  ;;  %9427 = vmatprep.mubr.msk.bf16.mxu0 %vm10620_vm0, %v10619_v1  ;;  %v10385_v9 = vld [vmem:[%s13493_s4 + $0x438] sm:$0xff]   ;;  %v2982_v63 = vor.u32 %v2981_v62, %v2978_v38  ;;  %v2990_v34 = vrot.slane %v2988_v33, 2  ;;  %v10392_v15 = vld [vmem:[%s13493_s4 + $0x468] sm:$0xff]   ;;  %v3224_v26 = vsel %vm2957_vm3, %v3214_v57, %v3223_v5  ;;  %v10396_v41 = vld [vmem:[%s13493_s4 + $0x460] sm:$0xff]  }
 0x13e   : > { %v9069_v52 = vpop.f32.mrf.mxu0  ;;  %9463 = vmatprep.mubr.msk.bf16.mxu1 %vm10620_vm0, %v10619_v1  ;;  %v11735_v17 = vld [vmem:[%s10730_s29 + $0x1c] sm:$0xff]   ;;  %v2974_v4 = vsel %vm2957_vm3, %v2965_v58, %v2973_v54  ;;  %v3235_v38 = vshrl.u32 %v11770_v13, 16 }
 0x13f   : > { %v11729_v27 = vadd.f32 %v1358_v49, %v1231_v22  ;;  %v9105_v45 = vpop.f32.mrf.mxu1  ;;  %v3226_v37 = vshrl.u32 %v11735_v17, 16  ;;  %v2983_v58 = vsel %vm2957_vm3, %v2973_v54, %v2982_v63  ;;  %v10395_v54 = vld [vmem:[%s13493_s4 + $0x420] sm:$0xff]   ;;  %v2991_v62 = vor.u32 %v2990_v34, %v2987_v11  ;;  %v10397_v33 = vld [vmem:[%s13493_s4 + $0x418] sm:$0xff]  }
 0x140   : > { %v1195_v28 = vpop.f32.mrf.mxu0 }
 0x141   : > { %v1232_v42 = vadd.f32 %v1195_v28, %v11552_v19  ;;  %v1361_v0 = vpop.f32.mrf.mxu1  ;;  %v3229_v19 = vshll.u32 %v11735_v17, 16  ;;  %v3228_v43 = vrot.slane %v3226_v37, 1  ;;  %v3238_v28 = vshll.u32 %v11770_v13, 16  ;;  %v11806_v37 = vld [vmem:[%s10739_s10 + $0x2c] ss:$0 sps:$4 sm:$0x11]  }
 0x142   : > { %v9070_v60 = vpop.f32.mrf.mxu0 }
 0x143   : > { %v11744_v46 = vadd.f32 %v1361_v0, %v1232_v42  ;;  %v9106_v39 = vpop.f32.mrf.mxu1  ;;  %v3231_v50 = vrot.slane %v3229_v19, 2  ;;  %v2996_v42 = vrot.slane %v2994_v25, 1  ;;  %v3237_v60 = vrot.slane %v3235_v38, 1 }
 0x144   : > { %v1200_v36 = vpop.f32.mrf.mxu0  ;;  %9428 = vmatmul.mubr.bf16.vlgmr.msra.gmra.mxu0 %v2974_v4  ;;  %v2992_v19 = vsel %vm2957_vm3, %v2982_v63, %v2991_v62  ;;  %v11822_v63 = vld [vmem:[%s10730_s29 + $0x2c] ss:$0 sps:$4 sm:$0x11]  }
 0x145   : > { %v1233_v12 = vadd.f32 %v1200_v36, %v11566_v40  ;;  %v1366_v55 = vpop.f32.mrf.mxu1  ;;  %9464 = vmatmul.mubr.bf16.vlgmr.msra.gmra.mxu1 %v3215_v48  ;;  %9484 = vmatpush3.bf16.msra.mxu0 %v10385_v9  ;;  %v10391_v40 = vld [vmem:[%s13493_s4 + $0x428] sm:$0xff]   ;;  %v3232_v61 = vor.u32 %v3231_v50, %v3228_v43  ;;  %v3240_v48 = vrot.slane %v3238_v28, 2 }
 0x146   : > { %v9073_v3 = vpop.f32.mrf.mxu0  ;;  %9520 = vmatpush3.bf16.msra.mxu1 %v10386_v24  ;;  %9485 = vmatprep.subr.bf16.mxu0 %v10619_v1 }
 0x147   : > { %v11760_v8 = vadd.f32 %v1366_v55, %v1233_v12  ;;  %v9109_v10 = vpop.f32.mrf.mxu1  ;;  %9431 = vmatprep.mubr.msk.bf16.mxu0 %vm10620_vm0, %v10619_v1  ;;  %9467 = vmatprep.mubr.msk.bf16.mxu1 %vm10620_vm0, %v10619_v1  ;;  %v10398_v12 = vld [vmem:[%s13493_s4 + $0x458] sm:$0xff]   ;;  %v3233_v3 = vsel %vm2957_vm3, %v3223_v5, %v3232_v61 }
 0x148   : > { %v1203_v14 = vpop.f32.mrf.mxu0  ;;  %9521 = vmatprep.subr.bf16.mxu1 %v10619_v1 }
 0x149   : > { %v1234_v22 = vadd.f32 %v1203_v14, %v11587_v31  ;;  %v1369_v49 = vpop.f32.mrf.mxu1  ;;  %9486 = vmatpush3.bf16.msra.mxu0 %v10387_v44  ;;  %v3241_v14 = vor.u32 %v3240_v48, %v3237_v60 }
 0x14a   : > { %v9074_v52 = vpop.f32.mrf.mxu0  ;;  %9522 = vmatpush3.bf16.msra.mxu1 %v10390_v6  ;;  %9487 = vmatprep.subr.bf16.mxu0 %v10619_v1 }
 0x14b   : > { %v11782_v45 = vadd.f32 %v1369_v49, %v1234_v22  ;;  %v9110_v9 = vpop.f32.mrf.mxu1  ;;  %9523 = vmatprep.subr.bf16.mxu1 %v10619_v1  ;;  %v10403_v22 = vld [vmem:[%s13493_s4 + $0x408] sm:$0xff]   ;;  %v3244_v49 = vshll.u32 %v11822_v63, 16  ;;  %v3242_v28 = vsel %vm2957_vm3, %v3232_v61, %v3241_v14 }
 0x14c   : > { %v1208_v31 = vpop.f32.mrf.mxu0  ;;  %9432 = vmatmul.mubr.bf16.gmra.mxu0 %v2983_v58  ;;  %v3384_v58 = vld [vmem:[%s10739_s10 + $0x4] sm:$0xc] }
 0x14d   : > { %v1235_v57 = vadd.f32 %v1208_v31, %v11606_v47  ;;  %v1374_v24 = vpop.f32.mrf.mxu1  ;;  %9468 = vmatmul.mubr.bf16.gmra.mxu1 %v3224_v26  ;;  %9488 = vmatpush3.bf16.msra.mxu0 %v10391_v40  ;;  %v2999_v47 = vrot.slane %v2997_v21, 2  ;;  %v7871_v61 = vcombine.low %v3384_v58, %v11636_v56  ;;  %v10408_v56 = vld [vmem:[%s13493_s4 + $0x440] sm:$0xff]  }
 0x14e   : > { %v9077_v30 = vpop.f32.mrf.mxu0  ;;  %9524 = vmatpush3.bf16.msra.mxu1 %v10392_v15  ;;  %9435 = vmatprep.mubr.msk.bf16.mxu0 %vm10620_vm0, %v10619_v1  ;;  %v3003_v15 = vshll.u32 %v11806_v37, 16 }
 0x14f   : > { %v11796_v0 = vadd.f32 %v1374_v24, %v1235_v57  ;;  %v9113_v4 = vpop.f32.mrf.mxu1  ;;  %9471 = vmatprep.mubr.msk.bf16.mxu1 %vm10620_vm0, %v10619_v1  ;;  %9489 = vmatprep.subr.bf16.mxu0 %v10619_v1  ;;  %v3000_v5 = vor.u32 %v2999_v47, %v2996_v42  ;;  %v3553_v30 = vld [vmem:[%s10730_s29 + $0x4] sm:$0xc] }
 0x150   : > { %v1211_v39 = vpop.f32.mrf.mxu0  ;;  %9525 = vmatprep.subr.bf16.mxu1 %v10619_v1  ;;  %v3005_v31 = vrot.slane %v3003_v15, 2  ;;  %v7896_v60 = vcombine.low %v3553_v30, %v11654_v20 }
 0x151   : > { %v1236_v36 = vadd.f32 %v1211_v39, %v11628_v7  ;;  %v1377_v44 = vpop.f32.mrf.mxu1  ;;  %9490 = vmatpush3.bf16.msra.mxu0 %v10395_v54  ;;  %v10401_v7 = vld [vmem:[%s13493_s4 + $0x410] sm:$0xff]   ;;  %v3001_v9 = vsel %vm2957_vm3, %v2991_v62, %v3000_v5  ;;  %v10406_v54 = vld [vmem:[%s13493_s4 + $0x448] sm:$0xff]   ;;  %v10407_v62 = vld [vmem:[%s13493_s4 + $0x400] sm:$0xff]  }
 0x152   : > { %v9078_v55 = vpop.f32.mrf.mxu0  ;;  %9526 = vmatpush3.bf16.msra.mxu1 %v10396_v41  ;;  %9491 = vmatprep.subr.bf16.mxu0 %v10619_v1  ;;  %v3246_v41 = vrot.slane %v3244_v49, 2  ;;  %v3409_v49 = vrot.slane %v11702_v51, 2 }
 0x153   : > { %v11815_v6 = vadd.f32 %v1377_v44, %v1236_v36  ;;  %v9114_v10 = vpop.f32.mrf.mxu1  ;;  %9527 = vmatprep.subr.bf16.mxu1 %v10619_v1  ;;  %v3407_v55 = vrot.slane %v11648_v16, 2 }
 0x154   : > { %v1216_v40 = vpop.f32.mrf.mxu0  ;;  %9436 = vmatmul.mubr.bf16.gmra.mxu0 %v2992_v19  ;;  %v3006_v19 = vsel %vm2957_vm3, %v3000_v5, %v3005_v31  ;;  %v3247_v20 = vsel %vm2957_vm3, %v3241_v14, %v3246_v41  ;;  %v3575_v10 = vrot.slane %v11662_v23, 2  ;;  %v10415_v41 = vld [vmem:[%s13493_s4 + $0x4a8] sm:$0xff]  }
 0x155   : > { %v1237_v11 = vadd.f32 %v1216_v40, %v11650_v18  ;;  %v1382_v34 = vpop.f32.mrf.mxu1  ;;  %9472 = vmatmul.mubr.bf16.gmra.mxu1 %v3233_v3  ;;  %9492 = vmatpush3.bf16.msra.mxu0 %v10397_v33  ;;  %v10402_v18 = vld [vmem:[%s13493_s4 + $0x450] sm:$0xff]   ;;  %v3406_v33 = vrot.slane %v7871_v61, 2  ;;  %v3574_v3 = vrot.slane %v7896_v60, 2 }
 0x156   : > { %v9081_v43 = vpop.f32.mrf.mxu0  ;;  %9439 = vmatprep.mubr.msk.bf16.mxu0 %vm10620_vm0, %v10619_v1  ;;  %9475 = vmatprep.mubr.msk.bf16.mxu1 %vm10620_vm0, %v10619_v1 }
 0x157   : > { %v11830_v50 = vadd.f32 %v1382_v34, %v1237_v11  ;;  %v9117_v25 = vpop.f32.mrf.mxu1  ;;  %9528 = vmatpush3.bf16.msra.mxu1 %v10398_v12  ;;  %9493 = vmatprep.subr.bf16.mxu0 %v10619_v1  ;;  %v10411_v43 = vld [vmem:[%s13493_s4 + $0x4b8] sm:$0xff]  }
 0x158   : > { %v1219_v21 = vpop.f32.mrf.mxu0  ;;  %9529 = vmatprep.subr.bf16.mxu1 %v10619_v1  ;;  %v3408_v25 = vsel %vm3405_vm4, %v3406_v33, %v3407_v55 }
 0x159   : > { %v1238_v52 = vadd.f32 %v1219_v21, %v11677_v29  ;;  %v1385_v26 = vpop.f32.mrf.mxu1  ;;  %9494 = vmatpush3.bf16.msra.mxu0 %v10401_v7  ;;  %v3576_v21 = vsel %vm3405_vm4, %v3574_v3, %v3575_v10 }
 0x15a   : > { %v9082_v38 = vpop.f32.mrf.mxu0  ;;  %9495 = vmatprep.subr.bf16.mxu0 %v10619_v1 }
 0x15b   : > { %v11849_v57 = vadd.f32 %v1385_v26, %v1238_v52  ;;  %v9118_v24 = vpop.f32.mrf.mxu1  ;;  %9530 = vmatpush3.bf16.msra.mxu1 %v10402_v18  ;;  %v10413_v26 = vld [vmem:[%s13493_s4 + $0x4b0] sm:$0xff]  }
 0x15c   : > { %v1224_v29 = vpop.f32.mrf.mxu0  ;;  %9440 = vmatmul.mubr.bf16.gmra.mxu0 %v3001_v9  ;;  %9531 = vmatprep.subr.bf16.mxu1 %v10619_v1  ;;  %v10414_v38 = vld [vmem:[%s13493_s4 + $0x4f0] sm:$0xff]  }
 0x15d   : > { %v1239_v42 = vadd.f32 %v1224_v29, %v11698_v35  ;;  %v1390_v4 = vpop.f32.mrf.mxu1  ;;  %9476 = vmatmul.mubr.bf16.gmra.mxu1 %v3242_v28  ;;  %9443 = vmatprep.mubr.msk.bf16.mxu0 %vm10620_vm0, %v10619_v1  ;;  %v3410_v29 = vsel %vm3405_vm4, %v3407_v55, %v3409_v49  ;;  %v10419_v55 = vld [vmem:[%s13493_s4 + $0x498] sm:$0xff]  }
 0x15e   : > { %v9085_v47 = vpop.f32.mrf.mxu0  ;;  %9479 = vmatprep.mubr.msk.bf16.mxu1 %vm10620_vm0, %v10619_v1  ;;  %9496 = vmatpush3.bf16.msra.mxu0 %v10403_v22  ;;  %v10412_v22 = vld [vmem:[%s13493_s4 + $0x4f8] sm:$0xff]  }
 0x15f   : > { %v11863_v48 = vadd.f32 %v1390_v4, %v1239_v42  ;;  %v9121_v39 = vpop.f32.mrf.mxu1  ;;  %9532 = vmatpush3.bf16.msra.mxu1 %v10406_v54  ;;  %9497 = vmatprep.subr.bf16.mxu0 %v10619_v1  ;;  %v10416_v42 = vld [vmem:[%s13493_s4 + $0x4e8] sm:$0xff]  }
 0x160   : > { %v1227_v35 = vpop.f32.mrf.mxu0  ;;  %9533 = vmatprep.subr.bf16.mxu1 %v10619_v1 }
 0x161   : > { %v1240_v36 = vadd.f32 %v1227_v35, %v11709_v59  ;;  %v1393_v44 = vpop.f32.mrf.mxu1  ;;  %v10417_v35 = vld [vmem:[%s13493_s4 + $0x4a0] sm:$0xff]  }
 0x162   : > { %v9086_v12 = vpop.f32.mrf.mxu0  ;;  %9498 = vmatpush3.bf16.msra.mxu0 %v10407_v62 }
 0x163   : > { %v11875_v7 = vadd.f32 %v1393_v44, %v1240_v36  ;;  %v9122_v40 = vpop.f32.mrf.mxu1  ;;  %9534 = vmatpush3.bf16.msra.mxu1 %v10408_v56  ;;  %9555 = vmatprep.subr.bf16.mxu0 %v10619_v1  ;;  %v3411_v56 = vrot.slane %v11720_v32, 2  ;;  %v3579_v36 = vrot.slane %v11735_v17, 2 }
 0x164   : > { %v1546_v59 = vpop.f32.mrf.mxu0  ;;  %9444 = vmatmul.mubr.bf16.gmra.mxu0 %v3006_v19  ;;  %9591 = vmatprep.subr.bf16.mxu1 %v10619_v1 }
 0x165   : > { %v1585_v11 = vadd.f32 %v1546_v59, %v11729_v27  ;;  %v1734_v34 = vpop.f32.mrf.mxu1  ;;  %9480 = vmatmul.mubr.bf16.gmra.mxu1 %v3247_v20  ;;  %9499 = vmatprep.mubr.msk.bf16.mxu0 %vm10620_vm0, %v10619_v1  ;;  %v3412_v17 = vsel %vm3405_vm4, %v3409_v49, %v3411_v56 }
 0x166   : > { %v9141_v16 = vpop.f32.mrf.mxu0  ;;  %9535 = vmatprep.mubr.msk.bf16.mxu1 %vm10620_vm0, %v10619_v1 }
 0x167   : > { %v11884_v23 = vadd.f32 %v1734_v34, %v1585_v11  ;;  %v9177_v5 = vpop.f32.mrf.mxu1 }
 0x168   : > { %v1549_v14 = vpop.f32.mrf.mxu0  ;;  %v3413_v5 = vrot.slane %v11753_v53, 2  ;;  %v10422_v53 = vld [vmem:[%s13493_s4 + $0x4d0] sm:$0xff]  }
 0x169   : > { %v1586_v15 = vadd.f32 %v1549_v14, %v11744_v46  ;;  %v1737_v27 = vpop.f32.mrf.mxu1  ;;  %v3577_v46 = vrot.slane %v11706_v2, 2 }
 0x16a   : > { %v9142_v18 = vpop.f32.mrf.mxu0 }
 0x16b   : > { %v11896_v58 = vadd.f32 %v1737_v27, %v1586_v15  ;;  %v9178_v52 = vpop.f32.mrf.mxu1  ;;  %v3578_v61 = vsel %vm3405_vm4, %v3575_v10, %v3577_v46  ;;  %v3580_v10 = vsel %vm3405_vm4, %v3577_v46, %v3579_v36  ;;  %v3581_v15 = vrot.slane %v11770_v13, 2 }
 0x16c   : > { %v1554_v9 = vpop.f32.mrf.mxu0  ;;  %9500 = vmatmul.mubr.bf16.vlgmr.msra.gmra.mxu0 %v3408_v25  ;;  %v10423_v52 = vld [vmem:[%s13493_s4 + $0x488] sm:$0xff]  }
 0x16d   : > { %v1587_v28 = vadd.f32 %v1554_v9, %v11760_v8  ;;  %v1742_v31 = vpop.f32.mrf.mxu1  ;;  %9536 = vmatmul.mubr.bf16.vlgmr.msra.gmra.mxu1 %v3576_v21  ;;  %9556 = vmatpush3.bf16.msra.mxu0 %v10411_v43  ;;  %v10421_v43 = vld [vmem:[%s13493_s4 + $0x490] sm:$0xff]   ;;  %v3582_v49 = vsel %vm3405_vm4, %v3579_v36, %v3581_v15 }
 0x16e   : > { %v9145_v51 = vpop.f32.mrf.mxu0  ;;  %9592 = vmatpush3.bf16.msra.mxu1 %v10412_v22  ;;  %9557 = vmatprep.subr.bf16.mxu0 %v10619_v1  ;;  %v3414_v22 = vsel %vm3405_vm4, %v3411_v56, %v3413_v5 }
 0x16f   : > { %v11907_v54 = vadd.f32 %v1742_v31, %v1587_v28  ;;  %v9181_v24 = vpop.f32.mrf.mxu1  ;;  %9503 = vmatprep.mubr.msk.bf16.mxu0 %vm10620_vm0, %v10619_v1  ;;  %9539 = vmatprep.mubr.msk.bf16.mxu1 %vm10620_vm0, %v10619_v1  ;;  %v3415_v31 = vrot.slane %v11806_v37, 2  ;;  %v10426_v37 = vld [vmem:[%s13493_s4 + $0x4c0] sm:$0xff]  }
 0x170   : > { %v1557_v2 = vpop.f32.mrf.mxu0  ;;  %9593 = vmatprep.subr.bf16.mxu1 %v10619_v1  ;;  %v3583_v24 = vrot.slane %v11822_v63, 2 }
 0x171   : > { %v1588_v8 = vadd.f32 %v1557_v2, %v11782_v45  ;;  %v1745_v30 = vpop.f32.mrf.mxu1  ;;  %9558 = vmatpush3.bf16.msra.mxu0 %v10413_v26 }
 0x172   : > { %v9146_v62 = vpop.f32.mrf.mxu0  ;;  %9594 = vmatpush3.bf16.msra.mxu1 %v10414_v38  ;;  %9559 = vmatprep.subr.bf16.mxu0 %v10619_v1 }
 0x173   : > { %v11924_v4 = vadd.f32 %v1745_v30, %v1588_v8  ;;  %v9182_v45 = vpop.f32.mrf.mxu1  ;;  %9595 = vmatprep.subr.bf16.mxu1 %v10619_v1  ;;  %v10427_v62 = vld [vmem:[%s10953_s20 + $0x4] sm:$0xfe]  }
 0x174   : > { %v1562_v47 = vpop.f32.mrf.mxu0  ;;  %9504 = vmatmul.mubr.bf16.gmra.mxu0 %v3410_v29  ;;  %v3584_v45 = vsel %vm3405_vm4, %v3581_v15, %v3583_v24  ;;  %v3773_v36 = vrot.slane %v10427_v62, 1 }
 0x175   : > { %v1589_v60 = vadd.f32 %v1562_v47, %v11796_v0  ;;  %v1750_v39 = vpop.f32.mrf.mxu1  ;;  %9540 = vmatmul.mubr.bf16.gmra.mxu1 %v3578_v61  ;;  %9560 = vmatpush3.bf16.msra.mxu0 %v10415_v41  ;;  %v10418_v0 = vld [vmem:[%s13493_s4 + $0x4e0] sm:$0xff]   ;;  %v3416_v41 = vsel %vm3405_vm4, %v3413_v5, %v3415_v31  ;;  %v10428_v61 = vld [vmem:[%s10953_s20 + $0xc] sm:$0xff]   ;;  %v12035_v5 = vld [vmem:[%s10965_s27 + $0x14] sm:$0xff]  }
 0x176   : > { %v9149_v33 = vpop.f32.mrf.mxu0  ;;  %9596 = vmatpush3.bf16.msra.mxu1 %v10416_v42  ;;  %9507 = vmatprep.mubr.msk.bf16.mxu0 %vm10620_vm0, %v10619_v1  ;;  %v10429_v47 = vld [vmem:[%s10965_s27 + $0x4] sm:$0xfe]  }
 0x177   : > { %v11938_v44 = vadd.f32 %v1750_v39, %v1589_v60  ;;  %v9185_v19 = vpop.f32.mrf.mxu1  ;;  %9543 = vmatprep.mubr.msk.bf16.mxu1 %vm10620_vm0, %v10619_v1  ;;  %9561 = vmatprep.subr.bf16.mxu0 %v10619_v1  ;;  %v10430_v60 = vld [vmem:[%s10965_s27 + $0xc] sm:$0xff]  }
 0x178   : > { %v1565_v32 = vpop.f32.mrf.mxu0  ;;  %9597 = vmatprep.subr.bf16.mxu1 %v10619_v1 }
 0x179   : > { %v1590_v20 = vadd.f32 %v1565_v32, %v11815_v6  ;;  %v1753_v12 = vpop.f32.mrf.mxu1  ;;  %9562 = vmatpush3.bf16.msra.mxu0 %v10417_v35  ;;  %v10420_v6 = vld [vmem:[%s13493_s4 + $0x4d8] sm:$0xff]   ;;  %v3970_v32 = vrot.slane %v10429_v47, 1 }
 0x17a   : > { %v9150_v3 = vpop.f32.mrf.mxu0  ;;  %9598 = vmatpush3.bf16.msra.mxu1 %v10418_v0  ;;  %9563 = vmatprep.subr.bf16.mxu0 %v10619_v1  ;;  %v3774_v0 = vrot.slane %v10428_v61, 1 }
 0x17b   : > { %v11951_v40 = vadd.f32 %v1753_v12, %v1590_v20  ;;  %v9186_v59 = vpop.f32.mrf.mxu1  ;;  %9599 = vmatprep.subr.bf16.mxu1 %v10619_v1  ;;  %v3971_v20 = vrot.slane %v10430_v60, 1 }
 0x17c   : > { %v1570_v11 = vpop.f32.mrf.mxu0  ;;  %9508 = vmatmul.mubr.bf16.gmra.mxu0 %v3412_v17  ;;  %v10431_v59 = vld [vmem:[%s13493_s4 + $0x538] sm:$0xff]  }
 0x17d   : > { %v1591_v34 = vadd.f32 %v1570_v11, %v11830_v50  ;;  %v1758_v16 = vpop.f32.mrf.mxu1  ;;  %9544 = vmatmul.mubr.bf16.gmra.mxu1 %v3580_v10  ;;  %9564 = vmatpush3.bf16.msra.mxu0 %v10419_v55  ;;  %v3775_v10 = vsel %vm1095_vm1, %v3773_v36, %v3774_v0 }
 0x17e   : > { %v9153_v14 = vpop.f32.mrf.mxu0  ;;  %9511 = vmatprep.mubr.msk.bf16.mxu0 %vm10620_vm0, %v10619_v1  ;;  %9547 = vmatprep.mubr.msk.bf16.mxu1 %vm10620_vm0, %v10619_v1 }
 0x17f   : > { %v11967_v27 = vadd.f32 %v1758_v16, %v1591_v34  ;;  %v9189_v50 = vpop.f32.mrf.mxu1  ;;  %9600 = vmatpush3.bf16.msra.mxu1 %v10420_v6  ;;  %9565 = vmatprep.subr.bf16.mxu0 %v10619_v1  ;;  %v12028_v6 = vld [vmem:[%s10953_s20 + $0x14] sm:$0xff]   ;;  %v3972_v34 = vsel %vm1095_vm1, %v3970_v32, %v3971_v20 }
 0x180   : > { %v1573_v25 = vpop.f32.mrf.mxu0  ;;  %9601 = vmatprep.subr.bf16.mxu1 %v10619_v1  ;;  %v10432_v16 = vld [vmem:[%s13493_s4 + $0x578] sm:$0xff]  }
 0x181   : > { %v1592_v18 = vadd.f32 %v1573_v25, %v11849_v57  ;;  %v1761_v21 = vpop.f32.mrf.mxu1  ;;  %9566 = vmatpush3.bf16.msra.mxu0 %v10421_v43  ;;  %v10424_v57 = vld [vmem:[%s13493_s4 + $0x4c8] sm:$0xff]   ;;  %v3776_v25 = vrot.slane %v12028_v6, 1  ;;  %v10444_v32 = vld [vmem:[%s13493_s4 + $0x558] sm:$0xff]  }
 0x182   : > { %v9154_v13 = vpop.f32.mrf.mxu0  ;;  %9567 = vmatprep.subr.bf16.mxu0 %v10619_v1 }
 0x183   : > { %v11981_v26 = vadd.f32 %v1761_v21, %v1592_v18  ;;  %v9190_v46 = vpop.f32.mrf.mxu1  ;;  %9602 = vmatpush3.bf16.msra.mxu1 %v10422_v53  ;;  %v10433_v53 = vld [vmem:[%s13493_s4 + $0x530] sm:$0xff]   ;;  %v3973_v21 = vrot.slane %v12035_v5, 1  ;;  %v4356_v5 = vld [vmem:[%s10965_s27 + $0x4] sm:$0xe] }
 0x184   : > { %v1578_v9 = vpop.f32.mrf.mxu0  ;;  %9512 = vmatmul.mubr.bf16.gmra.mxu0 %v3414_v22  ;;  %9603 = vmatprep.subr.bf16.mxu1 %v10619_v1 }
 0x185   : > { %v1593_v38 = vadd.f32 %v1578_v9, %v11863_v48  ;;  %v1766_v28 = vpop.f32.mrf.mxu1  ;;  %9548 = vmatmul.mubr.bf16.gmra.mxu1 %v3582_v49  ;;  %9515 = vmatprep.mubr.msk.bf16.mxu0 %vm10620_vm0, %v10619_v1  ;;  %v10425_v48 = vld [vmem:[%s13493_s4 + $0x480] sm:$0xff]   ;;  %v10437_v9 = vld [vmem:[%s13493_s4 + $0x528] sm:$0xff]   ;;  %v3974_v31 = vsel %vm1095_vm1, %v3971_v20, %v3973_v21 }
 0x186   : > { %v9157_v51 = vpop.f32.mrf.mxu0  ;;  %9551 = vmatprep.mubr.msk.bf16.mxu1 %vm10620_vm0, %v10619_v1  ;;  %9568 = vmatpush3.bf16.msra.mxu0 %v10423_v52 }
 0x187   : > { %v11997_v2 = vadd.f32 %v1766_v28, %v1593_v38  ;;  %v9193_v8 = vpop.f32.mrf.mxu1  ;;  %9604 = vmatpush3.bf16.msra.mxu1 %v10424_v57  ;;  %9569 = vmatprep.subr.bf16.mxu0 %v10619_v1  ;;  %v3777_v57 = vsel %vm1095_vm1, %v3774_v0, %v3776_v25  ;;  %v12062_v38 = vld [vmem:[%s10953_s20 + $0x1c] sm:$0xff]   ;;  %v12103_v0 = vld [vmem:[%s10965_s27 + $0x24] sm:$0xff]  }
 0x188   : > { %v1581_v30 = vpop.f32.mrf.mxu0  ;;  %9605 = vmatprep.subr.bf16.mxu1 %v10619_v1  ;;  %v12070_v51 = vld [vmem:[%s10965_s27 + $0x1c] sm:$0xff]  }
 0x189   : > { %v1594_v63 = vadd.f32 %v1581_v30, %v11875_v7  ;;  %v1769_v29 = vpop.f32.mrf.mxu1  ;;  %v3975_v62 = vrot.slane %v12070_v51, 1 }
 0x18a   : > { %v9158_v42 = vpop.f32.mrf.mxu0  ;;  %9570 = vmatpush3.bf16.msra.mxu0 %v10425_v48 }
 0x18b   : > { %v12011_v39 = vadd.f32 %v1769_v29, %v1594_v63  ;;  %v9194_v56 = vpop.f32.mrf.mxu1  ;;  %9606 = vmatpush3.bf16.msra.mxu1 %v10426_v37  ;;  %9627 = vmatprep.subr.bf16.mxu0 %v10619_v1  ;;  %v3778_v63 = vrot.slane %v12062_v38, 1  ;;  %v10441_v29 = vld [vmem:[%s13493_s4 + $0x520] sm:$0xff]   ;;  %v3976_v36 = vsel %vm1095_vm1, %v3973_v21, %v3975_v62 }
 0x18c   : > { %v1930_v35 = vpop.f32.mrf.mxu0  ;;  %9516 = vmatmul.mubr.bf16.gmra.mxu0 %v3416_v41  ;;  %9663 = vmatprep.subr.bf16.mxu1 %v10619_v1 }
 0x18d   : > { %v1969_v7 = vadd.f32 %v1930_v35, %v11884_v23  ;;  %v2126_v33 = vpop.f32.mrf.mxu1  ;;  %9552 = vmatmul.mubr.bf16.gmra.mxu1 %v3584_v45  ;;  %9571 = vmatprep.mubr.msk.bf16.mxu0 %vm10620_vm0, %v10619_v1  ;;  %v3779_v56 = vsel %vm1095_vm1, %v3776_v25, %v3778_v63  ;;  %v10443_v35 = vld [vmem:[%s13493_s4 + $0x518] sm:$0xff]  }
 0x18e   : > { %v9213_v19 = vpop.f32.mrf.mxu0  ;;  %9607 = vmatprep.mubr.msk.bf16.mxu1 %vm10620_vm0, %v10619_v1 }
 0x18f   : > { %v12020_v12 = vadd.f32 %v2126_v33, %v1969_v7  ;;  %v9249_v17 = vpop.f32.mrf.mxu1  ;;  %v12098_v7 = vld [vmem:[%s10953_s20 + $0x24] sm:$0xff]  }
 0x190   : > { %v1933_v55 = vpop.f32.mrf.mxu0 }
 0x191   : > { %v1970_v23 = vadd.f32 %v1933_v55, %v11896_v58  ;;  %v2129_v3 = vpop.f32.mrf.mxu1 }
 0x192   : > { %v9214_v11 = vpop.f32.mrf.mxu0 }
 0x193   : > { %v12037_v43 = vadd.f32 %v2129_v3, %v1970_v23  ;;  %v9250_v58 = vpop.f32.mrf.mxu1  ;;  %v3780_v23 = vrot.slane %v12098_v7, 1  ;;  %v10447_v3 = vld [vmem:[%s13493_s4 + $0x510] sm:$0xff]  }
 0x194   : > { %v1938_v14 = vpop.f32.mrf.mxu0  ;;  %9572 = vmatmul.mubr.bf16.vlgmr.msra.gmra.mxu0 %v3775_v10  ;;  %v4115_v10 = vld [vmem:[%s10953_s20 + $0x4] sm:$0xe]  ;;  %v12133_v58 = vld [vmem:[%s10965_s27 + $0x8] sm:$0xf] }
 0x195   : > { %v1971_v15 = vadd.f32 %v1938_v14, %v11907_v54  ;;  %v2134_v50 = vpop.f32.mrf.mxu1  ;;  %9608 = vmatmul.mubr.bf16.vlgmr.msra.gmra.mxu1 %v3972_v34  ;;  %9628 = vmatpush3.bf16.msra.mxu0 %v10431_v59  ;;  %v10436_v54 = vld [vmem:[%s13493_s4 + $0x570] sm:$0xff]   ;;  %v12118_v59 = vld [vmem:[%s10953_s20 + $0x8] sm:$0xf]  ;;  %v3781_v25 = vsel %vm1095_vm1, %v3778_v63, %v3780_v23 }
 0x196   : > { %v9217_v18 = vpop.f32.mrf.mxu0  ;;  %9664 = vmatpush3.bf16.msra.mxu1 %v10432_v16  ;;  %9629 = vmatprep.subr.bf16.mxu0 %v10619_v1  ;;  %v10448_v16 = vld [vmem:[%s13493_s4 + $0x550] sm:$0xff]  }
 0x197   : > { %v12049_v22 = vadd.f32 %v2134_v50, %v1971_v15  ;;  %v9253_v13 = vpop.f32.mrf.mxu1  ;;  %9575 = vmatprep.mubr.msk.bf16.mxu0 %vm10620_vm0, %v10619_v1  ;;  %9611 = vmatprep.mubr.msk.bf16.mxu1 %vm10620_vm0, %v10619_v1  ;;  %v7979_v15 = vcombine.low %v4115_v10, %v12118_v59  ;;  %v12142_v18 = vld [vmem:[%s10953_s20 + $0xc] sm:$0xff]  }
 0x198   : > { %v1941_v49 = vpop.f32.mrf.mxu0  ;;  %9665 = vmatprep.subr.bf16.mxu1 %v10619_v1  ;;  %v10449_v13 = vld [vmem:[%s13493_s4 + $0x508] sm:$0xff]   ;;  %v4180_v51 = vshrl.u32 %v12142_v18, 16 }
 0x199   : > { %v1972_v52 = vadd.f32 %v1941_v49, %v11924_v4  ;;  %v2137_v46 = vpop.f32.mrf.mxu1  ;;  %9630 = vmatpush3.bf16.msra.mxu0 %v10433_v53  ;;  %v10438_v4 = vld [vmem:[%s13493_s4 + $0x568] sm:$0xff]   ;;  %v4172_v38 = vshrl.u32 %v7979_v15, 16 }
 0x19a   : > { %v9218_v28 = vpop.f32.mrf.mxu0  ;;  %9666 = vmatpush3.bf16.msra.mxu1 %v10436_v54  ;;  %9631 = vmatprep.subr.bf16.mxu0 %v10619_v1  ;;  %v12153_v49 = vld [vmem:[%s10965_s27 + $0xc] sm:$0xff]  }
 0x19b   : > { %v12072_v24 = vadd.f32 %v2137_v46, %v1972_v52  ;;  %v9254_v48 = vpop.f32.mrf.mxu1  ;;  %9667 = vmatprep.subr.bf16.mxu1 %v10619_v1  ;;  %v4175_v28 = vshll.u32 %v7979_v15, 16  ;;  %v4421_v63 = vshrl.u32 %v12153_v49, 16 }
 0x19c   : > { %v1946_v8 = vpop.f32.mrf.mxu0  ;;  %9576 = vmatmul.mubr.bf16.gmra.mxu0 %v3777_v57  ;;  %v10450_v57 = vld [vmem:[%s13493_s4 + $0x548] sm:$0xff]   ;;  %v4183_v48 = vshll.u32 %v12142_v18, 16 }
 0x19d   : > { %v1973_v37 = vadd.f32 %v1946_v8, %v11938_v44  ;;  %v2142_v30 = vpop.f32.mrf.mxu1  ;;  %9612 = vmatmul.mubr.bf16.gmra.mxu1 %v3974_v31  ;;  %9632 = vmatpush3.bf16.msra.mxu0 %v10437_v9  ;;  %v10442_v44 = vld [vmem:[%s13493_s4 + $0x560] sm:$0xff]  }
 0x19e   : > { %v9221_v41 = vpop.f32.mrf.mxu0  ;;  %9668 = vmatpush3.bf16.msra.mxu1 %v10438_v4  ;;  %9579 = vmatprep.mubr.msk.bf16.mxu0 %vm10620_vm0, %v10619_v1 }
 0x19f   : > { %v12086_v61 = vadd.f32 %v2142_v30, %v1973_v37  ;;  %v9257_v42 = vpop.f32.mrf.mxu1  ;;  %9615 = vmatprep.mubr.msk.bf16.mxu1 %vm10620_vm0, %v10619_v1  ;;  %9633 = vmatprep.subr.bf16.mxu0 %v10619_v1  ;;  %v10451_v37 = vld [vmem:[%s13493_s4 + $0x500] sm:$0xff]  }
 0x1a0   : > { %v1949_v45 = vpop.f32.mrf.mxu0  ;;  %9669 = vmatprep.subr.bf16.mxu1 %v10619_v1 }
 0x1a1   : > { %v1974_v47 = vadd.f32 %v1949_v45, %v11951_v40  ;;  %v2145_v60 = vpop.f32.mrf.mxu1  ;;  %9634 = vmatpush3.bf16.msra.mxu0 %v10441_v29  ;;  %v4424_v29 = vshll.u32 %v12153_v49, 16  ;;  %v4174_v45 = vrot.slane %v4172_v38, 1  ;;  %v12212_v38 = vld [vmem:[%s10953_s20 + $0x1c] sm:$0xff]  }
 0x1a2   : > { %v9222_v33 = vpop.f32.mrf.mxu0  ;;  %9670 = vmatpush3.bf16.msra.mxu1 %v10442_v44  ;;  %9635 = vmatprep.subr.bf16.mxu0 %v10619_v1  ;;  %v10452_v44 = vld [vmem:[%s13493_s4 + $0x540] sm:$0xff]  }
 0x1a3   : > { %v12105_v40 = vadd.f32 %v2145_v60, %v1974_v47  ;;  %v9258_v19 = vpop.f32.mrf.mxu1  ;;  %9671 = vmatprep.subr.bf16.mxu1 %v10619_v1  ;;  %v4177_v47 = vrot.slane %v4175_v28, 2  ;;  %v4185_v33 = vrot.slane %v4183_v48, 2  ;;  %v12219_v48 = vld [vmem:[%s10965_s27 + $0x1c] sm:$0xff]  }
 0x1a4   : > { %v1954_v20 = vpop.f32.mrf.mxu0  ;;  %9580 = vmatmul.mubr.bf16.gmra.mxu0 %v3779_v56 }
 0x1a5   : > { %v1975_v17 = vadd.f32 %v1954_v20, %v11967_v27  ;;  %v2150_v55 = vpop.f32.mrf.mxu1  ;;  %9616 = vmatmul.mubr.bf16.gmra.mxu1 %v3976_v36  ;;  %9636 = vmatpush3.bf16.msra.mxu0 %v10443_v35  ;;  %v3977_v27 = vrot.slane %v12103_v0, 1  ;;  %v4182_v35 = vrot.slane %v4180_v51, 1  ;;  %v12182_v36 = vld [vmem:[%s10953_s20 + $0x14] sm:$0xff]  }
 0x1a6   : > { %v9225_v6 = vpop.f32.mrf.mxu0  ;;  %9583 = vmatprep.mubr.msk.bf16.mxu0 %vm10620_vm0, %v10619_v1  ;;  %9619 = vmatprep.mubr.msk.bf16.mxu1 %vm10620_vm0, %v10619_v1  ;;  %v4189_v15 = vshrl.u32 %v12182_v36, 16 }
 0x1a7   : > { %v12125_v11 = vadd.f32 %v2150_v55, %v1975_v17  ;;  %v9261_v34 = vpop.f32.mrf.mxu1  ;;  %9672 = vmatpush3.bf16.msra.mxu1 %v10444_v32  ;;  %9637 = vmatprep.subr.bf16.mxu0 %v10619_v1  ;;  %v3978_v54 = vsel %vm1095_vm1, %v3975_v62, %v3977_v27  ;;  %v4423_v17 = vrot.slane %v4421_v63, 1  ;;  %v4426_v55 = vrot.slane %v4424_v29, 2  ;;  %v10459_v29 = vld [vmem:[%s13493_s4 + $0x5b0] sm:$0xff]  }
 0x1a8   : > { %v1957_v14 = vpop.f32.mrf.mxu0  ;;  %9673 = vmatprep.subr.bf16.mxu1 %v10619_v1  ;;  %v4178_v34 = vor.u32 %v4177_v47, %v4174_v45 }
 0x1a9   : > { %v1976_v50 = vadd.f32 %v1957_v14, %v11981_v26  ;;  %v2153_v53 = vpop.f32.mrf.mxu1  ;;  %9638 = vmatpush3.bf16.msra.mxu0 %v10447_v3  ;;  %v8009_v26 = vcombine.low %v4356_v5, %v12133_v58  ;;  %v12185_v3 = vld [vmem:[%s10965_s27 + $0x14] sm:$0xff]   ;;  %v4186_v14 = vor.u32 %v4185_v33, %v4182_v35 }
 0x1aa   : > { %v9226_v21 = vpop.f32.mrf.mxu0  ;;  %9639 = vmatprep.subr.bf16.mxu0 %v10619_v1  ;;  %v4433_v0 = vshll.u32 %v12185_v3, 16 }
 0x1ab   : > { %v12155_v52 = vadd.f32 %v2153_v53, %v1976_v50  ;;  %v9262_v46 = vpop.f32.mrf.mxu1  ;;  %9674 = vmatpush3.bf16.msra.mxu1 %v10448_v16  ;;  %v4413_v30 = vshrl.u32 %v8009_v26, 16  ;;  %v4192_v50 = vshll.u32 %v12182_v36, 16  ;;  %v4427_v53 = vor.u32 %v4426_v55, %v4423_v17  ;;  %v10463_v55 = vld [vmem:[%s13493_s4 + $0x5a8] sm:$0xff]  }
 0x1ac   : > { %v1962_v9 = vpop.f32.mrf.mxu0  ;;  %9584 = vmatmul.mubr.bf16.gmra.mxu0 %v3781_v25  ;;  %9675 = vmatprep.subr.bf16.mxu1 %v10619_v1  ;;  %v10457_v46 = vld [vmem:[%s13493_s4 + $0x5b8] sm:$0xff]  }
 0x1ad   : > { %v1977_v31 = vadd.f32 %v1962_v9, %v11997_v2  ;;  %v2158_v4 = vpop.f32.mrf.mxu1  ;;  %9620 = vmatmul.mubr.bf16.gmra.mxu1 %v3978_v54  ;;  %9587 = vmatprep.mubr.msk.bf16.mxu0 %vm10620_vm0, %v10619_v1  ;;  %v4416_v2 = vshll.u32 %v8009_v26, 16  ;;  %v4415_v32 = vrot.slane %v4413_v30, 1  ;;  %v4187_v26 = vsel %vm2957_vm3, %v4178_v34, %v4186_v14  ;;  %v12248_v34 = vld [vmem:[%s10953_s20 + $0x24] sm:$0xff]  }
 0x1ae   : > { %v9229_v8 = vpop.f32.mrf.mxu0  ;;  %9623 = vmatprep.mubr.msk.bf16.mxu1 %vm10620_vm0, %v10619_v1  ;;  %9640 = vmatpush3.bf16.msra.mxu0 %v10449_v13  ;;  %v4194_v9 = vrot.slane %v4192_v50, 2  ;;  %v12256_v50 = vld [vmem:[%s10965_s27 + $0x24] sm:$0xff]  }
 0x1af   : > { %v12173_v41 = vadd.f32 %v2158_v4, %v1977_v31  ;;  %v9265_v62 = vpop.f32.mrf.mxu1  ;;  %9676 = vmatpush3.bf16.msra.mxu1 %v10450_v57  ;;  %9641 = vmatprep.subr.bf16.mxu0 %v10619_v1  ;;  %v4418_v20 = vrot.slane %v4416_v2, 2  ;;  %v4191_v57 = vrot.slane %v4189_v15, 1  ;;  %v10458_v4 = vld [vmem:[%s13493_s4 + $0x5f8] sm:$0xff]  }
 0x1b0   : > { %v1965_v42 = vpop.f32.mrf.mxu0  ;;  %9677 = vmatprep.subr.bf16.mxu1 %v10619_v1 }
 0x1b1   : > { %v1978_v60 = vadd.f32 %v1965_v42, %v12011_v39  ;;  %v2161_v56 = vpop.f32.mrf.mxu1  ;;  %v4195_v62 = vor.u32 %v4194_v9, %v4191_v57  ;;  %v4201_v42 = vshll.u32 %v12212_v38, 16  ;;  %v4448_v57 = vshrl.u32 %v12256_v50, 16 }
 0x1b2   : > { %v9230_v19 = vpop.f32.mrf.mxu0  ;;  %9642 = vmatpush3.bf16.msra.mxu0 %v10451_v37  ;;  %v4451_v9 = vshll.u32 %v12256_v50, 16 }
 0x1b3   : > { %v12187_v10 = vadd.f32 %v2161_v56, %v1978_v60  ;;  %v9266_v6 = vpop.f32.mrf.mxu1  ;;  %9678 = vmatpush3.bf16.msra.mxu1 %v10452_v44  ;;  %9699 = vmatprep.subr.bf16.mxu0 %v10619_v1  ;;  %v4198_v44 = vshrl.u32 %v12212_v38, 16  ;;  %v4439_v60 = vshrl.u32 %v12219_v48, 16  ;;  %v4442_v56 = vshll.u32 %v12219_v48, 16 }
 0x1b4   : > { %v2292_v39 = vpop.f32.mrf.mxu0  ;;  %9588 = vmatmul.mubr.bf16.gmra.mxu0 %v3780_v23  ;;  %9735 = vmatprep.subr.bf16.mxu1 %v10619_v1  ;;  %v4419_v23 = vor.u32 %v4418_v20, %v4415_v32  ;;  %v4196_v17 = vsel %vm2957_vm3, %v4186_v14, %v4195_v62 }
 0x1b5   : > { %v2331_v16 = vadd.f32 %v2292_v39, %v12020_v12  ;;  %v2458_v5 = vpop.f32.mrf.mxu1  ;;  %9624 = vmatmul.mubr.bf16.gmra.mxu1 %v3977_v27  ;;  %9643 = vmatprep.mubr.msk.bf16.mxu0 %vm10620_vm0, %v10619_v1  ;;  %v4430_v12 = vshrl.u32 %v12185_v3, 16  ;;  %v4200_v6 = vrot.slane %v4198_v44, 1  ;;  %v4203_v39 = vrot.slane %v4201_v42, 2 }
 0x1b6   : > { %v9285_v7 = vpop.f32.mrf.mxu0  ;;  %9679 = vmatprep.mubr.msk.bf16.mxu1 %vm10620_vm0, %v10619_v1  ;;  %v4428_v31 = vsel %vm2957_vm3, %v4419_v23, %v4427_v53  ;;  %v4441_v15 = vrot.slane %v4439_v60, 1  ;;  %v4444_v14 = vrot.slane %v4442_v56, 2  ;;  %v4450_v42 = vrot.slane %v4448_v57, 1 }
 0x1b7   : > { %v12204_v27 = vadd.f32 %v2458_v5, %v2331_v16  ;;  %v9321_v25 = vpop.f32.mrf.mxu1  ;;  %v4432_v51 = vrot.slane %v4430_v12, 1 }
 0x1b8   : > { %v2295_v21 = vpop.f32.mrf.mxu0  ;;  %v4204_v25 = vor.u32 %v4203_v39, %v4200_v6  ;;  %v10474_v39 = vld [vmem:[%s13493_s4 + $0x5d0] sm:$0xff]  }
 0x1b9   : > { %v2332_v54 = vadd.f32 %v2295_v21, %v12037_v43  ;;  %v2461_v13 = vpop.f32.mrf.mxu1  ;;  %v4435_v43 = vrot.slane %v4433_v0, 2  ;;  %v10467_v21 = vld [vmem:[%s13493_s4 + $0x5a0] sm:$0xff]  }
 0x1ba   : > { %v9286_v28 = vpop.f32.mrf.mxu0 }
 0x1bb   : > { %v12221_v8 = vadd.f32 %v2461_v13, %v2332_v54  ;;  %v9322_v37 = vpop.f32.mrf.mxu1  ;;  %v4436_v47 = vor.u32 %v4435_v43, %v4432_v51  ;;  %v4207_v54 = vshrl.u32 %v12248_v34, 16  ;;  %v4210_v13 = vshll.u32 %v12248_v34, 16 }
 0x1bc   : > { %v2300_v30 = vpop.f32.mrf.mxu0  ;;  %9644 = vmatmul.mubr.bf16.vlgmr.msra.gmra.mxu0 %v4187_v26  ;;  %v4205_v37 = vsel %vm2957_vm3, %v4195_v62, %v4204_v25  ;;  %v10470_v62 = vld [vmem:[%s13493_s4 + $0x5d8] sm:$0xff]  }
 0x1bd   : > { %v2333_v2 = vadd.f32 %v2300_v30, %v12049_v22  ;;  %v2466_v63 = vpop.f32.mrf.mxu1  ;;  %9680 = vmatmul.mubr.bf16.vlgmr.msra.gmra.mxu1 %v4428_v31  ;;  %9700 = vmatpush3.bf16.msra.mxu0 %v10457_v46  ;;  %v10462_v22 = vld [vmem:[%s13493_s4 + $0x5f0] sm:$0xff]   ;;  %v4437_v5 = vsel %vm2957_vm3, %v4427_v53, %v4436_v47  ;;  %v4445_v46 = vor.u32 %v4444_v14, %v4441_v15  ;;  %v10469_v30 = vld [vmem:[%s13493_s4 + $0x598] sm:$0xff]  }
 0x1be   : > { %v9289_v45 = vpop.f32.mrf.mxu0  ;;  %9736 = vmatpush3.bf16.msra.mxu1 %v10458_v4  ;;  %9701 = vmatprep.subr.bf16.mxu0 %v10619_v1 }
 0x1bf   : > { %v12235_v35 = vadd.f32 %v2466_v63, %v2333_v2  ;;  %v9325_v33 = vpop.f32.mrf.mxu1  ;;  %9647 = vmatprep.mubr.msk.bf16.mxu0 %vm10620_vm0, %v10619_v1  ;;  %9683 = vmatprep.mubr.msk.bf16.mxu1 %vm10620_vm0, %v10619_v1  ;;  %v4209_v2 = vrot.slane %v4207_v54, 1  ;;  %v4212_v63 = vrot.slane %v4210_v13, 2  ;;  %v4446_v44 = vsel %vm2957_vm3, %v4436_v47, %v4445_v46 }
 0x1c0   : > { %v2303_v19 = vpop.f32.mrf.mxu0  ;;  %9737 = vmatprep.subr.bf16.mxu1 %v10619_v1  ;;  %v4453_v45 = vrot.slane %v4451_v9, 2  ;;  %v10479_v9 = vld [vmem:[%s13493_s4 + $0x580] sm:$0xff]  }
 0x1c1   : > { %v2334_v32 = vadd.f32 %v2303_v19, %v12072_v24  ;;  %v2469_v20 = vpop.f32.mrf.mxu1  ;;  %9702 = vmatpush3.bf16.msra.mxu0 %v10459_v29  ;;  %v10464_v24 = vld [vmem:[%s13493_s4 + $0x5e8] sm:$0xff]   ;;  %v4213_v33 = vor.u32 %v4212_v63, %v4209_v2  ;;  %v10473_v19 = vld [vmem:[%s13493_s4 + $0x590] sm:$0xff]  }
 0x1c2   : > { %v9290_v16 = vpop.f32.mrf.mxu0  ;;  %9738 = vmatpush3.bf16.msra.mxu1 %v10462_v22  ;;  %9703 = vmatprep.subr.bf16.mxu0 %v10619_v1 }
 0x1c3   : > { %v12258_v7 = vadd.f32 %v2469_v20, %v2334_v32  ;;  %v9326_v23 = vpop.f32.mrf.mxu1  ;;  %9739 = vmatprep.subr.bf16.mxu1 %v10619_v1  ;;  %v12298_v32 = vld [vmem:[%s10953_s20 + $0x2c] ss:$0 sps:$4 sm:$0x11]   ;;  %v4214_v15 = vsel %vm2957_vm3, %v4204_v25, %v4213_v33 }
 0x1c4   : > { %v2308_v12 = vpop.f32.mrf.mxu0  ;;  %9648 = vmatmul.mubr.bf16.gmra.mxu0 %v4196_v17  ;;  %v4454_v17 = vor.u32 %v4453_v45, %v4450_v42  ;;  %v4216_v14 = vshll.u32 %v12298_v32, 16  ;;  %v10478_v25 = vld [vmem:[%s13493_s4 + $0x5c8] sm:$0xff]  }
 0x1c5   : > { %v2335_v53 = vadd.f32 %v2308_v12, %v12086_v61  ;;  %v2474_v0 = vpop.f32.mrf.mxu1  ;;  %9684 = vmatmul.mubr.bf16.gmra.mxu1 %v4437_v5  ;;  %9704 = vmatpush3.bf16.msra.mxu0 %v10463_v55  ;;  %v10468_v61 = vld [vmem:[%s13493_s4 + $0x5e0] sm:$0xff]   ;;  %v12305_v55 = vld [vmem:[%s10965_s27 + $0x2c] ss:$0 sps:$4 sm:$0x11]  }
 0x1c6   : > { %v9293_v26 = vpop.f32.mrf.mxu0  ;;  %9740 = vmatpush3.bf16.msra.mxu1 %v10464_v24  ;;  %9651 = vmatprep.mubr.msk.bf16.mxu0 %vm10620_vm0, %v10619_v1  ;;  %v4455_v12 = vsel %vm2957_vm3, %v4445_v46, %v4454_v17  ;;  %v4218_v46 = vrot.slane %v4216_v14, 2 }
 0x1c7   : > { %v12274_v28 = vadd.f32 %v2474_v0, %v2335_v53  ;;  %v9329_v31 = vpop.f32.mrf.mxu1  ;;  %9687 = vmatprep.mubr.msk.bf16.mxu1 %vm10620_vm0, %v10619_v1  ;;  %9705 = vmatprep.subr.bf16.mxu0 %v10619_v1  ;;  %v10475_v53 = vld [vmem:[%s13493_s4 + $0x588] sm:$0xff]   ;;  %v4457_v0 = vshll.u32 %v12305_v55, 16 }
 0x1c8   : > { %v2311_v4 = vpop.f32.mrf.mxu0  ;;  %9741 = vmatprep.subr.bf16.mxu1 %v10619_v1  ;;  %v4597_v31 = vld [vmem:[%s10953_s20 + $0x4] sm:$0xc]  ;;  %v4219_v63 = vsel %vm2957_vm3, %v4213_v33, %v4218_v46 }
 0x1c9   : > { %v2336_v51 = vadd.f32 %v2311_v4, %v12105_v40  ;;  %v2477_v43 = vpop.f32.mrf.mxu1  ;;  %9706 = vmatpush3.bf16.msra.mxu0 %v10467_v21  ;;  %v4459_v57 = vrot.slane %v4457_v0, 2  ;;  %v4621_v0 = vrot.slane %v12182_v36, 2 }
 0x1ca   : > { %v9294_v29 = vpop.f32.mrf.mxu0  ;;  %9742 = vmatpush3.bf16.msra.mxu1 %v10468_v61  ;;  %9707 = vmatprep.subr.bf16.mxu0 %v10619_v1 }
 0x1cb   : > { %v12287_v40 = vadd.f32 %v2477_v43, %v2336_v51  ;;  %v9330_v22 = vpop.f32.mrf.mxu1  ;;  %9743 = vmatprep.subr.bf16.mxu1 %v10619_v1  ;;  %v10480_v51 = vld [vmem:[%s13493_s4 + $0x5c0] sm:$0xff]   ;;  %v8039_v29 = vcombine.low %v4597_v31, %v12118_v59  ;;  %v4460_v42 = vsel %vm2957_vm3, %v4454_v17, %v4459_v57  ;;  %v10488_v31 = vld [vmem:[%s13493_s4 + $0x668] sm:$0xff]  }
 0x1cc   : > { %v2316_v60 = vpop.f32.mrf.mxu0  ;;  %9652 = vmatmul.mubr.bf16.gmra.mxu0 %v4205_v37  ;;  %v4765_v43 = vld [vmem:[%s10965_s27 + $0x4] sm:$0xc] }
 0x1cd   : > { %v2337_v47 = vadd.f32 %v2316_v60, %v12125_v11  ;;  %v2482_v56 = vpop.f32.mrf.mxu1  ;;  %9688 = vmatmul.mubr.bf16.gmra.mxu1 %v4446_v44  ;;  %9708 = vmatpush3.bf16.msra.mxu0 %v10469_v30  ;;  %v8064_v45 = vcombine.low %v4765_v43, %v12133_v58  ;;  %v4618_v59 = vrot.slane %v8039_v29, 2  ;;  %v4619_v58 = vrot.slane %v12142_v18, 2  ;;  %v10483_v18 = vld [vmem:[%s13493_s4 + $0x638] sm:$0xff]  }
 0x1ce   : > { %v9297_v20 = vpop.f32.mrf.mxu0  ;;  %9655 = vmatprep.mubr.msk.bf16.mxu0 %vm10620_vm0, %v10619_v1  ;;  %9691 = vmatprep.mubr.msk.bf16.mxu1 %vm10620_vm0, %v10619_v1  ;;  %v4791_v29 = vrot.slane %v12219_v48, 2 }
 0x1cf   : > { %v12307_v11 = vadd.f32 %v2482_v56, %v2337_v47  ;;  %v9333_v6 = vpop.f32.mrf.mxu1  ;;  %9744 = vmatpush3.bf16.msra.mxu1 %v10470_v62  ;;  %9709 = vmatprep.subr.bf16.mxu0 %v10619_v1  ;;  %v4786_v33 = vrot.slane %v8064_v45, 2 }
 0x1d0   : > { %v2319_v16 = vpop.f32.mrf.mxu0  ;;  %9745 = vmatprep.subr.bf16.mxu1 %v10619_v1 }
 0x1d1   : > { %v2338_v5 = vadd.f32 %v2319_v16, %v12155_v52  ;;  %v2485_v24 = vpop.f32.mrf.mxu1  ;;  %9710 = vmatpush3.bf16.msra.mxu0 %v10473_v19  ;;  %v4787_v19 = vrot.slane %v12153_v49, 2  ;;  %v4620_v16 = vsel %vm3405_vm4, %v4618_v59, %v4619_v58  ;;  %v10484_v49 = vld [vmem:[%s13493_s4 + $0x678] sm:$0xff]  }
 0x1d2   : > { %v9298_v23 = vpop.f32.mrf.mxu0  ;;  %9711 = vmatprep.subr.bf16.mxu0 %v10619_v1 }
 0x1d3   : > { %v12323_v21 = vadd.f32 %v2485_v24, %v2338_v5  ;;  %v9334_v52 = vpop.f32.mrf.mxu1  ;;  %9746 = vmatpush3.bf16.msra.mxu1 %v10474_v39  ;;  %v4788_v24 = vsel %vm3405_vm4, %v4786_v33, %v4787_v19 }
 0x1d4   : > { %v2324_v54 = vpop.f32.mrf.mxu0  ;;  %9656 = vmatmul.mubr.bf16.gmra.mxu0 %v4214_v15  ;;  %9747 = vmatprep.subr.bf16.mxu1 %v10619_v1 }
 0x1d5   : > { %v2339_v13 = vadd.f32 %v2324_v54, %v12173_v41  ;;  %v2490_v26 = vpop.f32.mrf.mxu1  ;;  %9692 = vmatmul.mubr.bf16.gmra.mxu1 %v4455_v12  ;;  %9659 = vmatprep.mubr.msk.bf16.mxu0 %vm10620_vm0, %v10619_v1  ;;  %v10486_v54 = vld [vmem:[%s13493_s4 + $0x670] sm:$0xff]  }
 0x1d6   : > { %v9301_v61 = vpop.f32.mrf.mxu0  ;;  %9695 = vmatprep.mubr.msk.bf16.mxu1 %vm10620_vm0, %v10619_v1  ;;  %9712 = vmatpush3.bf16.msra.mxu0 %v10475_v53  ;;  %v10485_v53 = vld [vmem:[%s13493_s4 + $0x630] sm:$0xff]  }
 0x1d7   : > { %v12338_v4 = vadd.f32 %v2490_v26, %v2339_v13  ;;  %v9337_v41 = vpop.f32.mrf.mxu1  ;;  %9748 = vmatpush3.bf16.msra.mxu1 %v10478_v25  ;;  %9713 = vmatprep.subr.bf16.mxu0 %v10619_v1  ;;  %v4789_v25 = vrot.slane %v12185_v3, 2  ;;  %v4622_v3 = vsel %vm3405_vm4, %v4619_v58, %v4621_v0  ;;  %v10487_v61 = vld [vmem:[%s13493_s4 + $0x628] sm:$0xff]  }
 0x1d8   : > { %v2327_v37 = vpop.f32.mrf.mxu0  ;;  %9749 = vmatprep.subr.bf16.mxu1 %v10619_v1 }
 0x1d9   : > { %v2340_v30 = vadd.f32 %v2327_v37, %v12187_v10  ;;  %v2493_v2 = vpop.f32.mrf.mxu1 }
 0x1da   : > { %v9302_v44 = vpop.f32.mrf.mxu0  ;;  %9714 = vmatpush3.bf16.msra.mxu0 %v10479_v9  ;;  %v4790_v9 = vsel %vm3405_vm4, %v4787_v19, %v4789_v25 }
 0x1db   : > { %v12351_v22 = vadd.f32 %v2493_v2, %v2340_v30  ;;  %v9338_v62 = vpop.f32.mrf.mxu1  ;;  %9750 = vmatpush3.bf16.msra.mxu1 %v10480_v51  ;;  %9771 = vmatprep.subr.bf16.mxu0 %v10619_v1  ;;  %v4623_v30 = vrot.slane %v12212_v38, 2  ;;  %v10489_v2 = vld [vmem:[%s13493_s4 + $0x620] sm:$0xff]  }
 0x1dc   : > { %v2655_v60 = vpop.f32.mrf.mxu0  ;;  %9660 = vmatmul.mubr.bf16.gmra.mxu0 %v4219_v63  ;;  %9807 = vmatprep.subr.bf16.mxu1 %v10619_v1 }
 0x1dd   : > { %v2694_v10 = vadd.f32 %v2655_v60, %v12204_v27  ;;  %v2852_v47 = vpop.f32.mrf.mxu1  ;;  %9696 = vmatmul.mubr.bf16.gmra.mxu1 %v4460_v42  ;;  %9715 = vmatprep.mubr.msk.bf16.mxu0 %vm10620_vm0, %v10619_v1  ;;  %v4624_v48 = vsel %vm3405_vm4, %v4621_v0, %v4623_v30  ;;  %v10491_v60 = vld [vmem:[%s13493_s4 + $0x618] sm:$0xff]  }
 0x1de   : > { %v9357_v56 = vpop.f32.mrf.mxu0  ;;  %9751 = vmatprep.mubr.msk.bf16.mxu1 %vm10620_vm0, %v10619_v1 }
 0x1df   : > { %v12362_v20 = vadd.f32 %v2852_v47, %v2694_v10  ;;  %v9393_v17 = vpop.f32.mrf.mxu1  ;;  %v4792_v47 = vsel %vm3405_vm4, %v4789_v25, %v4791_v29  ;;  %v4627_v25 = vrot.slane %v12298_v32, 2  ;;  %v10498_v32 = vld [vmem:[%s13493_s4 + $0x640] sm:$0xff]  }
 0x1e0   : > { %v2658_v6 = vpop.f32.mrf.mxu0  ;;  %v4625_v17 = vrot.slane %v12248_v34, 2  ;;  %v10494_v34 = vld [vmem:[%s13493_s4 + $0x650] sm:$0xff]  }
 0x1e1   : > { %v2695_v27 = vadd.f32 %v2658_v6, %v12221_v8  ;;  %v2855_v39 = vpop.f32.mrf.mxu1  ;;  %v10493_v6 = vld [vmem:[%s13493_s4 + $0x610] sm:$0xff]  }
 0x1e2   : > { %v9358_v5 = vpop.f32.mrf.mxu0 }
 0x1e3   : > { %v12373_v15 = vadd.f32 %v2855_v39, %v2695_v27  ;;  %v9394_v14 = vpop.f32.mrf.mxu1  ;;  %v4793_v39 = vrot.slane %v12256_v50, 2 }
 0x1e4   : > { %v2663_v23 = vpop.f32.mrf.mxu0  ;;  %9716 = vmatmul.mubr.bf16.vlgmr.msra.gmra.mxu0 %v4620_v16 }
 0x1e5   : > { %v2696_v8 = vadd.f32 %v2663_v23, %v12235_v35  ;;  %v2860_v12 = vpop.f32.mrf.mxu1  ;;  %9752 = vmatmul.mubr.bf16.vlgmr.msra.gmra.mxu1 %v4788_v24  ;;  %9772 = vmatpush3.bf16.msra.mxu0 %v10483_v18  ;;  %v4794_v14 = vsel %vm3405_vm4, %v4791_v29, %v4793_v39  ;;  %v10495_v23 = vld [vmem:[%s13493_s4 + $0x608] sm:$0xff]  }
 0x1e6   : > { %v9361_v52 = vpop.f32.mrf.mxu0  ;;  %9808 = vmatpush3.bf16.msra.mxu1 %v10484_v49  ;;  %9773 = vmatprep.subr.bf16.mxu0 %v10619_v1  ;;  %v4626_v49 = vsel %vm3405_vm4, %v4623_v30, %v4625_v17 }
 0x1e7   : > { %v12385_v35 = vadd.f32 %v2860_v12, %v2696_v8  ;;  %v9397_v13 = vpop.f32.mrf.mxu1  ;;  %9719 = vmatprep.mubr.msk.bf16.mxu0 %vm10620_vm0, %v10619_v1  ;;  %9755 = vmatprep.mubr.msk.bf16.mxu1 %vm10620_vm0, %v10619_v1 }
 0x1e8   : > { %v2666_v36 = vpop.f32.mrf.mxu0  ;;  %9809 = vmatprep.subr.bf16.mxu1 %v10619_v1  ;;  %v4795_v13 = vrot.slane %v12305_v55, 2  ;;  %v5136_v55 = vld [vmem:[%s10730_s29 + $0x8] sm:$0xc] }
 0x1e9   : > { %v2697_v26 = vadd.f32 %v2666_v36, %v12258_v7  ;;  %v2863_v46 = vpop.f32.mrf.mxu1  ;;  %9774 = vmatpush3.bf16.msra.mxu0 %v10485_v53  ;;  %v4933_v36 = vld [vmem:[%s10739_s10 + $0x8] sm:$0xc] }
 0x1ea   : > { %v9362_v57 = vpop.f32.mrf.mxu0  ;;  %9810 = vmatpush3.bf16.msra.mxu1 %v10486_v54  ;;  %9775 = vmatprep.subr.bf16.mxu0 %v10619_v1  ;;  %v4796_v30 = vsel %vm3405_vm4, %v4793_v39, %v4795_v13  ;;  %v10504_v39 = vld [vmem:[%s13493_s4 + $0x6f8] sm:$0xff]   ;;  %v12560_v13 = vld [vmem:[%s10739_s10 + $0x20] sm:$0xff]  }
 0x1eb   : > { %v12402_v41 = vadd.f32 %v2863_v46, %v2697_v26  ;;  %v9398_v7 = vpop.f32.mrf.mxu1  ;;  %9811 = vmatprep.subr.bf16.mxu1 %v10619_v1  ;;  %v12477_v26 = vld [vmem:[%s10739_s10 + $0xc] sm:$0xf] }
 0x1ec   : > { %v2671_v51 = vpop.f32.mrf.mxu0  ;;  %9720 = vmatmul.mubr.bf16.gmra.mxu0 %v4622_v3  ;;  %v4628_v7 = vsel %vm3405_vm4, %v4625_v17, %v4627_v25  ;;  %v12526_v17 = vld [vmem:[%s10739_s10 + $0x18] sm:$0xff]  }
 0x1ed   : > { %v2698_v43 = vadd.f32 %v2671_v51, %v12274_v28  ;;  %v2868_v37 = vpop.f32.mrf.mxu1  ;;  %9756 = vmatmul.mubr.bf16.gmra.mxu1 %v4790_v9  ;;  %9776 = vmatpush3.bf16.msra.mxu0 %v10487_v61  ;;  %v10490_v28 = vld [vmem:[%s13493_s4 + $0x660] sm:$0xff]   ;;  %v12487_v61 = vld [vmem:[%s10730_s29 + $0xc] sm:$0xf]  ;;  %v12493_v51 = vcombine.low %v4933_v36, %v12477_v26 }
 0x1ee   : > { %v9365_v63 = vpop.f32.mrf.mxu0  ;;  %9812 = vmatpush3.bf16.msra.mxu1 %v10488_v31  ;;  %9723 = vmatprep.mubr.msk.bf16.mxu0 %vm10620_vm0, %v10619_v1 }
 0x1ef   : > { %v12416_v44 = vadd.f32 %v2868_v37, %v2698_v43  ;;  %v9401_v42 = vpop.f32.mrf.mxu1  ;;  %9759 = vmatprep.mubr.msk.bf16.mxu1 %vm10620_vm0, %v10619_v1  ;;  %9777 = vmatprep.subr.bf16.mxu0 %v10619_v1  ;;  %v12496_v43 = vld [vmem:[%s10739_s10 + $0x10] sm:$0xff]  }
 0x1f0   : > { %v2674_v38 = vpop.f32.mrf.mxu0  ;;  %9813 = vmatprep.subr.bf16.mxu1 %v10619_v1  ;;  %v12503_v63 = vld [vmem:[%s10730_s29 + $0x10] sm:$0xff]  }
 0x1f1   : > { %v2699_v45 = vadd.f32 %v2674_v38, %v12287_v40  ;;  %v2871_v62 = vpop.f32.mrf.mxu1  ;;  %9778 = vmatpush3.bf16.msra.mxu0 %v10489_v2  ;;  %v10492_v40 = vld [vmem:[%s13493_s4 + $0x658] sm:$0xff]   ;;  %v12500_v2 = vcombine.low %v5136_v55, %v12487_v61 }
 0x1f2   : > { %v9366_v10 = vpop.f32.mrf.mxu0  ;;  %9814 = vmatpush3.bf16.msra.mxu1 %v10490_v28  ;;  %9779 = vmatprep.subr.bf16.mxu0 %v10619_v1 }
 0x1f3   : > { %v12429_v59 = vadd.f32 %v2871_v62, %v2699_v45  ;;  %v9402_v58 = vpop.f32.mrf.mxu1  ;;  %9815 = vmatprep.subr.bf16.mxu1 %v10619_v1  ;;  %v4989_v45 = vrot.slane %v12493_v51, 2  ;;  %v4990_v62 = vrot.slane %v12496_v43, 2  ;;  %v5193_v10 = vrot.slane %v12503_v63, 2 }
 0x1f4   : > { %v2679_v56 = vpop.f32.mrf.mxu0  ;;  %9724 = vmatmul.mubr.bf16.gmra.mxu0 %v4624_v48 }
 0x1f5   : > { %v2700_v33 = vadd.f32 %v2679_v56, %v12307_v11  ;;  %v2876_v19 = vpop.f32.mrf.mxu1  ;;  %9760 = vmatmul.mubr.bf16.gmra.mxu1 %v4792_v47  ;;  %9780 = vmatpush3.bf16.msra.mxu0 %v10491_v60  ;;  %v5192_v60 = vrot.slane %v12500_v2, 2 }
 0x1f6   : > { %v9369_v27 = vpop.f32.mrf.mxu0  ;;  %9727 = vmatprep.mubr.msk.bf16.mxu0 %vm10620_vm0, %v10619_v1  ;;  %9763 = vmatprep.mubr.msk.bf16.mxu1 %vm10620_vm0, %v10619_v1 }
 0x1f7   : > { %v12445_v16 = vadd.f32 %v2876_v19, %v2700_v33  ;;  %v9405_v11 = vpop.f32.mrf.mxu1  ;;  %9816 = vmatpush3.bf16.msra.mxu1 %v10492_v40  ;;  %9781 = vmatprep.subr.bf16.mxu0 %v10619_v1  ;;  %v4991_v33 = vsel %vm3405_vm4, %v4989_v45, %v4990_v62  ;;  %v10503_v19 = vld [vmem:[%s13493_s4 + $0x6b8] sm:$0xff]   ;;  %v5194_v27 = vsel %vm3405_vm4, %v5192_v60, %v5193_v10 }
 0x1f8   : > { %v2682_v18 = vpop.f32.mrf.mxu0  ;;  %9817 = vmatprep.subr.bf16.mxu1 %v10619_v1  ;;  %v12533_v11 = vld [vmem:[%s10730_s29 + $0x18] sm:$0xff]  }
 0x1f9   : > { %v2701_v5 = vadd.f32 %v2682_v18, %v12323_v21  ;;  %v2879_v24 = vpop.f32.mrf.mxu1  ;;  %9782 = vmatpush3.bf16.msra.mxu0 %v10493_v6  ;;  %v10496_v21 = vld [vmem:[%s13493_s4 + $0x648] sm:$0xff]   ;;  %v10515_v60 = vld [vmem:[%s13493_s4 + $0x698] sm:$0xff]  }
 0x1fa   : > { %v9370_v50 = vpop.f32.mrf.mxu0  ;;  %9783 = vmatprep.subr.bf16.mxu0 %v10619_v1 }
 0x1fb   : > { %v12459_v8 = vadd.f32 %v2879_v24, %v2701_v5  ;;  %v9406_v12 = vpop.f32.mrf.mxu1  ;;  %9818 = vmatpush3.bf16.msra.mxu1 %v10494_v34  ;;  %v4992_v50 = vrot.slane %v12526_v17, 2 }
 0x1fc   : > { %v2687_v53 = vpop.f32.mrf.mxu0  ;;  %9728 = vmatmul.mubr.bf16.gmra.mxu0 %v4626_v49  ;;  %9819 = vmatprep.subr.bf16.mxu1 %v10619_v1  ;;  %v10505_v49 = vld [vmem:[%s13493_s4 + $0x6b0] sm:$0xff]  }
 0x1fd   : > { %v2702_v0 = vadd.f32 %v2687_v53, %v12338_v4  ;;  %v2884_v52 = vpop.f32.mrf.mxu1  ;;  %9764 = vmatmul.mubr.bf16.gmra.mxu1 %v4794_v14  ;;  %9731 = vmatprep.mubr.msk.bf16.mxu0 %vm10620_vm0, %v10619_v1  ;;  %v10497_v4 = vld [vmem:[%s13493_s4 + $0x600] sm:$0xff]   ;;  %v4993_v25 = vsel %vm3405_vm4, %v4990_v62, %v4992_v50 }
 0x1fe   : > { %v9373_v54 = vpop.f32.mrf.mxu0  ;;  %9767 = vmatprep.mubr.msk.bf16.mxu1 %vm10620_vm0, %v10619_v1  ;;  %9784 = vmatpush3.bf16.msra.mxu0 %v10495_v23  ;;  %v5195_v23 = vrot.slane %v12533_v11, 2 }
 0x1ff   : > { %v12479_v46 = vadd.f32 %v2884_v52, %v2702_v0  ;;  %v9409_v3 = vpop.f32.mrf.mxu1  ;;  %9820 = vmatpush3.bf16.msra.mxu1 %v10496_v21  ;;  %9785 = vmatprep.subr.bf16.mxu0 %v10619_v1  ;;  %v10509_v54 = vld [vmem:[%s13493_s4 + $0x6a8] sm:$0xff]  }
 0x200   : > { %v2690_v57 = vpop.f32.mrf.mxu0  ;;  %9821 = vmatprep.subr.bf16.mxu1 %v10619_v1  ;;  %v5196_v36 = vsel %vm3405_vm4, %v5193_v10, %v5195_v23  ;;  %v12568_v3 = vld [vmem:[%s10730_s29 + $0x20] sm:$0xff]   ;;  %v12596_v10 = vld [vmem:[%s10739_s10 + $0x28] sm:$0xff]  }
 0x201   : > { %v2703_v9 = vadd.f32 %v2690_v57, %v12351_v22  ;;  %v2887_v31 = vpop.f32.mrf.mxu1 }
 0x202   : > { %v9374_v37 = vpop.f32.mrf.mxu0  ;;  %9786 = vmatpush3.bf16.msra.mxu0 %v10497_v4 }
 0x203   : > { %v12505_v29 = vadd.f32 %v2887_v31, %v2703_v9  ;;  %v9410_v22 = vpop.f32.mrf.mxu1  ;;  %9822 = vmatpush3.bf16.msra.mxu1 %v10498_v32  ;;  %9843 = vmatprep.subr.bf16.mxu0 %v10619_v1  ;;  %v10513_v37 = vld [vmem:[%s13493_s4 + $0x6a0] sm:$0xff]  }
 0x204   : > { %v3094_v28 = vpop.f32.mrf.mxu0  ;;  %9732 = vmatmul.mubr.bf16.gmra.mxu0 %v4628_v7  ;;  %9879 = vmatprep.subr.bf16.mxu1 %v10619_v1  ;;  %v4994_v7 = vrot.slane %v12560_v13, 2  ;;  %v5197_v22 = vrot.slane %v12568_v3, 2 }
 0x205   : > { %v3133_v42 = vadd.f32 %v3094_v28, %v12362_v20  ;;  %v3335_v38 = vpop.f32.mrf.mxu1  ;;  %9768 = vmatmul.mubr.bf16.gmra.mxu1 %v4796_v30  ;;  %9787 = vmatprep.mubr.msk.bf16.mxu0 %vm10620_vm0, %v10619_v1 }
 0x206   : > { %v9429_v48 = vpop.f32.mrf.mxu0  ;;  %9823 = vmatprep.mubr.msk.bf16.mxu1 %vm10620_vm0, %v10619_v1 }
 0x207   : > { %v12518_v20 = vadd.f32 %v3335_v38, %v3133_v42  ;;  %v9465_v47 = vpop.f32.mrf.mxu1  ;;  %v4995_v48 = vsel %vm3405_vm4, %v4992_v50, %v4994_v7 }
 0x208   : > { %v3097_v58 = vpop.f32.mrf.mxu0 }
 0x209   : > { %v3134_v40 = vadd.f32 %v3097_v58, %v12373_v15  ;;  %v3338_v56 = vpop.f32.mrf.mxu1  ;;  %v5198_v58 = vsel %vm3405_vm4, %v5195_v23, %v5197_v22 }
 0x20a   : > { %v9430_v6 = vpop.f32.mrf.mxu0 }
 0x20b   : > { %v12535_v34 = vadd.f32 %v3338_v56, %v3134_v40  ;;  %v9466_v15 = vpop.f32.mrf.mxu1  ;;  %v12601_v40 = vld [vmem:[%s10730_s29 + $0x28] sm:$0xff]  }
 0x20c   : > { %v3102_v18 = vpop.f32.mrf.mxu0  ;;  %9788 = vmatmul.mubr.bf16.vlgmr.msra.gmra.mxu0 %v4991_v33  ;;  %v10516_v33 = vld [vmem:[%s13493_s4 + $0x6d8] sm:$0xff]   ;;  %v10519_v15 = vld [vmem:[%s13493_s4 + $0x690] sm:$0xff]  }
 0x20d   : > { %v3135_v5 = vadd.f32 %v3102_v18, %v12385_v35  ;;  %v3343_v24 = vpop.f32.mrf.mxu1  ;;  %9824 = vmatmul.mubr.bf16.vlgmr.msra.gmra.mxu1 %v5194_v27  ;;  %9844 = vmatpush3.bf16.msra.mxu0 %v10503_v19  ;;  %v10508_v35 = vld [vmem:[%s13493_s4 + $0x6f0] sm:$0xff]  }
 0x20e   : > { %v9433_v14 = vpop.f32.mrf.mxu0  ;;  %9880 = vmatpush3.bf16.msra.mxu1 %v10504_v39  ;;  %9845 = vmatprep.subr.bf16.mxu0 %v10619_v1  ;;  %v4996_v39 = vrot.slane %v12596_v10, 2 }
 0x20f   : > { %v12547_v12 = vadd.f32 %v3343_v24, %v3135_v5  ;;  %v9469_v21 = vpop.f32.mrf.mxu1  ;;  %9791 = vmatprep.mubr.msk.bf16.mxu0 %vm10620_vm0, %v10619_v1  ;;  %9827 = vmatprep.mubr.msk.bf16.mxu1 %vm10620_vm0, %v10619_v1 }
 0x210   : > { %v3105_v53 = vpop.f32.mrf.mxu0  ;;  %9881 = vmatprep.subr.bf16.mxu1 %v10619_v1  ;;  %v10522_v21 = vld [vmem:[%s10739_s10 + $0x30] ss:$0 sps:$4 sm:$0x11]  }
 0x211   : > { %v3136_v0 = vadd.f32 %v3105_v53, %v12402_v41  ;;  %v3346_v52 = vpop.f32.mrf.mxu1  ;;  %9846 = vmatpush3.bf16.msra.mxu0 %v10505_v49  ;;  %v10510_v41 = vld [vmem:[%s13493_s4 + $0x6e8] sm:$0xff]   ;;  %v10520_v49 = vld [vmem:[%s13493_s4 + $0x6d0] sm:$0xff]  }
 0x212   : > { %v9434_v4 = vpop.f32.mrf.mxu0  ;;  %9882 = vmatpush3.bf16.msra.mxu1 %v10508_v35  ;;  %9847 = vmatprep.subr.bf16.mxu0 %v10619_v1  ;;  %v4997_v35 = vsel %vm3405_vm4, %v4994_v7, %v4996_v39  ;;  %v10523_v53 = vld [vmem:[%s10730_s29 + $0x30] ss:$0 sps:$4 sm:$0x11]  }
 0x213   : > { %v12570_v32 = vadd.f32 %v3346_v52, %v3136_v0  ;;  %v9470_v55 = vpop.f32.mrf.mxu1  ;;  %9883 = vmatprep.subr.bf16.mxu1 %v10619_v1 }
 0x214   : > { %v3110_v57 = vpop.f32.mrf.mxu0  ;;  %9792 = vmatmul.mubr.bf16.gmra.mxu0 %v4993_v25  ;;  %v10521_v25 = vld [vmem:[%s13493_s4 + $0x688] sm:$0xff]   ;;  %v5365_v55 = vshll.u32 %v12493_v51, 16 }
 0x215   : > { %v3137_v9 = vadd.f32 %v3110_v57, %v12416_v44  ;;  %v3351_v31 = vpop.f32.mrf.mxu1  ;;  %9828 = vmatmul.mubr.bf16.gmra.mxu1 %v5196_v36  ;;  %9848 = vmatpush3.bf16.msra.mxu0 %v10509_v54  ;;  %v10514_v44 = vld [vmem:[%s13493_s4 + $0x6e0] sm:$0xff]   ;;  %v5370_v57 = vshrl.u32 %v12496_v43, 16 }
 0x216   : > { %v9437_v30 = vpop.f32.mrf.mxu0  ;;  %9884 = vmatpush3.bf16.msra.mxu1 %v10510_v41  ;;  %9795 = vmatprep.mubr.msk.bf16.mxu0 %vm10620_vm0, %v10619_v1  ;;  %v5362_v41 = vshrl.u32 %v12493_v51, 16  ;;  %v10525_v51 = vld [vmem:[%s13493_s4 + $0x680] sm:$0xff]  }
 0x217   : > { %v12584_v28 = vadd.f32 %v3351_v31, %v3137_v9  ;;  %v9473_v42 = vpop.f32.mrf.mxu1  ;;  %9831 = vmatprep.mubr.msk.bf16.mxu1 %vm10620_vm0, %v10619_v1  ;;  %9849 = vmatprep.subr.bf16.mxu0 %v10619_v1  ;;  %v5373_v9 = vshll.u32 %v12496_v43, 16  ;;  %v5201_v30 = vrot.slane %v10523_v53, 2  ;;  %v5379_v53 = vshrl.u32 %v12526_v17, 16 }
 0x218   : > { %v3113_v38 = vpop.f32.mrf.mxu0  ;;  %9885 = vmatprep.subr.bf16.mxu1 %v10619_v1  ;;  %v5580_v42 = vshrl.u32 %v12503_v63, 16 }
 0x219   : > { %v3138_v45 = vadd.f32 %v3113_v38, %v12429_v59  ;;  %v3354_v62 = vpop.f32.mrf.mxu1  ;;  %9850 = vmatpush3.bf16.msra.mxu0 %v10513_v37  ;;  %v4998_v37 = vrot.slane %v10522_v21, 2  ;;  %v5583_v38 = vshll.u32 %v12503_v63, 16 }
 0x21a   : > { %v9438_v47 = vpop.f32.mrf.mxu0  ;;  %9886 = vmatpush3.bf16.msra.mxu1 %v10514_v44  ;;  %9851 = vmatprep.subr.bf16.mxu0 %v10619_v1  ;;  %v5572_v44 = vshrl.u32 %v12500_v2, 16 }
 0x21b   : > { %v12603_v56 = vadd.f32 %v3354_v62, %v3138_v45  ;;  %v9474_v59 = vpop.f32.mrf.mxu1  ;;  %9887 = vmatprep.subr.bf16.mxu1 %v10619_v1  ;;  %v5364_v47 = vrot.slane %v5362_v41, 2 }
 0x21c   : > { %v3118_v19 = vpop.f32.mrf.mxu0  ;;  %9796 = vmatmul.mubr.bf16.gmra.mxu0 %v4995_v48  ;;  %v10526_v48 = vld [vmem:[%s13493_s4 + $0x6c0] sm:$0xff]   ;;  %v5375_v59 = vrot.slane %v5373_v9, 3 }
 0x21d   : > { %v3139_v6 = vadd.f32 %v3118_v19, %v12445_v16  ;;  %v3359_v27 = vpop.f32.mrf.mxu1  ;;  %9832 = vmatmul.mubr.bf16.gmra.mxu1 %v5198_v58  ;;  %9852 = vmatpush3.bf16.msra.mxu0 %v10515_v60  ;;  %v5199_v16 = vrot.slane %v12601_v40, 2  ;;  %v5367_v58 = vrot.slane %v5365_v55, 3 }
 0x21e   : > { %v9441_v18 = vpop.f32.mrf.mxu0  ;;  %9799 = vmatprep.mubr.msk.bf16.mxu0 %vm10620_vm0, %v10619_v1  ;;  %9835 = vmatprep.mubr.msk.bf16.mxu1 %vm10620_vm0, %v10619_v1 }
 0x21f   : > { %v12619_v5 = vadd.f32 %v3359_v27, %v3139_v6  ;;  %v9477_v24 = vpop.f32.mrf.mxu1  ;;  %9888 = vmatpush3.bf16.msra.mxu1 %v10516_v33  ;;  %9853 = vmatprep.subr.bf16.mxu0 %v10619_v1  ;;  %v5200_v52 = vsel %vm3405_vm4, %v5197_v22, %v5199_v16  ;;  %v4999_v6 = vsel %vm3405_vm4, %v4996_v39, %v4998_v37  ;;  %v5574_v18 = vrot.slane %v5572_v44, 2  ;;  %v10528_v44 = vld [vmem:[%s13493_s4 + $0x778] sm:$0xff]  }
 0x220   : > { %v3121_v50 = vpop.f32.mrf.mxu0  ;;  %9889 = vmatprep.subr.bf16.mxu1 %v10619_v1  ;;  %v5202_v27 = vsel %vm3405_vm4, %v5199_v16, %v5201_v30  ;;  %v5381_v37 = vrot.slane %v5379_v53, 2 }
 0x221   : > { %v3140_v14 = vadd.f32 %v3121_v50, %v12459_v8  ;;  %v3362_v23 = vpop.f32.mrf.mxu1  ;;  %9854 = vmatpush3.bf16.msra.mxu0 %v10519_v15  ;;  %v10524_v8 = vld [vmem:[%s13493_s4 + $0x6c8] sm:$0xff]   ;;  %v5585_v50 = vrot.slane %v5583_v38, 3 }
 0x222   : > { %v9442_v0 = vpop.f32.mrf.mxu0  ;;  %9855 = vmatprep.subr.bf16.mxu0 %v10619_v1 }
 0x223   : > { %v12635_v54 = vadd.f32 %v3362_v23, %v3140_v14  ;;  %v9478_v4 = vpop.f32.mrf.mxu1  ;;  %9890 = vmatpush3.bf16.msra.mxu1 %v10520_v49  ;;  %v5582_v49 = vrot.slane %v5580_v42, 2  ;;  %v5382_v0 = vshll.u32 %v12526_v17, 16 }
 0x224   : > { %v3126_v36 = vpop.f32.mrf.mxu0  ;;  %9800 = vmatmul.mubr.bf16.gmra.mxu0 %v4997_v35  ;;  %9891 = vmatprep.subr.bf16.mxu1 %v10619_v1 }
 0x225   : > { %v3141_v31 = vadd.f32 %v3126_v36, %v12479_v46  ;;  %v3367_v7 = vpop.f32.mrf.mxu1  ;;  %9836 = vmatmul.mubr.bf16.gmra.mxu1 %v5200_v52  ;;  %9803 = vmatprep.mubr.msk.bf16.mxu0 %vm10620_vm0, %v10619_v1  ;;  %v5575_v46 = vshll.u32 %v12500_v2, 16  ;;  %v5372_v2 = vrot.slane %v5370_v57, 2  ;;  %v5586_v4 = vor.u32 %v5585_v50, %v5582_v49 }
 0x226   : > { %v9445_v22 = vpop.f32.mrf.mxu0  ;;  %9839 = vmatprep.mubr.msk.bf16.mxu1 %vm10620_vm0, %v10619_v1  ;;  %9856 = vmatpush3.bf16.msra.mxu0 %v10521_v25  ;;  %v5384_v30 = vrot.slane %v5382_v0, 3 }
 0x227   : > { %v12657_v45 = vadd.f32 %v3367_v7, %v3141_v31  ;;  %v9481_v62 = vpop.f32.mrf.mxu1  ;;  %9892 = vmatpush3.bf16.msra.mxu1 %v10524_v8  ;;  %9857 = vmatprep.subr.bf16.mxu0 %v10619_v1  ;;  %v5577_v24 = vrot.slane %v5575_v46, 3  ;;  %v5376_v21 = vor.u32 %v5375_v59, %v5372_v2  ;;  %v5589_v8 = vshrl.u32 %v12533_v11, 16  ;;  %v10527_v7 = vld [vmem:[%s13493_s4 + $0x738] sm:$0xff]  }
 0x228   : > { %v3129_v60 = vpop.f32.mrf.mxu0  ;;  %9893 = vmatprep.subr.bf16.mxu1 %v10619_v1  ;;  %v5388_v2 = vshrl.u32 %v12560_v13, 16  ;;  %v5391_v59 = vshll.u32 %v12560_v13, 16 }
 0x229   : > { %v3142_v33 = vadd.f32 %v3129_v60, %v12505_v29  ;;  %v3370_v19 = vpop.f32.mrf.mxu1  ;;  %v5368_v29 = vor.u32 %v5367_v58, %v5364_v47  ;;  %v5578_v25 = vor.u32 %v5577_v24, %v5574_v18  ;;  %v5591_v46 = vrot.slane %v5589_v8, 2  ;;  %v10529_v47 = vld [vmem:[%s13493_s4 + $0x730] sm:$0xff]  }
 0x22a   : > { %v9446_v15 = vpop.f32.mrf.mxu0  ;;  %9858 = vmatpush3.bf16.msra.mxu0 %v10525_v51  ;;  %v5385_v58 = vor.u32 %v5384_v30, %v5381_v37  ;;  %v5607_v37 = vshrl.u32 %v12601_v40, 16  ;;  %v5610_v30 = vshll.u32 %v12601_v40, 16 }
 0x22b   : > { %v12667_v14 = vadd.f32 %v3370_v19, %v3142_v33  ;;  %v9482_v23 = vpop.f32.mrf.mxu1  ;;  %9894 = vmatpush3.bf16.msra.mxu1 %v10526_v48  ;;  %9915 = vmatprep.subr.bf16.mxu0 %v10619_v1  ;;  %v5377_v31 = vsel %vm5360_vm5, %v5368_v29, %v5376_v21  ;;  %v5587_v51 = vsel %vm5360_vm5, %v5578_v25, %v5586_v4  ;;  %v5390_v29 = vrot.slane %v5388_v2, 2 }
 0x22c   : > { %v3504_v35 = vpop.f32.mrf.mxu0  ;;  %9804 = vmatmul.mubr.bf16.gmra.mxu0 %v4999_v6  ;;  %9951 = vmatprep.subr.bf16.mxu1 %v10619_v1  ;;  %v5598_v6 = vshrl.u32 %v12568_v3, 16  ;;  %v5386_v23 = vsel %vm5360_vm5, %v5376_v21, %v5385_v58 }
 0x22d   : > { %v3543_v39 = vadd.f32 %v3504_v35, %v12518_v20  ;;  %v3672_v16 = vpop.f32.mrf.mxu1  ;;  %9840 = vmatmul.mubr.bf16.gmra.mxu1 %v5202_v27  ;;  %9859 = vmatprep.mubr.msk.bf16.mxu0 %vm10620_vm0, %v10619_v1  ;;  %v5592_v20 = vshll.u32 %v12533_v11, 16  ;;  %v5601_v27 = vshll.u32 %v12568_v3, 16  ;;  %v10531_v35 = vld [vmem:[%s13493_s4 + $0x728] sm:$0xff]  }
 0x22e   : > { %v9501_v52 = vpop.f32.mrf.mxu0  ;;  %9895 = vmatprep.mubr.msk.bf16.mxu1 %vm10620_vm0, %v10619_v1  ;;  %v5600_v0 = vrot.slane %v5598_v6, 2 }
 0x22f   : > { %v12680_v36 = vadd.f32 %v3672_v16, %v3543_v39  ;;  %v9537_v41 = vpop.f32.mrf.mxu1  ;;  %v5594_v42 = vrot.slane %v5592_v20, 3  ;;  %v5393_v39 = vrot.slane %v5391_v59, 3  ;;  %v5603_v52 = vrot.slane %v5601_v27, 3  ;;  %v10536_v27 = vld [vmem:[%s13493_s4 + $0x758] sm:$0xff]  }
 0x230   : > { %v3507_v55 = vpop.f32.mrf.mxu0 }
 0x231   : > { %v3544_v57 = vadd.f32 %v3507_v55, %v12535_v34  ;;  %v3675_v9 = vpop.f32.mrf.mxu1  ;;  %v5595_v19 = vor.u32 %v5594_v42, %v5591_v46  ;;  %v10533_v55 = vld [vmem:[%s13493_s4 + $0x720] sm:$0xff]  }
 0x232   : > { %v9502_v22 = vpop.f32.mrf.mxu0 }
 0x233   : > { %v12691_v38 = vadd.f32 %v3675_v9, %v3544_v57  ;;  %v9538_v34 = vpop.f32.mrf.mxu1  ;;  %v5596_v53 = vsel %vm5360_vm5, %v5586_v4, %v5595_v19  ;;  %v5394_v4 = vor.u32 %v5393_v39, %v5390_v29  ;;  %v5397_v57 = vshrl.u32 %v12596_v10, 16 }
 0x234   : > { %v3512_v62 = vpop.f32.mrf.mxu0  ;;  %9860 = vmatmul.mubr.bf16.vlgmr.msra.gmra.mxu0 %v5377_v31  ;;  %v5400_v9 = vshll.u32 %v12596_v10, 16 }
 0x235   : > { %v3545_v48 = vadd.f32 %v3512_v62, %v12547_v12  ;;  %v3680_v60 = vpop.f32.mrf.mxu1  ;;  %9896 = vmatmul.mubr.bf16.vlgmr.msra.gmra.mxu1 %v5587_v51  ;;  %9916 = vmatpush3.bf16.msra.mxu0 %v10527_v7  ;;  %v10530_v12 = vld [vmem:[%s13493_s4 + $0x770] sm:$0xff]   ;;  %v5604_v7 = vor.u32 %v5603_v52, %v5600_v0  ;;  %v5395_v34 = vsel %vm5360_vm5, %v5385_v58, %v5394_v4  ;;  %v10535_v62 = vld [vmem:[%s13493_s4 + $0x718] sm:$0xff]  }
 0x236   : > { %v9505_v33 = vpop.f32.mrf.mxu0  ;;  %9952 = vmatpush3.bf16.msra.mxu1 %v10528_v44  ;;  %9917 = vmatprep.subr.bf16.mxu0 %v10619_v1  ;;  %v10538_v0 = vld [vmem:[%s13493_s4 + $0x750] sm:$0xff]  }
 0x237   : > { %v12705_v15 = vadd.f32 %v3680_v60, %v3545_v48  ;;  %v9541_v18 = vpop.f32.mrf.mxu1  ;;  %9863 = vmatprep.mubr.msk.bf16.mxu0 %vm10620_vm0, %v10619_v1  ;;  %9899 = vmatprep.mubr.msk.bf16.mxu1 %vm10620_vm0, %v10619_v1  ;;  %v5399_v48 = vrot.slane %v5397_v57, 2  ;;  %v5402_v60 = vrot.slane %v5400_v9, 3  ;;  %v5605_v59 = vsel %vm5360_vm5, %v5595_v19, %v5604_v7 }
 0x238   : > { %v3515_v24 = vpop.f32.mrf.mxu0  ;;  %9953 = vmatprep.subr.bf16.mxu1 %v10619_v1  ;;  %v5609_v33 = vrot.slane %v5607_v37, 2 }
 0x239   : > { %v3546_v49 = vadd.f32 %v3515_v24, %v12570_v32  ;;  %v3683_v50 = vpop.f32.mrf.mxu1  ;;  %9918 = vmatpush3.bf16.msra.mxu0 %v10529_v47  ;;  %v10532_v32 = vld [vmem:[%s13493_s4 + $0x768] sm:$0xff]   ;;  %v12750_v47 = vld [vmem:[%s10739_s10 + $0x30] ss:$0 sps:$4 sm:$0x33]  }
 0x23a   : > { %v9506_v16 = vpop.f32.mrf.mxu0  ;;  %9954 = vmatpush3.bf16.msra.mxu1 %v10530_v12  ;;  %9919 = vmatprep.subr.bf16.mxu0 %v10619_v1  ;;  %v12755_v12 = vld [vmem:[%s10730_s29 + $0x30] ss:$0 sps:$4 sm:$0x33]  }
 0x23b   : > { %v12722_v25 = vadd.f32 %v3683_v50, %v3546_v49  ;;  %v9542_v21 = vpop.f32.mrf.mxu1  ;;  %9955 = vmatprep.subr.bf16.mxu1 %v10619_v1  ;;  %v5403_v49 = vor.u32 %v5402_v60, %v5399_v48  ;;  %v10537_v50 = vld [vmem:[%s13493_s4 + $0x710] sm:$0xff]   ;;  %v5616_v39 = vshrl.u32 %v12755_v12, 16  ;;  %v5619_v16 = vshll.u32 %v12755_v12, 16  ;;  %v5760_v48 = vld [vmem:[%s10739_s10 + $0x8] sm:$0x8] }
 0x23c   : > { %v3520_v8 = vpop.f32.mrf.mxu0  ;;  %9864 = vmatmul.mubr.bf16.gmra.mxu0 %v5386_v23  ;;  %v5406_v23 = vshrl.u32 %v12750_v47, 16 }
 0x23d   : > { %v3547_v20 = vadd.f32 %v3520_v8, %v12584_v28  ;;  %v3688_v41 = vpop.f32.mrf.mxu1  ;;  %9900 = vmatmul.mubr.bf16.gmra.mxu1 %v5596_v53  ;;  %9920 = vmatpush3.bf16.msra.mxu0 %v10531_v35  ;;  %v10534_v28 = vld [vmem:[%s13493_s4 + $0x760] sm:$0xff]   ;;  %v5409_v35 = vshll.u32 %v12750_v47, 16  ;;  %v5621_v37 = vrot.slane %v5619_v16, 3  ;;  %v5951_v16 = vrot.slane %v12503_v63, 3  ;;  %v10548_v63 = vld [vmem:[%s13493_s4 + $0x7f8] sm:$0xff]  }
 0x23e   : > { %v9509_v31 = vpop.f32.mrf.mxu0  ;;  %9956 = vmatpush3.bf16.msra.mxu1 %v10532_v32  ;;  %9867 = vmatprep.mubr.msk.bf16.mxu0 %vm10620_vm0, %v10619_v1 }
 0x23f   : > { %v12738_v22 = vadd.f32 %v3688_v41, %v3547_v20  ;;  %v9545_v51 = vpop.f32.mrf.mxu1  ;;  %9903 = vmatprep.mubr.msk.bf16.mxu1 %vm10620_vm0, %v10619_v1  ;;  %9921 = vmatprep.subr.bf16.mxu0 %v10619_v1  ;;  %v5404_v20 = vsel %vm5360_vm5, %v5394_v4, %v5403_v49  ;;  %v5408_v41 = vrot.slane %v5406_v23, 2  ;;  %v10539_v31 = vld [vmem:[%s13493_s4 + $0x708] sm:$0xff]  }
 0x240   : > { %v3523_v44 = vpop.f32.mrf.mxu0  ;;  %9957 = vmatprep.subr.bf16.mxu1 %v10619_v1  ;;  %v10542_v4 = vld [vmem:[%s13493_s4 + $0x748] sm:$0xff]  }
 0x241   : > { %v3548_v46 = vadd.f32 %v3523_v44, %v12603_v56  ;;  %v3691_v42 = vpop.f32.mrf.mxu1  ;;  %9922 = vmatpush3.bf16.msra.mxu0 %v10533_v55  ;;  %v5612_v56 = vrot.slane %v5610_v30, 3  ;;  %v5411_v55 = vrot.slane %v5409_v35, 3 }
 0x242   : > { %v9510_v2 = vpop.f32.mrf.mxu0  ;;  %9958 = vmatpush3.bf16.msra.mxu1 %v10534_v28  ;;  %9923 = vmatprep.subr.bf16.mxu0 %v10619_v1  ;;  %v5618_v28 = vrot.slane %v5616_v39, 2 }
 0x243   : > { %v12757_v58 = vadd.f32 %v3691_v42, %v3548_v46  ;;  %v9546_v6 = vpop.f32.mrf.mxu1  ;;  %9959 = vmatprep.subr.bf16.mxu1 %v10619_v1  ;;  %v5412_v46 = vor.u32 %v5411_v55, %v5408_v41  ;;  %v10544_v2 = vld [vmem:[%s13493_s4 + $0x740] sm:$0xff]  }
 0x244   : > { %v3528_v18 = vpop.f32.mrf.mxu0  ;;  %9868 = vmatmul.mubr.bf16.gmra.mxu0 %v5395_v34  ;;  %v5622_v34 = vor.u32 %v5621_v37, %v5618_v28  ;;  %v10549_v28 = vld [vmem:[%s13493_s4 + $0x7b0] sm:$0xff]   ;;  %v5785_v37 = vrot.slane %v12526_v17, 3 }
 0x245   : > { %v3549_v19 = vadd.f32 %v3528_v18, %v12619_v5  ;;  %v3696_v24 = vpop.f32.mrf.mxu1  ;;  %9904 = vmatmul.mubr.bf16.gmra.mxu1 %v5605_v59  ;;  %9924 = vmatpush3.bf16.msra.mxu0 %v10535_v62  ;;  %v5613_v5 = vor.u32 %v5612_v56, %v5609_v33  ;;  %v10543_v62 = vld [vmem:[%s13493_s4 + $0x700] sm:$0xff]   ;;  %v5929_v59 = vld [vmem:[%s10730_s29 + $0x8] sm:$0x8]  ;;  %v8199_v18 = vcombine.low %v5760_v48, %v12477_v26 }
 0x246   : > { %v9513_v29 = vpop.f32.mrf.mxu0  ;;  %9871 = vmatprep.mubr.msk.bf16.mxu0 %vm10620_vm0, %v10619_v1  ;;  %9907 = vmatprep.mubr.msk.bf16.mxu1 %vm10620_vm0, %v10619_v1  ;;  %v10552_v48 = vld [vmem:[%s13493_s4 + $0x7e8] sm:$0xff]  }
 0x247   : > { %v12775_v53 = vadd.f32 %v3696_v24, %v3549_v19  ;;  %v9549_v32 = vpop.f32.mrf.mxu1  ;;  %9960 = vmatpush3.bf16.msra.mxu1 %v10536_v27  ;;  %9925 = vmatprep.subr.bf16.mxu0 %v10619_v1  ;;  %v5614_v9 = vsel %vm5360_vm5, %v5604_v7, %v5613_v5  ;;  %v5413_v27 = vsel %vm5360_vm5, %v5403_v49, %v5412_v46  ;;  %v5782_v26 = vrot.slane %v8199_v18, 3 }
 0x248   : > { %v3531_v52 = vpop.f32.mrf.mxu0  ;;  %9961 = vmatprep.subr.bf16.mxu1 %v10619_v1  ;;  %v5623_v24 = vsel %vm5360_vm5, %v5613_v5, %v5622_v34  ;;  %v5955_v18 = vrot.slane %v12568_v3, 3 }
 0x249   : > { %v3550_v21 = vadd.f32 %v3531_v52, %v12635_v54  ;;  %v3699_v8 = vpop.f32.mrf.mxu1  ;;  %9926 = vmatpush3.bf16.msra.mxu0 %v10537_v50  ;;  %v8224_v50 = vcombine.low %v5929_v59, %v12487_v61  ;;  %v5783_v61 = vrot.slane %v12496_v43, 3  ;;  %v10547_v43 = vld [vmem:[%s13493_s4 + $0x7b8] sm:$0xff]  }
 0x24a   : > { %v9514_v57 = vpop.f32.mrf.mxu0  ;;  %9927 = vmatprep.subr.bf16.mxu0 %v10619_v1 }
 0x24b   : > { %v12789_v30 = vadd.f32 %v3699_v8, %v3550_v21  ;;  %v9550_v54 = vpop.f32.mrf.mxu1  ;;  %9962 = vmatpush3.bf16.msra.mxu1 %v10538_v0  ;;  %v5950_v39 = vrot.slane %v8224_v50, 3  ;;  %v5784_v8 = vsel %vm5781_vm6, %v5782_v26, %v5783_v61 }
 0x24c   : > { %v3536_v51 = vpop.f32.mrf.mxu0  ;;  %9872 = vmatmul.mubr.bf16.gmra.mxu0 %v5404_v20  ;;  %9963 = vmatprep.subr.bf16.mxu1 %v10619_v1 }
 0x24d   : > { %v3551_v7 = vadd.f32 %v3536_v51, %v12657_v45  ;;  %v3704_v44 = vpop.f32.mrf.mxu1  ;;  %9908 = vmatmul.mubr.bf16.gmra.mxu1 %v5614_v9  ;;  %9875 = vmatprep.mubr.msk.bf16.mxu0 %vm10620_vm0, %v10619_v1  ;;  %v5952_v41 = vsel %vm5781_vm6, %v5950_v39, %v5951_v16  ;;  %v10550_v51 = vld [vmem:[%s13493_s4 + $0x7f0] sm:$0xff]  }
 0x24e   : > { %v9517_v42 = vpop.f32.mrf.mxu0  ;;  %9911 = vmatprep.mubr.msk.bf16.mxu1 %vm10620_vm0, %v10619_v1  ;;  %9928 = vmatpush3.bf16.msra.mxu0 %v10539_v31 }
 0x24f   : > { %v12804_v60 = vadd.f32 %v3704_v44, %v3551_v7  ;;  %v9553_v45 = vpop.f32.mrf.mxu1  ;;  %9964 = vmatpush3.bf16.msra.mxu1 %v10542_v4  ;;  %9929 = vmatprep.subr.bf16.mxu0 %v10619_v1  ;;  %v5953_v4 = vrot.slane %v12533_v11, 3  ;;  %v5786_v11 = vsel %vm5781_vm6, %v5783_v61, %v5785_v37  ;;  %v10551_v42 = vld [vmem:[%s13493_s4 + $0x7a8] sm:$0xff]  }
 0x250   : > { %v3539_v33 = vpop.f32.mrf.mxu0  ;;  %9965 = vmatprep.subr.bf16.mxu1 %v10619_v1 }
 0x251   : > { %v3552_v56 = vadd.f32 %v3539_v33, %v12667_v14  ;;  %v3707_v6 = vpop.f32.mrf.mxu1 }
 0x252   : > { %v9518_v19 = vpop.f32.mrf.mxu0  ;;  %9930 = vmatpush3.bf16.msra.mxu0 %v10543_v62  ;;  %v5954_v62 = vsel %vm5781_vm6, %v5951_v16, %v5953_v4 }
 0x253   : > { %v12817_v23 = vadd.f32 %v3707_v6, %v3552_v56  ;;  %v9554_v35 = vpop.f32.mrf.mxu1  ;;  %9966 = vmatpush3.bf16.msra.mxu1 %v10544_v2  ;;  %9987 = vmatprep.subr.bf16.mxu0 %v10619_v1  ;;  %v5787_v56 = vrot.slane %v12560_v13, 3  ;;  %v10553_v6 = vld [vmem:[%s13493_s4 + $0x7a0] sm:$0xff]  }
 0x254   : > { %v3869_v29 = vpop.f32.mrf.mxu0  ;;  %9876 = vmatmul.mubr.bf16.gmra.mxu0 %v5413_v27  ;;  %10023 = vmatprep.subr.bf16.mxu1 %v10619_v1 }
 0x255   : > { %v3908_v14 = vadd.f32 %v3869_v29, %v12680_v36  ;;  %v4066_v49 = vpop.f32.mrf.mxu1  ;;  %9912 = vmatmul.mubr.bf16.gmra.mxu1 %v5623_v24  ;;  %9931 = vmatprep.mubr.msk.bf16.mxu0 %vm10620_vm0, %v10619_v1  ;;  %v5788_v3 = vsel %vm5781_vm6, %v5785_v37, %v5787_v56  ;;  %v10555_v29 = vld [vmem:[%s13493_s4 + $0x798] sm:$0xff]  }
 0x256   : > { %v9573_v5 = vpop.f32.mrf.mxu0  ;;  %9967 = vmatprep.mubr.msk.bf16.mxu1 %vm10620_vm0, %v10619_v1 }
 0x257   : > { %v12828_v32 = vadd.f32 %v4066_v49, %v3908_v14  ;;  %v9609_v0 = vpop.f32.mrf.mxu1  ;;  %v5956_v49 = vsel %vm5781_vm6, %v5953_v4, %v5955_v18  ;;  %v5791_v4 = vrot.slane %v12750_v47, 3  ;;  %v10562_v47 = vld [vmem:[%s13493_s4 + $0x7c0] sm:$0xff]  }
 0x258   : > { %v3872_v36 = vpop.f32.mrf.mxu0  ;;  %v5789_v0 = vrot.slane %v12596_v10, 3  ;;  %v10558_v10 = vld [vmem:[%s13493_s4 + $0x7d0] sm:$0xff]  }
 0x259   : > { %v3909_v52 = vadd.f32 %v3872_v36, %v12691_v38  ;;  %v4069_v21 = vpop.f32.mrf.mxu1  ;;  %v10557_v36 = vld [vmem:[%s13493_s4 + $0x790] sm:$0xff]  }
 0x25a   : > { %v9574_v20 = vpop.f32.mrf.mxu0 }
 0x25b   : > { %v12839_v55 = vadd.f32 %v4069_v21, %v3909_v52  ;;  %v9610_v57 = vpop.f32.mrf.mxu1  ;;  %v5957_v21 = vrot.slane %v12601_v40, 3 }
 0x25c   : > { %v3877_v9 = vpop.f32.mrf.mxu0  ;;  %9932 = vmatmul.mubr.bf16.vlgmr.msra.gmra.mxu0 %v5784_v8 }
 0x25d   : > { %v3910_v38 = vadd.f32 %v3877_v9, %v12705_v15  ;;  %v4074_v31 = vpop.f32.mrf.mxu1  ;;  %9968 = vmatmul.mubr.bf16.vlgmr.msra.gmra.mxu1 %v5952_v41  ;;  %9988 = vmatpush3.bf16.msra.mxu0 %v10547_v43  ;;  %v5958_v57 = vsel %vm5781_vm6, %v5955_v18, %v5957_v21  ;;  %v10559_v9 = vld [vmem:[%s13493_s4 + $0x788] sm:$0xff]  }
 0x25e   : > { %v9577_v54 = vpop.f32.mrf.mxu0  ;;  %10024 = vmatpush3.bf16.msra.mxu1 %v10548_v63  ;;  %9989 = vmatprep.subr.bf16.mxu0 %v10619_v1  ;;  %v5790_v63 = vsel %vm5781_vm6, %v5787_v56, %v5789_v0 }
 0x25f   : > { %v12851_v15 = vadd.f32 %v4074_v31, %v3910_v38  ;;  %v9613_v7 = vpop.f32.mrf.mxu1  ;;  %9935 = vmatprep.mubr.msk.bf16.mxu0 %vm10620_vm0, %v10619_v1  ;;  %9971 = vmatprep.mubr.msk.bf16.mxu1 %vm10620_vm0, %v10619_v1 }
 0x260   : > { %v3880_v17 = vpop.f32.mrf.mxu0  ;;  %10025 = vmatprep.subr.bf16.mxu1 %v10619_v1  ;;  %v5959_v7 = vrot.slane %v12755_v12, 3  ;;  %v6300_v12 = vld [vmem:[%s10965_s27 + $0x8] sm:$0xc] }
 0x261   : > { %v3911_v44 = vadd.f32 %v3880_v17, %v12722_v25  ;;  %v4077_v46 = vpop.f32.mrf.mxu1  ;;  %9990 = vmatpush3.bf16.msra.mxu0 %v10549_v28  ;;  %v6097_v17 = vld [vmem:[%s10953_s20 + $0x8] sm:$0xc] }
 0x262   : > { %v9578_v34 = vpop.f32.mrf.mxu0  ;;  %10026 = vmatpush3.bf16.msra.mxu1 %v10550_v51  ;;  %9991 = vmatprep.subr.bf16.mxu0 %v10619_v1  ;;  %v5960_v56 = vsel %vm5781_vm6, %v5957_v21, %v5959_v7  ;;  %v10568_v21 = vld [vmem:[%s13493_s4 + $0x878] sm:$0xff]   ;;  %v13026_v7 = vld [vmem:[%s10953_s20 + $0x20] sm:$0xff]  }
 0x263   : > { %v12868_v45 = vadd.f32 %v4077_v46, %v3911_v44  ;;  %v9614_v25 = vpop.f32.mrf.mxu1  ;;  %10027 = vmatprep.subr.bf16.mxu1 %v10619_v1  ;;  %v12943_v44 = vld [vmem:[%s10953_s20 + $0xc] sm:$0xf] }
 0x264   : > { %v3885_v2 = vpop.f32.mrf.mxu0  ;;  %9936 = vmatmul.mubr.bf16.gmra.mxu0 %v5786_v11  ;;  %v5792_v25 = vsel %vm5781_vm6, %v5789_v0, %v5791_v4  ;;  %v12992_v0 = vld [vmem:[%s10953_s20 + $0x18] sm:$0xff]  }
 0x265   : > { %v3912_v59 = vadd.f32 %v3885_v2, %v12738_v22  ;;  %v4082_v33 = vpop.f32.mrf.mxu1  ;;  %9972 = vmatmul.mubr.bf16.gmra.mxu1 %v5954_v62  ;;  %9992 = vmatpush3.bf16.msra.mxu0 %v10551_v42  ;;  %v10554_v22 = vld [vmem:[%s13493_s4 + $0x7e0] sm:$0xff]   ;;  %v12953_v42 = vld [vmem:[%s10965_s27 + $0xc] sm:$0xf]  ;;  %v12959_v2 = vcombine.low %v6097_v17, %v12943_v44 }
 0x266   : > { %v9581_v27 = vpop.f32.mrf.mxu0  ;;  %10028 = vmatpush3.bf16.msra.mxu1 %v10552_v48  ;;  %9939 = vmatprep.mubr.msk.bf16.mxu0 %vm10620_vm0, %v10619_v1 }
 0x267   : > { %v12882_v19 = vadd.f32 %v4082_v33, %v3912_v59  ;;  %v9617_v24 = vpop.f32.mrf.mxu1  ;;  %9975 = vmatprep.mubr.msk.bf16.mxu1 %vm10620_vm0, %v10619_v1  ;;  %9993 = vmatprep.subr.bf16.mxu0 %v10619_v1  ;;  %v12962_v59 = vld [vmem:[%s10953_s20 + $0x10] sm:$0xff]  }
 0x268   : > { %v3888_v13 = vpop.f32.mrf.mxu0  ;;  %10029 = vmatprep.subr.bf16.mxu1 %v10619_v1  ;;  %v12969_v27 = vld [vmem:[%s10965_s27 + $0x10] sm:$0xff]  }
 0x269   : > { %v3913_v50 = vadd.f32 %v3888_v13, %v12757_v58  ;;  %v4085_v35 = vpop.f32.mrf.mxu1  ;;  %9994 = vmatpush3.bf16.msra.mxu0 %v10553_v6  ;;  %v10556_v58 = vld [vmem:[%s13493_s4 + $0x7d8] sm:$0xff]   ;;  %v12966_v6 = vcombine.low %v6300_v12, %v12953_v42 }
 0x26a   : > { %v9582_v14 = vpop.f32.mrf.mxu0  ;;  %10030 = vmatpush3.bf16.msra.mxu1 %v10554_v22  ;;  %9995 = vmatprep.subr.bf16.mxu0 %v10619_v1 }
 0x26b   : > { %v12895_v26 = vadd.f32 %v4085_v35, %v3913_v50  ;;  %v9618_v61 = vpop.f32.mrf.mxu1  ;;  %10031 = vmatprep.subr.bf16.mxu1 %v10619_v1  ;;  %v6153_v50 = vrot.slane %v12959_v2, 2  ;;  %v6154_v35 = vrot.slane %v12962_v59, 2  ;;  %v6357_v14 = vrot.slane %v12969_v27, 2 }
 0x26c   : > { %v3893_v5 = vpop.f32.mrf.mxu0  ;;  %9940 = vmatmul.mubr.bf16.gmra.mxu0 %v5788_v3 }
 0x26d   : > { %v3914_v39 = vadd.f32 %v3893_v5, %v12775_v53  ;;  %v4090_v16 = vpop.f32.mrf.mxu1  ;;  %9976 = vmatmul.mubr.bf16.gmra.mxu1 %v5956_v49  ;;  %9996 = vmatpush3.bf16.msra.mxu0 %v10555_v29  ;;  %v6356_v29 = vrot.slane %v12966_v6, 2 }
 0x26e   : > { %v9585_v52 = vpop.f32.mrf.mxu0  ;;  %9943 = vmatprep.mubr.msk.bf16.mxu0 %vm10620_vm0, %v10619_v1  ;;  %9979 = vmatprep.mubr.msk.bf16.mxu1 %vm10620_vm0, %v10619_v1 }
 0x26f   : > { %v12911_v8 = vadd.f32 %v4090_v16, %v3914_v39  ;;  %v9621_v53 = vpop.f32.mrf.mxu1  ;;  %10032 = vmatpush3.bf16.msra.mxu1 %v10556_v58  ;;  %9997 = vmatprep.subr.bf16.mxu0 %v10619_v1  ;;  %v6155_v39 = vsel %vm3405_vm4, %v6153_v50, %v6154_v35  ;;  %v10567_v16 = vld [vmem:[%s13493_s4 + $0x838] sm:$0xff]   ;;  %v6358_v52 = vsel %vm3405_vm4, %v6356_v29, %v6357_v14 }
 0x270   : > { %v3896_v43 = vpop.f32.mrf.mxu0  ;;  %10033 = vmatprep.subr.bf16.mxu1 %v10619_v1  ;;  %v12999_v53 = vld [vmem:[%s10965_s27 + $0x18] sm:$0xff]  }
 0x271   : > { %v3915_v20 = vadd.f32 %v3896_v43, %v12789_v30  ;;  %v4093_v41 = vpop.f32.mrf.mxu1  ;;  %9998 = vmatpush3.bf16.msra.mxu0 %v10557_v36  ;;  %v10560_v30 = vld [vmem:[%s13493_s4 + $0x7c8] sm:$0xff]   ;;  %v10579_v29 = vld [vmem:[%s13493_s4 + $0x818] sm:$0xff]  }
 0x272   : > { %v9586_v40 = vpop.f32.mrf.mxu0  ;;  %9999 = vmatprep.subr.bf16.mxu0 %v10619_v1 }
 0x273   : > { %v12925_v38 = vadd.f32 %v4093_v41, %v3915_v20  ;;  %v9622_v31 = vpop.f32.mrf.mxu1  ;;  %10034 = vmatpush3.bf16.msra.mxu1 %v10558_v10  ;;  %v6156_v40 = vrot.slane %v12992_v0, 2 }
 0x274   : > { %v3901_v28 = vpop.f32.mrf.mxu0  ;;  %9944 = vmatmul.mubr.bf16.gmra.mxu0 %v5790_v63  ;;  %10035 = vmatprep.subr.bf16.mxu1 %v10619_v1  ;;  %v10569_v63 = vld [vmem:[%s13493_s4 + $0x830] sm:$0xff]  }
 0x275   : > { %v3916_v37 = vadd.f32 %v3901_v28, %v12804_v60  ;;  %v4098_v54 = vpop.f32.mrf.mxu1  ;;  %9980 = vmatmul.mubr.bf16.gmra.mxu1 %v5958_v57  ;;  %9947 = vmatprep.mubr.msk.bf16.mxu0 %vm10620_vm0, %v10619_v1  ;;  %v10561_v60 = vld [vmem:[%s13493_s4 + $0x780] sm:$0xff]   ;;  %v6157_v4 = vsel %vm3405_vm4, %v6154_v35, %v6156_v40 }
 0x276   : > { %v9589_v51 = vpop.f32.mrf.mxu0  ;;  %9983 = vmatprep.mubr.msk.bf16.mxu1 %vm10620_vm0, %v10619_v1  ;;  %10000 = vmatpush3.bf16.msra.mxu0 %v10559_v9  ;;  %v6359_v9 = vrot.slane %v12999_v53, 2 }
 0x277   : > { %v12945_v46 = vadd.f32 %v4098_v54, %v3916_v37  ;;  %v9625_v11 = vpop.f32.mrf.mxu1  ;;  %10036 = vmatpush3.bf16.msra.mxu1 %v10560_v30  ;;  %10001 = vmatprep.subr.bf16.mxu0 %v10619_v1  ;;  %v10573_v51 = vld [vmem:[%s13493_s4 + $0x828] sm:$0xff]  }
 0x278   : > { %v3904_v34 = vpop.f32.mrf.mxu0  ;;  %10037 = vmatprep.subr.bf16.mxu1 %v10619_v1  ;;  %v6360_v17 = vsel %vm3405_vm4, %v6357_v14, %v6359_v9  ;;  %v13034_v11 = vld [vmem:[%s10965_s27 + $0x20] sm:$0xff]   ;;  %v13062_v14 = vld [vmem:[%s10953_s20 + $0x28] sm:$0xff]  }
 0x279   : > { %v3917_v62 = vadd.f32 %v3904_v34, %v12817_v23  ;;  %v4101_v48 = vpop.f32.mrf.mxu1 }
 0x27a   : > { %v9590_v33 = vpop.f32.mrf.mxu0  ;;  %10002 = vmatpush3.bf16.msra.mxu0 %v10561_v60 }
 0x27b   : > { %v12971_v18 = vadd.f32 %v4101_v48, %v3917_v62  ;;  %v9626_v23 = vpop.f32.mrf.mxu1  ;;  %10038 = vmatpush3.bf16.msra.mxu1 %v10562_v47  ;;  %10059 = vmatprep.subr.bf16.mxu0 %v10619_v1  ;;  %v10577_v33 = vld [vmem:[%s13493_s4 + $0x820] sm:$0xff]  }
 0x27c   : > { %v4307_v22 = vpop.f32.mrf.mxu0  ;;  %9948 = vmatmul.mubr.bf16.gmra.mxu0 %v5792_v25  ;;  %10095 = vmatprep.subr.bf16.mxu1 %v10619_v1  ;;  %v6158_v25 = vrot.slane %v13026_v7, 2  ;;  %v6361_v23 = vrot.slane %v13034_v11, 2 }
 0x27d   : > { %v4346_v24 = vadd.f32 %v4307_v22, %v12828_v32  ;;  %v4548_v13 = vpop.f32.mrf.mxu1  ;;  %9984 = vmatmul.mubr.bf16.gmra.mxu1 %v5960_v56  ;;  %10003 = vmatprep.mubr.msk.bf16.mxu0 %vm10620_vm0, %v10619_v1 }
 0x27e   : > { %v9645_v3 = vpop.f32.mrf.mxu0  ;;  %10039 = vmatprep.mubr.msk.bf16.mxu1 %vm10620_vm0, %v10619_v1 }
 0x27f   : > { %v12984_v32 = vadd.f32 %v4548_v13, %v4346_v24  ;;  %v9681_v49 = vpop.f32.mrf.mxu1  ;;  %v6159_v3 = vsel %vm3405_vm4, %v6156_v40, %v6158_v25 }
 0x280   : > { %v4310_v61 = vpop.f32.mrf.mxu0 }
 0x281   : > { %v4347_v58 = vadd.f32 %v4310_v61, %v12839_v55  ;;  %v4551_v5 = vpop.f32.mrf.mxu1  ;;  %v6362_v61 = vsel %vm3405_vm4, %v6359_v9, %v6361_v23 }
 0x282   : > { %v9646_v36 = vpop.f32.mrf.mxu0 }
 0x283   : > { %v13001_v10 = vadd.f32 %v4551_v5, %v4347_v58  ;;  %v9682_v55 = vpop.f32.mrf.mxu1  ;;  %v13067_v58 = vld [vmem:[%s10965_s27 + $0x28] sm:$0xff]  }
 0x284   : > { %v4315_v43 = vpop.f32.mrf.mxu0  ;;  %10004 = vmatmul.mubr.bf16.vlgmr.msra.gmra.mxu0 %v6155_v39  ;;  %v10580_v39 = vld [vmem:[%s13493_s4 + $0x858] sm:$0xff]   ;;  %v10583_v55 = vld [vmem:[%s13493_s4 + $0x810] sm:$0xff]  }
 0x285   : > { %v4348_v20 = vadd.f32 %v4315_v43, %v12851_v15  ;;  %v4556_v41 = vpop.f32.mrf.mxu1  ;;  %10040 = vmatmul.mubr.bf16.vlgmr.msra.gmra.mxu1 %v6358_v52  ;;  %10060 = vmatpush3.bf16.msra.mxu0 %v10567_v16  ;;  %v10572_v15 = vld [vmem:[%s13493_s4 + $0x870] sm:$0xff]  }
 0x286   : > { %v9649_v57 = vpop.f32.mrf.mxu0  ;;  %10096 = vmatpush3.bf16.msra.mxu1 %v10568_v21  ;;  %10061 = vmatprep.subr.bf16.mxu0 %v10619_v1  ;;  %v6160_v21 = vrot.slane %v13062_v14, 2 }
 0x287   : > { %v13013_v31 = vadd.f32 %v4556_v41, %v4348_v20  ;;  %v9685_v30 = vpop.f32.mrf.mxu1  ;;  %10007 = vmatprep.mubr.msk.bf16.mxu0 %vm10620_vm0, %v10619_v1  ;;  %10043 = vmatprep.mubr.msk.bf16.mxu1 %vm10620_vm0, %v10619_v1  ;;  %v10586_v57 = vld [vmem:[%s10953_s20 + $0x30] ss:$0 sps:$4 sm:$0x11]  }
 0x288   : > { %v4318_v28 = vpop.f32.mrf.mxu0  ;;  %10097 = vmatprep.subr.bf16.mxu1 %v10619_v1  ;;  %v6161_v30 = vsel %vm3405_vm4, %v6158_v25, %v6160_v21 }
 0x289   : > { %v4349_v37 = vadd.f32 %v4318_v28, %v12868_v45  ;;  %v4559_v54 = vpop.f32.mrf.mxu1  ;;  %10062 = vmatpush3.bf16.msra.mxu0 %v10569_v63  ;;  %v10574_v45 = vld [vmem:[%s13493_s4 + $0x868] sm:$0xff]   ;;  %v10584_v63 = vld [vmem:[%s13493_s4 + $0x850] sm:$0xff]  }
 0x28a   : > { %v9650_v60 = vpop.f32.mrf.mxu0  ;;  %10098 = vmatpush3.bf16.msra.mxu1 %v10572_v15  ;;  %10063 = vmatprep.subr.bf16.mxu0 %v10619_v1  ;;  %v10587_v28 = vld [vmem:[%s10965_s27 + $0x30] ss:$0 sps:$4 sm:$0x11]  }
 0x28b   : > { %v13036_v47 = vadd.f32 %v4559_v54, %v4349_v37  ;;  %v9686_v12 = vpop.f32.mrf.mxu1  ;;  %10099 = vmatprep.subr.bf16.mxu1 %v10619_v1  ;;  %v6365_v25 = vrot.slane %v10587_v28, 2  ;;  %v6542_v28 = vshrl.u32 %v12992_v0, 16 }
 0x28c   : > { %v4323_v34 = vpop.f32.mrf.mxu0  ;;  %10008 = vmatmul.mubr.bf16.gmra.mxu0 %v6157_v4  ;;  %v10585_v4 = vld [vmem:[%s13493_s4 + $0x808] sm:$0xff]   ;;  %v6525_v12 = vshrl.u32 %v12959_v2, 16 }
 0x28d   : > { %v4350_v62 = vadd.f32 %v4323_v34, %v12882_v19  ;;  %v4564_v48 = vpop.f32.mrf.mxu1  ;;  %10044 = vmatmul.mubr.bf16.gmra.mxu1 %v6360_v17  ;;  %10064 = vmatpush3.bf16.msra.mxu0 %v10573_v51  ;;  %v10578_v19 = vld [vmem:[%s13493_s4 + $0x860] sm:$0xff]   ;;  %v6528_v34 = vshll.u32 %v12959_v2, 16 }
 0x28e   : > { %v9653_v56 = vpop.f32.mrf.mxu0  ;;  %10100 = vmatpush3.bf16.msra.mxu1 %v10574_v45  ;;  %10011 = vmatprep.mubr.msk.bf16.mxu0 %vm10620_vm0, %v10619_v1  ;;  %v6162_v45 = vrot.slane %v10586_v57, 2  ;;  %v10589_v2 = vld [vmem:[%s13493_s4 + $0x800] sm:$0xff]  }
 0x28f   : > { %v13050_v22 = vadd.f32 %v4564_v48, %v4350_v62  ;;  %v9689_v24 = vpop.f32.mrf.mxu1  ;;  %10047 = vmatprep.mubr.msk.bf16.mxu1 %vm10620_vm0, %v10619_v1  ;;  %10065 = vmatprep.subr.bf16.mxu0 %v10619_v1  ;;  %v6536_v56 = vshll.u32 %v12962_v59, 16 }
 0x290   : > { %v4326_v13 = vpop.f32.mrf.mxu0  ;;  %10101 = vmatprep.subr.bf16.mxu1 %v10619_v1  ;;  %v6743_v24 = vshrl.u32 %v12969_v27, 16 }
 0x291   : > { %v4351_v50 = vadd.f32 %v4326_v13, %v12895_v26  ;;  %v4567_v35 = vpop.f32.mrf.mxu1  ;;  %10066 = vmatpush3.bf16.msra.mxu0 %v10577_v33  ;;  %v6533_v33 = vshrl.u32 %v12962_v59, 16  ;;  %v6746_v13 = vshll.u32 %v12969_v27, 16 }
 0x292   : > { %v9654_v49 = vpop.f32.mrf.mxu0  ;;  %10102 = vmatpush3.bf16.msra.mxu1 %v10578_v19  ;;  %10067 = vmatprep.subr.bf16.mxu0 %v10619_v1  ;;  %v6738_v19 = vshll.u32 %v12966_v6, 16 }
 0x293   : > { %v13069_v5 = vadd.f32 %v4567_v35, %v4351_v50  ;;  %v9690_v26 = vpop.f32.mrf.mxu1  ;;  %10103 = vmatprep.subr.bf16.mxu1 %v10619_v1  ;;  %v6163_v49 = vsel %vm3405_vm4, %v6160_v21, %v6162_v45 }
 0x294   : > { %v4331_v16 = vpop.f32.mrf.mxu0  ;;  %10012 = vmatmul.mubr.bf16.gmra.mxu0 %v6159_v3  ;;  %v10590_v3 = vld [vmem:[%s13493_s4 + $0x840] sm:$0xff]  }
 0x295   : > { %v4352_v36 = vadd.f32 %v4331_v16, %v12911_v8  ;;  %v4572_v52 = vpop.f32.mrf.mxu1  ;;  %10048 = vmatmul.mubr.bf16.gmra.mxu1 %v6362_v61  ;;  %10068 = vmatpush3.bf16.msra.mxu0 %v10579_v29  ;;  %v6363_v8 = vrot.slane %v13067_v58, 2  ;;  %v6530_v61 = vrot.slane %v6528_v34, 3 }
 0x296   : > { %v9657_v43 = vpop.f32.mrf.mxu0  ;;  %10015 = vmatprep.mubr.msk.bf16.mxu0 %vm10620_vm0, %v10619_v1  ;;  %10051 = vmatprep.mubr.msk.bf16.mxu1 %vm10620_vm0, %v10619_v1 }
 0x297   : > { %v13085_v20 = vadd.f32 %v4572_v52, %v4352_v36  ;;  %v9693_v41 = vpop.f32.mrf.mxu1  ;;  %10104 = vmatpush3.bf16.msra.mxu1 %v10580_v39  ;;  %10069 = vmatprep.subr.bf16.mxu0 %v10619_v1  ;;  %v6364_v54 = vsel %vm3405_vm4, %v6361_v23, %v6363_v8  ;;  %v6366_v16 = vsel %vm3405_vm4, %v6363_v8, %v6365_v25  ;;  %v6535_v36 = vrot.slane %v6533_v33, 2  ;;  %v10591_v25 = vld [vmem:[%s13493_s4 + $0x8b8] sm:$0xff]  }
 0x298   : > { %v4334_v40 = vpop.f32.mrf.mxu0  ;;  %10105 = vmatprep.subr.bf16.mxu1 %v10619_v1  ;;  %v6538_v52 = vrot.slane %v6536_v56, 3  ;;  %v6740_v41 = vrot.slane %v6738_v19, 3  ;;  %v6544_v33 = vrot.slane %v6542_v28, 2 }
 0x299   : > { %v4353_v9 = vadd.f32 %v4334_v40, %v12925_v38  ;;  %v4575_v15 = vpop.f32.mrf.mxu1  ;;  %10070 = vmatpush3.bf16.msra.mxu0 %v10583_v55  ;;  %v10588_v38 = vld [vmem:[%s13493_s4 + $0x848] sm:$0xff]   ;;  %v6748_v40 = vrot.slane %v6746_v13, 3 }
 0x29a   : > { %v9658_v37 = vpop.f32.mrf.mxu0  ;;  %10071 = vmatprep.subr.bf16.mxu0 %v10619_v1 }
 0x29b   : > { %v13101_v51 = vadd.f32 %v4575_v15, %v4353_v9  ;;  %v9694_v60 = vpop.f32.mrf.mxu1  ;;  %10106 = vmatpush3.bf16.msra.mxu1 %v10584_v63  ;;  %v6745_v63 = vrot.slane %v6743_v24, 2  ;;  %v6545_v37 = vshll.u32 %v12992_v0, 16 }
 0x29c   : > { %v4339_v17 = vpop.f32.mrf.mxu0  ;;  %10016 = vmatmul.mubr.bf16.gmra.mxu0 %v6161_v30  ;;  %10107 = vmatprep.subr.bf16.mxu1 %v10619_v1  ;;  %v6539_v30 = vor.u32 %v6538_v52, %v6535_v36  ;;  %v6761_v36 = vshrl.u32 %v13034_v11, 16  ;;  %v6764_v52 = vshll.u32 %v13034_v11, 16 }
 0x29d   : > { %v4354_v62 = vadd.f32 %v4339_v17, %v12945_v46  ;;  %v4580_v48 = vpop.f32.mrf.mxu1  ;;  %10052 = vmatmul.mubr.bf16.gmra.mxu1 %v6364_v54  ;;  %10019 = vmatprep.mubr.msk.bf16.mxu0 %vm10620_vm0, %v10619_v1  ;;  %v6735_v46 = vshrl.u32 %v12966_v6, 16  ;;  %v6527_v6 = vrot.slane %v6525_v12, 2  ;;  %v6749_v60 = vor.u32 %v6748_v40, %v6745_v63 }
 0x29e   : > { %v9661_v23 = vpop.f32.mrf.mxu0  ;;  %10055 = vmatprep.mubr.msk.bf16.mxu1 %vm10620_vm0, %v10619_v1  ;;  %10072 = vmatpush3.bf16.msra.mxu0 %v10585_v4  ;;  %v6547_v56 = vrot.slane %v6545_v37, 3  ;;  %v6763_v37 = vrot.slane %v6761_v36, 2 }
 0x29f   : > { %v13123_v50 = vadd.f32 %v4580_v48, %v4354_v62  ;;  %v9697_v35 = vpop.f32.mrf.mxu1  ;;  %10108 = vmatpush3.bf16.msra.mxu1 %v10588_v38  ;;  %10073 = vmatprep.subr.bf16.mxu0 %v10619_v1  ;;  %v6737_v43 = vrot.slane %v6735_v46, 2  ;;  %v6752_v38 = vshrl.u32 %v12999_v53, 16  ;;  %v10592_v46 = vld [vmem:[%s13493_s4 + $0x8f8] sm:$0xff]  }
 0x2a0   : > { %v4342_v29 = vpop.f32.mrf.mxu0  ;;  %10109 = vmatprep.subr.bf16.mxu1 %v10619_v1 }
 0x2a1   : > { %v4355_v26 = vadd.f32 %v4342_v29, %v12971_v18  ;;  %v4583_v39 = vpop.f32.mrf.mxu1  ;;  %v6531_v18 = vor.u32 %v6530_v61, %v6527_v6  ;;  %v6741_v4 = vor.u32 %v6740_v41, %v6737_v43  ;;  %v6754_v19 = vrot.slane %v6752_v38, 2 }
 0x2a2   : > { %v9662_v55 = vpop.f32.mrf.mxu0  ;;  %10074 = vmatpush3.bf16.msra.mxu0 %v10589_v2  ;;  %v6548_v6 = vor.u32 %v6547_v56, %v6544_v33  ;;  %v6551_v61 = vshrl.u32 %v13026_v7, 16  ;;  %v6770_v33 = vshrl.u32 %v13067_v58, 16  ;;  %v6773_v56 = vshll.u32 %v13067_v58, 16 }
 0x2a3   : > { %v13133_v57 = vadd.f32 %v4583_v39, %v4355_v26  ;;  %v9698_v21 = vpop.f32.mrf.mxu1  ;;  %10110 = vmatpush3.bf16.msra.mxu1 %v10590_v3  ;;  %10131 = vmatprep.subr.bf16.mxu0 %v10619_v1  ;;  %v6540_v48 = vsel %vm5360_vm5, %v6531_v18, %v6539_v30  ;;  %v6750_v2 = vsel %vm5360_vm5, %v6741_v4, %v6749_v60  ;;  %v6554_v26 = vshll.u32 %v13026_v7, 16 }
 0x2a4   : > { %v4716_v9 = vpop.f32.mrf.mxu0  ;;  %10020 = vmatmul.mubr.bf16.gmra.mxu0 %v6163_v49  ;;  %10167 = vmatprep.subr.bf16.mxu1 %v10619_v1  ;;  %v10593_v49 = vld [vmem:[%s13493_s4 + $0x8b0] sm:$0xff]   ;;  %v6549_v21 = vsel %vm5360_vm5, %v6539_v30, %v6548_v6  ;;  %v6553_v18 = vrot.slane %v6551_v61, 2 }
 0x2a5   : > { %v4755_v8 = vadd.f32 %v4716_v9, %v12984_v32  ;;  %v4884_v15 = vpop.f32.mrf.mxu1  ;;  %10056 = vmatmul.mubr.bf16.gmra.mxu1 %v6366_v16  ;;  %10075 = vmatprep.mubr.msk.bf16.mxu0 %vm10620_vm0, %v10619_v1  ;;  %v6755_v32 = vshll.u32 %v12999_v53, 16  ;;  %v10595_v9 = vld [vmem:[%s13493_s4 + $0x8a8] sm:$0xff]  }
 0x2a6   : > { %v9717_v54 = vpop.f32.mrf.mxu0  ;;  %10111 = vmatprep.mubr.msk.bf16.mxu1 %vm10620_vm0, %v10619_v1 }
 0x2a7   : > { %v13146_v17 = vadd.f32 %v4884_v15, %v4755_v8  ;;  %v9753_v45 = vpop.f32.mrf.mxu1  ;;  %v6757_v24 = vrot.slane %v6755_v32, 3  ;;  %v6556_v8 = vrot.slane %v6554_v26, 3  ;;  %v6766_v54 = vrot.slane %v6764_v52, 3  ;;  %v10600_v52 = vld [vmem:[%s13493_s4 + $0x8d8] sm:$0xff]  }
 0x2a8   : > { %v4719_v12 = vpop.f32.mrf.mxu0 }
 0x2a9   : > { %v4756_v34 = vadd.f32 %v4719_v12, %v13001_v10  ;;  %v4887_v62 = vpop.f32.mrf.mxu1  ;;  %v6758_v16 = vor.u32 %v6757_v24, %v6754_v19  ;;  %v10597_v12 = vld [vmem:[%s13493_s4 + $0x8a0] sm:$0xff]  }
 0x2aa   : > { %v9718_v23 = vpop.f32.mrf.mxu0 }
 0x2ab   : > { %v13157_v13 = vadd.f32 %v4887_v62, %v4756_v34  ;;  %v9754_v10 = vpop.f32.mrf.mxu1  ;;  %v6759_v28 = vsel %vm5360_vm5, %v6749_v60, %v6758_v16  ;;  %v6557_v60 = vor.u32 %v6556_v8, %v6553_v18  ;;  %v6560_v34 = vshrl.u32 %v13062_v14, 16 }
 0x2ac   : > { %v4724_v35 = vpop.f32.mrf.mxu0  ;;  %10076 = vmatmul.mubr.bf16.vlgmr.msra.gmra.mxu0 %v6540_v48  ;;  %v6563_v62 = vshll.u32 %v13062_v14, 16 }
 0x2ad   : > { %v4757_v3 = vadd.f32 %v4724_v35, %v13013_v31  ;;  %v4892_v29 = vpop.f32.mrf.mxu1  ;;  %10112 = vmatmul.mubr.bf16.vlgmr.msra.gmra.mxu1 %v6750_v2  ;;  %10132 = vmatpush3.bf16.msra.mxu0 %v10591_v25  ;;  %v10594_v31 = vld [vmem:[%s13493_s4 + $0x8f0] sm:$0xff]   ;;  %v6767_v25 = vor.u32 %v6766_v54, %v6763_v37  ;;  %v6558_v10 = vsel %vm5360_vm5, %v6548_v6, %v6557_v60  ;;  %v10599_v35 = vld [vmem:[%s13493_s4 + $0x898] sm:$0xff]  }
 0x2ae   : > { %v9721_v39 = vpop.f32.mrf.mxu0  ;;  %10168 = vmatpush3.bf16.msra.mxu1 %v10592_v46  ;;  %10133 = vmatprep.subr.bf16.mxu0 %v10619_v1  ;;  %v10602_v37 = vld [vmem:[%s13493_s4 + $0x8d0] sm:$0xff]  }
 0x2af   : > { %v13171_v55 = vadd.f32 %v4892_v29, %v4757_v3  ;;  %v9757_v43 = vpop.f32.mrf.mxu1  ;;  %10079 = vmatprep.mubr.msk.bf16.mxu0 %vm10620_vm0, %v10619_v1  ;;  %10115 = vmatprep.mubr.msk.bf16.mxu1 %vm10620_vm0, %v10619_v1  ;;  %v6562_v3 = vrot.slane %v6560_v34, 2  ;;  %v6565_v29 = vrot.slane %v6563_v62, 3  ;;  %v6768_v26 = vsel %vm5360_vm5, %v6758_v16, %v6767_v25 }
 0x2b0   : > { %v4727_v41 = vpop.f32.mrf.mxu0  ;;  %10169 = vmatprep.subr.bf16.mxu1 %v10619_v1  ;;  %v6772_v39 = vrot.slane %v6770_v33, 2 }
 0x2b1   : > { %v4758_v63 = vadd.f32 %v4727_v41, %v13036_v47  ;;  %v4895_v40 = vpop.f32.mrf.mxu1  ;;  %10134 = vmatpush3.bf16.msra.mxu0 %v10593_v49  ;;  %v10596_v47 = vld [vmem:[%s13493_s4 + $0x8e8] sm:$0xff]   ;;  %v13216_v49 = vld [vmem:[%s10953_s20 + $0x30] ss:$0 sps:$4 sm:$0x33]  }
 0x2b2   : > { %v9722_v15 = vpop.f32.mrf.mxu0  ;;  %10170 = vmatpush3.bf16.msra.mxu1 %v10594_v31  ;;  %10135 = vmatprep.subr.bf16.mxu0 %v10619_v1  ;;  %v13221_v31 = vld [vmem:[%s10965_s27 + $0x30] ss:$0 sps:$4 sm:$0x33]  }
 0x2b3   : > { %v13188_v4 = vadd.f32 %v4895_v40, %v4758_v63  ;;  %v9758_v30 = vpop.f32.mrf.mxu1  ;;  %10171 = vmatprep.subr.bf16.mxu1 %v10619_v1  ;;  %v6566_v63 = vor.u32 %v6565_v29, %v6562_v3  ;;  %v10601_v40 = vld [vmem:[%s13493_s4 + $0x890] sm:$0xff]   ;;  %v6779_v8 = vshrl.u32 %v13221_v31, 16  ;;  %v6782_v15 = vshll.u32 %v13221_v31, 16  ;;  %v6923_v3 = vld [vmem:[%s10953_s20 + $0x8] sm:$0x8] }
 0x2b4   : > { %v4732_v38 = vpop.f32.mrf.mxu0  ;;  %10080 = vmatmul.mubr.bf16.gmra.mxu0 %v6549_v21  ;;  %v6569_v21 = vshrl.u32 %v13216_v49, 16 }
 0x2b5   : > { %v4759_v32 = vadd.f32 %v4732_v38, %v13050_v22  ;;  %v4900_v45 = vpop.f32.mrf.mxu1  ;;  %10116 = vmatmul.mubr.bf16.gmra.mxu1 %v6759_v28  ;;  %10136 = vmatpush3.bf16.msra.mxu0 %v10595_v9  ;;  %v10598_v22 = vld [vmem:[%s13493_s4 + $0x8e0] sm:$0xff]   ;;  %v6572_v9 = vshll.u32 %v13216_v49, 16  ;;  %v6784_v33 = vrot.slane %v6782_v15, 3  ;;  %v7113_v15 = vrot.slane %v12969_v27, 3 }
 0x2b6   : > { %v9725_v48 = vpop.f32.mrf.mxu0  ;;  %10172 = vmatpush3.bf16.msra.mxu1 %v10596_v47  ;;  %10083 = vmatprep.mubr.msk.bf16.mxu0 %vm10620_vm0, %v10619_v1 }
 0x2b7   : > { %v13204_v23 = vadd.f32 %v4900_v45, %v4759_v32  ;;  %v9761_v2 = vpop.f32.mrf.mxu1  ;;  %10119 = vmatprep.mubr.msk.bf16.mxu1 %vm10620_vm0, %v10619_v1  ;;  %10137 = vmatprep.subr.bf16.mxu0 %v10619_v1  ;;  %v6567_v32 = vsel %vm5360_vm5, %v6557_v60, %v6566_v63  ;;  %v6571_v45 = vrot.slane %v6569_v21, 2  ;;  %v10603_v48 = vld [vmem:[%s13493_s4 + $0x888] sm:$0xff]  }
 0x2b8   : > { %v4735_v46 = vpop.f32.mrf.mxu0  ;;  %10173 = vmatprep.subr.bf16.mxu1 %v10619_v1  ;;  %v10606_v60 = vld [vmem:[%s13493_s4 + $0x8c8] sm:$0xff]  }
 0x2b9   : > { %v4760_v19 = vadd.f32 %v4735_v46, %v13069_v5  ;;  %v4903_v24 = vpop.f32.mrf.mxu1  ;;  %10138 = vmatpush3.bf16.msra.mxu0 %v10597_v12  ;;  %v6775_v5 = vrot.slane %v6773_v56, 3  ;;  %v6574_v12 = vrot.slane %v6572_v9, 3 }
 0x2ba   : > { %v9726_v61 = vpop.f32.mrf.mxu0  ;;  %10174 = vmatpush3.bf16.msra.mxu1 %v10598_v22  ;;  %10139 = vmatprep.subr.bf16.mxu0 %v10619_v1  ;;  %v6781_v22 = vrot.slane %v6779_v8, 2 }
 0x2bb   : > { %v13223_v6 = vadd.f32 %v4903_v24, %v4760_v19  ;;  %v9762_v36 = vpop.f32.mrf.mxu1  ;;  %10175 = vmatprep.subr.bf16.mxu1 %v10619_v1  ;;  %v6575_v19 = vor.u32 %v6574_v12, %v6571_v45  ;;  %v10608_v61 = vld [vmem:[%s13493_s4 + $0x8c0] sm:$0xff]  }
 0x2bc   : > { %v4740_v43 = vpop.f32.mrf.mxu0  ;;  %10084 = vmatmul.mubr.bf16.gmra.mxu0 %v6558_v10  ;;  %v6785_v10 = vor.u32 %v6784_v33, %v6781_v22  ;;  %v7115_v22 = vrot.slane %v12999_v53, 3 }
 0x2bd   : > { %v4761_v16 = vadd.f32 %v4740_v43, %v13085_v20  ;;  %v4908_v41 = vpop.f32.mrf.mxu1  ;;  %10120 = vmatmul.mubr.bf16.gmra.mxu1 %v6768_v26  ;;  %10140 = vmatpush3.bf16.msra.mxu0 %v10599_v35  ;;  %v6776_v20 = vor.u32 %v6775_v5, %v6772_v39  ;;  %v10607_v35 = vld [vmem:[%s13493_s4 + $0x880] sm:$0xff]   ;;  %v7091_v26 = vld [vmem:[%s10965_s27 + $0x8] sm:$0x8]  ;;  %v8359_v43 = vcombine.low %v6923_v3, %v12943_v44 }
 0x2be   : > { %v9729_v18 = vpop.f32.mrf.mxu0  ;;  %10087 = vmatprep.mubr.msk.bf16.mxu0 %vm10620_vm0, %v10619_v1  ;;  %10123 = vmatprep.mubr.msk.bf16.mxu1 %vm10620_vm0, %v10619_v1 }
 0x2bf   : > { %v13241_v28 = vadd.f32 %v4908_v41, %v4761_v16  ;;  %v9765_v47 = vpop.f32.mrf.mxu1  ;;  %10176 = vmatpush3.bf16.msra.mxu1 %v10600_v52  ;;  %10141 = vmatprep.subr.bf16.mxu0 %v10619_v1  ;;  %v6777_v62 = vsel %vm5360_vm5, %v6767_v25, %v6776_v20  ;;  %v6576_v52 = vsel %vm5360_vm5, %v6566_v63, %v6575_v19  ;;  %v6944_v44 = vrot.slane %v8359_v43, 3 }
 0x2c0   : > { %v4743_v54 = vpop.f32.mrf.mxu0  ;;  %10177 = vmatprep.subr.bf16.mxu1 %v10619_v1  ;;  %v6786_v41 = vsel %vm5360_vm5, %v6776_v20, %v6785_v10  ;;  %v6945_v63 = vrot.slane %v12962_v59, 3  ;;  %v7116_v19 = vsel %vm5781_vm6, %v7113_v15, %v7115_v22 }
 0x2c1   : > { %v4762_v30 = vadd.f32 %v4743_v54, %v13101_v51  ;;  %v4911_v38 = vpop.f32.mrf.mxu1  ;;  %10142 = vmatpush3.bf16.msra.mxu0 %v10601_v40  ;;  %v8384_v40 = vcombine.low %v7091_v26, %v12953_v42 }
 0x2c2   : > { %v9730_v34 = vpop.f32.mrf.mxu0  ;;  %10143 = vmatprep.subr.bf16.mxu0 %v10619_v1 }
 0x2c3   : > { %v13255_v56 = vadd.f32 %v4911_v38, %v4762_v30  ;;  %v9766_v51 = vpop.f32.mrf.mxu1  ;;  %10178 = vmatpush3.bf16.msra.mxu1 %v10602_v37  ;;  %v7112_v42 = vrot.slane %v8384_v40, 3  ;;  %v6946_v38 = vsel %vm5781_vm6, %v6944_v44, %v6945_v63 }
 0x2c4   : > { %v4748_v2 = vpop.f32.mrf.mxu0  ;;  %10088 = vmatmul.mubr.bf16.gmra.mxu0 %v6567_v32  ;;  %10179 = vmatprep.subr.bf16.mxu1 %v10619_v1 }
 0x2c5   : > { %v4763_v25 = vadd.f32 %v4748_v2, %v13123_v50  ;;  %v4916_v46 = vpop.f32.mrf.mxu1  ;;  %10124 = vmatmul.mubr.bf16.gmra.mxu1 %v6777_v62  ;;  %10091 = vmatprep.mubr.msk.bf16.mxu0 %vm10620_vm0, %v10619_v1  ;;  %v7114_v45 = vsel %vm5781_vm6, %v7112_v42, %v7113_v15 }
 0x2c6   : > { %v9733_v24 = vpop.f32.mrf.mxu0  ;;  %10127 = vmatprep.mubr.msk.bf16.mxu1 %vm10620_vm0, %v10619_v1  ;;  %10144 = vmatpush3.bf16.msra.mxu0 %v10603_v48 }
 0x2c7   : > { %v13270_v29 = vadd.f32 %v4916_v46, %v4763_v25  ;;  %v9769_v50 = vpop.f32.mrf.mxu1  ;;  %10180 = vmatpush3.bf16.msra.mxu1 %v10606_v60  ;;  %10145 = vmatprep.subr.bf16.mxu0 %v10619_v1 }
 0x2c8   : > { %v4751_v39 = vpop.f32.mrf.mxu0  ;;  %10181 = vmatprep.subr.bf16.mxu1 %v10619_v1  ;;  %v7117_v50 = vrot.slane %v13034_v11, 3 }
 0x2c9   : > { %v4764_v5 = vadd.f32 %v4751_v39, %v13133_v57  ;;  %v4919_v36 = vpop.f32.mrf.mxu1 }
 0x2ca   : > { %v9734_v16 = vpop.f32.mrf.mxu0  ;;  %10146 = vmatpush3.bf16.msra.mxu0 %v10607_v35  ;;  %v7118_v43 = vsel %vm5781_vm6, %v7115_v22, %v7117_v50 }
 0x2cb   : > { %v13283_v21 = vadd.f32 %v4919_v36, %v4764_v5  ;;  %v9770_v9 = vpop.f32.mrf.mxu1  ;;  %10182 = vmatpush3.bf16.msra.mxu1 %v10608_v61 }
 0x2cc   : > { %v5087_v18 = vpop.f32.mrf.mxu0  ;;  %10092 = vmatmul.mubr.bf16.gmra.mxu0 %v6576_v52 }
 0x2cd   : > { %v5126_v8 = vadd.f32 %v5087_v18, %v13146_v17  ;;  %v5290_v57 = vpop.f32.mrf.mxu1  ;;  %10128 = vmatmul.mubr.bf16.gmra.mxu1 %v6786_v41  ;;  %10147 = vmatprep.mubr.msk.bf16.mxu0 %vm10620_vm0, %v10619_v1  ;;  %v7119_v18 = vrot.slane %v13067_v58, 3 }
 0x2ce   : > { %v9789_v20 = vpop.f32.mrf.mxu0  ;;  %10183 = vmatprep.mubr.msk.bf16.mxu1 %vm10620_vm0, %v10619_v1 }
 0x2cf   : > { %v13292_v47 = vadd.f32 %v5290_v57, %v5126_v8  ;;  %v9825_v37 = vpop.f32.mrf.mxu1  ;;  %v7120_v15 = vsel %vm5781_vm6, %v7117_v50, %v7119_v18 }
 0x2d0   : > { %v5090_v54 = vpop.f32.mrf.mxu0 }
 0x2d1   : > { %v5127_v17 = vadd.f32 %v5090_v54, %v13157_v13  ;;  %v5293_v30 = vpop.f32.mrf.mxu1  ;;  %v6947_v13 = vrot.slane %v12992_v0, 3 }
 0x2d2   : > { %v9790_v32 = vpop.f32.mrf.mxu0 }
 0x2d3   : > { %v13297_v59 = vadd.f32 %v5293_v30, %v5127_v17  ;;  %v9826_v12 = vpop.f32.mrf.mxu1  ;;  %v6948_v25 = vsel %vm5781_vm6, %v6945_v63, %v6947_v13 }
 0x2d4   : > { %v5095_v34 = vpop.f32.mrf.mxu0  ;;  %10148 = vmatmul.mubr.bf16.vlgmr.msra.gmra.mxu0 %v6946_v38  ;;  %v7121_v38 = vrot.slane %v13221_v31, 3 }
 0x2d5   : > { %v5128_v62 = vadd.f32 %v5095_v34, %v13171_v55  ;;  %v5298_v27 = vpop.f32.mrf.mxu1  ;;  %10184 = vmatmul.mubr.bf16.vlgmr.msra.gmra.mxu1 %v7114_v45  ;;  %10151 = vmatprep.mubr.msk.bf16.mxu0 %vm10620_vm0, %v10619_v1 }
 0x2d6   : > { %v9793_v48 = vpop.f32.mrf.mxu0  ;;  %10187 = vmatprep.mubr.msk.bf16.mxu1 %vm10620_vm0, %v10619_v1 }
 0x2d7   : > { %v13306_v33 = vadd.f32 %v5298_v27, %v5128_v62  ;;  %v9829_v51 = vpop.f32.mrf.mxu1 }
 0x2d8   : > { %v5098_v60 = vpop.f32.mrf.mxu0 }
 0x2d9   : > { %v5129_v2 = vadd.f32 %v5098_v60, %v13188_v4  ;;  %v5301_v55 = vpop.f32.mrf.mxu1  ;;  %v6949_v4 = vrot.slane %v13026_v7, 3 }
 0x2da   : > { %v9794_v46 = vpop.f32.mrf.mxu0 }
 0x2db   : > { %v13311_v24 = vadd.f32 %v5301_v55, %v5129_v2  ;;  %v9830_v0 = vpop.f32.mrf.mxu1  ;;  %v6950_v36 = vsel %vm5781_vm6, %v6947_v13, %v6949_v4  ;;  %v7122_v13 = vsel %vm5781_vm6, %v7119_v18, %v7121_v38 }
 0x2dc   : > { %v5103_v10 = vpop.f32.mrf.mxu0  ;;  %10152 = vmatmul.mubr.bf16.gmra.mxu0 %v6948_v25 }
 0x2dd   : > { %v5130_v35 = vadd.f32 %v5103_v10, %v13204_v23  ;;  %v5306_v53 = vpop.f32.mrf.mxu1  ;;  %10188 = vmatmul.mubr.bf16.gmra.mxu1 %v7116_v19  ;;  %10155 = vmatprep.mubr.msk.bf16.mxu0 %vm10620_vm0, %v10619_v1 }
 0x2de   : > { %v9797_v3 = vpop.f32.mrf.mxu0  ;;  %10191 = vmatprep.mubr.msk.bf16.mxu1 %vm10620_vm0, %v10619_v1 }
 0x2df   : > { %v13320_v61 = vadd.f32 %v5306_v53, %v5130_v35  ;;  %v9833_v26 = vpop.f32.mrf.mxu1 }
 0x2e0   : > { %v5106_v39 = vpop.f32.mrf.mxu0 }
 0x2e1   : > { %v5131_v5 = vadd.f32 %v5106_v39, %v13223_v6  ;;  %v5309_v23 = vpop.f32.mrf.mxu1  ;;  %v6951_v6 = vrot.slane %v13062_v14, 3 }
 0x2e2   : > { %v9798_v52 = vpop.f32.mrf.mxu0 }
 0x2e3   : > { %v13325_v16 = vadd.f32 %v5309_v23, %v5131_v5  ;;  %v9834_v7 = vpop.f32.mrf.mxu1  ;;  %v6952_v20 = vsel %vm5781_vm6, %v6949_v4, %v6951_v6 }
 0x2e4   : > { %v5111_v41 = vpop.f32.mrf.mxu0  ;;  %10156 = vmatmul.mubr.bf16.gmra.mxu0 %v6950_v36 }
 0x2e5   : > { %v5132_v40 = vadd.f32 %v5111_v41, %v13241_v28  ;;  %v5314_v11 = vpop.f32.mrf.mxu1  ;;  %10192 = vmatmul.mubr.bf16.gmra.mxu1 %v7118_v43  ;;  %10159 = vmatprep.mubr.msk.bf16.mxu0 %vm10620_vm0, %v10619_v1 }
 0x2e6   : > { %v9801_v9 = vpop.f32.mrf.mxu0  ;;  %10195 = vmatprep.mubr.msk.bf16.mxu1 %vm10620_vm0, %v10619_v1 }
 0x2e7   : > { %v13334_v8 = vadd.f32 %v5314_v11, %v5132_v40  ;;  %v9837_v57 = vpop.f32.mrf.mxu1 }
 0x2e8   : > { %v5114_v44 = vpop.f32.mrf.mxu0 }
 0x2e9   : > { %v5133_v63 = vadd.f32 %v5114_v44, %v13255_v56  ;;  %v5317_v28 = vpop.f32.mrf.mxu1  ;;  %v6953_v56 = vrot.slane %v13216_v49, 3 }
 0x2ea   : > { %v9802_v42 = vpop.f32.mrf.mxu0 }
 0x2eb   : > { %v13339_v37 = vadd.f32 %v5317_v28, %v5133_v63  ;;  %v9838_v14 = vpop.f32.mrf.mxu1 }
 0x2ec   : > { %v5119_v54 = vpop.f32.mrf.mxu0  ;;  %10160 = vmatmul.mubr.bf16.gmra.mxu0 %v6952_v20 }
 0x2ed   : > { %v5134_v17 = vadd.f32 %v5119_v54, %v13270_v29  ;;  %v5322_v58 = vpop.f32.mrf.mxu1  ;;  %10196 = vmatmul.mubr.bf16.gmra.mxu1 %v7120_v15  ;;  %10163 = vmatprep.mubr.msk.bf16.mxu0 %vm10620_vm0, %v10619_v1  ;;  %v6954_v29 = vsel %vm5781_vm6, %v6951_v6, %v6953_v56 }
 0x2ee   : > { %v9805_v30 = vpop.f32.mrf.mxu0  ;;  %10199 = vmatprep.mubr.msk.bf16.mxu1 %vm10620_vm0, %v10619_v1 }
 0x2ef   : > { %v5337_v32 = vadd.f32 %v5322_v58, %v5134_v17  ;;  %v9841_v45 = vpop.f32.mrf.mxu1 }
 0x2f0   : > { %v5122_v12 = vpop.f32.mrf.mxu0 }
 0x2f1   : > { %v5135_v34 = vadd.f32 %v5122_v12, %v13283_v21  ;;  %v5325_v62 = vpop.f32.mrf.mxu1 }
 0x2f2   : > { %v9806_v27 = vpop.f32.mrf.mxu0 }
 0x2f3   : > { %v5338_v48 = vadd.f32 %v5325_v62, %v5135_v34  ;;  %v9842_v22 = vpop.f32.mrf.mxu1 }
 0x2f4   : > { %v5501_v49 = vpop.f32.mrf.mxu0  ;;  %10164 = vmatmul.mubr.bf16.gmra.mxu0 %v6954_v29 }
 0x2f5   : > { %v5540_v51 = vadd.f32 %v5501_v49, %v13292_v47  ;;  %v5711_v1 = vpop.f32.mrf.mxu1  ;;  %10200 = vmatmul.mubr.bf16.gmra.mxu1 %v7122_v13  ;;  %v10621_v13 = vmov 0  }
 0x2f6   : > { %v9861_v31 = vpop.f32.mrf.mxu0  ;;  %313 = vst [vmem:[%s13383_s8] sm:$0xf] %v10621_v13  ;;  %314 = vst [vmem:[%s13383_s8 + $0x4] sm:$0xf] %v10621_v13 }
 0x2f7   : > { %v13352_v60 = vadd.f32 %v5711_v1, %v5540_v51  ;;  %v9897_v2 = vpop.f32.mrf.mxu1  ;;  %323 = vst [vmem:[%s13383_s8 + $0x28] sm:$0xf] %v10621_v13  ;;  %324 = vst [vmem:[%s13383_s8 + $0x2c] sm:$0xf] %v10621_v13 }
 0x2f8   : > { %v5504_v55 = vpop.f32.mrf.mxu0  ;;  %325 = vst [vmem:[%s13383_s8 + $0x30] sm:$0x3] %v10621_v13  ;;  %315 = vst [vmem:[%s13383_s8 + $0x8] sm:$0xf] %v10621_v13 }
 0x2f9   : > { %v5541_v21 = vadd.f32 %v5504_v55, %v13297_v59  ;;  %v5714_v25 = vpop.f32.mrf.mxu1  ;;  %316 = vst [vmem:[%s13383_s8 + $0xc] sm:$0xf] %v10621_v13  ;;  %317 = vst [vmem:[%s13383_s8 + $0x10] sm:$0xf] %v10621_v13 }
 0x2fa   : > { %v9862_v46 = vpop.f32.mrf.mxu0  ;;  %318 = vst [vmem:[%s13383_s8 + $0x14] sm:$0xf] %v10621_v13  ;;  %319 = vst [vmem:[%s13383_s8 + $0x18] sm:$0xf] %v10621_v13 }
 0x2fb   : > { %v13355_v19 = vadd.f32 %v5714_v25, %v5541_v21  ;;  %v9898_v0 = vpop.f32.mrf.mxu1  ;;  %320 = vst [vmem:[%s13383_s8 + $0x1c] sm:$0xf] %v10621_v13  ;;  %321 = vst [vmem:[%s13383_s8 + $0x20] sm:$0xf] %v10621_v13 }
 0x2fc   : > { %v5509_v10 = vpop.f32.mrf.mxu0  ;;  %322 = vst [vmem:[%s13383_s8 + $0x24] sm:$0xf] %v10621_v13 }
 0x2fd   : > { %v5542_v35 = vadd.f32 %v5509_v10, %v13306_v33  ;;  %v5719_v53 = vpop.f32.mrf.mxu1 }
 0x2fe   : > { %v9865_v4 = vpop.f32.mrf.mxu0 }
 0x2ff   : > { %v13358_v47 = vadd.f32 %v5719_v53, %v5542_v35  ;;  %v9901_v3 = vpop.f32.mrf.mxu1 }
 0x300   : > { %v5512_v50 = vpop.f32.mrf.mxu0 }
 0x301   : > { %v5543_v26 = vadd.f32 %v5512_v50, %v13311_v24  ;;  %v5722_v39 = vpop.f32.mrf.mxu1 }
 0x302   : > { %v9866_v5 = vpop.f32.mrf.mxu0 }
 0x303   : > { %v13361_v23 = vadd.f32 %v5722_v39, %v5543_v26  ;;  %v9902_v59 = vpop.f32.mrf.mxu1 }
 0x304   : > { %v5517_v36 = vpop.f32.mrf.mxu0 }
 0x305   : > { %v5544_v52 = vadd.f32 %v5517_v36, %v13320_v61  ;;  %v5727_v43 = vpop.f32.mrf.mxu1 }
 0x306   : > { %v9869_v7 = vpop.f32.mrf.mxu0 }
 0x307   : > { %v13364_v41 = vadd.f32 %v5727_v43, %v5544_v52  ;;  %v9905_v33 = vpop.f32.mrf.mxu1 }
 0x308   : > { %v5520_v40 = vpop.f32.mrf.mxu0 }
 0x309   : > { %v5545_v11 = vadd.f32 %v5520_v40, %v13325_v16  ;;  %v5730_v6 = vpop.f32.mrf.mxu1 }
 0x30a   : > { %v9870_v9 = vpop.f32.mrf.mxu0 }
 0x30b   : > { %v13367_v18 = vadd.f32 %v5730_v6, %v5545_v11  ;;  %v9906_v24 = vpop.f32.mrf.mxu1 }
 0x30c   : > { %v5525_v57 = vpop.f32.mrf.mxu0 }
 0x30d   : > { %v5546_v44 = vadd.f32 %v5525_v57, %v13334_v8  ;;  %v5735_v63 = vpop.f32.mrf.mxu1 }
 0x30e   : > { %v9873_v28 = vpop.f32.mrf.mxu0 }
 0x30f   : > { %v13370_v20 = vadd.f32 %v5735_v63, %v5546_v44  ;;  %v9909_v61 = vpop.f32.mrf.mxu1 }
 0x310   : > { %v5528_v42 = vpop.f32.mrf.mxu0 }
 0x311   : > { %v5547_v15 = vadd.f32 %v5528_v42, %v13339_v37  ;;  %v5738_v14 = vpop.f32.mrf.mxu1 }
 0x312   : > { %v9874_v54 = vpop.f32.mrf.mxu0 }
 0x313   : > { %v13373_v16 = vadd.f32 %v5738_v14, %v5547_v15  ;;  %v9910_v17 = vpop.f32.mrf.mxu1 }
 0x314   : > { %v5533_v58 = vpop.f32.mrf.mxu0 }
 0x315   : > { %v5548_v56 = vadd.f32 %v5533_v58, %v5337_v32  ;;  %v5743_v30 = vpop.f32.mrf.mxu1 }
 0x316   : > { %v9877_v38 = vpop.f32.mrf.mxu0 }
 0x317   : > { %v13375_v45 = vadd.f32 %v5743_v30, %v5548_v56  ;;  %v9913_v8 = vpop.f32.mrf.mxu1 }
 0x318   : > { %v5536_v12 = vpop.f32.mrf.mxu0 }
 0x319   : > { %v5549_v34 = vadd.f32 %v5536_v12, %v5338_v48  ;;  %v5746_v62 = vpop.f32.mrf.mxu1 }
 0x31a   : > { %v9878_v29 = vpop.f32.mrf.mxu0 }
 0x31b   : > { %v13377_v27 = vadd.f32 %v5746_v62, %v5549_v34  ;;  %v9914_v37 = vpop.f32.mrf.mxu1 }
 0x31c   : > { %v5880_v32 = vpop.f32.mrf.mxu0 }
 0x31d   : > { %v5919_v48 = vadd.f32 %v5880_v32, %v13352_v60  ;;  %v6048_v22 = vpop.f32.mrf.mxu1 }
 0x31e   : > { %v9933_v49 = vpop.f32.mrf.mxu0 }
 0x31f   : > { %v6087_v51 = vadd.f32 %v6048_v22, %v5919_v48  ;;  %v9969_v1 = vpop.f32.mrf.mxu1 }
 0x320   : > { %v5883_v31 = vpop.f32.mrf.mxu0 }
 0x321   : > { %v5920_v2 = vadd.f32 %v5883_v31, %v13355_v19  ;;  %v6051_v55 = vpop.f32.mrf.mxu1 }
 0x322   : > { %v9934_v21 = vpop.f32.mrf.mxu0 }
 0x323   : > { %v6088_v25 = vadd.f32 %v6051_v55, %v5920_v2  ;;  %v9970_v46 = vpop.f32.mrf.mxu1 }
 0x324   : > { %v5888_v0 = vpop.f32.mrf.mxu0 }
 0x325   : > { %v5921_v10 = vadd.f32 %v5888_v0, %v13358_v47  ;;  %v6056_v35 = vpop.f32.mrf.mxu1 }
 0x326   : > { %v9937_v53 = vpop.f32.mrf.mxu0 }
 0x327   : > { %v6089_v4 = vadd.f32 %v6056_v35, %v5921_v10  ;;  %v9973_v3 = vpop.f32.mrf.mxu1 }
 0x328   : > { %v5891_v50 = vpop.f32.mrf.mxu0 }
 0x329   : > { %v5922_v60 = vadd.f32 %v5891_v50, %v13361_v23  ;;  %v6059_v26 = vpop.f32.mrf.mxu1 }
 0x32a   : > { %v9938_v39 = vpop.f32.mrf.mxu0 }
 0x32b   : > { %v6090_v5 = vadd.f32 %v6059_v26, %v5922_v60  ;;  %v9974_v59 = vpop.f32.mrf.mxu1 }
 0x32c   : > { %v5896_v36 = vpop.f32.mrf.mxu0 }
 0x32d   : > { %v5923_v19 = vadd.f32 %v5896_v36, %v13364_v41  ;;  %v6064_v52 = vpop.f32.mrf.mxu1 }
 0x32e   : > { %v9941_v43 = vpop.f32.mrf.mxu0 }
 0x32f   : > { %v6091_v7 = vadd.f32 %v6064_v52, %v5923_v19  ;;  %v9977_v33 = vpop.f32.mrf.mxu1 }
 0x330   : > { %v5899_v40 = vpop.f32.mrf.mxu0 }
 0x331   : > { %v5924_v47 = vadd.f32 %v5899_v40, %v13367_v18  ;;  %v6067_v11 = vpop.f32.mrf.mxu1 }
 0x332   : > { %v9942_v6 = vpop.f32.mrf.mxu0 }
 0x333   : > { %v6092_v9 = vadd.f32 %v6067_v11, %v5924_v47  ;;  %v9978_v24 = vpop.f32.mrf.mxu1 }
 0x334   : > { %v5904_v57 = vpop.f32.mrf.mxu0 }
 0x335   : > { %v5925_v23 = vadd.f32 %v5904_v57, %v13370_v20  ;;  %v6072_v44 = vpop.f32.mrf.mxu1 }
 0x336   : > { %v9945_v63 = vpop.f32.mrf.mxu0 }
 0x337   : > { %v6093_v28 = vadd.f32 %v6072_v44, %v5925_v23  ;;  %v9981_v61 = vpop.f32.mrf.mxu1 }
 0x338   : > { %v5907_v42 = vpop.f32.mrf.mxu0 }
 0x339   : > { %v5926_v41 = vadd.f32 %v5907_v42, %v13373_v16  ;;  %v6075_v15 = vpop.f32.mrf.mxu1 }
 0x33a   : > { %v9946_v14 = vpop.f32.mrf.mxu0 }
 0x33b   : > { %v6094_v54 = vadd.f32 %v6075_v15, %v5926_v41  ;;  %v9982_v17 = vpop.f32.mrf.mxu1 }
 0x33c   : > { %v5912_v58 = vpop.f32.mrf.mxu0 }
 0x33d   : > { %v5927_v18 = vadd.f32 %v5912_v58, %v13375_v45  ;;  %v6080_v56 = vpop.f32.mrf.mxu1 }
 0x33e   : > { %v9949_v30 = vpop.f32.mrf.mxu0 }
 0x33f   : > { %v6095_v38 = vadd.f32 %v6080_v56, %v5927_v18  ;;  %v9985_v8 = vpop.f32.mrf.mxu1 }
 0x340   : > { %v5915_v12 = vpop.f32.mrf.mxu0 }
 0x341   : > { %v5928_v20 = vadd.f32 %v5915_v12, %v13377_v27  ;;  %v6083_v34 = vpop.f32.mrf.mxu1 }
 0x342   : > { %v9950_v62 = vpop.f32.mrf.mxu0 }
 0x343   : > { %v6096_v29 = vadd.f32 %v6083_v34, %v5928_v20  ;;  %v9986_v37 = vpop.f32.mrf.mxu1 }
 0x344   : > { %v6251_v32 = vpop.f32.mrf.mxu0 }
 0x345   : > { %v6290_v16 = vadd.f32 %v6251_v32, %v6087_v51  ;;  %v6454_v13 = vpop.f32.mrf.mxu1 }
 0x346   : > { %v10005_v48 = vpop.f32.mrf.mxu0 }
 0x347   : > { %v13408_v22 = vadd.f32 %v6454_v13, %v6290_v16  ;;  %v10041_v49 = vpop.f32.mrf.mxu1 }
 0x348   : > { %v6254_v1 = vpop.f32.mrf.mxu0 }
 0x349   : > { %v6291_v45 = vadd.f32 %v6254_v1, %v6088_v25  ;;  %v6457_v31 = vpop.f32.mrf.mxu1 }
 0x34a   : > { %v10006_v2 = vpop.f32.mrf.mxu0 }
 0x34b   : > { %v13410_v55 = vadd.f32 %v6457_v31, %v6291_v45  ;;  %v10042_v21 = vpop.f32.mrf.mxu1 }
 0x34c   : > { %v6259_v46 = vpop.f32.mrf.mxu0 }
 0x34d   : > { %v6292_v27 = vadd.f32 %v6259_v46, %v6089_v4  ;;  %v6462_v0 = vpop.f32.mrf.mxu1 }
 0x34e   : > { %v10009_v10 = vpop.f32.mrf.mxu0 }
 0x34f   : > { %v13412_v35 = vadd.f32 %v6462_v0, %v6292_v27  ;;  %v10045_v53 = vpop.f32.mrf.mxu1 }
 0x350   : > { %v6262_v51 = vpop.f32.mrf.mxu0 }
 0x351   : > { %v6293_v3 = vadd.f32 %v6262_v51, %v6090_v5  ;;  %v6465_v50 = vpop.f32.mrf.mxu1 }
 0x352   : > { %v10010_v60 = vpop.f32.mrf.mxu0 }
 0x353   : > { %v13414_v26 = vadd.f32 %v6465_v50, %v6293_v3  ;;  %v10046_v39 = vpop.f32.mrf.mxu1 }
 0x354   : > { %v6267_v25 = vpop.f32.mrf.mxu0 }
 0x355   : > { %v6294_v59 = vadd.f32 %v6267_v25, %v6091_v7  ;;  %v6470_v36 = vpop.f32.mrf.mxu1 }
 0x356   : > { %v10013_v19 = vpop.f32.mrf.mxu0 }
 0x357   : > { %v13416_v52 = vadd.f32 %v6470_v36, %v6294_v59  ;;  %v10049_v43 = vpop.f32.mrf.mxu1 }
 0x358   : > { %v6270_v4 = vpop.f32.mrf.mxu0 }
 0x359   : > { %v6295_v33 = vadd.f32 %v6270_v4, %v6092_v9  ;;  %v6473_v40 = vpop.f32.mrf.mxu1 }
 0x35a   : > { %v10014_v47 = vpop.f32.mrf.mxu0 }
 0x35b   : > { %v13418_v11 = vadd.f32 %v6473_v40, %v6295_v33  ;;  %v10050_v6 = vpop.f32.mrf.mxu1 }
 0x35c   : > { %v6275_v5 = vpop.f32.mrf.mxu0 }
 0x35d   : > { %v6296_v24 = vadd.f32 %v6275_v5, %v6093_v28  ;;  %v6478_v57 = vpop.f32.mrf.mxu1 }
 0x35e   : > { %v10017_v23 = vpop.f32.mrf.mxu0 }
 0x35f   : > { %v13420_v44 = vadd.f32 %v6478_v57, %v6296_v24  ;;  %v10053_v63 = vpop.f32.mrf.mxu1 }
 0x360   : > { %v6278_v7 = vpop.f32.mrf.mxu0 }
 0x361   : > { %v6297_v61 = vadd.f32 %v6278_v7, %v6094_v54  ;;  %v6481_v42 = vpop.f32.mrf.mxu1 }
 0x362   : > { %v10018_v41 = vpop.f32.mrf.mxu0 }
 0x363   : > { %v13422_v15 = vadd.f32 %v6481_v42, %v6297_v61  ;;  %v10054_v14 = vpop.f32.mrf.mxu1 }
 0x364   : > { %v6283_v9 = vpop.f32.mrf.mxu0 }
 0x365   : > { %v6298_v17 = vadd.f32 %v6283_v9, %v6095_v38  ;;  %v6486_v58 = vpop.f32.mrf.mxu1 }
 0x366   : > { %v10021_v18 = vpop.f32.mrf.mxu0 }
 0x367   : > { %v13424_v56 = vadd.f32 %v6486_v58, %v6298_v17  ;;  %v10057_v30 = vpop.f32.mrf.mxu1 }
 0x368   : > { %v6286_v28 = vpop.f32.mrf.mxu0 }
 0x369   : > { %v6299_v8 = vadd.f32 %v6286_v28, %v6096_v29  ;;  %v6489_v12 = vpop.f32.mrf.mxu1 }
 0x36a   : > { %v10022_v20 = vpop.f32.mrf.mxu0 }
 0x36b   : > { %v13426_v34 = vadd.f32 %v6489_v12, %v6299_v8  ;;  %v10058_v62 = vpop.f32.mrf.mxu1 }
 0x36c   : > { %v6664_v54 = vpop.f32.mrf.mxu0 }
 0x36d   : > { %v6874_v37 = vpop.f32.mrf.mxu1  ;;  %v6703_v24 = vadd.f32 %v6664_v54, %v13408_v22  ;;  %v13452_v22 = vld [vmem:[%s13494_s5] ss:$0 sm:$0xff] }
 0x36e   : > { %v10077_v32 = vpop.f32.mrf.mxu0 }
 0x36f   : > { %v10113_v16 = vpop.f32.mrf.mxu1  ;;  %v6913_v61 = vadd.f32 %v6874_v37, %v6703_v24 }
 0x370   : > { %v6667_v13 = vpop.f32.mrf.mxu0 }
 0x371   : > { %v6877_v48 = vpop.f32.mrf.mxu1  ;;  %v6704_v42 = vadd.f32 %v6667_v13, %v13410_v55 }
 0x372   : > { %v10078_v49 = vpop.f32.mrf.mxu0 }
 0x373   : > { %v10114_v38 = vpop.f32.mrf.mxu1  ;;  %v6914_v18 = vadd.f32 %v6877_v48, %v6704_v42 }
 0x374   : > { %v6672_v1 = vpop.f32.mrf.mxu0 }
 0x375   : > { %v6882_v45 = vpop.f32.mrf.mxu1  ;;  %v6705_v30 = vadd.f32 %v6672_v1, %v13412_v35 }
 0x376   : > { %v10081_v31 = vpop.f32.mrf.mxu0 }
 0x377   : > { %v10117_v2 = vpop.f32.mrf.mxu1  ;;  %v6915_v37 = vadd.f32 %v6882_v45, %v6705_v30 }
 0x378   : > { %v6675_v21 = vpop.f32.mrf.mxu0 }
 0x379   : > { %v6885_v46 = vpop.f32.mrf.mxu1  ;;  %v6706_v55 = vadd.f32 %v6675_v21, %v13414_v26 }
 0x37a   : > { %v10082_v29 = vpop.f32.mrf.mxu0 }
 0x37b   : > { %v10118_v27 = vpop.f32.mrf.mxu1  ;;  %v6916_v1 = vadd.f32 %v6885_v46, %v6706_v55 }
 0x37c   : > { %v6680_v0 = vpop.f32.mrf.mxu0 }
 0x37d   : > { %v6890_v10 = vpop.f32.mrf.mxu1  ;;  %v6707_v2 = vadd.f32 %v6680_v0, %v13416_v52 }
 0x37e   : > { %v10085_v53 = vpop.f32.mrf.mxu0 }
 0x37f   : > { %v10121_v51 = vpop.f32.mrf.mxu1 }
 0x380   : > { %v6683_v3 = vpop.f32.mrf.mxu0 }
 0x381   : > { %v13428_v50 = vpop.f32.mrf.mxu1 }
 0x382   : > { %v10086_v60 = vpop.f32.mrf.mxu0 }
 0x383   : > { %v10122_v39 = vpop.f32.mrf.mxu1 }
 0x384   : > { %v13430_v25 = vpop.f32.mrf.mxu0  ;;  %v6708_v39 = vadd.f32 %v6683_v3, %v13418_v11 }
 0x385   : > { %v13432_v59 = vpop.f32.mrf.mxu1 }
 0x386   : > { %v10089_v36 = vpop.f32.mrf.mxu0 }
 0x387   : > { %v10125_v19 = vpop.f32.mrf.mxu1 }
 0x388   : > { %v13434_v43 = vpop.f32.mrf.mxu0  ;;  %v6917_v19 = vadd.f32 %v6890_v10, %v6707_v2 }
 0x389   : > { %v13436_v4 = vpop.f32.mrf.mxu1 }
 0x38a   : > { %v10090_v33 = vpop.f32.mrf.mxu0 }
 0x38b   : > { %v10126_v40 = vpop.f32.mrf.mxu1 }
 0x38c   : > { %v13438_v47 = vpop.f32.mrf.mxu0 }
 0x38d   : > { %v13440_v6 = vpop.f32.mrf.mxu1 }
 0x38e   : > { %v10093_v5 = vpop.f32.mrf.mxu0 }
 0x38f   : > { %v10129_v57 = vpop.f32.mrf.mxu1 }
 0x390   : > { %v13443_v23 = vpop.f32.mrf.mxu0  ;;  %v6918_v57 = vadd.f32 %v13428_v50, %v6708_v39 }
 0x391   : > { %v13445_v63 = vpop.f32.mrf.mxu1 }
 0x392   : > { %v10094_v7 = vpop.f32.mrf.mxu0 }
 0x393   : > { %v10130_v41 = vpop.f32.mrf.mxu1 }
 0x394   : > { %v7042_v14 = vpop.f32.mrf.mxu0 }
 0x395   : > { %v7081_v9 = vadd.f32 %v7042_v14, %v6913_v61  ;;  %v7210_v17 = vpop.f32.mrf.mxu1  ;;  %v6709_v61 = vadd.f32 %v13430_v25, %v13420_v44 }
 0x396   : > { %v10149_v58 = vpop.f32.mrf.mxu0 }
 0x397   : > { %v7249_v28 = vadd.f32 %v7210_v17, %v7081_v9  ;;  %v10185_v8 = vpop.f32.mrf.mxu1  ;;  %v6710_v58 = vadd.f32 %v13434_v43, %v13422_v15  ;;  %v6919_v30 = vadd.f32 %v13432_v59, %v6709_v61  ;;  %v6711_v15 = vadd.f32 %v13438_v47, %v13424_v56 }
 0x398   : > { %v7045_v12 = vpop.f32.mrf.mxu0 }
 0x399   : > { %v7082_v20 = vadd.f32 %v7045_v12, %v6914_v18  ;;  %v7213_v62 = vpop.f32.mrf.mxu1  ;;  %v7266_v32 = vadd.f32 %v13452_v22, %v7249_v28 }
 0x39a   : > { %v10150_v54 = vpop.f32.mrf.mxu0 }
 0x39b   : > { %v7250_v16 = vadd.f32 %v7213_v62, %v7082_v20  ;;  %v10186_v13 = vpop.f32.mrf.mxu1  ;;  %v7276_v29 = vmax.f32 %v7266_v32, 0.0  ;;  %v6920_v62 = vadd.f32 %v13436_v4, %v6710_v58 }
 0x39c   : > { %v7050_v48 = vpop.f32.mrf.mxu0 }
 0x39d   : > { %v7267_v35 = vadd.f32 %v13452_v22, %v7250_v16  ;;  %v7083_v49 = vadd.f32 %v7050_v48, %v6915_v37  ;;  %v7218_v38 = vpop.f32.mrf.mxu1 }
 0x39e   : > { %v10153_v31 = vpop.f32.mrf.mxu0 }
 0x39f   : > { %v7277_v27 = vmax.f32 %v7267_v35, 0.0  ;;  %v7251_v53 = vadd.f32 %v7218_v38, %v7083_v49  ;;  %v10189_v26 = vpop.f32.mrf.mxu1  ;;  %v6921_v49 = vadd.f32 %v13440_v6, %v6711_v15  ;;  %v6712_v38 = vadd.f32 %v13443_v23, %v13426_v34 }
 0x3a0   : > { %v7053_v21 = vpop.f32.mrf.mxu0 }
 0x3a1   : > { %v8419_v45 = vpack.c.bf16 %v7277_v27, %v7276_v29  ;;  %v7084_v51 = vadd.f32 %v7053_v21, %v6916_v1  ;;  %v7221_v60 = vpop.f32.mrf.mxu1  ;;  %v7268_v33 = vadd.f32 %v13452_v22, %v7251_v53  ;;  %v6922_v53 = vadd.f32 %v13445_v63, %v6712_v38 }
 0x3a2   : > { %v10154_v36 = vpop.f32.mrf.mxu0 }
 0x3a3   : > { %8420 = vst [vmem:[%s13383_s8] sm:$0xff] %v8419_v45   ;;  %v7252_v40 = vadd.f32 %v7221_v60, %v7084_v51  ;;  %v10190_v46 = vpop.f32.mrf.mxu1  ;;  %v7278_v11 = vmax.f32 %v7268_v33, 0.0 }
 0x3a4   : > { %v7058_v5 = vpop.f32.mrf.mxu0 }
 0x3a5   : > { %v7269_v52 = vadd.f32 %v13452_v22, %v7252_v40  ;;  %v7085_v0 = vadd.f32 %v7058_v5, %v6917_v19  ;;  %v7226_v24 = vpop.f32.mrf.mxu1 }
 0x3a6   : > { %v10157_v7 = vpop.f32.mrf.mxu0 }
 0x3a7   : > { %v7279_v3 = vmax.f32 %v7269_v52, 0.0  ;;  %v7253_v10 = vadd.f32 %v7226_v24, %v7085_v0  ;;  %v10193_v42 = vpop.f32.mrf.mxu1 }
 0x3a8   : > { %v7061_v41 = vpop.f32.mrf.mxu0 }
 0x3a9   : > { %v8424_v14 = vpack.c.bf16 %v7279_v3, %v7278_v11  ;;  %v7086_v9 = vadd.f32 %v7061_v41, %v6918_v57  ;;  %v7229_v17 = vpop.f32.mrf.mxu1  ;;  %v7270_v50 = vadd.f32 %v13452_v22, %v7253_v10 }
 0x3aa   : > { %v10158_v18 = vpop.f32.mrf.mxu0 }
 0x3ab   : > { %8436 = vst [vmem:[%s13383_s8 + $0x8] sm:$0xff] %v8424_v14   ;;  %v7254_v28 = vadd.f32 %v7229_v17, %v7086_v9  ;;  %v10194_v8 = vpop.f32.mrf.mxu1  ;;  %v7280_v43 = vmax.f32 %v7270_v50, 0.0 }
 0x3ac   : > { %v7066_v44 = vpop.f32.mrf.mxu0 }
 0x3ad   : > { %v7271_v25 = vadd.f32 %v13452_v22, %v7254_v28  ;;  %v7087_v12 = vadd.f32 %v7066_v44, %v6919_v30  ;;  %v7234_v20 = vpop.f32.mrf.mxu1 }
 0x3ae   : > { %v10161_v55 = vpop.f32.mrf.mxu0 }
 0x3af   : > { %v7281_v54 = vmax.f32 %v7271_v25, 0.0  ;;  %v7255_v59 = vadd.f32 %v7234_v20, %v7087_v12  ;;  %v10197_v37 = vpop.f32.mrf.mxu1 }
 0x3b0   : > { %v7069_v32 = vpop.f32.mrf.mxu0 }
 0x3b1   : > { %v8429_v16 = vpack.c.bf16 %v7281_v54, %v7280_v43  ;;  %v7088_v13 = vadd.f32 %v7069_v32, %v6920_v62  ;;  %v7237_v48 = vpop.f32.mrf.mxu1  ;;  %v7272_v4 = vadd.f32 %v13452_v22, %v7255_v59 }
 0x3b2   : > { %v10162_v35 = vpop.f32.mrf.mxu0 }
 0x3b3   : > { %8437 = vst [vmem:[%s13383_s8 + $0x10] sm:$0xff] %v8429_v16   ;;  %v7256_v1 = vadd.f32 %v7237_v48, %v7088_v13  ;;  %v10198_v31 = vpop.f32.mrf.mxu1  ;;  %v7282_v26 = vmax.f32 %v7272_v4, 0.0 }
 0x3b4   : > { %v7074_v56 = vpop.f32.mrf.mxu0 }
 0x3b5   : > { %v7273_v47 = vadd.f32 %v13452_v22, %v7256_v1  ;;  %v7089_v2 = vadd.f32 %v7074_v56, %v6921_v49  ;;  %v7242_v29 = vpop.f32.mrf.mxu1 }
 0x3b6   : > { %v10165_v27 = vpop.f32.mrf.mxu0 }
 0x3b7   : > { %v7283_v6 = vmax.f32 %v7273_v47, 0.0  ;;  %v7257_v21 = vadd.f32 %v7242_v29, %v7089_v2  ;;  %v10201_v45 = vpop.f32.mrf.mxu1 }
 0x3b8   : > { %v7077_v34 = vpop.f32.mrf.mxu0 }
 0x3b9   : > { %v8434_v23 = vpack.c.bf16 %v7283_v6, %v7282_v26  ;;  %v7274_v51 = vadd.f32 %v13452_v22, %v7257_v21  ;;  %v7090_v60 = vadd.f32 %v7077_v34, %v6922_v53  ;;  %v7245_v39 = vpop.f32.mrf.mxu1 }
 0x3ba   : > { %v10166_v36 = vpop.f32.mrf.mxu0 }
 0x3bb   : > { %8438 = vst [vmem:[%s13383_s8 + $0x18] sm:$0xff] %v8434_v23   ;;  %v7284_v19 = vmax.f32 %v7274_v51, 0.0  ;;  %v7258_v33 = vadd.f32 %v7245_v39, %v7090_v60  ;;  %v10202_v40 = vpop.f32.mrf.mxu1 }
 0x3bd   : > { %v8414_v46 = vpack.c.bf16 %v7284_v19, %v7284_v19  ;;  %v7275_v63 = vadd.f32 %v13452_v22, %v7258_v33 }
 0x3bf   : > { %7334 = vst [vmem:[%s13383_s8 + $0x20] sm:$0xf] %v8414_v46  ;;  %v7285_v5 = vmax.f32 %v7275_v63, 0.0 }
 0x3c1   : > { %v8415_v52 = vpack.c.bf16 %v7285_v5, %v7285_v5 }
 0x3c3   : > { %7335 = vst [vmem:[%s13383_s8 + $0x24] sm:$0x7] %v8415_v52 }
 0x3c4 PF: > { %s16_s21 = sadd.s32 1, %s10617_s21  }
 0x3c5   : > { %p13_p4 = scmp.ge.s32.totalorder %s16_s21, 4  }
 0x3c7   :  { %15 = sbr.rel (!%p13_p4) target bundleno = 1 (0x1), region = 118 }

</bundles_post_ra>
